<compile_context>
chip_gen: v7x
topology: tpu7x:2x2x1
jax: 0.10.0
libtpu: 0.0.40
codegen_flags: <defaults>
</compile_context>

<pallas_src>
import functools

import jax
import jax.numpy as jnp
from jax import lax
from jax.experimental import pallas as pl
from jax.experimental.pallas import tpu as pltpu

NEG_SLOPE = 0.01   # nn.LeakyReLU default negative_slope
EPS = 1e-5         # nn.InstanceNorm3d default eps (affine=False, no running stats)


def _round_up(x, m):
    return (x + m - 1) // m * m


# ----------------------------------------------------------------------------
# Fused Pallas kernel: whole ResFourLayerConvBlock for one batch sample.
# ----------------------------------------------------------------------------
def _res_block_kernel(x_ref, w1_ref, w2_ref, ws_ref, w3_ref, w4_ref, mask_ref,
                      o_ref, *, D, H, W):
    """Per-sample VMEM tiles.

    x_ref    : (1, Cin_p, SP)        f32  zero-padded, channels-first, flat volume
    w{1..4}  : (3, Co_p, 9*Ci_p)     bf16 3x3x3 conv weights, kd-major GEMM layout
    ws_ref   : (Cmid_p, Cin_p)       bf16 1x1x1 shortcut conv weight
    mask_ref : (1, SP)               f32  1.0 on interior voxels, 0.0 on halo/tail
    o_ref    : (1, Cout_p, SP)       f32  output in the same padded-flat layout
    """
    SP = x_ref.shape[-1]
    Cmid_p = w1_ref.shape[1]
    Cout_p = w4_ref.shape[1]
    sd, sh = (H + 2) * (W + 2), (W + 2)
    hw_deltas = [(kh - 1) * sh + (kw - 1) for kh in range(3) for kw in range(3)]
    inv_n = 1.0 / float(D * H * W)

    # Hoist the interior mask broadcasts once; reuse for all norms / re-zeros.
    mask_row = mask_ref[...]                                       # (1, SP)
    mask_mid = jnp.broadcast_to(mask_row, (Cmid_p, SP))
    mask_out = (mask_mid if Cout_p == Cmid_p
                else jnp.broadcast_to(mask_row, (Cout_p, SP)))

    def shift(x, delta):
        # z[:, p] = x[:, (p + delta) mod SP] via a single XLU lane rotation.
        # Wrapped lanes only ever land in halo / tail output positions, which
        # are masked before the next conv and sliced off at the end.
        if delta % SP == 0:
            return x
        return pltpu.roll(x, (-delta) % SP, 1)

    def conv3(x, w_ref3):
        # x: (Cin_p, SP) f32 with zero halo.  Per-kd accumulation of wide-K
        # GEMMs (K = 9*Cin_p); bf16 MXU inputs, f32 accumulation.
        acc = None
        for kd in range(3):
            base = (kd - 1) * sd
            slab = jnp.concatenate([shift(x, base + d) for d in hw_deltas],
                                   axis=0).astype(jnp.bfloat16)    # (9*Cin_p, SP)
            part = lax.dot_general(w_ref3[kd], slab, (((1,), (0,)), ((), ())),
                                   preferred_element_type=jnp.float32)
            acc = part if acc is None else acc + part
        return acc

    def inorm(y, maskb):
        # InstanceNorm3d over the D*H*W interior voxels only (biased variance);
        # one-pass statistics: var = E[y^2] - mean^2 (clamped for safety).
        ym = y * maskb
        mean = jnp.sum(ym, axis=1, keepdims=True) * inv_n
        ex2 = jnp.sum(ym * y, axis=1, keepdims=True) * inv_n
        var = jnp.maximum(ex2 - mean * mean, 0.0)
        return (y - mean) * lax.rsqrt(var + EPS)

    def leaky(y):
        return jnp.where(y >= 0.0, y, NEG_SLOPE * y)

    x = x_ref[0]                                                   # (Cin_p, SP)
    # --- residual unit 1 (Dropout3d = identity in eval mode) ---
    h1 = leaky(inorm(conv3(x, w1_ref), mask_mid)) * mask_mid       # re-zero halo
    r1 = inorm(conv3(h1, w2_ref), mask_mid)
    # --- shortcut unit 1: 1x1x1 conv + InstanceNorm ---
    s1 = inorm(lax.dot_general(ws_ref[...], x.astype(jnp.bfloat16),
                               (((1,), (0,)), ((), ())),
                               preferred_element_type=jnp.float32), mask_mid)
    o1 = leaky(r1 + s1) * mask_mid

    # --- residual unit 2 + identity shortcut ---
    h2 = leaky(inorm(conv3(o1, w3_ref), mask_mid)) * mask_mid
    r2 = inorm(conv3(h2, w4_ref), mask_out)
    o_ref[0] = leaky(r2 + o1)


# ----------------------------------------------------------------------------
# Weight layout helpers + forward wrapper
# ----------------------------------------------------------------------------
def _conv3_w_to_gemm(w_dhwio, cin_p, cout_p):
    # (3,3,3,Cin,Cout) -> (3, Cout_p, 9*Cin_p); kd-major, col = (kh*3+kw)*Cin_p+ci
    _, _, _, ci, co = w_dhwio.shape
    w = jnp.transpose(w_dhwio, (0, 4, 1, 2, 3))                    # (kd,co,kh,kw,ci)
    w = jnp.pad(w, ((0, 0), (0, cout_p - co), (0, 0), (0, 0), (0, cin_p - ci)))
    return w.reshape(3, cout_p, 9 * cin_p).astype(jnp.bfloat16)


def _conv1_w_to_gemm(w_cf, cin_p, cout_p):
    # (Cin, Cout) -> (Cout_p, Cin_p)
    ci, co = w_cf.shape
    w = jnp.pad(jnp.transpose(w_cf, (1, 0)), ((0, cout_p - co), (0, cin_p - ci)))
    return w.astype(jnp.bfloat16)


def _vmem_limit_bytes():
    # Derive the per-kernel VMEM budget from the actual part (v7x: 64 MiB/TC,
    # v5e/v6e: 128 MiB); leave headroom, cap at 100 MiB.
    try:
        cap = int(pltpu.get_tpu_info().vmem_capacity_bytes)
    except Exception:
        cap = 64 * 1024 * 1024
    return max(32 * 1024 * 1024, min(cap - 16 * 1024 * 1024, 100 * 1024 * 1024))


def block_forward(x_ncdhw, params):
    """ResFourLayerConvBlock forward. Input/output: NCDHW (PyTorch convention)."""
    N, Cin, D, H, W = x_ncdhw.shape
    Cmid = params['w1'].shape[-1]
    Cout = params['w4'].shape[-1]
    Cin_p, Cmid_p, Cout_p = (_round_up(c, 8) for c in (Cin, Cmid, Cout))
    Spr = (D + 2) * (H + 2) * (W + 2)
    SP = _round_up(Spr, 128)          # lane-dense flattened padded volume

    # One-time layout prep (XLA): channel pad + spatial zero-pad + flatten.
    xp = jnp.pad(x_ncdhw.astype(jnp.float32),
                 ((0, 0), (0, Cin_p - Cin), (1, 1), (1, 1), (1, 1)))
    xp = xp.reshape(N, Cin_p, Spr)
    xp = jnp.pad(xp, ((0, 0), (0, 0), (0, SP - Spr)))

    # Interior-voxel mask in the flattened padded coordinate system.
    mask = jnp.pad(jnp.ones((D, H, W), jnp.float32), ((1, 1),) * 3)
    mask = jnp.pad(mask.reshape(1, Spr), ((0, 0), (0, SP - Spr)))

    w1g = _conv3_w_to_gemm(params['w1'], Cin_p, Cmid_p)
    w2g = _conv3_w_to_gemm(params['w2'], Cmid_p, Cmid_p)
    wsg = _conv1_w_to_gemm(params['ws'], Cin_p, Cmid_p)
    w3g = _conv3_w_to_gemm(params['w3'], Cmid_p, Cmid_p)
    w4g = _conv3_w_to_gemm(params['w4'], Cmid_p, Cout_p)

    kernel = functools.partial(_res_block_kernel, D=D, H=H, W=W)

    out_pf = pl.pallas_call(
        kernel,
        out_shape=jax.ShapeDtypeStruct((N, Cout_p, SP), jnp.float32),
        grid_spec=pltpu.PrefetchScalarGridSpec(
            num_scalar_prefetch=0,
            grid=(N,),
            in_specs=[
                pl.BlockSpec((1, Cin_p, SP), lambda n: (n, 0, 0)),
                pl.BlockSpec(w1g.shape, lambda n: (0, 0, 0)),
                pl.BlockSpec(w2g.shape, lambda n: (0, 0, 0)),
                pl.BlockSpec(wsg.shape, lambda n: (0, 0)),
                pl.BlockSpec(w3g.shape, lambda n: (0, 0, 0)),
                pl.BlockSpec(w4g.shape, lambda n: (0, 0, 0)),
                pl.BlockSpec((1, SP), lambda n: (0, 0)),
            ],
            out_specs=pl.BlockSpec((1, Cout_p, SP), lambda n: (n, 0, 0))),
        compiler_params=pltpu.CompilerParams(
            dimension_semantics=("parallel",),           # batch across TCs (v7x)
            vmem_limit_bytes=_vmem_limit_bytes()),
    )(xp, w1g, w2g, wsg, w3g, w4g, mask)

    out = out_pf[:, :, :Spr].reshape(N, Cout_p, D + 2, H + 2, W + 2)
    return out[:, :Cout, 1:D + 1, 1:H + 1, 1:W + 1]


# ----------------------------------------------------------------------------
# Pure-JAX reference (optionally precision-matched to the bf16 GEMM inputs)
# ----------------------------------------------------------------------------
def _maybe_bf16(a, match):
    return a.astype(jnp.bfloat16).astype(jnp.float32) if match else a


def _ref_inorm(y):
    m = jnp.mean(y, axis=(1, 2, 3), keepdims=True)
    v = jnp.mean((y - m) ** 2, axis=(1, 2, 3), keepdims=True)
    return (y - m) * lax.rsqrt(v + EPS)


def _ref_leaky(y):
    return jnp.where(y >= 0.0, y, NEG_SLOPE * y)


def _ref_conv3(x, w):
    return lax.conv_general_dilated(
        x, w, window_strides=(1, 1, 1),
        padding=((1, 1), (1, 1), (1, 1)),
        dimension_numbers=('NDHWC', 'DHWIO', 'NDHWC'))


def ref_forward(x_ncdhw, params, *, match_bf16=False):
    q = lambda a: _maybe_bf16(a, match_bf16)
    x = jnp.transpose(x_ncdhw, (0, 2, 3, 4, 1)).astype(jnp.float32)
    h1 = _ref_leaky(_ref_inorm(_ref_conv3(q(x), q(params['w1']))))
    r1 = _ref_inorm(_ref_conv3(q(h1), q(params['w2'])))
    s1 = _ref_inorm(jnp.einsum('ndhwc,cf->ndhwf', q(x), q(params['ws'])))
    o1 = _ref_leaky(r1 + s1)
    h2 = _ref_leaky(_ref_inorm(_ref_conv3(q(o1), q(params['w3']))))
    r2 = _ref_inorm(_ref_conv3(q(h2), q(params['w4'])))
    o2 = _ref_leaky(r2 + o1)
    return jnp.transpose(o2, (0, 4, 1, 2, 3))


# ----------------------------------------------------------------------------
# Deterministic parameter init (mirrors nn.Conv3d weight shapes)
# ----------------------------------------------------------------------------
def init_params(key, cin, cmid, cout):
    k1, k2, k3, k4, k5 = jax.random.split(key, 5)

    def conv3_w(k, ci, co):
        # PyTorch weight (co, ci, 3, 3, 3) -> kernel layout (3, 3, 3, ci, co)
        w = jax.random.normal(k, (co, ci, 3, 3, 3), jnp.float32)
        w = w * (2.0 / (ci * 27)) ** 0.5
        return jnp.transpose(w, (2, 3, 4, 1, 0))

    def conv1_w(k, ci, co):
        w = jax.random.normal(k, (co, ci, 1, 1, 1), jnp.float32)
        w = w * (2.0 / ci) ** 0.5
        return jnp.transpose(w, (2, 3, 4, 1, 0)).reshape(ci, co)

    return dict(
        w1=conv3_w(k1, cin, cmid),   # residual_unit_1 conv a
        w2=conv3_w(k2, cmid, cmid),  # residual_unit_1 conv b
        ws=conv1_w(k3, cin, cmid),   # shortcut_unit_1 1x1x1 conv
        w3=conv3_w(k4, cmid, cmid),  # residual_unit_2 conv a
        w4=conv3_w(k5, cmid, cout),  # residual_unit_2 conv b
    )


if __name__ == "__main__":
    key = jax.random.PRNGKey(0)
    kx, kp = jax.random.split(key)

    # small shapes: batch=2, in_channel=4, mid=out=8, spatial 8^3
    N, Cin, Cmid, Cout, D, H, W = 2, 4, 8, 8, 8, 8, 8
    x = jax.random.normal(kx, (N, Cin, D, H, W), jnp.float32)
    params = init_params(kp, Cin, Cmid, Cout)

    out = jax.block_until_ready(block_forward(x, params))
    assert out.shape == (N, Cout, D, H, W), out.shape

    # (1) precision-matched reference: same bf16 rounding of GEMM inputs, f32 accum.
    ref_bf = jax.block_until_ready(ref_forward(x, params, match_bf16=True))
    err_bf = float(jnp.max(jnp.abs(out - ref_bf)))
    if err_bf > 1e-2:
        raise AssertionError(f"mismatch vs bf16-matched reference: {err_bf}")

    # (2) module's nominal f32 math: loose bound covering bf16 MXU-input noise.
    ref32 = jax.block_until_ready(ref_forward(x, params, match_bf16=False))
    err32 = float(jnp.max(jnp.abs(out - ref32)))
    if err32 > 1e-1:
        raise AssertionError(f"mismatch vs f32 reference: {err32}")

    print("KERNEL_OK")
</pallas_src>

<mosaic_0001>
module attributes {stable_mosaic.version = 11 : i64} {
  func.func @_res_block_kernel(%arg0: i32, %arg1: memref<1x8x1024xf32, #tpu.memory_space<vmem>>, %arg2: memref<3x8x72xbf16, #tpu.memory_space<vmem>>, %arg3: memref<3x8x72xbf16, #tpu.memory_space<vmem>>, %arg4: memref<8x8xbf16, #tpu.memory_space<vmem>>, %arg5: memref<3x8x72xbf16, #tpu.memory_space<vmem>>, %arg6: memref<3x8x72xbf16, #tpu.memory_space<vmem>>, %arg7: memref<1x1024xf32, #tpu.memory_space<vmem>>, %arg8: memref<1x8x1024xf32, #tpu.memory_space<vmem>>) attributes {dimension_semantics = [#tpu.dimension_semantics<parallel>], iteration_bounds = array<i64: 2>, scalar_prefetch = 0 : i64, scratch_operands = 0 : i64, tpu.core_type = #tpu.core_type<tc>, window_params = [{transform_indices = @transform_0, window_bounds = array<i64: 1, 8, 1024>}, {pipeline_mode = #tpu.pipeline_mode<synchronous>, transform_indices = @transform_1, window_bounds = array<i64: 3, 8, 72>}, {pipeline_mode = #tpu.pipeline_mode<synchronous>, transform_indices = @transform_2, window_bounds = array<i64: 3, 8, 72>}, {pipeline_mode = #tpu.pipeline_mode<synchronous>, transform_indices = @transform_3, window_bounds = array<i64: 8, 8>}, {pipeline_mode = #tpu.pipeline_mode<synchronous>, transform_indices = @transform_4, window_bounds = array<i64: 3, 8, 72>}, {pipeline_mode = #tpu.pipeline_mode<synchronous>, transform_indices = @transform_5, window_bounds = array<i64: 3, 8, 72>}, {pipeline_mode = #tpu.pipeline_mode<synchronous>, transform_indices = @transform_6, window_bounds = array<i64: 1, 1024>}, {transform_indices = @transform_7, window_bounds = array<i64: 1, 8, 1024>}]} {
    %c0 = arith.constant 0 : index
    %c0_0 = arith.constant 0 : index
    %0 = vector.load %arg7[%c0, %c0_0] : memref<1x1024xf32, #tpu.memory_space<vmem>>, vector<1x1024xf32>
    %1 = vector.shape_cast %0 : vector<1x1024xf32> to vector<1x1024xf32>
    %2 = vector.broadcast %1 : vector<1x1024xf32> to vector<8x1024xf32>
    %c0_1 = arith.constant 0 : index
    %c0_2 = arith.constant 0 : index
    %c0_3 = arith.constant 0 : index
    %3 = vector.load %arg1[%c0_1, %c0_2, %c0_3] : memref<1x8x1024xf32, #tpu.memory_space<vmem>>, vector<1x8x1024xf32>
    %4 = vector.shape_cast %3 : vector<1x8x1024xf32> to vector<8x1024xf32>
    %c111_i32 = arith.constant 111 : i32
    %5 = tpu.dynamic_rotate %4 by %c111_i32 dim 1 : vector<8x1024xf32>, i32 -> vector<8x1024xf32>
    %c110_i32 = arith.constant 110 : i32
    %6 = tpu.dynamic_rotate %4 by %c110_i32 dim 1 : vector<8x1024xf32>, i32 -> vector<8x1024xf32>
    %c109_i32 = arith.constant 109 : i32
    %7 = tpu.dynamic_rotate %4 by %c109_i32 dim 1 : vector<8x1024xf32>, i32 -> vector<8x1024xf32>
    %c101_i32 = arith.constant 101 : i32
    %8 = tpu.dynamic_rotate %4 by %c101_i32 dim 1 : vector<8x1024xf32>, i32 -> vector<8x1024xf32>
    %c100_i32 = arith.constant 100 : i32
    %9 = tpu.dynamic_rotate %4 by %c100_i32 dim 1 : vector<8x1024xf32>, i32 -> vector<8x1024xf32>
    %c99_i32 = arith.constant 99 : i32
    %10 = tpu.dynamic_rotate %4 by %c99_i32 dim 1 : vector<8x1024xf32>, i32 -> vector<8x1024xf32>
    %c91_i32 = arith.constant 91 : i32
    %11 = tpu.dynamic_rotate %4 by %c91_i32 dim 1 : vector<8x1024xf32>, i32 -> vector<8x1024xf32>
    %c90_i32 = arith.constant 90 : i32
    %12 = tpu.dynamic_rotate %4 by %c90_i32 dim 1 : vector<8x1024xf32>, i32 -> vector<8x1024xf32>
    %c89_i32 = arith.constant 89 : i32
    %13 = tpu.dynamic_rotate %4 by %c89_i32 dim 1 : vector<8x1024xf32>, i32 -> vector<8x1024xf32>
    %14 = tpu.concatenate %5, %6, %7, %8, %9, %10, %11, %12, %13 in 0 : vector<8x1024xf32>, vector<8x1024xf32>, vector<8x1024xf32>, vector<8x1024xf32>, vector<8x1024xf32>, vector<8x1024xf32>, vector<8x1024xf32>, vector<8x1024xf32>, vector<8x1024xf32> -> vector<72x1024xf32>
    %15 = arith.truncf %14 : vector<72x1024xf32> to vector<72x1024xbf16>
    %c0_4 = arith.constant 0 : index
    %c0_5 = arith.constant 0 : index
    %c0_6 = arith.constant 0 : index
    %16 = vector.load %arg2[%c0_4, %c0_5, %c0_6] : memref<3x8x72xbf16, #tpu.memory_space<vmem>>, vector<1x8x72xbf16>
    %17 = vector.shape_cast %16 : vector<1x8x72xbf16> to vector<8x72xbf16>
    %cst = arith.constant dense<0.000000e+00> : vector<8x1024xf32>
    %18 = tpu.matmul %17, %15, %cst {dimension_numbers = #tpu.dot_dimension_numbers<[1], [0], [0], [1], [0, 0, 1, 1], [], []>} : vector<8x72xbf16>, vector<72x1024xbf16>, vector<8x1024xf32> -> vector<8x1024xf32>
    %c11_i32 = arith.constant 11 : i32
    %19 = tpu.dynamic_rotate %4 by %c11_i32 dim 1 : vector<8x1024xf32>, i32 -> vector<8x1024xf32>
    %c10_i32 = arith.constant 10 : i32
    %20 = tpu.dynamic_rotate %4 by %c10_i32 dim 1 : vector<8x1024xf32>, i32 -> vector<8x1024xf32>
    %c9_i32 = arith.constant 9 : i32
    %21 = tpu.dynamic_rotate %4 by %c9_i32 dim 1 : vector<8x1024xf32>, i32 -> vector<8x1024xf32>
    %c1_i32 = arith.constant 1 : i32
    %22 = tpu.dynamic_rotate %4 by %c1_i32 dim 1 : vector<8x1024xf32>, i32 -> vector<8x1024xf32>
    %c1023_i32 = arith.constant 1023 : i32
    %23 = tpu.dynamic_rotate %4 by %c1023_i32 dim 1 : vector<8x1024xf32>, i32 -> vector<8x1024xf32>
    %c1015_i32 = arith.constant 1015 : i32
    %24 = tpu.dynamic_rotate %4 by %c1015_i32 dim 1 : vector<8x1024xf32>, i32 -> vector<8x1024xf32>
    %c1014_i32 = arith.constant 1014 : i32
    %25 = tpu.dynamic_rotate %4 by %c1014_i32 dim 1 : vector<8x1024xf32>, i32 -> vector<8x1024xf32>
    %c1013_i32 = arith.constant 1013 : i32
    %26 = tpu.dynamic_rotate %4 by %c1013_i32 dim 1 : vector<8x1024xf32>, i32 -> vector<8x1024xf32>
    %27 = tpu.concatenate %19, %20, %21, %22, %4, %23, %24, %25, %26 in 0 : vector<8x1024xf32>, vector<8x1024xf32>, vector<8x1024xf32>, vector<8x1024xf32>, vector<8x1024xf32>, vector<8x1024xf32>, vector<8x1024xf32>, vector<8x1024xf32>, vector<8x1024xf32> -> vector<72x1024xf32>
    %28 = arith.truncf %27 : vector<72x1024xf32> to vector<72x1024xbf16>
    %c1 = arith.constant 1 : index
    %c0_7 = arith.constant 0 : index
    %c0_8 = arith.constant 0 : index
    %29 = vector.load %arg2[%c1, %c0_7, %c0_8] : memref<3x8x72xbf16, #tpu.memory_space<vmem>>, vector<1x8x72xbf16>
    %30 = vector.shape_cast %29 : vector<1x8x72xbf16> to vector<8x72xbf16>
    %cst_9 = arith.constant dense<0.000000e+00> : vector<8x1024xf32>
    %31 = tpu.matmul %30, %28, %cst_9 {dimension_numbers = #tpu.dot_dimension_numbers<[1], [0], [0], [1], [0, 0, 1, 1], [], []>} : vector<8x72xbf16>, vector<72x1024xbf16>, vector<8x1024xf32> -> vector<8x1024xf32>
    %32 = arith.addf %18, %31 : vector<8x1024xf32>
    %c935_i32 = arith.constant 935 : i32
    %33 = tpu.dynamic_rotate %4 by %c935_i32 dim 1 : vector<8x1024xf32>, i32 -> vector<8x1024xf32>
    %c934_i32 = arith.constant 934 : i32
    %34 = tpu.dynamic_rotate %4 by %c934_i32 dim 1 : vector<8x1024xf32>, i32 -> vector<8x1024xf32>
    %c933_i32 = arith.constant 933 : i32
    %35 = tpu.dynamic_rotate %4 by %c933_i32 dim 1 : vector<8x1024xf32>, i32 -> vector<8x1024xf32>
    %c925_i32 = arith.constant 925 : i32
    %36 = tpu.dynamic_rotate %4 by %c925_i32 dim 1 : vector<8x1024xf32>, i32 -> vector<8x1024xf32>
    %c924_i32 = arith.constant 924 : i32
    %37 = tpu.dynamic_rotate %4 by %c924_i32 dim 1 : vector<8x1024xf32>, i32 -> vector<8x1024xf32>
    %c923_i32 = arith.constant 923 : i32
    %38 = tpu.dynamic_rotate %4 by %c923_i32 dim 1 : vector<8x1024xf32>, i32 -> vector<8x1024xf32>
    %c915_i32 = arith.constant 915 : i32
    %39 = tpu.dynamic_rotate %4 by %c915_i32 dim 1 : vector<8x1024xf32>, i32 -> vector<8x1024xf32>
    %c914_i32 = arith.constant 914 : i32
    %40 = tpu.dynamic_rotate %4 by %c914_i32 dim 1 : vector<8x1024xf32>, i32 -> vector<8x1024xf32>
    %c913_i32 = arith.constant 913 : i32
    %41 = tpu.dynamic_rotate %4 by %c913_i32 dim 1 : vector<8x1024xf32>, i32 -> vector<8x1024xf32>
    %42 = tpu.concatenate %33, %34, %35, %36, %37, %38, %39, %40, %41 in 0 : vector<8x1024xf32>, vector<8x1024xf32>, vector<8x1024xf32>, vector<8x1024xf32>, vector<8x1024xf32>, vector<8x1024xf32>, vector<8x1024xf32>, vector<8x1024xf32>, vector<8x1024xf32> -> vector<72x1024xf32>
    %43 = arith.truncf %42 : vector<72x1024xf32> to vector<72x1024xbf16>
    %c2 = arith.constant 2 : index
    %c0_10 = arith.constant 0 : index
    %c0_11 = arith.constant 0 : index
    %44 = vector.load %arg2[%c2, %c0_10, %c0_11] : memref<3x8x72xbf16, #tpu.memory_space<vmem>>, vector<1x8x72xbf16>
    %45 = vector.shape_cast %44 : vector<1x8x72xbf16> to vector<8x72xbf16>
    %cst_12 = arith.constant dense<0.000000e+00> : vector<8x1024xf32>
    %46 = tpu.matmul %45, %43, %cst_12 {dimension_numbers = #tpu.dot_dimension_numbers<[1], [0], [0], [1], [0, 0, 1, 1], [], []>} : vector<8x72xbf16>, vector<72x1024xbf16>, vector<8x1024xf32> -> vector<8x1024xf32>
    %47 = arith.addf %32, %46 : vector<8x1024xf32>
    %48 = arith.mulf %47, %2 : vector<8x1024xf32>
    %cst_13 = arith.constant dense<0.000000e+00> : vector<8xf32>
    %49 = vector.multi_reduction <add>, %48, %cst_13 [1] : vector<8x1024xf32> to vector<8xf32>
    %50 = vector.shape_cast %49 : vector<8xf32> to vector<8x1xf32>
    %cst_14 = arith.constant 0.001953125 : f32
    %51 = vector.broadcast %cst_14 : f32 to vector<8x1xf32>
    %52 = arith.mulf %50, %51 : vector<8x1xf32>
    %53 = arith.mulf %48, %47 : vector<8x1024xf32>
    %cst_15 = arith.constant dense<0.000000e+00> : vector<8xf32>
    %54 = vector.multi_reduction <add>, %53, %cst_15 [1] : vector<8x1024xf32> to vector<8xf32>
    %55 = vector.shape_cast %54 : vector<8xf32> to vector<8x1xf32>
    %cst_16 = arith.constant 0.001953125 : f32
    %56 = vector.broadcast %cst_16 : f32 to vector<8x1xf32>
    %57 = arith.mulf %55, %56 : vector<8x1xf32>
    %58 = arith.mulf %52, %52 : vector<8x1xf32>
    %59 = arith.subf %57, %58 : vector<8x1xf32>
    %cst_17 = arith.constant 0.000000e+00 : f32
    %60 = vector.broadcast %cst_17 : f32 to vector<8x1xf32>
    %61 = arith.maximumf %59, %60 : vector<8x1xf32>
    %62 = vector.broadcast %52 : vector<8x1xf32> to vector<8x1024xf32>
    %63 = arith.subf %47, %62 : vector<8x1024xf32>
    %cst_18 = arith.constant 9.99999974E-6 : f32
    %64 = vector.broadcast %cst_18 : f32 to vector<8x1xf32>
    %65 = arith.addf %61, %64 : vector<8x1xf32>
    %66 = math.rsqrt %65 : vector<8x1xf32>
    %67 = vector.broadcast %66 : vector<8x1xf32> to vector<8x1024xf32>
    %68 = arith.mulf %63, %67 : vector<8x1024xf32>
    %cst_19 = arith.constant 0.000000e+00 : f32
    %69 = vector.broadcast %cst_19 : f32 to vector<8x1024xf32>
    %70 = arith.cmpf oge, %68, %69 : vector<8x1024xf32>
    %cst_20 = arith.constant 0.00999999977 : f32
    %71 = vector.broadcast %cst_20 : f32 to vector<8x1024xf32>
    %72 = arith.mulf %71, %68 : vector<8x1024xf32>
    %73 = arith.select %70, %68, %72 : vector<8x1024xi1>, vector<8x1024xf32>
    %74 = arith.mulf %73, %2 : vector<8x1024xf32>
    %c111_i32_21 = arith.constant 111 : i32
    %75 = tpu.dynamic_rotate %74 by %c111_i32_21 dim 1 : vector<8x1024xf32>, i32 -> vector<8x1024xf32>
    %c110_i32_22 = arith.constant 110 : i32
    %76 = tpu.dynamic_rotate %74 by %c110_i32_22 dim 1 : vector<8x1024xf32>, i32 -> vector<8x1024xf32>
    %c109_i32_23 = arith.constant 109 : i32
    %77 = tpu.dynamic_rotate %74 by %c109_i32_23 dim 1 : vector<8x1024xf32>, i32 -> vector<8x1024xf32>
    %c101_i32_24 = arith.constant 101 : i32
    %78 = tpu.dynamic_rotate %74 by %c101_i32_24 dim 1 : vector<8x1024xf32>, i32 -> vector<8x1024xf32>
    %c100_i32_25 = arith.constant 100 : i32
    %79 = tpu.dynamic_rotate %74 by %c100_i32_25 dim 1 : vector<8x1024xf32>, i32 -> vector<8x1024xf32>
    %c99_i32_26 = arith.constant 99 : i32
    %80 = tpu.dynamic_rotate %74 by %c99_i32_26 dim 1 : vector<8x1024xf32>, i32 -> vector<8x1024xf32>
    %c91_i32_27 = arith.constant 91 : i32
    %81 = tpu.dynamic_rotate %74 by %c91_i32_27 dim 1 : vector<8x1024xf32>, i32 -> vector<8x1024xf32>
    %c90_i32_28 = arith.constant 90 : i32
    %82 = tpu.dynamic_rotate %74 by %c90_i32_28 dim 1 : vector<8x1024xf32>, i32 -> vector<8x1024xf32>
    %c89_i32_29 = arith.constant 89 : i32
    %83 = tpu.dynamic_rotate %74 by %c89_i32_29 dim 1 : vector<8x1024xf32>, i32 -> vector<8x1024xf32>
    %84 = tpu.concatenate %75, %76, %77, %78, %79, %80, %81, %82, %83 in 0 : vector<8x1024xf32>, vector<8x1024xf32>, vector<8x1024xf32>, vector<8x1024xf32>, vector<8x1024xf32>, vector<8x1024xf32>, vector<8x1024xf32>, vector<8x1024xf32>, vector<8x1024xf32> -> vector<72x1024xf32>
    %85 = arith.truncf %84 : vector<72x1024xf32> to vector<72x1024xbf16>
    %c0_30 = arith.constant 0 : index
    %c0_31 = arith.constant 0 : index
    %c0_32 = arith.constant 0 : index
    %86 = vector.load %arg3[%c0_30, %c0_31, %c0_32] : memref<3x8x72xbf16, #tpu.memory_space<vmem>>, vector<1x8x72xbf16>
    %87 = vector.shape_cast %86 : vector<1x8x72xbf16> to vector<8x72xbf16>
    %cst_33 = arith.constant dense<0.000000e+00> : vector<8x1024xf32>
    %88 = tpu.matmul %87, %85, %cst_33 {dimension_numbers = #tpu.dot_dimension_numbers<[1], [0], [0], [1], [0, 0, 1, 1], [], []>} : vector<8x72xbf16>, vector<72x1024xbf16>, vector<8x1024xf32> -> vector<8x1024xf32>
    %c11_i32_34 = arith.constant 11 : i32
    %89 = tpu.dynamic_rotate %74 by %c11_i32_34 dim 1 : vector<8x1024xf32>, i32 -> vector<8x1024xf32>
    %c10_i32_35 = arith.constant 10 : i32
    %90 = tpu.dynamic_rotate %74 by %c10_i32_35 dim 1 : vector<8x1024xf32>, i32 -> vector<8x1024xf32>
    %c9_i32_36 = arith.constant 9 : i32
    %91 = tpu.dynamic_rotate %74 by %c9_i32_36 dim 1 : vector<8x1024xf32>, i32 -> vector<8x1024xf32>
    %c1_i32_37 = arith.constant 1 : i32
    %92 = tpu.dynamic_rotate %74 by %c1_i32_37 dim 1 : vector<8x1024xf32>, i32 -> vector<8x1024xf32>
    %c1023_i32_38 = arith.constant 1023 : i32
    %93 = tpu.dynamic_rotate %74 by %c1023_i32_38 dim 1 : vector<8x1024xf32>, i32 -> vector<8x1024xf32>
    %c1015_i32_39 = arith.constant 1015 : i32
    %94 = tpu.dynamic_rotate %74 by %c1015_i32_39 dim 1 : vector<8x1024xf32>, i32 -> vector<8x1024xf32>
    %c1014_i32_40 = arith.constant 1014 : i32
    %95 = tpu.dynamic_rotate %74 by %c1014_i32_40 dim 1 : vector<8x1024xf32>, i32 -> vector<8x1024xf32>
    %c1013_i32_41 = arith.constant 1013 : i32
    %96 = tpu.dynamic_rotate %74 by %c1013_i32_41 dim 1 : vector<8x1024xf32>, i32 -> vector<8x1024xf32>
    %97 = tpu.concatenate %89, %90, %91, %92, %74, %93, %94, %95, %96 in 0 : vector<8x1024xf32>, vector<8x1024xf32>, vector<8x1024xf32>, vector<8x1024xf32>, vector<8x1024xf32>, vector<8x1024xf32>, vector<8x1024xf32>, vector<8x1024xf32>, vector<8x1024xf32> -> vector<72x1024xf32>
    %98 = arith.truncf %97 : vector<72x1024xf32> to vector<72x1024xbf16>
    %c1_42 = arith.constant 1 : index
    %c0_43 = arith.constant 0 : index
    %c0_44 = arith.constant 0 : index
    %99 = vector.load %arg3[%c1_42, %c0_43, %c0_44] : memref<3x8x72xbf16, #tpu.memory_space<vmem>>, vector<1x8x72xbf16>
    %100 = vector.shape_cast %99 : vector<1x8x72xbf16> to vector<8x72xbf16>
    %cst_45 = arith.constant dense<0.000000e+00> : vector<8x1024xf32>
    %101 = tpu.matmul %100, %98, %cst_45 {dimension_numbers = #tpu.dot_dimension_numbers<[1], [0], [0], [1], [0, 0, 1, 1], [], []>} : vector<8x72xbf16>, vector<72x1024xbf16>, vector<8x1024xf32> -> vector<8x1024xf32>
    %102 = arith.addf %88, %101 : vector<8x1024xf32>
    %c935_i32_46 = arith.constant 935 : i32
    %103 = tpu.dynamic_rotate %74 by %c935_i32_46 dim 1 : vector<8x1024xf32>, i32 -> vector<8x1024xf32>
    %c934_i32_47 = arith.constant 934 : i32
    %104 = tpu.dynamic_rotate %74 by %c934_i32_47 dim 1 : vector<8x1024xf32>, i32 -> vector<8x1024xf32>
    %c933_i32_48 = arith.constant 933 : i32
    %105 = tpu.dynamic_rotate %74 by %c933_i32_48 dim 1 : vector<8x1024xf32>, i32 -> vector<8x1024xf32>
    %c925_i32_49 = arith.constant 925 : i32
    %106 = tpu.dynamic_rotate %74 by %c925_i32_49 dim 1 : vector<8x1024xf32>, i32 -> vector<8x1024xf32>
    %c924_i32_50 = arith.constant 924 : i32
    %107 = tpu.dynamic_rotate %74 by %c924_i32_50 dim 1 : vector<8x1024xf32>, i32 -> vector<8x1024xf32>
    %c923_i32_51 = arith.constant 923 : i32
    %108 = tpu.dynamic_rotate %74 by %c923_i32_51 dim 1 : vector<8x1024xf32>, i32 -> vector<8x1024xf32>
    %c915_i32_52 = arith.constant 915 : i32
    %109 = tpu.dynamic_rotate %74 by %c915_i32_52 dim 1 : vector<8x1024xf32>, i32 -> vector<8x1024xf32>
    %c914_i32_53 = arith.constant 914 : i32
    %110 = tpu.dynamic_rotate %74 by %c914_i32_53 dim 1 : vector<8x1024xf32>, i32 -> vector<8x1024xf32>
    %c913_i32_54 = arith.constant 913 : i32
    %111 = tpu.dynamic_rotate %74 by %c913_i32_54 dim 1 : vector<8x1024xf32>, i32 -> vector<8x1024xf32>
    %112 = tpu.concatenate %103, %104, %105, %106, %107, %108, %109, %110, %111 in 0 : vector<8x1024xf32>, vector<8x1024xf32>, vector<8x1024xf32>, vector<8x1024xf32>, vector<8x1024xf32>, vector<8x1024xf32>, vector<8x1024xf32>, vector<8x1024xf32>, vector<8x1024xf32> -> vector<72x1024xf32>
    %113 = arith.truncf %112 : vector<72x1024xf32> to vector<72x1024xbf16>
    %c2_55 = arith.constant 2 : index
    %c0_56 = arith.constant 0 : index
    %c0_57 = arith.constant 0 : index
    %114 = vector.load %arg3[%c2_55, %c0_56, %c0_57] : memref<3x8x72xbf16, #tpu.memory_space<vmem>>, vector<1x8x72xbf16>
    %115 = vector.shape_cast %114 : vector<1x8x72xbf16> to vector<8x72xbf16>
    %cst_58 = arith.constant dense<0.000000e+00> : vector<8x1024xf32>
    %116 = tpu.matmul %115, %113, %cst_58 {dimension_numbers = #tpu.dot_dimension_numbers<[1], [0], [0], [1], [0, 0, 1, 1], [], []>} : vector<8x72xbf16>, vector<72x1024xbf16>, vector<8x1024xf32> -> vector<8x1024xf32>
    %117 = arith.addf %102, %116 : vector<8x1024xf32>
    %118 = arith.mulf %117, %2 : vector<8x1024xf32>
    %cst_59 = arith.constant dense<0.000000e+00> : vector<8xf32>
    %119 = vector.multi_reduction <add>, %118, %cst_59 [1] : vector<8x1024xf32> to vector<8xf32>
    %120 = vector.shape_cast %119 : vector<8xf32> to vector<8x1xf32>
    %cst_60 = arith.constant 0.001953125 : f32
    %121 = vector.broadcast %cst_60 : f32 to vector<8x1xf32>
    %122 = arith.mulf %120, %121 : vector<8x1xf32>
    %123 = arith.mulf %118, %117 : vector<8x1024xf32>
    %cst_61 = arith.constant dense<0.000000e+00> : vector<8xf32>
    %124 = vector.multi_reduction <add>, %123, %cst_61 [1] : vector<8x1024xf32> to vector<8xf32>
    %125 = vector.shape_cast %124 : vector<8xf32> to vector<8x1xf32>
    %cst_62 = arith.constant 0.001953125 : f32
    %126 = vector.broadcast %cst_62 : f32 to vector<8x1xf32>
    %127 = arith.mulf %125, %126 : vector<8x1xf32>
    %128 = arith.mulf %122, %122 : vector<8x1xf32>
    %129 = arith.subf %127, %128 : vector<8x1xf32>
    %cst_63 = arith.constant 0.000000e+00 : f32
    %130 = vector.broadcast %cst_63 : f32 to vector<8x1xf32>
    %131 = arith.maximumf %129, %130 : vector<8x1xf32>
    %132 = vector.broadcast %122 : vector<8x1xf32> to vector<8x1024xf32>
    %133 = arith.subf %117, %132 : vector<8x1024xf32>
    %cst_64 = arith.constant 9.99999974E-6 : f32
    %134 = vector.broadcast %cst_64 : f32 to vector<8x1xf32>
    %135 = arith.addf %131, %134 : vector<8x1xf32>
    %136 = math.rsqrt %135 : vector<8x1xf32>
    %137 = vector.broadcast %136 : vector<8x1xf32> to vector<8x1024xf32>
    %138 = arith.mulf %133, %137 : vector<8x1024xf32>
    %c0_65 = arith.constant 0 : index
    %c0_66 = arith.constant 0 : index
    %139 = vector.load %arg4[%c0_65, %c0_66] : memref<8x8xbf16, #tpu.memory_space<vmem>>, vector<8x8xbf16>
    %140 = arith.truncf %4 : vector<8x1024xf32> to vector<8x1024xbf16>
    %cst_67 = arith.constant dense<0.000000e+00> : vector<8x1024xf32>
    %141 = tpu.matmul %139, %140, %cst_67 {dimension_numbers = #tpu.dot_dimension_numbers<[1], [0], [0], [1], [0, 0, 1, 1], [], []>} : vector<8x8xbf16>, vector<8x1024xbf16>, vector<8x1024xf32> -> vector<8x1024xf32>
    %142 = arith.mulf %141, %2 : vector<8x1024xf32>
    %cst_68 = arith.constant dense<0.000000e+00> : vector<8xf32>
    %143 = vector.multi_reduction <add>, %142, %cst_68 [1] : vector<8x1024xf32> to vector<8xf32>
    %144 = vector.shape_cast %143 : vector<8xf32> to vector<8x1xf32>
    %cst_69 = arith.constant 0.001953125 : f32
    %145 = vector.broadcast %cst_69 : f32 to vector<8x1xf32>
    %146 = arith.mulf %144, %145 : vector<8x1xf32>
    %147 = arith.mulf %142, %141 : vector<8x1024xf32>
    %cst_70 = arith.constant dense<0.000000e+00> : vector<8xf32>
    %148 = vector.multi_reduction <add>, %147, %cst_70 [1] : vector<8x1024xf32> to vector<8xf32>
    %149 = vector.shape_cast %148 : vector<8xf32> to vector<8x1xf32>
    %cst_71 = arith.constant 0.001953125 : f32
    %150 = vector.broadcast %cst_71 : f32 to vector<8x1xf32>
    %151 = arith.mulf %149, %150 : vector<8x1xf32>
    %152 = arith.mulf %146, %146 : vector<8x1xf32>
    %153 = arith.subf %151, %152 : vector<8x1xf32>
    %cst_72 = arith.constant 0.000000e+00 : f32
    %154 = vector.broadcast %cst_72 : f32 to vector<8x1xf32>
    %155 = arith.maximumf %153, %154 : vector<8x1xf32>
    %156 = vector.broadcast %146 : vector<8x1xf32> to vector<8x1024xf32>
    %157 = arith.subf %141, %156 : vector<8x1024xf32>
    %cst_73 = arith.constant 9.99999974E-6 : f32
    %158 = vector.broadcast %cst_73 : f32 to vector<8x1xf32>
    %159 = arith.addf %155, %158 : vector<8x1xf32>
    %160 = math.rsqrt %159 : vector<8x1xf32>
    %161 = vector.broadcast %160 : vector<8x1xf32> to vector<8x1024xf32>
    %162 = arith.mulf %157, %161 : vector<8x1024xf32>
    %163 = arith.addf %138, %162 : vector<8x1024xf32>
    %cst_74 = arith.constant 0.000000e+00 : f32
    %164 = vector.broadcast %cst_74 : f32 to vector<8x1024xf32>
    %165 = arith.cmpf oge, %163, %164 : vector<8x1024xf32>
    %cst_75 = arith.constant 0.00999999977 : f32
    %166 = vector.broadcast %cst_75 : f32 to vector<8x1024xf32>
    %167 = arith.mulf %166, %163 : vector<8x1024xf32>
    %168 = arith.select %165, %163, %167 : vector<8x1024xi1>, vector<8x1024xf32>
    %169 = arith.mulf %168, %2 : vector<8x1024xf32>
    %c111_i32_76 = arith.constant 111 : i32
    %170 = tpu.dynamic_rotate %169 by %c111_i32_76 dim 1 : vector<8x1024xf32>, i32 -> vector<8x1024xf32>
    %c110_i32_77 = arith.constant 110 : i32
    %171 = tpu.dynamic_rotate %169 by %c110_i32_77 dim 1 : vector<8x1024xf32>, i32 -> vector<8x1024xf32>
    %c109_i32_78 = arith.constant 109 : i32
    %172 = tpu.dynamic_rotate %169 by %c109_i32_78 dim 1 : vector<8x1024xf32>, i32 -> vector<8x1024xf32>
    %c101_i32_79 = arith.constant 101 : i32
    %173 = tpu.dynamic_rotate %169 by %c101_i32_79 dim 1 : vector<8x1024xf32>, i32 -> vector<8x1024xf32>
    %c100_i32_80 = arith.constant 100 : i32
    %174 = tpu.dynamic_rotate %169 by %c100_i32_80 dim 1 : vector<8x1024xf32>, i32 -> vector<8x1024xf32>
    %c99_i32_81 = arith.constant 99 : i32
    %175 = tpu.dynamic_rotate %169 by %c99_i32_81 dim 1 : vector<8x1024xf32>, i32 -> vector<8x1024xf32>
    %c91_i32_82 = arith.constant 91 : i32
    %176 = tpu.dynamic_rotate %169 by %c91_i32_82 dim 1 : vector<8x1024xf32>, i32 -> vector<8x1024xf32>
    %c90_i32_83 = arith.constant 90 : i32
    %177 = tpu.dynamic_rotate %169 by %c90_i32_83 dim 1 : vector<8x1024xf32>, i32 -> vector<8x1024xf32>
    %c89_i32_84 = arith.constant 89 : i32
    %178 = tpu.dynamic_rotate %169 by %c89_i32_84 dim 1 : vector<8x1024xf32>, i32 -> vector<8x1024xf32>
    %179 = tpu.concatenate %170, %171, %172, %173, %174, %175, %176, %177, %178 in 0 : vector<8x1024xf32>, vector<8x1024xf32>, vector<8x1024xf32>, vector<8x1024xf32>, vector<8x1024xf32>, vector<8x1024xf32>, vector<8x1024xf32>, vector<8x1024xf32>, vector<8x1024xf32> -> vector<72x1024xf32>
    %180 = arith.truncf %179 : vector<72x1024xf32> to vector<72x1024xbf16>
    %c0_85 = arith.constant 0 : index
    %c0_86 = arith.constant 0 : index
    %c0_87 = arith.constant 0 : index
    %181 = vector.load %arg5[%c0_85, %c0_86, %c0_87] : memref<3x8x72xbf16, #tpu.memory_space<vmem>>, vector<1x8x72xbf16>
    %182 = vector.shape_cast %181 : vector<1x8x72xbf16> to vector<8x72xbf16>
    %cst_88 = arith.constant dense<0.000000e+00> : vector<8x1024xf32>
    %183 = tpu.matmul %182, %180, %cst_88 {dimension_numbers = #tpu.dot_dimension_numbers<[1], [0], [0], [1], [0, 0, 1, 1], [], []>} : vector<8x72xbf16>, vector<72x1024xbf16>, vector<8x1024xf32> -> vector<8x1024xf32>
    %c11_i32_89 = arith.constant 11 : i32
    %184 = tpu.dynamic_rotate %169 by %c11_i32_89 dim 1 : vector<8x1024xf32>, i32 -> vector<8x1024xf32>
    %c10_i32_90 = arith.constant 10 : i32
    %185 = tpu.dynamic_rotate %169 by %c10_i32_90 dim 1 : vector<8x1024xf32>, i32 -> vector<8x1024xf32>
    %c9_i32_91 = arith.constant 9 : i32
    %186 = tpu.dynamic_rotate %169 by %c9_i32_91 dim 1 : vector<8x1024xf32>, i32 -> vector<8x1024xf32>
    %c1_i32_92 = arith.constant 1 : i32
    %187 = tpu.dynamic_rotate %169 by %c1_i32_92 dim 1 : vector<8x1024xf32>, i32 -> vector<8x1024xf32>
    %c1023_i32_93 = arith.constant 1023 : i32
    %188 = tpu.dynamic_rotate %169 by %c1023_i32_93 dim 1 : vector<8x1024xf32>, i32 -> vector<8x1024xf32>
    %c1015_i32_94 = arith.constant 1015 : i32
    %189 = tpu.dynamic_rotate %169 by %c1015_i32_94 dim 1 : vector<8x1024xf32>, i32 -> vector<8x1024xf32>
    %c1014_i32_95 = arith.constant 1014 : i32
    %190 = tpu.dynamic_rotate %169 by %c1014_i32_95 dim 1 : vector<8x1024xf32>, i32 -> vector<8x1024xf32>
    %c1013_i32_96 = arith.constant 1013 : i32
    %191 = tpu.dynamic_rotate %169 by %c1013_i32_96 dim 1 : vector<8x1024xf32>, i32 -> vector<8x1024xf32>
    %192 = tpu.concatenate %184, %185, %186, %187, %169, %188, %189, %190, %191 in 0 : vector<8x1024xf32>, vector<8x1024xf32>, vector<8x1024xf32>, vector<8x1024xf32>, vector<8x1024xf32>, vector<8x1024xf32>, vector<8x1024xf32>, vector<8x1024xf32>, vector<8x1024xf32> -> vector<72x1024xf32>
    %193 = arith.truncf %192 : vector<72x1024xf32> to vector<72x1024xbf16>
    %c1_97 = arith.constant 1 : index
    %c0_98 = arith.constant 0 : index
    %c0_99 = arith.constant 0 : index
    %194 = vector.load %arg5[%c1_97, %c0_98, %c0_99] : memref<3x8x72xbf16, #tpu.memory_space<vmem>>, vector<1x8x72xbf16>
    %195 = vector.shape_cast %194 : vector<1x8x72xbf16> to vector<8x72xbf16>
    %cst_100 = arith.constant dense<0.000000e+00> : vector<8x1024xf32>
    %196 = tpu.matmul %195, %193, %cst_100 {dimension_numbers = #tpu.dot_dimension_numbers<[1], [0], [0], [1], [0, 0, 1, 1], [], []>} : vector<8x72xbf16>, vector<72x1024xbf16>, vector<8x1024xf32> -> vector<8x1024xf32>
    %197 = arith.addf %183, %196 : vector<8x1024xf32>
    %c935_i32_101 = arith.constant 935 : i32
    %198 = tpu.dynamic_rotate %169 by %c935_i32_101 dim 1 : vector<8x1024xf32>, i32 -> vector<8x1024xf32>
    %c934_i32_102 = arith.constant 934 : i32
    %199 = tpu.dynamic_rotate %169 by %c934_i32_102 dim 1 : vector<8x1024xf32>, i32 -> vector<8x1024xf32>
    %c933_i32_103 = arith.constant 933 : i32
    %200 = tpu.dynamic_rotate %169 by %c933_i32_103 dim 1 : vector<8x1024xf32>, i32 -> vector<8x1024xf32>
    %c925_i32_104 = arith.constant 925 : i32
    %201 = tpu.dynamic_rotate %169 by %c925_i32_104 dim 1 : vector<8x1024xf32>, i32 -> vector<8x1024xf32>
    %c924_i32_105 = arith.constant 924 : i32
    %202 = tpu.dynamic_rotate %169 by %c924_i32_105 dim 1 : vector<8x1024xf32>, i32 -> vector<8x1024xf32>
    %c923_i32_106 = arith.constant 923 : i32
    %203 = tpu.dynamic_rotate %169 by %c923_i32_106 dim 1 : vector<8x1024xf32>, i32 -> vector<8x1024xf32>
    %c915_i32_107 = arith.constant 915 : i32
    %204 = tpu.dynamic_rotate %169 by %c915_i32_107 dim 1 : vector<8x1024xf32>, i32 -> vector<8x1024xf32>
    %c914_i32_108 = arith.constant 914 : i32
    %205 = tpu.dynamic_rotate %169 by %c914_i32_108 dim 1 : vector<8x1024xf32>, i32 -> vector<8x1024xf32>
    %c913_i32_109 = arith.constant 913 : i32
    %206 = tpu.dynamic_rotate %169 by %c913_i32_109 dim 1 : vector<8x1024xf32>, i32 -> vector<8x1024xf32>
    %207 = tpu.concatenate %198, %199, %200, %201, %202, %203, %204, %205, %206 in 0 : vector<8x1024xf32>, vector<8x1024xf32>, vector<8x1024xf32>, vector<8x1024xf32>, vector<8x1024xf32>, vector<8x1024xf32>, vector<8x1024xf32>, vector<8x1024xf32>, vector<8x1024xf32> -> vector<72x1024xf32>
    %208 = arith.truncf %207 : vector<72x1024xf32> to vector<72x1024xbf16>
    %c2_110 = arith.constant 2 : index
    %c0_111 = arith.constant 0 : index
    %c0_112 = arith.constant 0 : index
    %209 = vector.load %arg5[%c2_110, %c0_111, %c0_112] : memref<3x8x72xbf16, #tpu.memory_space<vmem>>, vector<1x8x72xbf16>
    %210 = vector.shape_cast %209 : vector<1x8x72xbf16> to vector<8x72xbf16>
    %cst_113 = arith.constant dense<0.000000e+00> : vector<8x1024xf32>
    %211 = tpu.matmul %210, %208, %cst_113 {dimension_numbers = #tpu.dot_dimension_numbers<[1], [0], [0], [1], [0, 0, 1, 1], [], []>} : vector<8x72xbf16>, vector<72x1024xbf16>, vector<8x1024xf32> -> vector<8x1024xf32>
    %212 = arith.addf %197, %211 : vector<8x1024xf32>
    %213 = arith.mulf %212, %2 : vector<8x1024xf32>
    %cst_114 = arith.constant dense<0.000000e+00> : vector<8xf32>
    %214 = vector.multi_reduction <add>, %213, %cst_114 [1] : vector<8x1024xf32> to vector<8xf32>
    %215 = vector.shape_cast %214 : vector<8xf32> to vector<8x1xf32>
    %cst_115 = arith.constant 0.001953125 : f32
    %216 = vector.broadcast %cst_115 : f32 to vector<8x1xf32>
    %217 = arith.mulf %215, %216 : vector<8x1xf32>
    %218 = arith.mulf %213, %212 : vector<8x1024xf32>
    %cst_116 = arith.constant dense<0.000000e+00> : vector<8xf32>
    %219 = vector.multi_reduction <add>, %218, %cst_116 [1] : vector<8x1024xf32> to vector<8xf32>
    %220 = vector.shape_cast %219 : vector<8xf32> to vector<8x1xf32>
    %cst_117 = arith.constant 0.001953125 : f32
    %221 = vector.broadcast %cst_117 : f32 to vector<8x1xf32>
    %222 = arith.mulf %220, %221 : vector<8x1xf32>
    %223 = arith.mulf %217, %217 : vector<8x1xf32>
    %224 = arith.subf %222, %223 : vector<8x1xf32>
    %cst_118 = arith.constant 0.000000e+00 : f32
    %225 = vector.broadcast %cst_118 : f32 to vector<8x1xf32>
    %226 = arith.maximumf %224, %225 : vector<8x1xf32>
    %227 = vector.broadcast %217 : vector<8x1xf32> to vector<8x1024xf32>
    %228 = arith.subf %212, %227 : vector<8x1024xf32>
    %cst_119 = arith.constant 9.99999974E-6 : f32
    %229 = vector.broadcast %cst_119 : f32 to vector<8x1xf32>
    %230 = arith.addf %226, %229 : vector<8x1xf32>
    %231 = math.rsqrt %230 : vector<8x1xf32>
    %232 = vector.broadcast %231 : vector<8x1xf32> to vector<8x1024xf32>
    %233 = arith.mulf %228, %232 : vector<8x1024xf32>
    %cst_120 = arith.constant 0.000000e+00 : f32
    %234 = vector.broadcast %cst_120 : f32 to vector<8x1024xf32>
    %235 = arith.cmpf oge, %233, %234 : vector<8x1024xf32>
    %cst_121 = arith.constant 0.00999999977 : f32
    %236 = vector.broadcast %cst_121 : f32 to vector<8x1024xf32>
    %237 = arith.mulf %236, %233 : vector<8x1024xf32>
    %238 = arith.select %235, %233, %237 : vector<8x1024xi1>, vector<8x1024xf32>
    %239 = arith.mulf %238, %2 : vector<8x1024xf32>
    %c111_i32_122 = arith.constant 111 : i32
    %240 = tpu.dynamic_rotate %239 by %c111_i32_122 dim 1 : vector<8x1024xf32>, i32 -> vector<8x1024xf32>
    %c110_i32_123 = arith.constant 110 : i32
    %241 = tpu.dynamic_rotate %239 by %c110_i32_123 dim 1 : vector<8x1024xf32>, i32 -> vector<8x1024xf32>
    %c109_i32_124 = arith.constant 109 : i32
    %242 = tpu.dynamic_rotate %239 by %c109_i32_124 dim 1 : vector<8x1024xf32>, i32 -> vector<8x1024xf32>
    %c101_i32_125 = arith.constant 101 : i32
    %243 = tpu.dynamic_rotate %239 by %c101_i32_125 dim 1 : vector<8x1024xf32>, i32 -> vector<8x1024xf32>
    %c100_i32_126 = arith.constant 100 : i32
    %244 = tpu.dynamic_rotate %239 by %c100_i32_126 dim 1 : vector<8x1024xf32>, i32 -> vector<8x1024xf32>
    %c99_i32_127 = arith.constant 99 : i32
    %245 = tpu.dynamic_rotate %239 by %c99_i32_127 dim 1 : vector<8x1024xf32>, i32 -> vector<8x1024xf32>
    %c91_i32_128 = arith.constant 91 : i32
    %246 = tpu.dynamic_rotate %239 by %c91_i32_128 dim 1 : vector<8x1024xf32>, i32 -> vector<8x1024xf32>
    %c90_i32_129 = arith.constant 90 : i32
    %247 = tpu.dynamic_rotate %239 by %c90_i32_129 dim 1 : vector<8x1024xf32>, i32 -> vector<8x1024xf32>
    %c89_i32_130 = arith.constant 89 : i32
    %248 = tpu.dynamic_rotate %239 by %c89_i32_130 dim 1 : vector<8x1024xf32>, i32 -> vector<8x1024xf32>
    %249 = tpu.concatenate %240, %241, %242, %243, %244, %245, %246, %247, %248 in 0 : vector<8x1024xf32>, vector<8x1024xf32>, vector<8x1024xf32>, vector<8x1024xf32>, vector<8x1024xf32>, vector<8x1024xf32>, vector<8x1024xf32>, vector<8x1024xf32>, vector<8x1024xf32> -> vector<72x1024xf32>
    %250 = arith.truncf %249 : vector<72x1024xf32> to vector<72x1024xbf16>
    %c0_131 = arith.constant 0 : index
    %c0_132 = arith.constant 0 : index
    %c0_133 = arith.constant 0 : index
    %251 = vector.load %arg6[%c0_131, %c0_132, %c0_133] : memref<3x8x72xbf16, #tpu.memory_space<vmem>>, vector<1x8x72xbf16>
    %252 = vector.shape_cast %251 : vector<1x8x72xbf16> to vector<8x72xbf16>
    %cst_134 = arith.constant dense<0.000000e+00> : vector<8x1024xf32>
    %253 = tpu.matmul %252, %250, %cst_134 {dimension_numbers = #tpu.dot_dimension_numbers<[1], [0], [0], [1], [0, 0, 1, 1], [], []>} : vector<8x72xbf16>, vector<72x1024xbf16>, vector<8x1024xf32> -> vector<8x1024xf32>
    %c11_i32_135 = arith.constant 11 : i32
    %254 = tpu.dynamic_rotate %239 by %c11_i32_135 dim 1 : vector<8x1024xf32>, i32 -> vector<8x1024xf32>
    %c10_i32_136 = arith.constant 10 : i32
    %255 = tpu.dynamic_rotate %239 by %c10_i32_136 dim 1 : vector<8x1024xf32>, i32 -> vector<8x1024xf32>
    %c9_i32_137 = arith.constant 9 : i32
    %256 = tpu.dynamic_rotate %239 by %c9_i32_137 dim 1 : vector<8x1024xf32>, i32 -> vector<8x1024xf32>
    %c1_i32_138 = arith.constant 1 : i32
    %257 = tpu.dynamic_rotate %239 by %c1_i32_138 dim 1 : vector<8x1024xf32>, i32 -> vector<8x1024xf32>
    %c1023_i32_139 = arith.constant 1023 : i32
    %258 = tpu.dynamic_rotate %239 by %c1023_i32_139 dim 1 : vector<8x1024xf32>, i32 -> vector<8x1024xf32>
    %c1015_i32_140 = arith.constant 1015 : i32
    %259 = tpu.dynamic_rotate %239 by %c1015_i32_140 dim 1 : vector<8x1024xf32>, i32 -> vector<8x1024xf32>
    %c1014_i32_141 = arith.constant 1014 : i32
    %260 = tpu.dynamic_rotate %239 by %c1014_i32_141 dim 1 : vector<8x1024xf32>, i32 -> vector<8x1024xf32>
    %c1013_i32_142 = arith.constant 1013 : i32
    %261 = tpu.dynamic_rotate %239 by %c1013_i32_142 dim 1 : vector<8x1024xf32>, i32 -> vector<8x1024xf32>
    %262 = tpu.concatenate %254, %255, %256, %257, %239, %258, %259, %260, %261 in 0 : vector<8x1024xf32>, vector<8x1024xf32>, vector<8x1024xf32>, vector<8x1024xf32>, vector<8x1024xf32>, vector<8x1024xf32>, vector<8x1024xf32>, vector<8x1024xf32>, vector<8x1024xf32> -> vector<72x1024xf32>
    %263 = arith.truncf %262 : vector<72x1024xf32> to vector<72x1024xbf16>
    %c1_143 = arith.constant 1 : index
    %c0_144 = arith.constant 0 : index
    %c0_145 = arith.constant 0 : index
    %264 = vector.load %arg6[%c1_143, %c0_144, %c0_145] : memref<3x8x72xbf16, #tpu.memory_space<vmem>>, vector<1x8x72xbf16>
    %265 = vector.shape_cast %264 : vector<1x8x72xbf16> to vector<8x72xbf16>
    %cst_146 = arith.constant dense<0.000000e+00> : vector<8x1024xf32>
    %266 = tpu.matmul %265, %263, %cst_146 {dimension_numbers = #tpu.dot_dimension_numbers<[1], [0], [0], [1], [0, 0, 1, 1], [], []>} : vector<8x72xbf16>, vector<72x1024xbf16>, vector<8x1024xf32> -> vector<8x1024xf32>
    %267 = arith.addf %253, %266 : vector<8x1024xf32>
    %c935_i32_147 = arith.constant 935 : i32
    %268 = tpu.dynamic_rotate %239 by %c935_i32_147 dim 1 : vector<8x1024xf32>, i32 -> vector<8x1024xf32>
    %c934_i32_148 = arith.constant 934 : i32
    %269 = tpu.dynamic_rotate %239 by %c934_i32_148 dim 1 : vector<8x1024xf32>, i32 -> vector<8x1024xf32>
    %c933_i32_149 = arith.constant 933 : i32
    %270 = tpu.dynamic_rotate %239 by %c933_i32_149 dim 1 : vector<8x1024xf32>, i32 -> vector<8x1024xf32>
    %c925_i32_150 = arith.constant 925 : i32
    %271 = tpu.dynamic_rotate %239 by %c925_i32_150 dim 1 : vector<8x1024xf32>, i32 -> vector<8x1024xf32>
    %c924_i32_151 = arith.constant 924 : i32
    %272 = tpu.dynamic_rotate %239 by %c924_i32_151 dim 1 : vector<8x1024xf32>, i32 -> vector<8x1024xf32>
    %c923_i32_152 = arith.constant 923 : i32
    %273 = tpu.dynamic_rotate %239 by %c923_i32_152 dim 1 : vector<8x1024xf32>, i32 -> vector<8x1024xf32>
    %c915_i32_153 = arith.constant 915 : i32
    %274 = tpu.dynamic_rotate %239 by %c915_i32_153 dim 1 : vector<8x1024xf32>, i32 -> vector<8x1024xf32>
    %c914_i32_154 = arith.constant 914 : i32
    %275 = tpu.dynamic_rotate %239 by %c914_i32_154 dim 1 : vector<8x1024xf32>, i32 -> vector<8x1024xf32>
    %c913_i32_155 = arith.constant 913 : i32
    %276 = tpu.dynamic_rotate %239 by %c913_i32_155 dim 1 : vector<8x1024xf32>, i32 -> vector<8x1024xf32>
    %277 = tpu.concatenate %268, %269, %270, %271, %272, %273, %274, %275, %276 in 0 : vector<8x1024xf32>, vector<8x1024xf32>, vector<8x1024xf32>, vector<8x1024xf32>, vector<8x1024xf32>, vector<8x1024xf32>, vector<8x1024xf32>, vector<8x1024xf32>, vector<8x1024xf32> -> vector<72x1024xf32>
    %278 = arith.truncf %277 : vector<72x1024xf32> to vector<72x1024xbf16>
    %c2_156 = arith.constant 2 : index
    %c0_157 = arith.constant 0 : index
    %c0_158 = arith.constant 0 : index
    %279 = vector.load %arg6[%c2_156, %c0_157, %c0_158] : memref<3x8x72xbf16, #tpu.memory_space<vmem>>, vector<1x8x72xbf16>
    %280 = vector.shape_cast %279 : vector<1x8x72xbf16> to vector<8x72xbf16>
    %cst_159 = arith.constant dense<0.000000e+00> : vector<8x1024xf32>
    %281 = tpu.matmul %280, %278, %cst_159 {dimension_numbers = #tpu.dot_dimension_numbers<[1], [0], [0], [1], [0, 0, 1, 1], [], []>} : vector<8x72xbf16>, vector<72x1024xbf16>, vector<8x1024xf32> -> vector<8x1024xf32>
    %282 = arith.addf %267, %281 : vector<8x1024xf32>
    %283 = arith.mulf %282, %2 : vector<8x1024xf32>
    %cst_160 = arith.constant dense<0.000000e+00> : vector<8xf32>
    %284 = vector.multi_reduction <add>, %283, %cst_160 [1] : vector<8x1024xf32> to vector<8xf32>
    %285 = vector.shape_cast %284 : vector<8xf32> to vector<8x1xf32>
    %cst_161 = arith.constant 0.001953125 : f32
    %286 = vector.broadcast %cst_161 : f32 to vector<8x1xf32>
    %287 = arith.mulf %285, %286 : vector<8x1xf32>
    %288 = arith.mulf %283, %282 : vector<8x1024xf32>
    %cst_162 = arith.constant dense<0.000000e+00> : vector<8xf32>
    %289 = vector.multi_reduction <add>, %288, %cst_162 [1] : vector<8x1024xf32> to vector<8xf32>
    %290 = vector.shape_cast %289 : vector<8xf32> to vector<8x1xf32>
    %cst_163 = arith.constant 0.001953125 : f32
    %291 = vector.broadcast %cst_163 : f32 to vector<8x1xf32>
    %292 = arith.mulf %290, %291 : vector<8x1xf32>
    %293 = arith.mulf %287, %287 : vector<8x1xf32>
    %294 = arith.subf %292, %293 : vector<8x1xf32>
    %cst_164 = arith.constant 0.000000e+00 : f32
    %295 = vector.broadcast %cst_164 : f32 to vector<8x1xf32>
    %296 = arith.maximumf %294, %295 : vector<8x1xf32>
    %297 = vector.broadcast %287 : vector<8x1xf32> to vector<8x1024xf32>
    %298 = arith.subf %282, %297 : vector<8x1024xf32>
    %cst_165 = arith.constant 9.99999974E-6 : f32
    %299 = vector.broadcast %cst_165 : f32 to vector<8x1xf32>
    %300 = arith.addf %296, %299 : vector<8x1xf32>
    %301 = math.rsqrt %300 : vector<8x1xf32>
    %302 = vector.broadcast %301 : vector<8x1xf32> to vector<8x1024xf32>
    %303 = arith.mulf %298, %302 : vector<8x1024xf32>
    %304 = arith.addf %303, %169 : vector<8x1024xf32>
    %cst_166 = arith.constant 0.000000e+00 : f32
    %305 = vector.broadcast %cst_166 : f32 to vector<8x1024xf32>
    %306 = arith.cmpf oge, %304, %305 : vector<8x1024xf32>
    %cst_167 = arith.constant 0.00999999977 : f32
    %307 = vector.broadcast %cst_167 : f32 to vector<8x1024xf32>
    %308 = arith.mulf %307, %304 : vector<8x1024xf32>
    %309 = arith.select %306, %304, %308 : vector<8x1024xi1>, vector<8x1024xf32>
    %c0_168 = arith.constant 0 : index
    %c0_169 = arith.constant 0 : index
    %c0_170 = arith.constant 0 : index
    %310 = vector.load %arg8[%c0_168, %c0_169, %c0_170] : memref<1x8x1024xf32, #tpu.memory_space<vmem>>, vector<1x8x1024xf32>
    %311 = vector.shape_cast %310 : vector<1x8x1024xf32> to vector<8x1024xf32>
    %312 = vector.shape_cast %309 : vector<8x1024xf32> to vector<1x8x1024xf32>
    tpu.vector_store %arg8[%c0_168, %c0_169, %c0_170], %312 {strides = array<i32>} : memref<1x8x1024xf32, #tpu.memory_space<vmem>>, vector<1x8x1024xf32>,
    return
  }
  func.func @transform_0(%arg0: i32) -> (i32, i32, i32) {
    %c0_i32 = arith.constant 0 : i32
    %c0_i32_0 = arith.constant 0 : i32
    %c0_i32_1 = arith.constant 0 : i32
    return %arg0, %c0_i32, %c0_i32_0 : i32, i32, i32
  }
  func.func @transform_1(%arg0: i32) -> (i32, i32, i32) {
    %c0_i32 = arith.constant 0 : i32
    %c0_i32_0 = arith.constant 0 : i32
    %c0_i32_1 = arith.constant 0 : i32
    %c0_i32_2 = arith.constant 0 : i32
    return %c0_i32, %c0_i32_0, %c0_i32_1 : i32, i32, i32
  }
  func.func @transform_2(%arg0: i32) -> (i32, i32, i32) {
    %c0_i32 = arith.constant 0 : i32
    %c0_i32_0 = arith.constant 0 : i32
    %c0_i32_1 = arith.constant 0 : i32
    %c0_i32_2 = arith.constant 0 : i32
    return %c0_i32, %c0_i32_0, %c0_i32_1 : i32, i32, i32
  }
  func.func @transform_3(%arg0: i32) -> (i32, i32) {
    %c0_i32 = arith.constant 0 : i32
    %c0_i32_0 = arith.constant 0 : i32
    %c0_i32_1 = arith.constant 0 : i32
    return %c0_i32, %c0_i32_0 : i32, i32
  }
  func.func @transform_4(%arg0: i32) -> (i32, i32, i32) {
    %c0_i32 = arith.constant 0 : i32
    %c0_i32_0 = arith.constant 0 : i32
    %c0_i32_1 = arith.constant 0 : i32
    %c0_i32_2 = arith.constant 0 : i32
    return %c0_i32, %c0_i32_0, %c0_i32_1 : i32, i32, i32
  }
  func.func @transform_5(%arg0: i32) -> (i32, i32, i32) {
    %c0_i32 = arith.constant 0 : i32
    %c0_i32_0 = arith.constant 0 : i32
    %c0_i32_1 = arith.constant 0 : i32
    %c0_i32_2 = arith.constant 0 : i32
    return %c0_i32, %c0_i32_0, %c0_i32_1 : i32, i32, i32
  }
  func.func @transform_6(%arg0: i32) -> (i32, i32) {
    %c0_i32 = arith.constant 0 : i32
    %c0_i32_0 = arith.constant 0 : i32
    %c0_i32_1 = arith.constant 0 : i32
    return %c0_i32, %c0_i32_0 : i32, i32
  }
  func.func @transform_7(%arg0: i32) -> (i32, i32, i32) {
    %c0_i32 = arith.constant 0 : i32
    %c0_i32_0 = arith.constant 0 : i32
    %c0_i32_1 = arith.constant 0 : i32
    return %arg0, %c0_i32, %c0_i32_0 : i32, i32, i32
  }
}

</mosaic_0001>

<bundles_post_ra>
// kernel: tpu_custom_call.1
= control target key start
LH: loop header
LB: loop body
LE: loop exit
PB: predicated region body
PF: predicated region fallthrough
CT: control target
= control target key end

     0   :  { %s14738_s0 = inlined_call_operand.hbm [shape: f32[2,8,1024], index: 0, kind: input, shape index: {}]   ;;  %s14739_s1 = inlined_call_operand.hbm [shape: bf16[3,8,72], index: 1, kind: input, shape index: {}]   ;;  %s14740_s2 = inlined_call_operand.hbm [shape: bf16[3,8,72], index: 2, kind: input, shape index: {}]   ;;  %s14741_s3 = inlined_call_operand.hbm [shape: bf16[8,8], index: 3, kind: input, shape index: {}]   ;;  %s14742_s4 = inlined_call_operand.vmem [shape: bf16[3,8,72], index: 4, kind: input, shape index: {}]   ;;  %s14743_s5 = inlined_call_operand.hbm [shape: bf16[3,8,72], index: 5, kind: input, shape index: {}]   ;;  %s14744_s6 = inlined_call_operand.vmem [shape: f32[1,1024], index: 6, kind: input, shape index: {}]   ;;  %s14745_s7 = inlined_call_operand.hbm [shape: f32[2,8,1024], index: 7, kind: output, shape index: {}]  }
   0x1   :  { %14900 = sst [smem:[#allocation30_spill]] %s14738_s0 }
   0x2   :  { %14901 = sst [smem:[#allocation31_spill]] %s14739_s1 }
   0x3   :  { %14902 = sst [smem:[#allocation32_spill]] %s14740_s2 }
   0x4   :  { %14903 = sst [smem:[#allocation33_spill]] %s14741_s3 }
   0x5   :  { %14904 = sst [smem:[#allocation34_spill]] %s14743_s5 }
   0x6   :  { %14905 = sst [smem:[#allocation35_spill]] %s14744_s6 }
   0x7   :  { %14906 = sst [smem:[#allocation36_spill]] %s14745_s7 }
   0x8   :  { %12 = vsyncpa [#allocation3], 0 }
   0x9   :  { %14 = vsyncpa [#allocation3 + $0x1], 0 }
   0xa   :  { %15 = vsyncpa [#allocation6], 0 }
   0xb   :  { %16 = vsyncpa [#allocation9], 0 }
   0xc   :  { %17 = vsyncpa [#allocation4], 0 }
   0xd   :  { %19 = vsyncpa [#allocation4 + $0x1], 0  ;;  %s9194_s24 = smov 0   ;;  %s9196_s25 = smov 0  }
   0xe   :  { %s9198_s26 = smov 0   ;;  %s9200_s27 = smov 0  }
   0xf LB: > { %14907 = sst [smem:[#allocation16_spill]] %s9105_s24  ;;  %s9119_s28 = smov [#allocation5]   ;;  %s9117_s27 = sphi %s9200_s27, %s15458_s27   ;;  %s9113_s26 = sphi %s9198_s26, %s15461_s26   ;;  %s9109_s25 = sphi %s9196_s25, %s15460_s25   ;;  %s9105_s24 = sphi %s9194_s24, %s15459_s24  }
  0x10   : > { %14908 = sst [smem:[#allocation17_spill]] %s9109_s25  ;;  %s220_s29 = sshll.u32 %s9119_s28, 4  ;;  %s9220_s29 = int_to_ptr.vmem [resolvable:$true] %s220_s29 }
  0x11   : > { %14909 = sst [smem:[#allocation18_spill]] %s9113_s26  ;;  %s9215_s30 = sadd.s32 4294967295, %s9117_s27  }
  0x12   : > { %14910 = sst [smem:[#allocation19_spill]] %s9117_s27  ;;  %p6506_p0 = scmp.ge.s32.totalorder %s9117_s27, 1 }
  0x13   : > { %p14746_p1 = scmp.eq.s32.totalorder %s9215_s30, 0  ;;  %p208_p2 = scmp.lt.s32.totalorder %s9117_s27, 3 }
  0x14   : > { %s9120_s9 = smov [#allocation8]   ;;  %s9121_s12 = smov [#allocation7]  }
  0x15   : > { %p9222_p3 = pnand %p6506_p0, %p208_p2  ;;  %s247_s10 = sshll.u32 %s9120_s9, 4  ;;  %s9235_s10 = int_to_ptr.vmem [resolvable:$true] %s247_s10 }
  0x16   : > { %s233_s13 = sshll.u32 %s9121_s12, 4  ;;  %s14913_s1 = sld [smem:[#allocation31_spill]]  ;;  %s9237_s13 = int_to_ptr.vmem [resolvable:$true] %s233_s13 }
  0x17   : > { %s14911_s8 = scalar_select %p9222_p3, 1, 0 }
  0x18   : > { %p6783_p5 = pneg %p9222_p3 }
  0x1a   : > { %p9231_p6 = pnand %p6783_p5, %p14746_p1 }
  0x1c   : > { %s8901_s16 = scalar_lea.hbm %s14913_s1, 192  ;;  %p9247_p8 = pneg %p9231_p6 }
  0x1d   : > { %p8902_p7 = scmp.ne.s32.totalorder %s14913_s1, %s8901_s16  ;;  %p8908_p11 = scmp.lt.u32.totalorder %s8901_s16, %s14913_s1 }
  0x1f   : > { %p8904_p9 = pnand %p9247_p8, %p8902_p7 }
  0x21   : > { %p8905_p10 = pneg %p8904_p9 }
  0x23   : > { %p8910_p12 = pnand %p8908_p11, %p8905_p10 }
  0x25   : > { %8913 = shalt.err (!%p8910_p12)
}
  0x26   : > { %s8914_s22 = scalar_lea.vmem %s9220_s29, 192  ;;  %p8922_p5 = scmp.lt.s32.totalorder %s9220_s29, %s9220_s29 }
  0x27   : > { %p8915_p13 = scmp.ne.s32.totalorder %s9220_s29, %s8914_s22  ;;  %p8923_p4 = scmp.lt.s32.totalorder %s8914_s22, %s8914_s22 }
  0x29   : > { %p8917_p0 = pnand %p8915_p13, %p9247_p8  ;;  %p8924_p7 = por %p8923_p4, %p8922_p5 }
  0x2b   : > { %p8918_p2 = pneg %p8917_p0 }
  0x2d   : > { %p8925_p9 = pnand %p8924_p7, %p8918_p2 }
  0x2f   : > { %8928 = shalt.err (!%p8925_p9)
}
  0x30   : > { %s9122_s23 = smov 64   ;;  %s9123_s28 = smov 4  }
  0x31   : > { %6786 = dma.hbm_to_vmem [thread:$0]  (!%p9231_p6), %s14913_s1, 192, %s9220_s29, [#allocation6], %s9122_s23, %s9122_s23, %s9123_s28  }
  0x32   : > { %s14915_s3 = sld [smem:[#allocation33_spill]] }
  0x38   : > { %s8929_s16 = scalar_lea.hbm %s14915_s3, 64 }
  0x39   : > { %p8930_p4 = scmp.ne.s32.totalorder %s14915_s3, %s8929_s16  ;;  %p8936_p12 = scmp.lt.u32.totalorder %s8929_s16, %s14915_s3 }
  0x3b   : > { %p8932_p10 = pnand %p8930_p4, %p9247_p8 }
  0x3d   : > { %p8933_p11 = pneg %p8932_p10 }
  0x3f   : > { %p8938_p13 = pnand %p8936_p12, %p8933_p11 }
  0x41   : > { %8941 = shalt.err (!%p8938_p13)
}
  0x42   : > { %s8942_s29 = scalar_lea.vmem %s9235_s10, 64  ;;  %p8950_p7 = scmp.lt.s32.totalorder %s9235_s10, %s9235_s10 }
  0x43   : > { %p8943_p0 = scmp.ne.s32.totalorder %s9235_s10, %s8942_s29  ;;  %p8951_p9 = scmp.lt.s32.totalorder %s8942_s29, %s8942_s29 }
  0x45   : > { %p8945_p2 = pnand %p8943_p0, %p9247_p8  ;;  %p8952_p4 = por %p8951_p9, %p8950_p7 }
  0x47   : > { %p8946_p5 = pneg %p8945_p2 }
  0x49   : > { %p8953_p10 = pnand %p8952_p4, %p8946_p5 }
  0x4b   : > { %8956 = shalt.err (!%p8953_p10)
}
  0x4c   : > { %6792 = dma.hbm_to_vmem [thread:$0]  (!%p9231_p6), %s14915_s3, 64, %s9235_s10, [#allocation9]  }
  0x4d   : > { %s14916_s2 = sld [smem:[#allocation32_spill]] }
  0x53   : > { %s8957_s15 = scalar_lea.hbm %s14916_s2, 192 }
  0x54   : > { %p8958_p11 = scmp.ne.s32.totalorder %s14916_s2, %s8957_s15  ;;  %p8964_p0 = scmp.lt.u32.totalorder %s8957_s15, %s14916_s2 }
  0x56   : > { %p8960_p12 = pnand %p8958_p11, %p9247_p8 }
  0x58   : > { %p8961_p13 = pneg %p8960_p12 }
  0x5a   : > { %p8966_p2 = pnand %p8964_p0, %p8961_p13 }
  0x5c   : > { %8969 = shalt.err (!%p8966_p2)
}
  0x5d   : > { %s8970_s10 = scalar_lea.vmem %s9237_s13, 192  ;;  %p8978_p4 = scmp.lt.s32.totalorder %s9237_s13, %s9237_s13 }
  0x5e   : > { %p8971_p5 = scmp.ne.s32.totalorder %s9237_s13, %s8970_s10  ;;  %p8979_p10 = scmp.lt.s32.totalorder %s8970_s10, %s8970_s10 }
  0x60   : > { %p8973_p7 = pnand %p8971_p5, %p9247_p8  ;;  %p8980_p11 = por %p8979_p10, %p8978_p4 }
  0x62   : > { %p8974_p9 = pneg %p8973_p7 }
  0x64   : > { %p8981_p12 = pnand %p8980_p11, %p8974_p9 }
  0x66   : > { %8984 = shalt.err (!%p8981_p12)
}
  0x67   : > { %6789 = dma.hbm_to_vmem [thread:$0]  (!%p9231_p6), %s14916_s2, 192, %s9237_s13, [#allocation6], %s9122_s23, %s9122_s23, %s9123_s28  }
  0x68   : > { %s9124_s22 = smov [#allocation10]   ;;  %s14917_s5 = sld [smem:[#allocation34_spill]] }
  0x69   : > { %s260_s9 = sshll.u32 %s9124_s22, 4  ;;  %s261_s9 = int_to_ptr.vmem [resolvable:$true] %s260_s9 }
  0x6e   : > { %s8985_s15 = scalar_lea.hbm %s14917_s5, 192 }
  0x6f   : > { %p8986_p13 = scmp.ne.s32.totalorder %s14917_s5, %s8985_s15  ;;  %p8992_p5 = scmp.lt.u32.totalorder %s8985_s15, %s14917_s5 }
  0x71   : > { %p8988_p0 = pnand %p8986_p13, %p9247_p8 }
  0x73   : > { %p8989_p2 = pneg %p8988_p0 }
  0x75   : > { %p8994_p7 = pnand %p8992_p5, %p8989_p2 }
  0x77   : > { %8997 = shalt.err (!%p8994_p7)
}
  0x78   : > { %s8998_s13 = scalar_lea.vmem %s261_s9, 192  ;;  %p9006_p11 = scmp.lt.s32.totalorder %s261_s9, %s261_s9 }
  0x79   : > { %p8999_p9 = scmp.ne.s32.totalorder %s261_s9, %s8998_s13  ;;  %p9007_p12 = scmp.lt.s32.totalorder %s8998_s13, %s8998_s13 }
  0x7b   : > { %p9001_p4 = pnand %p8999_p9, %p9247_p8  ;;  %p9008_p1 = por %p9007_p12, %p9006_p11 }
  0x7d   : > { %p9002_p10 = pneg %p9001_p4 }
  0x7f   : > { %p9009_p3 = pnand %p9008_p1, %p9002_p10 }
  0x81   : > { %9012 = shalt.err (!%p9009_p3)
}
  0x82   : > { %6795 = dma.hbm_to_vmem [thread:$0]  (!%p9231_p6), %s14917_s5, 192, %s261_s9, [#allocation9], %s9122_s23, %s9122_s23, %s9123_s28  }
  0x83   : > { %s6505_s11 = sadd.s32 4294967294, %s9117_s27   ;;  %s9343_s19 = sadd.s32 1, %s9117_s27  }
  0x84   : > { %14918 = sst [smem:[#allocation20_spill]] %s9343_s19  ;;  %s29_s29 = ssub.s32 %s9117_s27, %s9343_s19 }
  0x85   : > { %s32_s22 = sadd.s32 1, %s9113_s26  ;;  %p30_p1 = scmp.eq.s32.totalorder %s29_s29, 0 }
  0x86   : > { %p39_p3 = scmp.ne.s32.totalorder %s9113_s26, %s9109_s25  ;;  %p40_p8 = scmp.eq.s32.totalorder %s9117_s27, 0 }
  0x87   : > { %p45_p13 = scmp.ne.s32.totalorder %s9109_s25, %s9105_s24  ;;  %p14921_p2 = scmp.eq.s32.totalorder %s9215_s30, 0 }
  0x88   : > { %s9354_s12 = scalar_select %p30_p1, %s9113_s26, %s32_s22  }
  0x89   : > { %p9356_p0 = por %p40_p8, %p39_p3  ;;  %p9362_p6 = por %p14921_p2, %p45_p13 }
  0x8a   : > { %14919 = sst [smem:[#allocation21_spill]] %s9354_s12  ;;  %p195_p5 = scmp.eq.s32.totalorder %s9215_s30, 1 }
  0x8b   : > { %p201_p7 = scmp.eq.s32.totalorder %s6505_s11, 1  ;;  %p6808_p9 = scmp.lt.s32.totalorder %s9117_s27, 2 }
  0x8c   : > { %s277_s28 = sand.u32 1, %s9113_s26   ;;  %p9369_p4 = por %p195_p5, %p39_p3 }
  0x8d   : > { %p9373_p10 = por %p201_p7, %p45_p13  ;;  %s6512_s16 = sshll.u32 %s277_s28, 6 }
  0x8e   : > { %s14923_s9 = scalar_select %p9369_p4, 1, 0 }
  0x8f   : > { %s14925_s15 = scalar_select %p9373_p10, 1, 0 }
  0x90   : > { %14924 = sst [smem:[#allocation22_spill]] %s14923_s9  ;;  %s6633_s17 = sshll.u32 %s9117_s27, 10 }
  0x91   : > { %14926 = sst [smem:[#allocation23_spill]] %s14925_s15  ;;  %s14927_s0 = sld [smem:[#allocation30_spill]] }
  0x92   : > { %s281_s10 = scalar_lea.vmem [#allocation2], %s6512_s16  ;;  %p9387_p11 = pnand %p6808_p9, %p9356_p0 }
  0x93   : > { %s289_s21 = sshll.u32 %s281_s10, 4  ;;  %s278_s29 = scalar_lea.sflag [#allocation3], %s277_s28  ;;  %s9383_s21 = int_to_ptr.vmem [resolvable:$true] %s289_s21 }
  0x94   : > { %p9015_p1 = pneg %p9387_p11 }
  0x97   : > { %s9381_s13 = scalar_lea.hbm %s14927_s0, %s6633_s17  ;;  %s9018_s18 = scalar_lea.hbm %s14927_s0, 2048 }
  0x98   : > { %s9013_s22 = scalar_lea.hbm %s9381_s13, 1024  ;;  %p9019_p13 = scmp.lt.u32.totalorder %s9381_s13, %s14927_s0 }
  0x99   : > { %p9014_p12 = scmp.ne.s32.totalorder %s9381_s13, %s9013_s22  ;;  %p9020_p0 = scmp.lt.u32.totalorder %s9018_s18, %s9013_s22 }
  0x9a   : > { %p9022_p5 = scmp.lt.u32.totalorder %s9013_s22, %s9381_s13 }
  0x9b   : > { %p9016_p3 = pnand %p9015_p1, %p9014_p12  ;;  %p9021_p2 = por %p9020_p0, %p9019_p13 }
  0x9d   : > { %p9017_p8 = pneg %p9016_p3  ;;  %p9023_p7 = por %p9022_p5, %p9021_p2 }
  0x9f   : > { %p9024_p9 = pnand %p9023_p7, %p9017_p8 }
  0xa1   : > { %9027 = shalt.err (!%p9024_p9)
}
  0xa2   : > { %s9028_s28 = scalar_lea.vmem %s9383_s21, 1024  ;;  %s9125_s10 = smov [#allocation2]  }
  0xa3   : > { %p9029_p12 = scmp.ne.s32.totalorder %s9383_s21, %s9028_s28  ;;  %s9033_s16 = sshll.u32 %s9125_s10, 4  ;;  %s9034_s16 = int_to_ptr.vmem [resolvable:$false] %s9033_s16 }
  0xa4   : > { %s9035_s17 = scalar_lea.vmem %s9034_s16, 2048  ;;  %p9036_p4 = scmp.lt.s32.totalorder %s9383_s21, %s9034_s16 }
  0xa5   : > { %p9031_p3 = pnand %p9029_p12, %p9015_p1  ;;  %p9037_p13 = scmp.lt.s32.totalorder %s9035_s17, %s9028_s28 }
  0xa7   : > { %p9032_p10 = pneg %p9031_p3  ;;  %p9038_p0 = por %p9037_p13, %p9036_p4 }
  0xa9   : > { %p9039_p2 = pnand %p9038_p0, %p9032_p10 }
  0xab   : > { %9042 = shalt.err (!%p9039_p2)
}
  0xac   : > { %6799 = dma.hbm_to_vmem [thread:$0]  (!%p9387_p11), %s9381_s13, 1024, %s9383_s21, %s278_s29  }
  0xad   : > { %p14929_p8 = scmp.ne.s32.totalorder %s14911_s8, 0 }
  0xaf   : > { %298 = sbr.rel (%p14929_p8) target bundleno = 3158 (0xc56), region = 48 }
  0xb6   : > { %s9419_s22 = sand.u32 1, %s9109_s25  }
  0xb7   : > { %s14749_s18 = sshll.u32 %s9419_s22, 6  ;;  %s301_s14 = scalar_lea.sflag [#allocation3], %s9419_s22 }
  0xb8   : > { %s9425_s20 = scalar_lea.vmem [#allocation2], %s14749_s18 }
  0xb9   : > { %9088 = dma.done.wait (%p9362_p6), %s301_s14, 1024  }
  0xba   : > { %9090 = vsyncadd (%p9362_p6), %s301_s14, 4294966272  ;;  %p14930_p4 = scmp.eq.s32.totalorder %s9215_s30, 0 }
  0xbc   : > { %9092 = dma.done.wait (%p14930_p4), [#allocation6], 384   ;;  %p14931_p10 = pmov %p14930_p4 }
  0xbd   : > { %p14932_p11 = pmov %p14930_p4 }
  0xbe   : > { %9094 = vsyncadd (%p14931_p10), [#allocation6], 4294966912 }
  0xbf   : > { %9096 = dma.done.wait (%p14932_p11), [#allocation9], 256   ;;  %p14933_p1 = pmov %p14930_p4 }
  0xc0   : > { %v9440_v0 = vld [vmem:[%s9425_s20 + $0x10] sm:$0xff]  ;;  %v9443_v1 = vld [vmem:[%s9425_s20 + $0x38] sm:$0xff]  ;;  %v9446_v2 = vld [vmem:[%s9425_s20] sm:$0xff]  ;;  %s14809_s8 = smov 11   ;;  %s14811_s23 = smov 10   ;;  %v14822_v16 = vmov 0   ;;  %v14770_v18 = vlaneseq }
  0xc1   : > { %9098 = vsyncadd (%p14933_p1), [#allocation9], 4294967040  ;;  %v9450_v3 = vpack.i.bf16 %v9440_v0, %v9443_v1  ;;  %v9453_v4 = vld [vmem:[%s9425_s20 + $0x8] sm:$0xff]  ;;  %v9464_v6 = vld [vmem:[%s9425_s20 + $0x18] sm:$0xff]  ;;  %s14807_s13 = smov 1   ;;  %s14758_s21 = smov 9   ;;  %973 = vmatprep.mubr.bf16.mxu0 %v14822_v16  ;;  %1014 = vmatprep.mubr.bf16.mxu1 %v14822_v16 }
  0xc2   : > { %v9457_v5 = vpack.i.bf16 %v9453_v4, %v9446_v2  ;;  %v9467_v7 = vld [vmem:[%s9425_s20 + $0x20] sm:$0xff]  ;;  %v9493_v9 = vpack.i.bf16 %v9464_v6, %v9446_v2  ;;  %v9499_v10 = vpack.i.bf16 %v9440_v0, %v9453_v4  ;;  %v9502_v11 = vld [vmem:[%s9425_s20 + $0x28] sm:$0xff]  ;;  %s14756_s11 = smov 127   ;;  %s14754_s29 = smov 119   ;;  %v9525_v13 = vld [vmem:[%s9425_s20 + $0x30] sm:$0xff]  ;;  %v9537_v15 = vpack.i.bf16 %v9464_v6, %v9440_v0 }
  0xc3   : > { %6890 = vrot.lane.b32.xlu1 %v9450_v3, %s14809_s8  ;;  %v9473_v8 = vpack.i.bf16 %v9467_v7, %v9464_v6  ;;  %v9510_v12 = vpack.i.bf16 %v9502_v11, %v9467_v7  ;;  %s14752_s28 = smov 118   ;;  %s14750_s10 = smov 117   ;;  %v9531_v14 = vpack.i.bf16 %v9525_v13, %v9502_v11  ;;  %v9553_v17 = vpack.i.bf16 %v9443_v1, %v9525_v13 }
  0xc4   : > { %6880 = vrot.lane.b32.xlu0 %v9457_v5, %s14809_s8  ;;  %s14777_s16 = smov 110   ;;  %s14775_s17 = smov 111   ;;  %v9620_v21 = vand.u32 127, %v14770_v18  ;;  %vm916_vm8 = vcmask 1043456   ;;  %vm912_vm9 = vcmask 588800  }
  0xc5   : > { %s14773_s14 = smov 101   ;;  %s14771_s18 = smov 109  }
  0xc6   : > { %vm711_vm0 = vcmp.lt.s32.totalorder %v9620_v21, 10  ;;  %vm686_vm1 = vcmp.lt.s32.totalorder %v9620_v21, 11  ;;  %vm736_vm2 = vcmp.lt.s32.totalorder %v9620_v21, 9  ;;  %vm761_vm3 = vcmp.lt.s32.totalorder %v9620_v21, 1  ;;  %s14935_s6 = sld [smem:[#allocation35_spill]]  ;;  %s14948_s0 = smov 91  }
  0xc7   : > { %6895 = vrot.lane.b32.xlu1 %v9450_v3, %s14811_s23  ;;  %vm786_vm4 = vcmp.lt.s32.totalorder %v9620_v21, 127  ;;  %vm14781_vm5 = vcmp.lt.s32.totalorder %v9620_v21, 119  ;;  %vm14780_vm6 = vcmp.lt.s32.totalorder %v9620_v21, 118  ;;  %vm14779_vm7 = vcmp.lt.s32.totalorder %v9620_v21, 117  ;;  %s14949_s1 = smov 89   ;;  %s14950_s2 = smov 38  }
  0xc8   : > { %6885 = vrot.lane.b32.xlu0 %v9457_v5, %s14811_s23  ;;  %vm14782_vm10 = vcmp.lt.s32.totalorder %v9620_v21, 110  ;;  %vm14790_vm11 = vcmp.lt.s32.totalorder %v9620_v21, 111  ;;  %vm14788_vm12 = vcmp.lt.s32.totalorder %v9620_v21, 101  ;;  %vm14789_vm13 = vcmp.lt.s32.totalorder %v9620_v21, 109  ;;  %s14951_s3 = smov 39   ;;  %s14952_s5 = smov 29  }
  0xc9   : > { %vm14787_vm14 = vcmp.lt.s32.totalorder %v9620_v21, 99  ;;  %vm14783_vm15 = vcmp.lt.s32.totalorder %v9620_v21, 100  ;;  %s14963_s12 = smov 27   ;;  %s14964_s26 = smov 28  }
  0xca   : > { %s14970_s25 = smov 18   ;;  %s14971_s19 = smov 19  }
  0xcb   : > { %6905 = vrot.lane.b32.xlu1 %v9473_v8, %s14811_s23  ;;  %s14994_s27 = smov 17   ;;  %s15114_s15 = smov 11  }
  0xcc   : > { %6900 = vrot.lane.b32.xlu0 %v9473_v8, %s14809_s8  ;;  %s15115_s24 = smov 1  }
  0xcf   : > { %6915 = vrot.lane.b32.xlu1 %v9457_v5, %s14807_s13 }
  0xd0   : > { %6910 = vrot.lane.b32.xlu0 %v9457_v5, %s14758_s21 }
  0xd3   : > { %6925 = vrot.lane.b32.xlu1 %v9450_v3, %s14807_s13 }
  0xd4   : > { %6920 = vrot.lane.b32.xlu0 %v9450_v3, %s14758_s21 }
  0xd7   : > { %6935 = vrot.lane.b32.xlu1 %v9473_v8, %s14807_s13 }
  0xd8   : > { %6930 = vrot.lane.b32.xlu0 %v9473_v8, %s14758_s21 }
  0xdb   : > { %6945 = vrot.lane.b32.xlu1 %v9493_v9, %s14756_s11 }
  0xdc   : > { %6940 = vrot.lane.b32.xlu0 %v9499_v10, %s14756_s11 }
  0xdf   : > { %6955 = vrot.lane.b32.xlu1 %v9499_v10, %s14754_s29 }
  0xe0   : > { %6950 = vrot.lane.b32.xlu0 %v9510_v12, %s14756_s11 }
  0xe3   : > { %6965 = vrot.lane.b32.xlu1 %v9493_v9, %s14754_s29 }
  0xe4   : > { %6960 = vrot.lane.b32.xlu0 %v9499_v10, %s14752_s28 }
  0xe7   : > { %6975 = vrot.lane.b32.xlu1 %v9510_v12, %s14754_s29 }
  0xe8   : > { %6970 = vrot.lane.b32.xlu0 %v9493_v9, %s14752_s28 }
  0xeb   : > { %6985 = vrot.lane.b32.xlu1 %v9457_v5, %s14750_s10 }
  0xec   : > { %6980 = vrot.lane.b32.xlu0 %v9510_v12, %s14752_s28 }
  0xef   : > { %6995 = vrot.lane.b32.xlu1 %v9531_v14, %s14809_s8 }
  0xf0   : > { %6990 = vrot.lane.b32.xlu0 %v9537_v15, %s14750_s10 }
  0xf3   : > { %7005 = vrot.lane.b32.xlu1 %v9510_v12, %s14750_s10 }
  0xf4   : > { %7000 = vrot.lane.b32.xlu0 %v9531_v14, %s14811_s23 }
  0xf7   : > { %7015 = vrot.lane.b32.xlu1 %v9531_v14, %s14807_s13 }
  0xf8   : > { %7010 = vrot.lane.b32.xlu0 %v9531_v14, %s14758_s21  ;;  %s14760_s21 = smov 89  }
  0xfb   : > { %7025 = vrot.lane.b32.xlu1 %v9553_v17, %s14754_s29  ;;  %s14764_s29 = smov 90  }
  0xfc   : > { %7020 = vrot.lane.b32.xlu0 %v9553_v17, %s14756_s11  ;;  %s14762_s11 = smov 91  }
  0xff   : > { %7035 = vrot.lane.b32.xlu1 %v9553_v17, %s14750_s10  ;;  %s14768_s10 = smov 99  }
 0x100   : > { %7030 = vrot.lane.b32.xlu0 %v9553_v17, %s14752_s28  ;;  %s14766_s28 = smov 100  }
 0x103   : > { %7045 = vrot.lane.b32.xlu1 %v9457_v5, %s14777_s16 }
 0x104   : > { %7040 = vrot.lane.b32.xlu0 %v9457_v5, %s14775_s17 }
 0x107   : > { %7055 = vrot.lane.b32.xlu1 %v9450_v3, %s14777_s16 }
 0x108   : > { %7050 = vrot.lane.b32.xlu0 %v9450_v3, %s14775_s17 }
 0x10b   : > { %7065 = vrot.lane.b32.xlu1 %v9473_v8, %s14777_s16 }
 0x10c   : > { %7060 = vrot.lane.b32.xlu0 %v9473_v8, %s14775_s17 }
 0x10f   : > { %7075 = vrot.lane.b32.xlu1 %v9457_v5, %s14773_s14 }
 0x110   : > { %7070 = vrot.lane.b32.xlu0 %v9457_v5, %s14771_s18 }
 0x113   : > { %7085 = vrot.lane.b32.xlu1 %v9450_v3, %s14773_s14 }
 0x114   : > { %7080 = vrot.lane.b32.xlu0 %v9450_v3, %s14771_s18 }
 0x117   : > { %7095 = vrot.lane.b32.xlu1 %v9473_v8, %s14773_s14 }
 0x118   : > { %7090 = vrot.lane.b32.xlu0 %v9473_v8, %s14771_s18 }
 0x11b   : > { %7105 = vrot.lane.b32.xlu1 %v9457_v5, %s14768_s10 }
 0x11c   : > { %7100 = vrot.lane.b32.xlu0 %v9457_v5, %s14766_s28 }
 0x11f   : > { %7115 = vrot.lane.b32.xlu1 %v9450_v3, %s14768_s10 }
 0x120   : > { %7110 = vrot.lane.b32.xlu0 %v9450_v3, %s14766_s28 }
 0x123   : > { %7125 = vrot.lane.b32.xlu1 %v9473_v8, %s14768_s10 }
 0x124   : > { %7120 = vrot.lane.b32.xlu0 %v9473_v8, %s14766_s28 }
 0x127   : > { %7135 = vrot.lane.b32.xlu1 %v9457_v5, %s14764_s29 }
 0x128   : > { %7130 = vrot.lane.b32.xlu0 %v9457_v5, %s14762_s11 }
 0x12b   : > { %7145 = vrot.lane.b32.xlu1 %v9450_v3, %s14764_s29 }
 0x12c   : > { %7140 = vrot.lane.b32.xlu0 %v9450_v3, %s14762_s11 }
 0x12f   : > { %7155 = vrot.lane.b32.xlu1 %v9473_v8, %s14764_s29 }
 0x130   : > { %7150 = vrot.lane.b32.xlu0 %v9473_v8, %s14762_s11 }
 0x133   : > { %7165 = vrot.lane.b32.xlu1 %v9450_v3, %s14760_s21 }
 0x134   : > { %7160 = vrot.lane.b32.xlu0 %v9457_v5, %s14760_s21 }
 0x135   : > { %v9617_v19 = vpop.permute.xlu1 %6890 }
 0x136   : > { %v6881_v20 = vpop.permute.xlu0 %6880  ;;  %v6892_v22 = vunpack.i.l.bf16 %v9617_v19  ;;  %v6893_v36 = vunpack.i.h.bf16 %v9617_v19 }
 0x137   : > { %7175 = vrot.lane.b32.xlu1 %v9531_v14, %s14777_s16  ;;  %v6883_v23 = vunpack.i.h.bf16 %v6881_v20  ;;  %v6882_v24 = vunpack.i.l.bf16 %v6881_v20  ;;  %s14791_s16 = smov 17  }
 0x138   : > { %7170 = vrot.lane.b32.xlu0 %v9531_v14, %s14775_s17  ;;  %s14793_s17 = smov 19  }
 0x139   : > { %v9627_v25 = vpop.permute.xlu1 %6895  ;;  %v693_v32 = vsel %vm686_vm1, %v6882_v24, %v6883_v23  ;;  %v694_v34 = vsel %vm686_vm1, %v6892_v22, %v6882_v24  ;;  %v692_v50 = vsel %vm686_vm1, %v6883_v23, %v6893_v36 }
 0x13a   : > { %v6897_v26 = vunpack.i.l.bf16 %v9627_v25  ;;  %v6886_v27 = vpop.permute.xlu0 %6885  ;;  %v6898_v30 = vunpack.i.h.bf16 %v9627_v25 }
 0x13b   : > { %v6888_v28 = vunpack.i.h.bf16 %v6886_v27  ;;  %v6887_v29 = vunpack.i.l.bf16 %v6886_v27  ;;  %7185 = vrot.lane.b32.xlu1 %v9531_v14, %s14771_s18  ;;  %s14803_s18 = smov 28  }
 0x13c   : > { %7180 = vrot.lane.b32.xlu0 %v9473_v8, %s14760_s21 }
 0x13d   : > { %v9637_v31 = vpop.permute.xlu1 %6905  ;;  %v718_v33 = vsel %vm711_vm0, %v6887_v29, %v6888_v28  ;;  %v719_v35 = vsel %vm711_vm0, %v6897_v26, %v6887_v29  ;;  %v717_v43 = vsel %vm711_vm0, %v6888_v28, %v6898_v30 }
 0x13e   : > { %v6907_v37 = vunpack.i.l.bf16 %v9637_v31  ;;  %v9653_v38 = vpop.permute.xlu0 %6900  ;;  %v871_v39 = vpack.c.bf16 %v718_v33, %v693_v32  ;;  %v870_v40 = vpack.c.bf16 %v719_v35, %v694_v34  ;;  %v872_v53 = vpack.c.bf16 %v717_v43, %v692_v50 }
 0x13f   : > { %v6902_v41 = vunpack.i.l.bf16 %v9653_v38  ;;  %7195 = vrot.lane.b32.xlu1 %v9531_v14, %s14766_s28  ;;  %s14813_s28 = smov 37  }
 0x140   : > { %7190 = vrot.lane.b32.xlu0 %v9531_v14, %s14773_s14  ;;  %941 = vmatprep.subr.bf16.mxu0 %v871_v39  ;;  %v716_v42 = vsel %vm711_vm0, %v6898_v30, %v6907_v37  ;;  %s14801_s14 = smov 18  }
 0x141   : > { %942 = vmatpush1.bf16.msra.mxu0 %v870_v40  ;;  %v6916_v44 = vpop.permute.xlu1 %6915  ;;  %v691_v45 = vsel %vm686_vm1, %v6893_v36, %v6902_v41 }
 0x142   : > { %v6918_v46 = vunpack.i.h.bf16 %v6916_v44  ;;  %v6917_v47 = vunpack.i.l.bf16 %v6916_v44  ;;  %v6911_v48 = vpop.permute.xlu0 %6910  ;;  %v873_v49 = vpack.c.bf16 %v716_v42, %v691_v45 }
 0x143   : > { %v6913_v51 = vunpack.i.h.bf16 %v6911_v48  ;;  %v6912_v52 = vunpack.i.l.bf16 %v6911_v48  ;;  %7205 = vrot.lane.b32.xlu1 %v9531_v14, %s14762_s11  ;;  %s14817_s11 = smov 39  }
 0x144   : > { %7200 = vrot.lane.b32.xlu0 %v9531_v14, %s14768_s10  ;;  %982 = vmatprep.subr.bf16.mxu1 %v873_v49  ;;  %v768_v54 = vsel %vm761_vm3, %v6917_v47, %v6918_v46  ;;  %s14805_s10 = smov 27  }
 0x145   : > { %983 = vmatpush1.bf16.msra.mxu1 %v872_v53  ;;  %v9680_v55 = vpop.permute.xlu1 %6925  ;;  %v743_v56 = vsel %vm736_vm2, %v6912_v52, %v6913_v51 }
 0x146   : > { %v6927_v57 = vunpack.i.l.bf16 %v9680_v55  ;;  %v9685_v58 = vpop.permute.xlu0 %6920  ;;  %v879_v59 = vpack.c.bf16 %v768_v54, %v743_v56  ;;  %v6928_v61 = vunpack.i.h.bf16 %v9680_v55 }
 0x147   : > { %v6922_v60 = vunpack.i.l.bf16 %v9685_v58  ;;  %7215 = vrot.lane.b32.xlu1 %v9531_v14, %s14760_s21  ;;  %v6923_v62 = vunpack.i.h.bf16 %v9685_v58  ;;  %s14819_s21 = smov 38  }
 0x148   : > { %7210 = vrot.lane.b32.xlu0 %v9531_v14, %s14764_s29  ;;  %943 = vmatprep.subr.bf16.mxu0 %v879_v59  ;;  %v769_v63 = vsel %vm761_vm3, %v6927_v57, %v6917_v47  ;;  %v767_v30 = vsel %vm761_vm3, %v6918_v46, %v6928_v61  ;;  %s14815_s29 = smov 29  }
 0x149   : > { %v9698_v3 = vpop.permute.xlu1 %6935  ;;  %v744_v8 = vsel %vm736_vm2, %v6922_v60, %v6912_v52  ;;  %v742_v29 = vsel %vm736_vm2, %v6913_v51, %v6923_v62 }
 0x14a   : > { %v6937_v20 = vunpack.i.l.bf16 %v9698_v3  ;;  %v9705_v23 = vpop.permute.xlu0 %6930  ;;  %v878_v24 = vpack.c.bf16 %v769_v63, %v744_v8  ;;  %v880_v42 = vpack.c.bf16 %v767_v30, %v742_v29 }
 0x14b   : > { %v6932_v27 = vunpack.i.l.bf16 %v9705_v23  ;;  %7225 = vrot.lane.b32.xlu1 %v9499_v10, %s14819_s21 }
 0x14c   : > { %7220 = vrot.lane.b32.xlu0 %v9499_v10, %s14817_s11  ;;  %944 = vmatpush1.bf16.msra.mxu0 %v878_v24  ;;  %v766_v28 = vsel %vm761_vm3, %v6928_v61, %v6937_v20 }
 0x14d   : > { %v9720_v32 = vpop.permute.xlu1 %6945  ;;  %v741_v33 = vsel %vm736_vm2, %v6923_v62, %v6932_v27 }
 0x14e   : > { %v6947_v34 = vunpack.i.l.bf16 %v9720_v32  ;;  %v6941_v35 = vpop.permute.xlu0 %6940  ;;  %v881_v36 = vpack.c.bf16 %v766_v28, %v741_v33  ;;  %v6948_v43 = vunpack.i.h.bf16 %v9720_v32 }
 0x14f   : > { %v6943_v39 = vunpack.i.h.bf16 %v6941_v35  ;;  %v6942_v40 = vunpack.i.l.bf16 %v6941_v35  ;;  %7235 = vrot.lane.b32.xlu1 %v9493_v9, %s14819_s21 }
 0x150   : > { %7230 = vrot.lane.b32.xlu0 %v9493_v9, %s14817_s11  ;;  %984 = vmatprep.subr.bf16.mxu1 %v881_v36 }
 0x151   : > { %985 = vmatpush1.bf16.msra.mxu1 %v880_v42  ;;  %v9733_v44 = vpop.permute.xlu1 %6955  ;;  %v792_v45 = vsel %vm786_vm4, %v6942_v40, %v6943_v39  ;;  %v793_v46 = vsel %vm786_vm4, %v6947_v34, %v6942_v40  ;;  %v791_v53 = vsel %vm786_vm4, %v6943_v39, %v6948_v43 }
 0x152   : > { %v9741_v47 = vpop.permute.xlu0 %6950  ;;  %v887_v48 = vpack.c.bf16 %v792_v45, %v9453_v4  ;;  %v886_v49 = vpack.c.bf16 %v793_v46, %v9446_v2  ;;  %v6958_v50 = vunpack.i.h.bf16 %v9733_v44  ;;  %v6957_v51 = vunpack.i.l.bf16 %v9733_v44 }
 0x153   : > { %v6952_v52 = vunpack.i.l.bf16 %v9741_v47  ;;  %7245 = vrot.lane.b32.xlu1 %v9510_v12, %s14819_s21  ;;  %v888_v62 = vpack.c.bf16 %v791_v53, %v9440_v0  ;;  %v6908_v46 = vunpack.i.h.bf16 %v9637_v31 }
 0x154   : > { %7240 = vrot.lane.b32.xlu0 %v9510_v12, %s14817_s11  ;;  %945 = vmatprep.subr.bf16.mxu0 %v887_v48  ;;  %v817_v63 = vsel %vm14781_vm5, %v6957_v51, %v6958_v50 }
 0x155   : > { %946 = vmatpush1.bf16.msra.mxu0 %v886_v49  ;;  %v9755_v2 = vpop.permute.xlu1 %6965  ;;  %v790_v4 = vsel %vm786_vm4, %v6948_v43, %v6952_v52  ;;  %v6903_v49 = vunpack.i.h.bf16 %v9653_v38  ;;  %v715_v18 = vsel %vm711_vm0, %v6907_v37, %v6908_v46 }
 0x156   : > { %v6961_v54 = vpop.permute.xlu0 %6960  ;;  %v889_v56 = vpack.c.bf16 %v790_v4, %v9464_v6  ;;  %v6967_v6 = vunpack.i.l.bf16 %v9755_v2  ;;  %v6968_v40 = vunpack.i.h.bf16 %v9755_v2 }
 0x157   : > { %v6963_v59 = vunpack.i.h.bf16 %v6961_v54  ;;  %v6962_v61 = vunpack.i.l.bf16 %v6961_v54  ;;  %7255 = vrot.lane.b32.xlu1 %v9499_v10, %s14815_s29  ;;  %v6933_v54 = vunpack.i.h.bf16 %v9705_v23 }
 0x158   : > { %7250 = vrot.lane.b32.xlu0 %v9499_v10, %s14813_s28  ;;  %986 = vmatprep.subr.bf16.mxu1 %v889_v56  ;;  %v818_v36 = vsel %vm14781_vm5, %v6967_v6, %v6957_v51  ;;  %v6938_v51 = vunpack.i.h.bf16 %v9698_v3 }
 0x159   : > { %987 = vmatpush1.bf16.msra.mxu1 %v888_v62  ;;  %v9771_v8 = vpop.permute.xlu1 %6975  ;;  %v842_v24 = vsel %vm14780_vm6, %v6962_v61, %v6963_v59  ;;  %v9853_v31 = vsel %vm736_vm2, %v6932_v27, %v6933_v54 }
 0x15a   : > { %v9775_v28 = vpop.permute.xlu0 %6970  ;;  %v895_v29 = vpack.c.bf16 %v842_v24, %v817_v63  ;;  %v6977_v33 = vunpack.i.l.bf16 %v9771_v8  ;;  %v816_v24 = vsel %vm14781_vm5, %v6958_v50, %v6968_v40  ;;  %v9843_v50 = vsel %vm761_vm3, %v6937_v20, %v6938_v51 }
 0x15b   : > { %v6972_v0 = vunpack.i.l.bf16 %v9775_v28  ;;  %7265 = vrot.lane.b32.xlu1 %v9493_v9, %s14815_s29  ;;  %v6973_v30 = vunpack.i.h.bf16 %v9775_v28 }
 0x15c   : > { %7260 = vrot.lane.b32.xlu0 %v9493_v9, %s14813_s28  ;;  %947 = vmatprep.subr.bf16.mxu0 %v895_v29 }
 0x15d   : > { %v9785_v35 = vpop.permute.xlu1 %6985  ;;  %v843_v39 = vsel %vm14780_vm6, %v6972_v0, %v6962_v61  ;;  %v841_v53 = vsel %vm14780_vm6, %v6963_v59, %v6973_v30  ;;  %v815_v61 = vsel %vm14781_vm5, %v6968_v40, %v6977_v33 }
 0x15e   : > { %v6988_v42 = vunpack.i.h.bf16 %v9785_v35  ;;  %v6987_v43 = vunpack.i.l.bf16 %v9785_v35  ;;  %v9798_v44 = vpop.permute.xlu0 %6980  ;;  %v894_v45 = vpack.c.bf16 %v843_v39, %v818_v36 }
 0x15f   : > { %v6982_v48 = vunpack.i.l.bf16 %v9798_v44  ;;  %7275 = vrot.lane.b32.xlu1 %v9510_v12, %s14815_s29 }
 0x160   : > { %7270 = vrot.lane.b32.xlu0 %v9510_v12, %s14813_s28  ;;  %948 = vmatpush1.bf16.msra.mxu0 %v894_v45  ;;  %v868_v4 = vsel %vm14779_vm7, %v6987_v43, %v6988_v42  ;;  %v896_v45 = vpack.c.bf16 %v841_v53, %v816_v24 }
 0x161   : > { %v9815_v56 = vpop.permute.xlu1 %6995  ;;  %v840_v62 = vsel %vm14780_vm6, %v6973_v30, %v6982_v48  ;;  %v902_v29 = vpack.c.bf16 %v868_v4, %v868_v4  ;;  %v690_v30 = vsel %vm686_vm1, %v6902_v41, %v6903_v49 }
 0x162   : > { %v6991_v59 = vpop.permute.xlu0 %6990  ;;  %v897_v63 = vpack.c.bf16 %v840_v62, %v815_v61  ;;  %v6997_v37 = vunpack.i.l.bf16 %v9815_v56  ;;  %v6998_v27 = vunpack.i.h.bf16 %v9815_v56  ;;  %v882_v56 = vpack.c.bf16 %v9843_v50, %v9853_v31  ;;  %v9885_v31 = vld [vmem:[#allocation5 + $0x4] sm:$0xf] }
 0x163   : > { %v6993_v36 = vunpack.i.h.bf16 %v6991_v59  ;;  %v6992_v39 = vunpack.i.l.bf16 %v6991_v59  ;;  %7285 = vrot.lane.b32.xlu1 %v9499_v10, %s14805_s10  ;;  %v918_v61 = vsel %vm916_vm8, %v902_v29, 0 }
 0x164   : > { %7280 = vrot.lane.b32.xlu0 %v9499_v10, %s14803_s18  ;;  %988 = vmatprep.subr.bf16.mxu1 %v897_v63  ;;  %v874_v63 = vpack.c.bf16 %v715_v18, %v690_v30  ;;  %v689_v18 = vsel %vm686_vm1, %v6903_v49, %v6997_v37  ;;  %v687_v25 = vsel %vm686_vm1, %v6998_v27, %v6892_v22 }
 0x165   : > { %989 = vmatpush1.bf16.msra.mxu1 %v896_v45  ;;  %v9856_v38 = vpop.permute.xlu1 %7005  ;;  %v867_v41 = vsel %vm14779_vm7, %v6988_v42, %v6992_v39  ;;  %v866_v20 = vsel %vm14779_vm7, %v6992_v39, %v6993_v36  ;;  %v688_v19 = vsel %vm686_vm1, %v6997_v37, %v6998_v27 }
 0x166   : > { %v7007_v40 = vunpack.i.l.bf16 %v9856_v38  ;;  %v7001_v53 = vpop.permute.xlu0 %7000  ;;  %v903_v4 = vpack.c.bf16 %v867_v41, %v867_v41  ;;  %v904_v24 = vpack.c.bf16 %v866_v20, %v866_v20 }
 0x167   : > { %v7003_v62 = vunpack.i.h.bf16 %v7001_v53  ;;  %v7002_v59 = vunpack.i.l.bf16 %v7001_v53  ;;  %7295 = vrot.lane.b32.xlu1 %v9493_v9, %s14805_s10 }
 0x168   : > { %7290 = vrot.lane.b32.xlu0 %v9493_v9, %s14803_s18  ;;  %6522 = vmatprep.subr.msk.bf16.mxu0 %vm916_vm8, %v903_v4  ;;  %v865_v42 = vsel %vm14779_vm7, %v6993_v36, %v7007_v40  ;;  %v6953_v36 = vunpack.i.h.bf16 %v9741_v47  ;;  %v6978_v4 = vunpack.i.h.bf16 %v9771_v8 }
 0x169   : > { %950 = vmatpush1.bf16.msra.mxu0 %v918_v61  ;;  %v7016_v29 = vpop.permute.xlu1 %7015  ;;  %v905_v39 = vpack.c.bf16 %v865_v42, %v865_v42  ;;  %v714_v45 = vsel %vm711_vm0, %v6908_v46, %v7002_v59  ;;  %v712_v30 = vsel %vm711_vm0, %v7003_v62, %v6897_v26  ;;  %v6983_v26 = vunpack.i.h.bf16 %v9798_v44 }
 0x16a   : > { %v7018_v41 = vunpack.i.h.bf16 %v7016_v29  ;;  %v7017_v20 = vunpack.i.l.bf16 %v7016_v29  ;;  %v7011_v53 = vpop.permute.xlu0 %7010  ;;  %v875_v50 = vpack.c.bf16 %v714_v45, %v689_v18  ;;  %v924_v46 = vsel %vm916_vm8, %v904_v24, 0 }
 0x16b   : > { %v7013_v61 = vunpack.i.h.bf16 %v7011_v53  ;;  %v7012_v49 = vunpack.i.l.bf16 %v7011_v53  ;;  %1429 = vrot.lane.b32.xlu1 %v9467_v7, %s14805_s10  ;;  %6524 = vmatprep.subr.msk.bf16.mxu1 %vm916_vm8, %v905_v39  ;;  %v877_v42 = vpack.c.bf16 %v712_v30, %v687_v25  ;;  %v713_v22 = vsel %vm711_vm0, %v7002_v59, %v7003_v62 }
 0x16c   : > { %7300 = vrot.lane.b32.xlu0 %v9510_v12, %s14803_s18  ;;  %1023 = vmatprep.subr.bf16.mxu0 %v875_v50  ;;  %v764_v29 = vsel %vm761_vm3, %v6938_v51, %v7017_v20  ;;  %v762_v27 = vsel %vm761_vm3, %v7018_v41, %v6927_v57  ;;  %v789_v23 = vsel %vm786_vm4, %v6952_v52, %v6953_v36 }
 0x16d   : > { %6523 = vmatmul.mubr.msk.bf16.vlgmr.msra.gmra.mrb[0].mxu0 %vm912_vm9, %v9885_v31  ;;  %991 = vmatpush1.bf16.msra.mxu1 %v924_v46  ;;  %v9909_v12 = vpop.permute.xlu1 %7025  ;;  %v739_v3 = vsel %vm736_vm2, %v6933_v54, %v7012_v49  ;;  %v737_v37 = vsel %vm736_vm2, %v7013_v61, %v6922_v60  ;;  %v7008_v54 = vunpack.i.h.bf16 %v9856_v38  ;;  %v814_v55 = vsel %vm14781_vm5, %v6977_v33, %v6978_v4 }
 0x16e   : > { %1024 = vmatpush1.bf16.msra.mxu0 %v874_v63  ;;  %v7021_v24 = vpop.permute.xlu0 %7020  ;;  %1064 = vmatprep.subr.bf16.mxu1 %v877_v42  ;;  %v883_v51 = vpack.c.bf16 %v764_v29, %v739_v3  ;;  %v839_v57 = vsel %vm14780_vm6, %v6982_v48, %v6983_v26  ;;  %v7027_v58 = vunpack.i.l.bf16 %v9909_v12  ;;  %v876_v60 = vpack.c.bf16 %v713_v22, %v688_v19 }
 0x16f   : > { %v7023_v62 = vunpack.i.h.bf16 %v7021_v24  ;;  %v7022_v59 = vunpack.i.l.bf16 %v7021_v24  ;;  %7310 = vrot.lane.b32.xlu1 %v9499_v10, %s14801_s14  ;;  %1055 = vmatprep.mubr.bf16.mxu0 %v14822_v16  ;;  %v763_v47 = vsel %vm761_vm3, %v7017_v20, %v7018_v41  ;;  %v738_v52 = vsel %vm736_vm2, %v7012_v49, %v7013_v61 }
 0x170   : > { %7305 = vrot.lane.b32.xlu0 %v9499_v10, %s14793_s17  ;;  %1025 = vmatprep.subr.bf16.mxu0 %v883_v51  ;;  %v885_v63 = vpack.c.bf16 %v762_v27, %v737_v37  ;;  %v890_v45 = vpack.c.bf16 %v789_v23, %v9467_v7  ;;  %v813_v53 = vsel %vm14781_vm5, %v6978_v4, %v7027_v58 }
 0x171   : > { %6525 = vmatmul.mubr.msk.bf16.vlgmr.msra.gmra.mrb[0].mxu1 %vm912_vm9, %v9885_v31  ;;  %v7036_v33 = vpop.permute.xlu1 %7035  ;;  %v788_v48 = vsel %vm786_vm4, %v6953_v36, %v7022_v59  ;;  %v794_v30 = vsel %vm786_vm4, %v7023_v62, %v6947_v34  ;;  %v898_v36 = vpack.c.bf16 %v839_v57, %v814_v55  ;;  %v787_v32 = vsel %vm786_vm4, %v7022_v59, %v7023_v62 }
 0x172   : > { %1026 = vmatpush1.bf16.msra.mxu0 %v882_v56  ;;  %1065 = vmatpush1.bf16.msra.mxu1 %v876_v60  ;;  %v7037_v39 = vunpack.i.l.bf16 %v7036_v33  ;;  %v7031_v10 = vpop.permute.xlu0 %7030  ;;  %v891_v18 = vpack.c.bf16 %v788_v48, %v9502_v11  ;;  %v864_v56 = vsel %vm14779_vm7, %v7007_v40, %v7008_v54  ;;  %v7028_v11 = vunpack.i.h.bf16 %v9909_v12 }
 0x173   : > { %v7033_v41 = vunpack.i.h.bf16 %v7031_v10  ;;  %v7032_v20 = vunpack.i.l.bf16 %v7031_v10  ;;  %1066 = vmatprep.subr.bf16.mxu1 %v885_v63  ;;  %7320 = vrot.lane.b32.xlu1 %v9493_v9, %s14801_s14  ;;  %v884_v34 = vpack.c.bf16 %v763_v47, %v738_v52  ;;  %v7038_v50 = vunpack.i.h.bf16 %v7036_v33 }
 0x174   : > { %7315 = vrot.lane.b32.xlu0 %v9493_v9, %s14793_s17  ;;  %1027 = vmatprep.subr.bf16.mxu0 %v891_v18  ;;  %v893_v40 = vpack.c.bf16 %v794_v30, %v9443_v1  ;;  %v863_v9 = vsel %vm14779_vm7, %v7008_v54, %v7037_v39  ;;  %v812_v44 = vsel %vm14781_vm5, %v7027_v58, %v7028_v11 }
 0x175   : > { %v9977_v38 = vpop.permute.xlu1 %7045  ;;  %v838_v61 = vsel %vm14780_vm6, %v6983_v26, %v7032_v20  ;;  %1096 = vmatprep.mubr.bf16.mxu1 %v14822_v16  ;;  %v844_v1 = vsel %vm14780_vm6, %v7033_v41, %v6972_v0  ;;  %v906_v42 = vpack.c.bf16 %v864_v56, %v864_v56  ;;  %v837_v29 = vsel %vm14780_vm6, %v7032_v20, %v7033_v41  ;;  %v10067_v56 = vld [vmem:[%s9425_s20 + $0x38] sm:$0xff] }
 0x176   : > { %1028 = vmatpush1.bf16.msra.mxu0 %v890_v45  ;;  %1067 = vmatpush1.bf16.msra.mxu1 %v884_v34  ;;  %v7048_v8 = vunpack.i.h.bf16 %v9977_v38  ;;  %v7047_v4 = vunpack.i.l.bf16 %v9977_v38  ;;  %v7041_v49 = vpop.permute.xlu0 %7040  ;;  %v899_v25 = vpack.c.bf16 %v838_v61, %v813_v53  ;;  %v892_v28 = vpack.c.bf16 %v787_v32, %v9525_v13  ;;  %v8890_v32 = vld [vmem:[%s9425_s20 + $0x20] sm:$0xff] }
 0x177   : > { %v7043_v26 = vunpack.i.h.bf16 %v7041_v49  ;;  %v7042_v46 = vunpack.i.l.bf16 %v7041_v49  ;;  %1068 = vmatprep.subr.bf16.mxu1 %v893_v40  ;;  %1479 = vrot.lane.b32.xlu1 %v9467_v7, %s14801_s14  ;;  %v819_v0 = vsel %vm14781_vm5, %v7028_v11, %v6967_v6  ;;  %v907_v22 = vpack.c.bf16 %v863_v9, %v863_v9 }
 0x178   : > { %1454 = vrot.lane.b32.xlu0 %v9467_v7, %s14793_s17  ;;  %1029 = vmatprep.subr.bf16.mxu0 %v899_v25  ;;  %v901_v12 = vpack.c.bf16 %v844_v1, %v819_v0  ;;  %v869_v3 = vsel %vm14779_vm7, %v7038_v50, %v6987_v43  ;;  %v862_v7 = vsel %vm14779_vm7, %v7037_v39, %v7038_v50  ;;  %v930_v27 = vsel %vm916_vm8, %v906_v42, 0  ;;  %v8891_v42 = vld [vmem:[%s9425_s20 + $0x28] sm:$0xff] }
 0x179   : > { %v10006_v19 = vpop.permute.xlu1 %7055  ;;  %v427_v6 = vsel %vm14790_vm11, %v7042_v46, %v7043_v26  ;;  %v452_v51 = vsel %vm14782_vm10, %v7047_v4, %v7048_v8  ;;  %v900_v43 = vpack.c.bf16 %v837_v29, %v812_v44  ;;  %v909_v23 = vpack.c.bf16 %v869_v3, %v869_v3 }
 0x17a   : > { %1030 = vmatpush1.bf16.msra.mxu0 %v898_v36  ;;  %1069 = vmatpush1.bf16.msra.mxu1 %v892_v28  ;;  %v7057_v24 = vunpack.i.l.bf16 %v10006_v19  ;;  %v10015_v2 = vpop.permute.xlu0 %7050  ;;  %v908_v54 = vpack.c.bf16 %v862_v7, %v862_v7  ;;  %v7058_v62 = vunpack.i.h.bf16 %v10006_v19  ;;  %v630_v58 = vpack.c.bf16 %v452_v51, %v427_v6 }
 0x17b   : > { %v7052_v35 = vunpack.i.l.bf16 %v10015_v2  ;;  %6526 = vmatprep.subr.msk.bf16.mxu0 %vm916_vm8, %v907_v22  ;;  %1070 = vmatprep.subr.bf16.mxu1 %v901_v12  ;;  %v7053_v59 = vunpack.i.h.bf16 %v10015_v2  ;;  %v7354_v11 = vpack.i.bf16 %v10067_v56, %v9525_v13  ;;  %v7369_v29 = vpack.i.bf16 %v9525_v13, %v8891_v42 }
 0x17c   : > { %v453_v37 = vsel %vm14782_vm10, %v7057_v24, %v7047_v4  ;;  %7330 = vrot.lane.b32.xlu1 %v9537_v15, %s14791_s16  ;;  %7325 = vrot.lane.b32.xlu0 %v9457_v5, %s14791_s16  ;;  %v451_v33 = vsel %vm14782_vm10, %v7048_v8, %v7058_v62  ;;  %v936_v48 = vsel %vm916_vm8, %v908_v54, 0  ;;  %vm14785_vm7 = vcmp.lt.s32.totalorder %v9620_v21, 90 }
 0x17d   : > { %v428_v55 = vsel %vm14790_vm11, %v7052_v35, %v7042_v46  ;;  %v10038_v57 = vpop.permute.xlu1 %7065  ;;  %v426_v63 = vsel %vm14790_vm11, %v7043_v26, %v7053_v59  ;;  %vm14786_vm6 = vcmp.lt.s32.totalorder %v9620_v21, 91  ;;  %vm14784_vm5 = vcmp.lt.s32.totalorder %v9620_v21, 89 }
 0x17e   : > { %1032 = vmatpush1.bf16.msra.mxu0 %v930_v27  ;;  %1071 = vmatpush1.bf16.msra.mxu1 %v900_v43  ;;  %v7067_v5 = vunpack.i.l.bf16 %v10038_v57  ;;  %v10041_v15 = vpop.permute.xlu0 %7060  ;;  %v629_v60 = vpack.c.bf16 %v453_v37, %v428_v55  ;;  %v631_v34 = vpack.c.bf16 %v451_v33, %v426_v63  ;;  %v8892_v63 = vld [vmem:[%s9425_s20 + $0x30] sm:$0xff] }
 0x17f   : > { %v7062_v47 = vunpack.i.l.bf16 %v10041_v15  ;;  %6528 = vmatprep.subr.msk.bf16.mxu1 %vm916_vm8, %v909_v23  ;;  %1132 = vmatprep.subr.bf16.mxu0 %v630_v58 }
 0x180   : > { %7340 = vrot.lane.b32.xlu1 %v9553_v17, %s14819_s21  ;;  %7335 = vrot.lane.b32.xlu0 %v9553_v17, %s14817_s11  ;;  %v450_v52 = vsel %vm14782_vm10, %v7058_v62, %v7067_v5  ;;  %s14946_s11 = smov 100   ;;  %s14947_s21 = smov 90  }
 0x181   : > { %6527 = vmatmul.mubr.msk.bf16.vlgmr.msra.gmra.mrb[4].mxu0 %vm912_vm9, %v9885_v31  ;;  %v7076_v39 = vpop.permute.xlu1 %7075  ;;  %v425_v10 = vsel %vm14790_vm11, %v7053_v59, %v7062_v47 }
 0x182   : > { %1073 = vmatpush1.bf16.msra.mxu1 %v936_v48  ;;  %1133 = vmatpush1.bf16.msra.mxu0 %v629_v60  ;;  %v7078_v18 = vunpack.i.h.bf16 %v7076_v39  ;;  %v7077_v45 = vunpack.i.l.bf16 %v7076_v39  ;;  %v7071_v30 = vpop.permute.xlu0 %7070  ;;  %v632_v41 = vpack.c.bf16 %v450_v52, %v425_v10  ;;  %v7374_v48 = vpack.i.bf16 %v8892_v63, %v8891_v42 }
 0x183   : > { %v7073_v20 = vunpack.i.h.bf16 %v7071_v30  ;;  %v7072_v36 = vunpack.i.l.bf16 %v7071_v30  ;;  %1164 = vmatprep.mubr.bf16.mxu0 %v14822_v16  ;;  %v7063_v63 = vunpack.i.h.bf16 %v10041_v15 }
 0x184   : > { %7345 = vrot.lane.b32.xlu1 %v9553_v17, %s14813_s28  ;;  %1504 = vrot.lane.b32.xlu0 %v8890_v32, %s14791_s16  ;;  %v502_v53 = vsel %vm14788_vm12, %v7077_v45, %v7078_v18  ;;  %s14944_s28 = smov 109  }
 0x185   : > { %1173 = vmatprep.subr.bf16.mxu1 %v632_v41  ;;  %6529 = vmatmul.mubr.msk.bf16.vlgmr.msra.gmra.mrb[4].mxu1 %vm912_vm9, %v9885_v31  ;;  %v10080_v50 = vpop.permute.xlu1 %7085  ;;  %v477_v38 = vsel %vm14789_vm13, %v7072_v36, %v7073_v20 }
 0x186   : > { %1174 = vmatpush1.bf16.msra.mxu1 %v631_v34  ;;  %v7087_v40 = vunpack.i.l.bf16 %v10080_v50  ;;  %v10085_v17 = vpop.permute.xlu0 %7080  ;;  %v638_v61 = vpack.c.bf16 %v502_v53, %v477_v38  ;;  %1205 = vmatprep.mubr.bf16.mxu1 %v14822_v16  ;;  %v7088_v8 = vunpack.i.h.bf16 %v10080_v50 }
 0x187   : > { %v7082_v9 = vunpack.i.l.bf16 %v10085_v17  ;;  %v7083_v4 = vunpack.i.h.bf16 %v10085_v17 }
 0x188   : > { %v503_v31 = vsel %vm14788_vm12, %v7087_v40, %v7077_v45  ;;  %7355 = vrot.lane.b32.xlu1 %v7354_v11, %s14803_s18  ;;  %7350 = vrot.lane.b32.xlu0 %v7354_v11, %s14815_s29  ;;  %v501_v0 = vsel %vm14788_vm12, %v7078_v18, %v7088_v8  ;;  %s14939_s18 = smov 118   ;;  %s14945_s29 = smov 99  }
 0x189   : > { %v478_v49 = vsel %vm14789_vm13, %v7082_v9, %v7072_v36  ;;  %1134 = vmatprep.subr.bf16.mxu0 %v638_v61  ;;  %v10101_v25 = vpop.permute.xlu1 %7095  ;;  %v476_v22 = vsel %vm14789_vm13, %v7073_v20, %v7083_v4 }
 0x18a   : > { %v7097_v1 = vunpack.i.l.bf16 %v10101_v25  ;;  %v10104_v44 = vpop.permute.xlu0 %7090  ;;  %v637_v26 = vpack.c.bf16 %v503_v31, %v478_v49  ;;  %v639_v37 = vpack.c.bf16 %v501_v0, %v476_v22 }
 0x18b   : > { %v7092_v46 = vunpack.i.l.bf16 %v10104_v44 }
 0x18c   : > { %1435 = vrot.lane.b32.xlu1 %v10067_v56, %s14805_s10  ;;  %7360 = vrot.lane.b32.xlu0 %v9531_v14, %s14805_s10  ;;  %v500_v28 = vsel %vm14788_vm12, %v7088_v8, %v7097_v1  ;;  %s14940_s10 = smov 117  }
 0x18d   : > { %1135 = vmatpush1.bf16.msra.mxu0 %v637_v26  ;;  %v7106_v12 = vpop.permute.xlu1 %7105  ;;  %v475_v14 = vsel %vm14789_vm13, %v7083_v4, %v7092_v46 }
 0x18e   : > { %v7108_v13 = vunpack.i.h.bf16 %v7106_v12  ;;  %v7107_v3 = vunpack.i.l.bf16 %v7106_v12  ;;  %v7101_v7 = vpop.permute.xlu0 %7100  ;;  %v640_v6 = vpack.c.bf16 %v500_v28, %v475_v14 }
 0x18f   : > { %v7103_v51 = vunpack.i.h.bf16 %v7101_v7  ;;  %v7102_v43 = vunpack.i.l.bf16 %v7101_v7 }
 0x190   : > { %7370 = vrot.lane.b32.xlu1 %v7369_v29, %s14801_s14  ;;  %7365 = vrot.lane.b32.xlu0 %v7369_v29, %s14793_s17  ;;  %v552_v27 = vsel %vm14787_vm14, %v7107_v3, %v7108_v13 }
 0x191   : > { %1175 = vmatprep.subr.bf16.mxu1 %v640_v6  ;;  %v10131_v23 = vpop.permute.xlu1 %7115  ;;  %v527_v54 = vsel %vm14783_vm15, %v7102_v43, %v7103_v51 }
 0x192   : > { %1176 = vmatpush1.bf16.msra.mxu1 %v639_v37  ;;  %v7117_v62 = vunpack.i.l.bf16 %v10131_v23  ;;  %v10136_v59 = vpop.permute.xlu0 %7110  ;;  %v646_v55 = vpack.c.bf16 %v552_v27, %v527_v54  ;;  %v7118_v60 = vunpack.i.h.bf16 %v10131_v23 }
 0x193   : > { %v7112_v58 = vunpack.i.l.bf16 %v10136_v59  ;;  %v7113_v33 = vunpack.i.h.bf16 %v10136_v59 }
 0x194   : > { %v553_v52 = vsel %vm14787_vm14, %v7117_v62, %v7107_v3  ;;  %1485 = vrot.lane.b32.xlu1 %v10067_v56, %s14801_s14  ;;  %1460 = vrot.lane.b32.xlu0 %v10067_v56, %s14793_s17  ;;  %v551_v20 = vsel %vm14787_vm14, %v7108_v13, %v7118_v60  ;;  %s14937_s17 = smov 127   ;;  %s14938_s14 = smov 119  }
 0x195   : > { %v528_v39 = vsel %vm14783_vm15, %v7112_v58, %v7102_v43  ;;  %1136 = vmatprep.subr.bf16.mxu0 %v646_v55  ;;  %v10154_v10 = vpop.permute.xlu1 %7125  ;;  %v526_v36 = vsel %vm14783_vm15, %v7103_v51, %v7113_v33 }
 0x196   : > { %v7127_v18 = vunpack.i.l.bf16 %v10154_v10  ;;  %v10157_v45 = vpop.permute.xlu0 %7120  ;;  %v645_v30 = vpack.c.bf16 %v553_v52, %v528_v39  ;;  %v647_v4 = vpack.c.bf16 %v551_v20, %v526_v36  ;;  %v7093_v36 = vunpack.i.h.bf16 %v10104_v44 }
 0x197   : > { %v7122_v41 = vunpack.i.l.bf16 %v10157_v45  ;;  %v7128_v15 = vunpack.i.h.bf16 %v10154_v10 }
 0x198   : > { %1510 = vrot.lane.b32.xlu1 %v10067_v56, %s14791_s16  ;;  %7375 = vrot.lane.b32.xlu0 %v7374_v48, %s14791_s16  ;;  %v550_v11 = vsel %vm14787_vm14, %v7118_v60, %v7127_v18  ;;  %v7068_v60 = vunpack.i.h.bf16 %v10038_v57  ;;  %v7098_v48 = vunpack.i.h.bf16 %v10101_v25  ;;  %v10252_v57 = vsel %vm14789_vm13, %v7092_v46, %v7093_v36  ;;  %s14936_s16 = smov 9  }
 0x199   : > { %1137 = vmatpush1.bf16.msra.mxu0 %v645_v30  ;;  %v7136_v32 = vpop.permute.xlu1 %7135  ;;  %v525_v34 = vsel %vm14783_vm15, %v7113_v33, %v7122_v41 }
 0x19a   : > { %v7138_v53 = vunpack.i.h.bf16 %v7136_v32  ;;  %v7137_v38 = vunpack.i.l.bf16 %v7136_v32  ;;  %v7131_v61 = vpop.permute.xlu0 %7130  ;;  %v648_v56 = vpack.c.bf16 %v550_v11, %v525_v34 }
 0x19b   : > { %v7133_v31 = vunpack.i.h.bf16 %v7131_v61  ;;  %v7132_v8 = vunpack.i.l.bf16 %v7131_v61 }
 0x19c   : > { %1177 = vmatprep.subr.bf16.mxu1 %v648_v56  ;;  %v602_v49 = vsel %vm14785_vm7, %v7137_v38, %v7138_v53 }
 0x19d   : > { %1178 = vmatpush1.bf16.msra.mxu1 %v647_v4  ;;  %v10179_v26 = vpop.permute.xlu1 %7145  ;;  %v577_v42 = vsel %vm14786_vm6, %v7132_v8, %v7133_v31 }
 0x19e   : > { %v7147_v29 = vunpack.i.l.bf16 %v10179_v26  ;;  %v10184_v28 = vpop.permute.xlu0 %7140  ;;  %v654_v0 = vpack.c.bf16 %v602_v49, %v577_v42  ;;  %v7148_v12 = vunpack.i.h.bf16 %v10179_v26 }
 0x19f   : > { %v7142_v22 = vunpack.i.l.bf16 %v10184_v28  ;;  %v7143_v13 = vunpack.i.h.bf16 %v10184_v28 }
 0x1a0   : > { %v603_v14 = vsel %vm14785_vm7, %v7147_v29, %v7137_v38  ;;  %1138 = vmatprep.subr.bf16.mxu0 %v654_v0  ;;  %v601_v27 = vsel %vm14785_vm7, %v7138_v53, %v7148_v12  ;;  %v424_v0 = vsel %vm14790_vm11, %v7062_v47, %v7063_v63  ;;  %v7123_v47 = vunpack.i.h.bf16 %v10157_v45 }
 0x1a1   : > { %v578_v3 = vsel %vm14786_vm6, %v7142_v22, %v7132_v8  ;;  %v10197_v7 = vpop.permute.xlu1 %7155  ;;  %v576_v54 = vsel %vm14786_vm6, %v7133_v31, %v7143_v13  ;;  %v449_v31 = vsel %vm14782_vm10, %v7067_v5, %v7068_v60 }
 0x1a2   : > { %v7157_v6 = vunpack.i.l.bf16 %v10197_v7  ;;  %v10200_v51 = vpop.permute.xlu0 %7150  ;;  %v653_v43 = vpack.c.bf16 %v603_v14, %v578_v3  ;;  %v655_v34 = vpack.c.bf16 %v601_v27, %v576_v54  ;;  %v10262_v27 = vld [vmem:[#allocation5] sm:$0xf] }
 0x1a3   : > { %v7152_v37 = vunpack.i.l.bf16 %v10200_v51 }
 0x1a4   : > { %1139 = vmatpush1.bf16.msra.mxu0 %v653_v43  ;;  %v600_v55 = vsel %vm14785_vm7, %v7148_v12, %v7157_v6  ;;  %v10244_v12 = vsel %vm14788_vm12, %v7097_v1, %v7098_v48 }
 0x1a5   : > { %v10212_v52 = vpop.permute.xlu1 %7165  ;;  %v575_v33 = vsel %vm14786_vm6, %v7143_v13, %v7152_v37 }
 0x1a6   : > { %v7167_v39 = vunpack.i.l.bf16 %v10212_v52  ;;  %v7161_v30 = vpop.permute.xlu0 %7160  ;;  %v656_v20 = vpack.c.bf16 %v600_v55, %v575_v33  ;;  %v7168_v53 = vunpack.i.h.bf16 %v10212_v52  ;;  %v7158_v55 = vunpack.i.h.bf16 %v10197_v7 }
 0x1a7   : > { %v7163_v11 = vunpack.i.h.bf16 %v7161_v30  ;;  %v7162_v32 = vunpack.i.l.bf16 %v7161_v30  ;;  %v7153_v33 = vunpack.i.h.bf16 %v10200_v51 }
 0x1a8   : > { %1179 = vmatprep.subr.bf16.mxu1 %v656_v20 }
 0x1a9   : > { %1180 = vmatpush1.bf16.msra.mxu1 %v655_v34  ;;  %v7176_v38 = vpop.permute.xlu1 %7175  ;;  %v627_v61 = vsel %vm14784_vm5, %v7162_v32, %v7163_v11  ;;  %v628_v56 = vsel %vm14784_vm5, %v7167_v39, %v7162_v32  ;;  %v626_v54 = vsel %vm14784_vm5, %v7163_v11, %v7168_v53  ;;  %v633_v32 = vpack.c.bf16 %v449_v31, %v424_v0 }
 0x1aa   : > { %v7177_v8 = vunpack.i.l.bf16 %v7176_v38  ;;  %v7171_v4 = vpop.permute.xlu0 %7170  ;;  %v662_v49 = vpack.c.bf16 %v627_v61, %v627_v61  ;;  %v661_v42 = vpack.c.bf16 %v628_v56, %v628_v56  ;;  %v7178_v13 = vunpack.i.h.bf16 %v7176_v38 }
 0x1ab   : > { %v7172_v5 = vunpack.i.l.bf16 %v7171_v4  ;;  %v7173_v3 = vunpack.i.h.bf16 %v7171_v4  ;;  %v641_v34 = vpack.c.bf16 %v10244_v12, %v10252_v57  ;;  %v10287_v11 = vsel %vm14783_vm15, %v7122_v41, %v7123_v47 }
 0x1ac   : > { %6530 = vmatprep.subr.msk.bf16.mxu0 %vm916_vm8, %v662_v49  ;;  %v1109_v14 = vsel %vm916_vm8, %v661_v42, 0  ;;  %v448_v1 = vsel %vm14782_vm10, %v7068_v60, %v7177_v8  ;;  %v663_v61 = vpack.c.bf16 %v626_v54, %v626_v54  ;;  %v446_v41 = vsel %vm14782_vm10, %v7178_v13, %v7057_v24 }
 0x1ad   : > { %1141 = vmatpush1.bf16.msra.mxu0 %v1109_v14  ;;  %v7186_v43 = vpop.permute.xlu1 %7185  ;;  %v423_v46 = vsel %vm14790_vm11, %v7063_v63, %v7172_v5  ;;  %v10279_v63 = vsel %vm14787_vm14, %v7127_v18, %v7128_v15  ;;  %v421_v4 = vsel %vm14790_vm11, %v7173_v3, %v7052_v35  ;;  %v10309_v49 = vsel %vm14785_vm7, %v7157_v6, %v7158_v55 }
 0x1ae   : > { %v10268_v30 = vpop.permute.xlu0 %7180  ;;  %v634_v20 = vpack.c.bf16 %v448_v1, %v423_v46  ;;  %v7187_v38 = vunpack.i.l.bf16 %v7186_v43  ;;  %v10317_v19 = vsel %vm14786_vm6, %v7152_v37, %v7153_v33  ;;  %v447_v24 = vsel %vm14782_vm10, %v7177_v8, %v7178_v13 }
 0x1af   : > { %v7182_v60 = vunpack.i.l.bf16 %v10268_v30  ;;  %v7183_v56 = vunpack.i.h.bf16 %v10268_v30  ;;  %v7188_v42 = vunpack.i.h.bf16 %v7186_v43  ;;  %v1115_v12 = vsel %vm916_vm8, %v663_v61, 0 }
 0x1b0   : > { %1214 = vmatprep.subr.bf16.mxu0 %v634_v20  ;;  %6531 = vmatmul.mubr.msk.bf16.vlgmr.msra.gmra.mrb[0].mxu0 %vm912_vm9, %v10262_v27  ;;  %v636_v57 = vpack.c.bf16 %v446_v41, %v421_v4  ;;  %v473_v37 = vsel %vm14789_vm13, %v7093_v36, %v7187_v38  ;;  %v649_v8 = vpack.c.bf16 %v10279_v63, %v10287_v11  ;;  %vm1337_vm10 = vcmp.lt.s32.totalorder %v9620_v21, 38 }
 0x1b1   : > { %1215 = vmatpush1.bf16.msra.mxu0 %v633_v32  ;;  %v7196_v31 = vpop.permute.xlu1 %7195  ;;  %v625_v18 = vsel %vm14784_vm5, %v7168_v53, %v7182_v60  ;;  %1246 = vmatprep.mubr.bf16.mxu0 %v14822_v16  ;;  %v422_v53 = vsel %vm14790_vm11, %v7172_v5, %v7173_v3  ;;  %v10343_v44 = vsel %vm14784_vm5, %v7182_v60, %v7183_v56  ;;  %vm14795_vm11 = vcmp.lt.s32.totalorder %v9620_v21, 17 }
 0x1b2   : > { %v7191_v2 = vpop.permute.xlu0 %7190  ;;  %v664_v35 = vpack.c.bf16 %v625_v18, %v625_v18  ;;  %v7197_v14 = vunpack.i.l.bf16 %v7196_v31  ;;  %v7198_v36 = vunpack.i.h.bf16 %v7196_v31  ;;  %v635_v46 = vpack.c.bf16 %v447_v24, %v422_v53 }
 0x1b3   : > { %v7193_v0 = vunpack.i.h.bf16 %v7191_v2  ;;  %v7192_v6 = vunpack.i.l.bf16 %v7191_v2  ;;  %v657_v25 = vpack.c.bf16 %v10309_v49, %v10317_v19  ;;  %v472_v50 = vsel %vm14789_vm13, %v7187_v38, %v7188_v42 }
 0x1b4   : > { %6532 = vmatprep.subr.msk.bf16.mxu1 %vm916_vm8, %v664_v35  ;;  %v471_v54 = vsel %vm14789_vm13, %v7188_v42, %v7082_v9  ;;  %v665_v63 = vpack.c.bf16 %v10343_v44, %v10343_v44  ;;  %v523_v17 = vsel %vm14783_vm15, %v7123_v47, %v7197_v14  ;;  %v521_v10 = vsel %vm14783_vm15, %v7198_v36, %v7112_v58 }
 0x1b5   : > { %1182 = vmatpush1.bf16.msra.mxu1 %v1115_v12  ;;  %v7206_v1 = vpop.permute.xlu1 %7205  ;;  %v498_v5 = vsel %vm14788_vm12, %v7098_v48, %v7192_v6  ;;  %v496_v13 = vsel %vm14788_vm12, %v7193_v0, %v7087_v40  ;;  %v497_v20 = vsel %vm14788_vm12, %v7192_v6, %v7193_v0  ;;  %vm14796_vm12 = vcmp.lt.s32.totalorder %v9620_v21, 18 }
 0x1b6   : > { %v7201_v3 = vpop.permute.xlu0 %7200  ;;  %1255 = vmatprep.subr.bf16.mxu1 %v636_v57  ;;  %v642_v43 = vpack.c.bf16 %v498_v5, %v473_v37  ;;  %v7207_v60 = vunpack.i.l.bf16 %v7206_v1  ;;  %v644_v32 = vpack.c.bf16 %v496_v13, %v471_v54  ;;  %v7208_v11 = vunpack.i.h.bf16 %v7206_v1 }
 0x1b7   : > { %v7203_v40 = vunpack.i.h.bf16 %v7201_v3  ;;  %v7202_v48 = vunpack.i.l.bf16 %v7201_v3  ;;  %v643_v4 = vpack.c.bf16 %v497_v20, %v472_v50  ;;  %v1121_v57 = vsel %vm916_vm8, %v665_v63, 0 }
 0x1b8   : > { %1216 = vmatprep.subr.bf16.mxu0 %v642_v43  ;;  %6533 = vmatmul.mubr.msk.bf16.vlgmr.msra.gmra.mrb[0].mxu1 %vm912_vm9, %v10262_v27  ;;  %v573_v59 = vsel %vm14786_vm6, %v7153_v33, %v7207_v60  ;;  %v571_v51 = vsel %vm14786_vm6, %v7208_v11, %v7142_v22  ;;  %vm14797_vm13 = vcmp.lt.s32.totalorder %v9620_v21, 19 }
 0x1b9   : > { %1217 = vmatpush1.bf16.msra.mxu0 %v641_v34  ;;  %1256 = vmatpush1.bf16.msra.mxu1 %v635_v46  ;;  %v7216_v38 = vpop.permute.xlu1 %7215  ;;  %v548_v9 = vsel %vm14787_vm14, %v7128_v15, %v7202_v48  ;;  %v546_v61 = vsel %vm14787_vm14, %v7203_v40, %v7117_v62  ;;  %v522_v34 = vsel %vm14783_vm15, %v7197_v14, %v7198_v36  ;;  %vm1312_vm15 = vcmp.lt.s32.totalorder %v9620_v21, 39 }
 0x1ba   : > { %v7217_v31 = vunpack.i.l.bf16 %v7216_v38  ;;  %v7211_v18 = vpop.permute.xlu0 %7210  ;;  %1257 = vmatprep.subr.bf16.mxu1 %v644_v32  ;;  %v650_v45 = vpack.c.bf16 %v548_v9, %v523_v17  ;;  %1287 = vmatprep.mubr.bf16.mxu1 %v14822_v16  ;;  %v7218_v15 = vunpack.i.h.bf16 %v7216_v38  ;;  %v572_v62 = vsel %vm14786_vm6, %v7207_v60, %v7208_v11 }
 0x1bb   : > { %v7213_v47 = vunpack.i.h.bf16 %v7211_v18  ;;  %v7212_v23 = vunpack.i.l.bf16 %v7211_v18  ;;  %v547_v41 = vsel %vm14787_vm14, %v7202_v48, %v7203_v40  ;;  %v652_v49 = vpack.c.bf16 %v546_v61, %v521_v10 }
 0x1bc   : > { %1218 = vmatprep.subr.bf16.mxu0 %v650_v45  ;;  %v623_v24 = vsel %vm14784_vm5, %v7183_v56, %v7217_v31  ;;  %v651_v42 = vpack.c.bf16 %v547_v41, %v522_v34  ;;  %v621_v28 = vsel %vm14784_vm5, %v7218_v15, %v7167_v39  ;;  %v622_v26 = vsel %vm14784_vm5, %v7217_v31, %v7218_v15 }
 0x1bd   : > { %1219 = vmatpush1.bf16.msra.mxu0 %v649_v8  ;;  %1258 = vmatpush1.bf16.msra.mxu1 %v643_v4  ;;  %v7226_v58 = vpop.permute.xlu1 %7225  ;;  %v598_v19 = vsel %vm14785_vm7, %v7158_v55, %v7212_v23  ;;  %v596_v55 = vsel %vm14785_vm7, %v7213_v47, %v7147_v29  ;;  %v597_v22 = vsel %vm14785_vm7, %v7212_v23, %v7213_v47  ;;  %vm14800_vm5 = vcmp.lt.s32.totalorder %v9620_v21, 29 }
 0x1be   : > { %v7228_v33 = vunpack.i.h.bf16 %v7226_v58  ;;  %v7227_v2 = vunpack.i.l.bf16 %v7226_v58  ;;  %v7221_v35 = vpop.permute.xlu0 %7220  ;;  %1259 = vmatprep.subr.bf16.mxu1 %v652_v49  ;;  %v658_v7 = vpack.c.bf16 %v598_v19, %v573_v59  ;;  %v666_v56 = vpack.c.bf16 %v623_v24, %v623_v24 }
 0x1bf   : > { %v7223_v53 = vunpack.i.h.bf16 %v7221_v35  ;;  %v7222_v30 = vunpack.i.l.bf16 %v7221_v35  ;;  %v660_v0 = vpack.c.bf16 %v596_v55, %v571_v51  ;;  %v659_v8 = vpack.c.bf16 %v597_v22, %v572_v62 }
 0x1c0   : > { %1220 = vmatprep.subr.bf16.mxu0 %v658_v7  ;;  %v1343_v52 = vsel %vm1337_vm10, %v7227_v2, %v7228_v33  ;;  %v668_v14 = vpack.c.bf16 %v621_v28, %v621_v28  ;;  %v667_v1 = vpack.c.bf16 %v622_v26, %v622_v26  ;;  %vm1362_vm7 = vcmp.lt.s32.totalorder %v9620_v21, 37 }
 0x1c1   : > { %1221 = vmatpush1.bf16.msra.mxu0 %v657_v25  ;;  %1260 = vmatpush1.bf16.msra.mxu1 %v651_v42  ;;  %v10412_v29 = vpop.permute.xlu1 %7235  ;;  %v1318_v6 = vsel %vm1312_vm15, %v7222_v30, %v7223_v53  ;;  %vm14798_vm6 = vcmp.lt.s32.totalorder %v9620_v21, 27  ;;  %vm14799_vm14 = vcmp.lt.s32.totalorder %v9620_v21, 28 }
 0x1c2   : > { %v7237_v39 = vunpack.i.l.bf16 %v10412_v29  ;;  %v10419_v12 = vpop.permute.xlu0 %7230  ;;  %6534 = vmatprep.subr.msk.bf16.mxu0 %vm916_vm8, %v666_v56  ;;  %1261 = vmatprep.subr.bf16.mxu1 %v660_v0  ;;  %v7238_v5 = vunpack.i.h.bf16 %v10412_v29  ;;  %v1522_v36 = vpack.c.bf16 %v1343_v52, %v1318_v6  ;;  %v1127_v20 = vsel %vm916_vm8, %v667_v1, 0 }
 0x1c3   : > { %v7232_v37 = vunpack.i.l.bf16 %v10419_v12  ;;  %v7233_v44 = vunpack.i.h.bf16 %v10419_v12 }
 0x1c4   : > { %v1344_v13 = vsel %vm1337_vm10, %v7237_v39, %v7227_v2  ;;  %v1342_v48 = vsel %vm1337_vm10, %v7228_v33, %v7238_v5 }
 0x1c5   : > { %v1319_v3 = vsel %vm1312_vm15, %v7232_v37, %v7222_v30  ;;  %1223 = vmatpush1.bf16.msra.mxu0 %v1121_v57  ;;  %1262 = vmatpush1.bf16.msra.mxu1 %v659_v8  ;;  %v10434_v43 = vpop.permute.xlu1 %7245  ;;  %v1317_v54 = vsel %vm1312_vm15, %v7223_v53, %v7233_v44 }
 0x1c6   : > { %v7247_v46 = vunpack.i.l.bf16 %v10434_v43  ;;  %v10437_v25 = vpop.permute.xlu0 %7240  ;;  %6536 = vmatprep.subr.msk.bf16.mxu1 %vm916_vm8, %v668_v14  ;;  %1590 = vmatprep.subr.bf16.mxu0 %v1522_v36  ;;  %v1521_v50 = vpack.c.bf16 %v1344_v13, %v1319_v3  ;;  %v1523_v31 = vpack.c.bf16 %v1342_v48, %v1317_v54 }
 0x1c7   : > { %v7242_v40 = vunpack.i.l.bf16 %v10437_v25 }
 0x1c8   : > { %6535 = vmatmul.mubr.msk.bf16.vlgmr.msra.gmra.mrb[4].mxu0 %vm912_vm9, %v10262_v27  ;;  %v1341_v60 = vsel %vm1337_vm10, %v7238_v5, %v7247_v46 }
 0x1c9   : > { %1264 = vmatpush1.bf16.msra.mxu1 %v1127_v20  ;;  %1591 = vmatpush1.bf16.msra.mxu0 %v1521_v50  ;;  %v7256_v32 = vpop.permute.xlu1 %7255  ;;  %v1316_v63 = vsel %vm1312_vm15, %v7233_v44, %v7242_v40 }
 0x1ca   : > { %v7258_v11 = vunpack.i.h.bf16 %v7256_v32  ;;  %v7257_v38 = vunpack.i.l.bf16 %v7256_v32  ;;  %v7251_v17 = vpop.permute.xlu0 %7250  ;;  %v1524_v9 = vpack.c.bf16 %v1341_v60, %v1316_v63  ;;  %1622 = vmatprep.mubr.bf16.mxu0 %v14822_v16 }
 0x1cb   : > { %v7253_v61 = vunpack.i.h.bf16 %v7251_v17  ;;  %v7252_v34 = vunpack.i.l.bf16 %v7251_v17 }
 0x1cc   : > { %1631 = vmatprep.subr.bf16.mxu1 %v1524_v9  ;;  %6537 = vmatmul.mubr.msk.bf16.vlgmr.msra.gmra.mrb[4].mxu1 %vm912_vm9, %v10262_v27  ;;  %v1393_v18 = vsel %vm14800_vm5, %v7257_v38, %v7258_v11 }
 0x1cd   : > { %1632 = vmatpush1.bf16.msra.mxu1 %v1523_v31  ;;  %v10463_v45 = vpop.permute.xlu1 %7265  ;;  %v1368_v10 = vsel %vm1362_vm7, %v7252_v34, %v7253_v61  ;;  %1663 = vmatprep.mubr.bf16.mxu1 %v14822_v16 }
 0x1ce   : > { %v7267_v15 = vunpack.i.l.bf16 %v10463_v45  ;;  %v10469_v47 = vpop.permute.xlu0 %7260  ;;  %v1530_v23 = vpack.c.bf16 %v1393_v18, %v1368_v10  ;;  %v7268_v27 = vunpack.i.h.bf16 %v10463_v45 }
 0x1cf   : > { %v7262_v4 = vunpack.i.l.bf16 %v10469_v47  ;;  %v7263_v41 = vunpack.i.h.bf16 %v10469_v47 }
 0x1d0   : > { %v1394_v62 = vsel %vm14800_vm5, %v7267_v15, %v7257_v38  ;;  %1592 = vmatprep.subr.bf16.mxu0 %v1530_v23  ;;  %v1392_v33 = vsel %vm14800_vm5, %v7258_v11, %v7268_v27 }
 0x1d1   : > { %v1369_v49 = vsel %vm1362_vm7, %v7262_v4, %v7252_v34  ;;  %v10482_v59 = vpop.permute.xlu1 %7275  ;;  %v1367_v2 = vsel %vm1362_vm7, %v7253_v61, %v7263_v41 }
 0x1d2   : > { %v7277_v58 = vunpack.i.l.bf16 %v10482_v59  ;;  %v10485_v19 = vpop.permute.xlu0 %7270  ;;  %v1529_v24 = vpack.c.bf16 %v1394_v62, %v1369_v49  ;;  %v1531_v0 = vpack.c.bf16 %v1392_v33, %v1367_v2 }
 0x1d3   : > { %v7272_v51 = vunpack.i.l.bf16 %v10485_v19 }
 0x1d4   : > { %1593 = vmatpush1.bf16.msra.mxu0 %v1529_v24  ;;  %v1391_v35 = vsel %vm14800_vm5, %v7268_v27, %v7277_v58 }
 0x1d5   : > { %v7286_v7 = vpop.permute.xlu1 %7285  ;;  %v1366_v55 = vsel %vm1362_vm7, %v7263_v41, %v7272_v51 }
 0x1d6   : > { %v7288_v53 = vunpack.i.h.bf16 %v7286_v7  ;;  %v7287_v30 = vunpack.i.l.bf16 %v7286_v7  ;;  %v7281_v42 = vpop.permute.xlu0 %7280  ;;  %v1532_v28 = vpack.c.bf16 %v1391_v35, %v1366_v55 }
 0x1d7   : > { %v7283_v22 = vunpack.i.h.bf16 %v7281_v42  ;;  %v7282_v56 = vunpack.i.l.bf16 %v7281_v42 }
 0x1d8   : > { %1633 = vmatprep.subr.bf16.mxu1 %v1532_v28  ;;  %v1443_v26 = vsel %vm14798_vm6, %v7287_v30, %v7288_v53 }
 0x1d9   : > { %1634 = vmatpush1.bf16.msra.mxu1 %v1531_v0  ;;  %v10504_v6 = vpop.permute.xlu1 %7295  ;;  %v1418_v52 = vsel %vm14799_vm14, %v7282_v56, %v7283_v22 }
 0x1da   : > { %v7297_v57 = vunpack.i.l.bf16 %v10504_v6  ;;  %v10509_v8 = vpop.permute.xlu0 %7290  ;;  %v1538_v14 = vpack.c.bf16 %v1443_v26, %v1418_v52  ;;  %v7298_v5 = vunpack.i.h.bf16 %v10504_v6  ;;  %v7248_v26 = vunpack.i.h.bf16 %v10434_v43 }
 0x1db   : > { %v7292_v1 = vunpack.i.l.bf16 %v10509_v8  ;;  %v7293_v44 = vunpack.i.h.bf16 %v10509_v8 }
 0x1dc   : > { %v1444_v13 = vsel %vm14798_vm6, %v7297_v57, %v7287_v30  ;;  %1594 = vmatprep.subr.bf16.mxu0 %v1538_v14  ;;  %v1442_v60 = vsel %vm14798_vm6, %v7288_v53, %v7298_v5  ;;  %v7243_v14 = vunpack.i.h.bf16 %v10437_v25  ;;  %v10599_v25 = vld [vmem:[#allocation5 + $0x8] sm:$0xf] }
 0x1dd   : > { %v1419_v36 = vsel %vm14799_vm14, %v7292_v1, %v7282_v56  ;;  %v10522_v3 = vpop.permute.xlu1 %1429  ;;  %v1417_v32 = vsel %vm14799_vm14, %v7283_v22, %v7293_v44 }
 0x1de   : > { %v10524_v50 = vpop.permute.xlu0 %7300  ;;  %v1537_v48 = vpack.c.bf16 %v1444_v13, %v1419_v36  ;;  %v1441_v54 = vsel %vm14798_vm6, %v7298_v5, %v10522_v3  ;;  %v1539_v18 = vpack.c.bf16 %v1442_v60, %v1417_v32  ;;  %v1340_v60 = vsel %vm1337_vm10, %v7247_v46, %v7248_v26 }
 0x1df   : > { %v7302_v20 = vunpack.i.l.bf16 %v10524_v50 }
 0x1e0   : > { %1595 = vmatpush1.bf16.msra.mxu0 %v1537_v48 }
 0x1e1   : > { %v7311_v63 = vpop.permute.xlu1 %7310  ;;  %v1416_v11 = vsel %vm14799_vm14, %v7293_v44, %v7302_v20 }
 0x1e2   : > { %v7313_v38 = vunpack.i.h.bf16 %v7311_v63  ;;  %v7312_v17 = vunpack.i.l.bf16 %v7311_v63  ;;  %v7306_v9 = vpop.permute.xlu0 %7305  ;;  %v1540_v61 = vpack.c.bf16 %v1441_v54, %v1416_v11  ;;  %v1315_v11 = vsel %vm1312_vm15, %v7242_v40, %v7243_v14 }
 0x1e3   : > { %v7308_v34 = vunpack.i.h.bf16 %v7306_v9  ;;  %v7307_v31 = vunpack.i.l.bf16 %v7306_v9 }
 0x1e4   : > { %1635 = vmatprep.subr.bf16.mxu1 %v1540_v61  ;;  %v1493_v10 = vsel %vm14796_vm12, %v7312_v17, %v7313_v38 }
 0x1e5   : > { %1636 = vmatpush1.bf16.msra.mxu1 %v1539_v18  ;;  %v10542_v23 = vpop.permute.xlu1 %7320  ;;  %v1468_v27 = vsel %vm14797_vm13, %v7307_v31, %v7308_v34 }
 0x1e6   : > { %v7323_v62 = vunpack.i.h.bf16 %v10542_v23  ;;  %v7322_v41 = vunpack.i.l.bf16 %v10542_v23  ;;  %v10548_v49 = vpop.permute.xlu0 %7315  ;;  %v1546_v24 = vpack.c.bf16 %v1493_v10, %v1468_v27 }
 0x1e7   : > { %v7318_v33 = vunpack.i.h.bf16 %v10548_v49  ;;  %v7317_v2 = vunpack.i.l.bf16 %v10548_v49 }
 0x1e8   : > { %v1494_v35 = vsel %vm14796_vm12, %v7322_v41, %v7312_v17  ;;  %1596 = vmatprep.subr.bf16.mxu0 %v1546_v24  ;;  %v1492_v53 = vsel %vm14796_vm12, %v7313_v38, %v7323_v62  ;;  %v7278_v24 = vunpack.i.h.bf16 %v10482_v59 }
 0x1e9   : > { %v1469_v7 = vsel %vm14797_vm13, %v7317_v2, %v7307_v31  ;;  %v10560_v55 = vpop.permute.xlu1 %1479  ;;  %v1467_v30 = vsel %vm14797_vm13, %v7308_v34, %v7318_v33 }
 0x1ea   : > { %v1491_v42 = vsel %vm14796_vm12, %v7323_v62, %v10560_v55  ;;  %v10569_v28 = vpop.permute.xlu0 %1454  ;;  %v1545_v22 = vpack.c.bf16 %v1494_v35, %v1469_v7  ;;  %v1547_v52 = vpack.c.bf16 %v1492_v53, %v1467_v30  ;;  %v1525_v62 = vpack.c.bf16 %v1340_v60, %v1315_v11 }
 0x1eb   : > { %v1466_v56 = vsel %vm14797_vm13, %v7318_v33, %v10569_v28  ;;  %v7273_v33 = vunpack.i.h.bf16 %v10485_v19  ;;  %v1390_v29 = vsel %vm14800_vm5, %v7277_v58, %v7278_v24 }
 0x1ec   : > { %1597 = vmatpush1.bf16.msra.mxu0 %v1545_v22  ;;  %v1548_v0 = vpack.c.bf16 %v1491_v42, %v1466_v56 }
 0x1ee   : > { %v7331_v5 = vpop.permute.xlu1 %7330  ;;  %v10576_v13 = vpop.permute.xlu0 %7325  ;;  %1637 = vmatprep.subr.bf16.mxu1 %v1548_v0 }
 0x1ef   : > { %v7333_v44 = vunpack.i.h.bf16 %v7331_v5  ;;  %v7332_v36 = vunpack.i.l.bf16 %v7331_v5  ;;  %v7328_v48 = vunpack.i.h.bf16 %v10576_v13  ;;  %v7327_v54 = vunpack.i.l.bf16 %v10576_v13  ;;  %1638 = vmatpush1.bf16.msra.mxu1 %v1547_v52 }
 0x1f1   : > { %v1518_v32 = vsel %vm14795_vm11, %v7328_v48, %v7332_v36  ;;  %v1519_v63 = vsel %vm14795_vm11, %v7327_v54, %v7328_v48  ;;  %v1517_v46 = vsel %vm14795_vm11, %v7332_v36, %v7333_v44  ;;  %v7303_v48 = vunpack.i.h.bf16 %v10524_v50 }
 0x1f2   : > { %v7341_v38 = vpop.permute.xlu1 %7340  ;;  %v7336_v17 = vpop.permute.xlu0 %7335  ;;  %v1554_v9 = vpack.c.bf16 %v1518_v32, %v1518_v32  ;;  %v1553_v43 = vpack.c.bf16 %v1519_v63, %v1519_v63  ;;  %v1555_v30 = vpack.c.bf16 %v1517_v46, %v1517_v46 }
 0x1f3   : > { %v7343_v61 = vunpack.i.h.bf16 %v7341_v38  ;;  %v7342_v34 = vunpack.i.l.bf16 %v7341_v38  ;;  %v7338_v31 = vunpack.i.h.bf16 %v7336_v17  ;;  %v7337_v18 = vunpack.i.l.bf16 %v7336_v17 }
 0x1f4   : > { %6538 = vmatprep.subr.msk.bf16.mxu0 %vm916_vm8, %v1554_v9  ;;  %v1567_v10 = vsel %vm916_vm8, %v1553_v43, 0 }
 0x1f5   : > { %1599 = vmatpush1.bf16.msra.mxu0 %v1567_v10  ;;  %v1314_v40 = vsel %vm1312_vm15, %v7243_v14, %v7337_v18  ;;  %v1339_v27 = vsel %vm1337_vm10, %v7248_v26, %v7342_v34  ;;  %v1338_v42 = vsel %vm1337_vm10, %v7342_v34, %v7343_v61  ;;  %v1320_v56 = vsel %vm1312_vm15, %v7338_v31, %v7232_v37 }
 0x1f6   : > { %v7346_v35 = vpop.permute.xlu1 %7345  ;;  %v10607_v7 = vpop.permute.xlu0 %1504  ;;  %v1526_v53 = vpack.c.bf16 %v1339_v27, %v1314_v40  ;;  %v1345_v0 = vsel %vm1337_vm10, %v7343_v61, %v7237_v39  ;;  %v1313_v26 = vsel %vm1312_vm15, %v7337_v18, %v7338_v31  ;;  %v1365_v39 = vsel %vm1362_vm7, %v7272_v51, %v7273_v33 }
 0x1f7   : > { %v1516_v22 = vsel %vm14795_vm11, %v7333_v44, %v10607_v7  ;;  %v7348_v52 = vunpack.i.h.bf16 %v7346_v35  ;;  %v7347_v14 = vunpack.i.l.bf16 %v7346_v35  ;;  %v1573_v44 = vsel %vm916_vm8, %v1555_v30, 0 }
 0x1f8   : > { %v1556_v5 = vpack.c.bf16 %v1516_v22, %v1516_v22  ;;  %6539 = vmatmul.mubr.msk.bf16.vlgmr.msra.gmra.mrb[0].mxu0 %vm912_vm9, %v10599_v25  ;;  %1672 = vmatprep.subr.bf16.mxu0 %v1526_v53  ;;  %v1528_v36 = vpack.c.bf16 %v1345_v0, %v1320_v56  ;;  %v1527_v59 = vpack.c.bf16 %v1338_v42, %v1313_v26 }
 0x1f9   : > { %1673 = vmatpush1.bf16.msra.mxu0 %v1525_v62  ;;  %1704 = vmatprep.mubr.bf16.mxu0 %v14822_v16  ;;  %v1363_v58 = vsel %vm1362_vm7, %v7347_v14, %v7348_v52  ;;  %v1364_v51 = vsel %vm1362_vm7, %v7273_v33, %v7347_v14  ;;  %v1370_v63 = vsel %vm1362_vm7, %v7348_v52, %v7262_v4 }
 0x1fa   : > { %v7356_v12 = vpop.permute.xlu1 %7355  ;;  %v7351_v37 = vpop.permute.xlu0 %7350  ;;  %6540 = vmatprep.subr.msk.bf16.mxu1 %vm916_vm8, %v1556_v5  ;;  %v1533_v4 = vpack.c.bf16 %v1390_v29, %v1365_v39  ;;  %v1415_v34 = vsel %vm14799_vm14, %v7302_v20, %v7303_v48 }
 0x1fb   : > { %v7353_v60 = vunpack.i.h.bf16 %v7351_v37  ;;  %v7352_v32 = vunpack.i.l.bf16 %v7351_v37  ;;  %1640 = vmatpush1.bf16.msra.mxu1 %v1573_v44  ;;  %v7357_v19 = vunpack.i.l.bf16 %v7356_v12  ;;  %v7358_v11 = vunpack.i.h.bf16 %v7356_v12 }
 0x1fc   : > { %1713 = vmatprep.subr.bf16.mxu1 %v1528_v36 }
 0x1fd   : > { %v1388_v38 = vsel %vm14800_vm5, %v7352_v32, %v7353_v60  ;;  %v1389_v17 = vsel %vm14800_vm5, %v7278_v24, %v7352_v32  ;;  %v1395_v9 = vsel %vm14800_vm5, %v7353_v60, %v7267_v15  ;;  %v1413_v18 = vsel %vm14799_vm14, %v7357_v19, %v7358_v11 }
 0x1fe   : > { %v1436_v43 = vpop.permute.xlu1 %1435  ;;  %v7361_v46 = vpop.permute.xlu0 %7360  ;;  %6541 = vmatmul.mubr.msk.bf16.vlgmr.msra.gmra.mrb[0].mxu1 %vm912_vm9, %v10599_v25  ;;  %v1534_v47 = vpack.c.bf16 %v1389_v17, %v1364_v51  ;;  %v1536_v61 = vpack.c.bf16 %v1395_v9, %v1370_v63  ;;  %v1535_v10 = vpack.c.bf16 %v1388_v38, %v1363_v58  ;;  %v1414_v50 = vsel %vm14799_vm14, %v7303_v48, %v7357_v19 }
 0x1ff   : > { %v1445_v45 = vsel %vm14798_vm6, %v1436_v43, %v7297_v57  ;;  %v7363_v31 = vunpack.i.h.bf16 %v7361_v46  ;;  %v7362_v15 = vunpack.i.l.bf16 %v7361_v46  ;;  %1714 = vmatpush1.bf16.msra.mxu1 %v1527_v59  ;;  %1745 = vmatprep.mubr.bf16.mxu1 %v14822_v16  ;;  %v1420_v40 = vsel %vm14799_vm14, %v7358_v11, %v7292_v1  ;;  %v352_v11 = vld [vmem:[%s14935_s6] sm:$0xff]  ;;  %s14953_s6 = smov 37  }
 0x200   : > { %1674 = vmatprep.subr.bf16.mxu0 %v1534_v47  ;;  %1715 = vmatprep.subr.bf16.mxu1 %v1536_v61  ;;  %v1544_v33 = vpack.c.bf16 %v1445_v45, %v1420_v40 }
 0x201   : > { %v1438_v6 = vsel %vm14798_vm6, %v7363_v31, %v1436_v43  ;;  %v1440_v57 = vsel %vm14798_vm6, %v10522_v3, %v7362_v15  ;;  %1675 = vmatpush1.bf16.msra.mxu0 %v1533_v4  ;;  %v1439_v20 = vsel %vm14798_vm6, %v7362_v15, %v7363_v31 }
 0x202   : > { %v7371_v27 = vpop.permute.xlu1 %7370  ;;  %v7366_v62 = vpop.permute.xlu0 %7365  ;;  %v1542_v24 = vpack.c.bf16 %v1439_v20, %v1414_v50  ;;  %v1541_v35 = vpack.c.bf16 %v1440_v57, %v1415_v34  ;;  %v1543_v3 = vpack.c.bf16 %v1438_v6, %v1413_v18 }
 0x203   : > { %v7373_v53 = vunpack.i.h.bf16 %v7371_v27  ;;  %v7372_v30 = vunpack.i.l.bf16 %v7371_v27  ;;  %v7368_v42 = vunpack.i.h.bf16 %v7366_v62  ;;  %v7367_v22 = vunpack.i.l.bf16 %v7366_v62  ;;  %1716 = vmatpush1.bf16.msra.mxu1 %v1535_v10 }
 0x204   : > { %1676 = vmatprep.subr.bf16.mxu0 %v1542_v24  ;;  %1717 = vmatprep.subr.bf16.mxu1 %v1544_v33 }
 0x205   : > { %v1490_v8 = vsel %vm14796_vm12, %v10560_v55, %v7372_v30  ;;  %v1465_v1 = vsel %vm14797_vm13, %v10569_v28, %v7367_v22  ;;  %1677 = vmatpush1.bf16.msra.mxu0 %v1541_v35  ;;  %v1464_v56 = vsel %vm14797_vm13, %v7367_v22, %v7368_v42  ;;  %v1489_v0 = vsel %vm14796_vm12, %v7372_v30, %v7373_v53 }
 0x206   : > { %v1486_v26 = vpop.permute.xlu1 %1485  ;;  %v1461_v52 = vpop.permute.xlu0 %1460  ;;  %v1550_v14 = vpack.c.bf16 %v1489_v0, %v1464_v56  ;;  %v1549_v5 = vpack.c.bf16 %v1490_v8, %v1465_v1 }
 0x207   : > { %v1488_v29 = vsel %vm14796_vm12, %v7373_v53, %v1486_v26  ;;  %v1495_v55 = vsel %vm14796_vm12, %v1486_v26, %v7322_v41  ;;  %v1463_v28 = vsel %vm14797_vm13, %v7368_v42, %v1461_v52  ;;  %v1470_v39 = vsel %vm14797_vm13, %v1461_v52, %v7317_v2  ;;  %1718 = vmatpush1.bf16.msra.mxu1 %v1543_v3 }
 0x208   : > { %v1551_v12 = vpack.c.bf16 %v1488_v29, %v1463_v28  ;;  %1678 = vmatprep.subr.bf16.mxu0 %v1550_v14  ;;  %v1552_v37 = vpack.c.bf16 %v1495_v55, %v1470_v39 }
 0x209   : > { %1679 = vmatpush1.bf16.msra.mxu0 %v1549_v5 }
 0x20a   : > { %v1511_v44 = vpop.permute.xlu1 %1510  ;;  %v7376_v36 = vpop.permute.xlu0 %7375  ;;  %1719 = vmatprep.subr.bf16.mxu1 %v1552_v37 }
 0x20b   : > { %v1520_v23 = vsel %vm14795_vm11, %v1511_v44, %v7327_v54  ;;  %v7378_v41 = vunpack.i.h.bf16 %v7376_v36  ;;  %v7377_v48 = vunpack.i.l.bf16 %v7376_v36  ;;  %1720 = vmatpush1.bf16.msra.mxu1 %v1551_v12 }
 0x20c   : > { %v1560_v49 = vpack.c.bf16 %v1520_v23, %v1520_v23 }
 0x20d   : > { %v1514_v2 = vsel %vm14795_vm11, %v7377_v48, %v7378_v41  ;;  %v1515_v60 = vsel %vm14795_vm11, %v10607_v7, %v7377_v48  ;;  %v1513_v32 = vsel %vm14795_vm11, %v7378_v41, %v1511_v44  ;;  %v14934_v7 = vlaneseq }
 0x20e   : > { %6544 = vmatprep.subr.msk.bf16.mxu1 %vm916_vm8, %v1560_v49  ;;  %v1558_v13 = vpack.c.bf16 %v1514_v2, %v1514_v2  ;;  %v1557_v59 = vpack.c.bf16 %v1515_v60, %v1515_v60  ;;  %v1559_v58 = vpack.c.bf16 %v1513_v32, %v1513_v32 }
 0x20f   : > { %v355_v51 = vshrl.u32 %v14934_v7, 7 }
 0x210   : > { %6542 = vmatprep.subr.msk.bf16.mxu0 %vm916_vm8, %v1558_v13  ;;  %v1579_v54 = vsel %vm916_vm8, %v1557_v59, 0  ;;  %v1585_v19 = vsel %vm916_vm8, %v1559_v58, 0 }
 0x211   : > { %1681 = vmatpush1.bf16.msra.mxu0 %v1579_v54  ;;  %1722 = vmatpush1.bf16.msra.mxu1 %v1585_v19  ;;  %v356_v63 = vsub.s32 0, %v355_v51  ;;  %v360_v38 = vsub.s32 1, %v355_v51  ;;  %v364_v43 = vsub.s32 2, %v355_v51  ;;  %v372_v3 = vsub.s32 4, %v355_v51 }
 0x212   : > { %v376_v8 = vsub.s32 5, %v355_v51  ;;  %v380_v1 = vsub.s32 6, %v355_v51  ;;  %v384_v0 = vsub.s32 7, %v355_v51 }
 0x213   : > { %v10727_v17 = vrot.slane %v352_v11, %v356_v63  ;;  %v10729_v9 = vrot.slane %v352_v11, %v360_v38  ;;  %v10740_v15 = vrot.slane %v352_v11, %v364_v43  ;;  %v10755_v56 = vrot.slane %v352_v11, %v372_v3 }
 0x214   : > { %6543 = vmatmul.mubr.msk.bf16.vlgmr.msra.gmra.mrb[4].mxu0 %vm912_vm9, %v10599_v25  ;;  %6545 = vmatmul.mubr.msk.bf16.vlgmr.msra.gmra.mrb[4].mxu1 %vm912_vm9, %v10599_v25  ;;  %v368_v25 = vsub.s32 3, %v355_v51  ;;  %v10757_v26 = vrot.slane %v352_v11, %v376_v8  ;;  %v10759_v52 = vrot.slane %v352_v11, %v380_v1  ;;  %v10766_v28 = vrot.slane %v352_v11, %v384_v0 }
 0x215   : > { %2401 = vmatprep.mubr.bf16.mxu0 %v14822_v16  ;;  %2442 = vmatprep.mubr.bf16.mxu1 %v14822_v16 }
 0x216   : > { %v10743_v50 = vrot.slane %v352_v11, %v368_v25 }
 0x2cb   : > { %v10731_v46 = vpop.f32.mrb[0].mxu0 }
 0x2cc   : > { %v1762_v47 = vmul.f32 %v10731_v46, %v10727_v17  ;;  %v10735_v61 = vpop.f32.mrb[1].mxu0 }
 0x2cd   : > { %v1763_v4 = vmul.f32 %v10735_v61, %v10729_v9  ;;  %v1628_v34 = vpop.f32.mrb[2].mxu0 }
 0x2ce   : > { %v1780_v45 = vmul.f32 %v1762_v47, %v10731_v46  ;;  %v1629_v31 = vpop.f32.mrb[3].mxu0 }
 0x2cf   : > { %v1770_v18 = vadd.f32 %v1763_v4, %v1762_v47  ;;  %v1781_v10 = vmul.f32 %v1763_v4, %v10735_v61 }
 0x2d1   : > { %v1788_v6 = vadd.f32 %v1781_v10, %v1780_v45  ;;  %v10745_v57 = vpop.f32.mrb[0].mxu1 }
 0x2d2   : > { %v1764_v20 = vmul.f32 %v10745_v57, %v10740_v15  ;;  %v10749_v40 = vpop.f32.mrb[1].mxu1 }
 0x2d3   : > { %v1765_v27 = vmul.f32 %v10749_v40, %v10743_v50  ;;  %v1669_v62 = vpop.f32.mrb[2].mxu1 }
 0x2d4   : > { %v1771_v24 = vadd.f32 %v1770_v18, %v1764_v20  ;;  %v1782_v33 = vmul.f32 %v1764_v20, %v10745_v57  ;;  %v1670_v35 = vpop.f32.mrb[3].mxu1 }
 0x2d5   : > { %v1783_v53 = vmul.f32 %v1765_v27, %v10749_v40 }
 0x2d6   : > { %v1789_v30 = vadd.f32 %v1788_v6, %v1782_v33  ;;  %v1772_v42 = vadd.f32 %v1771_v24, %v1765_v27 }
 0x2d8   : > { %v1790_v22 = vadd.f32 %v1789_v30, %v1783_v53 }
 0x2e7   : > { %v1706_v14 = vpop.f32.mrb[4].mxu0  ;;  %v10761_v5 = vpop.f32.mrb[4].mxu1 }
 0x2e8   : > { %v1766_v29 = vmul.f32 %v1706_v14, %v10755_v56  ;;  %v10764_v55 = vpop.f32.mrb[5].mxu0  ;;  %v1749_v39 = vpop.f32.mrb[5].mxu1  ;;  %v1768_v41 = vmul.f32 %v10761_v5, %v10759_v52 }
 0x2e9   : > { %v1767_v12 = vmul.f32 %v10764_v55, %v10757_v26  ;;  %v1710_v37 = vpop.f32.mrb[6].mxu0  ;;  %v1751_v44 = vpop.f32.mrb[6].mxu1  ;;  %v1769_v13 = vmul.f32 %v1749_v39, %v10766_v28 }
 0x2ea   : > { %v1773_v36 = vadd.f32 %v1772_v42, %v1766_v29  ;;  %v1784_v23 = vmul.f32 %v1766_v29, %v1706_v14  ;;  %v1711_v48 = vpop.f32.mrb[7].mxu0  ;;  %v1752_v49 = vpop.f32.mrb[7].mxu1  ;;  %v1786_v59 = vmul.f32 %v1768_v41, %v10761_v5 }
 0x2eb   : > { %v1785_v2 = vmul.f32 %v1767_v12, %v10764_v55  ;;  %v1787_v19 = vmul.f32 %v1769_v13, %v1749_v39 }
 0x2ec   : > { %v1791_v60 = vadd.f32 %v1790_v22, %v1784_v23  ;;  %v1774_v32 = vadd.f32 %v1773_v36, %v1767_v12 }
 0x2ee   : > { %v1792_v58 = vadd.f32 %v1791_v60, %v1785_v2  ;;  %v1775_v54 = vadd.f32 %v1774_v32, %v1768_v41 }
 0x2f0   : > { %v1776_v7 = vadd.f32 %v1775_v54, %v1769_v13  ;;  %v1793_v51 = vadd.f32 %v1792_v58, %v1786_v59 }
 0x2f2   : > { %1777 = vadd.xlane.f32.xlu0 %v1776_v7  ;;  %v1794_v63 = vadd.f32 %v1793_v51, %v1787_v19 }
 0x2f4   : > { %1795 = vadd.xlane.f32.xlu1 %v1794_v63 }
 0x37f   : > { %v1778_v11 = vpop.xlane.xlu0 %1777 }
 0x380   : > { %v10775_v38 = vmul.f32 0.001953125, %v1778_v11 }
 0x381   : > { %v1796_v43 = vpop.xlane.xlu1 %1795 }
 0x382   : > { %v1797_v25 = vmul.f32 0.001953125, %v1796_v43  ;;  %v1798_v47 = vmul.f32 %v10775_v38, %v10775_v38  ;;  %v1801_v31 = vsub.f32 %v10731_v46, %v10775_v38  ;;  %v1802_v18 = vsub.f32 %v10735_v61, %v10775_v38 }
 0x383   : > { %v1803_v10 = vsub.f32 %v10745_v57, %v10775_v38  ;;  %v1808_v20 = vsub.f32 %v1749_v39, %v10775_v38  ;;  %v1804_v27 = vsub.f32 %v10749_v40, %v10775_v38  ;;  %v1805_v35 = vsub.f32 %v1706_v14, %v10775_v38 }
 0x384   : > { %v1799_v4 = vsub.f32 %v1797_v25, %v1798_v47  ;;  %v1806_v60 = vsub.f32 %v10764_v55, %v10775_v38  ;;  %v1807_v19 = vsub.f32 %v10761_v5, %v10775_v38 }
 0x386   : > { %v1800_v34 = vmax.f32 %v1799_v4, 0.0 }
 0x388   : > { %v1809_v45 = vadd.f32 1e-05, %v1800_v34 }
 0x38a   : > { %8879 = vrsqrt.f32 %v1809_v45 }
 0x394   : > { %v8880_v6 = vpop.eup %8879 }
 0x395   : > { %v1811_v62 = vmul.f32 %v8880_v6, %v1801_v31  ;;  %v1812_v24 = vmul.f32 %v8880_v6, %v1802_v18  ;;  %v1813_v33 = vmul.f32 %v8880_v6, %v1803_v10  ;;  %v1818_v53 = vmul.f32 %v8880_v6, %v1808_v20 }
 0x396   : > { %v1814_v30 = vmul.f32 %v8880_v6, %v1804_v27  ;;  %v1815_v46 = vmul.f32 %v8880_v6, %v1805_v35  ;;  %v1816_v32 = vmul.f32 %v8880_v6, %v1806_v60  ;;  %v1817_v51 = vmul.f32 %v8880_v6, %v1807_v19 }
 0x397   : > { %vm1819_vm11 = vcmp.ge.f32.partialorder %v1811_v62, 0.0  ;;  %vm1820_vm12 = vcmp.ge.f32.partialorder %v1812_v24, 0.0  ;;  %vm1821_vm13 = vcmp.ge.f32.partialorder %v1813_v33, 0.0  ;;  %v1827_v61 = vmul.f32 0.01, %v1811_v62 }
 0x398   : > { %v1828_v42 = vmul.f32 0.01, %v1812_v24  ;;  %v1829_v57 = vmul.f32 0.01, %v1813_v33  ;;  %vm1826_vm6 = vcmp.ge.f32.partialorder %v1818_v53, 0.0  ;;  %vm1822_vm14 = vcmp.ge.f32.partialorder %v1814_v30, 0.0 }
 0x399   : > { %v1834_v22 = vmul.f32 0.01, %v1818_v53  ;;  %v1835_v3 = vsel %vm1819_vm11, %v1811_v62, %v1827_v61  ;;  %v1830_v40 = vmul.f32 0.01, %v1814_v30  ;;  %v1831_v1 = vmul.f32 0.01, %v1815_v46 }
 0x39a   : > { %v1836_v8 = vsel %vm1820_vm12, %v1812_v24, %v1828_v42  ;;  %v1837_v0 = vsel %vm1821_vm13, %v1813_v33, %v1829_v57  ;;  %vm1823_vm5 = vcmp.ge.f32.partialorder %v1815_v46, 0.0  ;;  %v10790_v14 = vmul.f32 %v1835_v3, %v10727_v17 }
 0x39b   : > { %v1842_v29 = vsel %vm1826_vm6, %v1818_v53, %v1834_v22  ;;  %v10793_v39 = vmul.f32 %v1836_v8, %v10729_v9  ;;  %v10796_v12 = vmul.f32 %v1837_v0, %v10740_v15  ;;  %v1838_v36 = vsel %vm1822_vm14, %v1814_v30, %v1830_v40 }
 0x39c   : > { %v10799_v37 = vmul.f32 %v1842_v29, %v10766_v28  ;;  %v1839_v23 = vsel %vm1823_vm5, %v1815_v46, %v1831_v1  ;;  %v10810_v41 = vmul.f32 %v1838_v36, %v10743_v50  ;;  %v1832_v13 = vmul.f32 0.01, %v1816_v32 }
 0x39d   : > { %v10803_v44 = vpack.i.bf16 %v10793_v39, %v10790_v14  ;;  %v10813_v48 = vmul.f32 %v1839_v23, %v10755_v56  ;;  %vm1824_vm5 = vcmp.ge.f32.partialorder %v1816_v32, 0.0  ;;  %v10854_v54 = vpack.i.bf16 %v10796_v12, %v10793_v39 }
 0x39e   : > { %v10817_v49 = vpack.i.bf16 %v10796_v12, %v10799_v37  ;;  %v1840_v59 = vsel %vm1824_vm5, %v1816_v32, %v1832_v13  ;;  %v10850_v58 = vpack.i.bf16 %v10810_v41, %v10790_v14  ;;  %v1833_v63 = vmul.f32 0.01, %v1817_v51 }
 0x39f   : > { %7385 = vrot.lane.b32.xlu1 %v10803_v44, %s14811_s23  ;;  %7380 = vrot.lane.b32.xlu0 %v10803_v44, %s14809_s8  ;;  %v10825_v2 = vpack.i.bf16 %v10813_v48, %v10810_v41  ;;  %v10846_v55 = vmul.f32 %v1840_v59, %v10757_v26  ;;  %vm1825_vm6 = vcmp.ge.f32.partialorder %v1817_v51, 0.0  ;;  %v10891_v43 = vpack.i.bf16 %v10810_v41, %v10796_v12 }
 0x3a0   : > { %v1841_v5 = vsel %vm1825_vm6, %v1817_v51, %v1833_v63  ;;  %vm14954_vm11 = vcmp.lt.s32.totalorder %v9620_v21, 119  ;;  %vm14955_vm12 = vcmp.lt.s32.totalorder %v9620_v21, 118 }
 0x3a1   : > { %v10864_v7 = vpack.i.bf16 %v10846_v55, %v10813_v48  ;;  %v10879_v11 = vmul.f32 %v1841_v5, %v10759_v52  ;;  %vm14956_vm13 = vmmov %vm14954_vm11 }
 0x3a2   : > { %vm14957_vm14 = vmmov %vm14955_vm12 }
 0x3a3   : > { %7395 = vrot.lane.b32.xlu1 %v10817_v49, %s14811_s23  ;;  %7390 = vrot.lane.b32.xlu0 %v10817_v49, %s14809_s8  ;;  %v10887_v38 = vpack.i.bf16 %v10879_v11, %v10846_v55  ;;  %v10907_v25 = vpack.i.bf16 %v10799_v37, %v10879_v11  ;;  %vm14958_vm5 = vmmov %vm14955_vm12 }
 0x3a4   : > { %vm14959_vm6 = vmmov %vm14954_vm11 }
 0x3a7   : > { %7405 = vrot.lane.b32.xlu1 %v10825_v2, %s14811_s23  ;;  %7400 = vrot.lane.b32.xlu0 %v10825_v2, %s14809_s8 }
 0x3ab   : > { %7415 = vrot.lane.b32.xlu1 %v10803_v44, %s14807_s13  ;;  %7410 = vrot.lane.b32.xlu0 %v10803_v44, %s14936_s16 }
 0x3af   : > { %7425 = vrot.lane.b32.xlu1 %v10817_v49, %s14807_s13  ;;  %7420 = vrot.lane.b32.xlu0 %v10817_v49, %s14936_s16 }
 0x3b3   : > { %7435 = vrot.lane.b32.xlu1 %v10825_v2, %s14807_s13  ;;  %7430 = vrot.lane.b32.xlu0 %v10825_v2, %s14936_s16 }
 0x3b7   : > { %7445 = vrot.lane.b32.xlu1 %v10850_v58, %s14937_s17  ;;  %7440 = vrot.lane.b32.xlu0 %v10854_v54, %s14937_s17 }
 0x3bb   : > { %7455 = vrot.lane.b32.xlu1 %v10854_v54, %s14938_s14  ;;  %7450 = vrot.lane.b32.xlu0 %v10864_v7, %s14937_s17 }
 0x3bf   : > { %7465 = vrot.lane.b32.xlu1 %v10850_v58, %s14938_s14  ;;  %7460 = vrot.lane.b32.xlu0 %v10854_v54, %s14939_s18 }
 0x3c3   : > { %7475 = vrot.lane.b32.xlu1 %v10864_v7, %s14938_s14  ;;  %7470 = vrot.lane.b32.xlu0 %v10850_v58, %s14939_s18 }
 0x3c7   : > { %7485 = vrot.lane.b32.xlu1 %v10803_v44, %s14940_s10  ;;  %7480 = vrot.lane.b32.xlu0 %v10864_v7, %s14939_s18 }
 0x3cb   : > { %7495 = vrot.lane.b32.xlu1 %v10887_v38, %s14809_s8  ;;  %7490 = vrot.lane.b32.xlu0 %v10891_v43, %s14940_s10  ;;  %s14942_s8 = smov 111  }
 0x3cf   : > { %7505 = vrot.lane.b32.xlu1 %v10864_v7, %s14940_s10  ;;  %7500 = vrot.lane.b32.xlu0 %v10887_v38, %s14811_s23  ;;  %s14943_s23 = smov 101  }
 0x3d3   : > { %7515 = vrot.lane.b32.xlu1 %v10887_v38, %s14807_s13  ;;  %7510 = vrot.lane.b32.xlu0 %v10887_v38, %s14936_s16  ;;  %s14941_s13 = smov 110  }
 0x3d7   : > { %7525 = vrot.lane.b32.xlu1 %v10907_v25, %s14938_s14  ;;  %7520 = vrot.lane.b32.xlu0 %v10907_v25, %s14937_s17 }
 0x3db   : > { %7535 = vrot.lane.b32.xlu1 %v10907_v25, %s14940_s10  ;;  %7530 = vrot.lane.b32.xlu0 %v10907_v25, %s14939_s18 }
 0x3df   : > { %7545 = vrot.lane.b32.xlu1 %v10803_v44, %s14941_s13  ;;  %7540 = vrot.lane.b32.xlu0 %v10803_v44, %s14942_s8 }
 0x3e3   : > { %7555 = vrot.lane.b32.xlu1 %v10817_v49, %s14941_s13  ;;  %7550 = vrot.lane.b32.xlu0 %v10817_v49, %s14942_s8 }
 0x3e7   : > { %7565 = vrot.lane.b32.xlu1 %v10825_v2, %s14941_s13  ;;  %7560 = vrot.lane.b32.xlu0 %v10825_v2, %s14942_s8 }
 0x3eb   : > { %7575 = vrot.lane.b32.xlu1 %v10803_v44, %s14943_s23  ;;  %7570 = vrot.lane.b32.xlu0 %v10803_v44, %s14944_s28 }
 0x3ef   : > { %7585 = vrot.lane.b32.xlu1 %v10817_v49, %s14943_s23  ;;  %7580 = vrot.lane.b32.xlu0 %v10817_v49, %s14944_s28 }
 0x3f3   : > { %7595 = vrot.lane.b32.xlu1 %v10825_v2, %s14943_s23  ;;  %7590 = vrot.lane.b32.xlu0 %v10825_v2, %s14944_s28 }
 0x3f7   : > { %7605 = vrot.lane.b32.xlu1 %v10803_v44, %s14945_s29  ;;  %7600 = vrot.lane.b32.xlu0 %v10803_v44, %s14946_s11 }
 0x3fb   : > { %7615 = vrot.lane.b32.xlu1 %v10817_v49, %s14945_s29  ;;  %7610 = vrot.lane.b32.xlu0 %v10817_v49, %s14946_s11 }
 0x3ff   : > { %7625 = vrot.lane.b32.xlu1 %v10825_v2, %s14945_s29  ;;  %7620 = vrot.lane.b32.xlu0 %v10825_v2, %s14946_s11 }
 0x403   : > { %7635 = vrot.lane.b32.xlu1 %v10803_v44, %s14947_s21  ;;  %7630 = vrot.lane.b32.xlu0 %v10803_v44, %s14948_s0 }
 0x407   : > { %7645 = vrot.lane.b32.xlu1 %v10817_v49, %s14947_s21  ;;  %7640 = vrot.lane.b32.xlu0 %v10817_v49, %s14948_s0 }
 0x40b   : > { %7655 = vrot.lane.b32.xlu1 %v10825_v2, %s14947_s21  ;;  %7650 = vrot.lane.b32.xlu0 %v10825_v2, %s14948_s0 }
 0x40f   : > { %7665 = vrot.lane.b32.xlu1 %v10817_v49, %s14949_s1  ;;  %7660 = vrot.lane.b32.xlu0 %v10803_v44, %s14949_s1 }
 0x411   : > { %v7386_v47 = vpop.permute.xlu1 %7385  ;;  %v7381_v4 = vpop.permute.xlu0 %7380 }
 0x412   : > { %v7388_v34 = vunpack.i.h.bf16 %v7386_v47  ;;  %v7387_v45 = vunpack.i.l.bf16 %v7386_v47  ;;  %v7383_v31 = vunpack.i.h.bf16 %v7381_v4  ;;  %v7382_v18 = vunpack.i.l.bf16 %v7381_v4 }
 0x413   : > { %7675 = vrot.lane.b32.xlu1 %v10887_v38, %s14941_s13  ;;  %7670 = vrot.lane.b32.xlu0 %v10887_v38, %s14942_s8 }
 0x414   : > { %v2130_v10 = vsel %vm686_vm1, %v7382_v18, %v7383_v31  ;;  %v2154_v6 = vsel %vm711_vm0, %v7387_v45, %v7388_v34 }
 0x415   : > { %v10977_v20 = vpop.permute.xlu1 %7395  ;;  %v10979_v27 = vpop.permute.xlu0 %7390  ;;  %v2301_v62 = vpack.c.bf16 %v2154_v6, %v2130_v10 }
 0x416   : > { %v7397_v24 = vunpack.i.l.bf16 %v10977_v20  ;;  %v7392_v33 = vunpack.i.l.bf16 %v10979_v27  ;;  %v7398_v35 = vunpack.i.h.bf16 %v10977_v20  ;;  %v7393_v30 = vunpack.i.h.bf16 %v10979_v27 }
 0x417   : > { %7685 = vrot.lane.b32.xlu1 %v10887_v38, %s14944_s28  ;;  %7680 = vrot.lane.b32.xlu0 %v10825_v2, %s14949_s1 }
 0x418   : > { %v2155_v53 = vsel %vm711_vm0, %v7397_v24, %v7387_v45  ;;  %v2131_v46 = vsel %vm686_vm1, %v7392_v33, %v7382_v18  ;;  %2369 = vmatprep.subr.bf16.mxu0 %v2301_v62  ;;  %v2153_v8 = vsel %vm711_vm0, %v7388_v34, %v7398_v35  ;;  %v2129_v40 = vsel %vm686_vm1, %v7383_v31, %v7393_v30 }
 0x419   : > { %v10997_v61 = vpop.permute.xlu1 %7405  ;;  %v10999_v42 = vpop.permute.xlu0 %7400  ;;  %v2300_v57 = vpack.c.bf16 %v2155_v53, %v2131_v46  ;;  %v2302_v13 = vpack.c.bf16 %v2153_v8, %v2129_v40 }
 0x41a   : > { %v7407_v22 = vunpack.i.l.bf16 %v10997_v61  ;;  %v7402_v3 = vunpack.i.l.bf16 %v10999_v42 }
 0x41b   : > { %7695 = vrot.lane.b32.xlu1 %v10887_v38, %s14946_s11  ;;  %7690 = vrot.lane.b32.xlu0 %v10887_v38, %s14943_s23 }
 0x41c   : > { %2370 = vmatpush1.bf16.msra.mxu0 %v2300_v57  ;;  %v2128_v1 = vsel %vm686_vm1, %v7393_v30, %v7402_v3  ;;  %v2152_v0 = vsel %vm711_vm0, %v7398_v35, %v7407_v22 }
 0x41d   : > { %v7416_v29 = vpop.permute.xlu1 %7415  ;;  %v7411_v36 = vpop.permute.xlu0 %7410  ;;  %v2303_v23 = vpack.c.bf16 %v2152_v0, %v2128_v1 }
 0x41e   : > { %v7418_v49 = vunpack.i.h.bf16 %v7416_v29  ;;  %v7417_v2 = vunpack.i.l.bf16 %v7416_v29  ;;  %v7413_v60 = vunpack.i.h.bf16 %v7411_v36  ;;  %v7412_v32 = vunpack.i.l.bf16 %v7411_v36 }
 0x41f   : > { %7705 = vrot.lane.b32.xlu1 %v10887_v38, %s14948_s0  ;;  %7700 = vrot.lane.b32.xlu0 %v10887_v38, %s14945_s29 }
 0x420   : > { %2410 = vmatprep.subr.bf16.mxu1 %v2303_v23  ;;  %v2178_v59 = vsel %vm736_vm2, %v7412_v32, %v7413_v60  ;;  %v2202_v19 = vsel %vm761_vm3, %v7417_v2, %v7418_v49 }
 0x421   : > { %2411 = vmatpush1.bf16.msra.mxu1 %v2302_v13  ;;  %v11027_v51 = vpop.permute.xlu1 %7425  ;;  %v11029_v63 = vpop.permute.xlu0 %7420  ;;  %v2309_v5 = vpack.c.bf16 %v2202_v19, %v2178_v59 }
 0x422   : > { %v14831_v47 = vunpack.i.l.bf16 %v11027_v51  ;;  %v14833_v4 = vunpack.i.l.bf16 %v11029_v63  ;;  %v7428_v34 = vunpack.i.h.bf16 %v11027_v51  ;;  %v7423_v31 = vunpack.i.h.bf16 %v11029_v63 }
 0x423   : > { %7715 = vrot.lane.b32.xlu1 %v10887_v38, %s14949_s1  ;;  %7710 = vrot.lane.b32.xlu0 %v10887_v38, %s14947_s21 }
 0x424   : > { %v2203_v45 = vsel %vm761_vm3, %v14831_v47, %v7417_v2  ;;  %v2179_v18 = vsel %vm736_vm2, %v14833_v4, %v7412_v32  ;;  %2371 = vmatprep.subr.bf16.mxu0 %v2309_v5  ;;  %v2201_v30 = vsel %vm761_vm3, %v7418_v49, %v7428_v34  ;;  %v2177_v46 = vsel %vm736_vm2, %v7413_v60, %v7423_v31 }
 0x425   : > { %v11047_v10 = vpop.permute.xlu1 %7435  ;;  %v11049_v6 = vpop.permute.xlu0 %7430  ;;  %v2308_v62 = vpack.c.bf16 %v2203_v45, %v2179_v18  ;;  %v2310_v49 = vpack.c.bf16 %v2201_v30, %v2177_v46 }
 0x426   : > { %v7437_v35 = vunpack.i.l.bf16 %v11047_v10  ;;  %v7432_v53 = vunpack.i.l.bf16 %v11049_v6 }
 0x427   : > { %7725 = vrot.lane.b32.xlu1 %v10854_v54, %s14950_s2  ;;  %7720 = vrot.lane.b32.xlu0 %v10854_v54, %s14951_s3 }
 0x428   : > { %2372 = vmatpush1.bf16.msra.mxu0 %v2308_v62  ;;  %v2176_v57 = vsel %vm736_vm2, %v7423_v31, %v7432_v53  ;;  %v2200_v8 = vsel %vm761_vm3, %v7428_v34, %v7437_v35 }
 0x429   : > { %v11069_v40 = vpop.permute.xlu1 %7445  ;;  %v7441_v1 = vpop.permute.xlu0 %7440  ;;  %v2311_v0 = vpack.c.bf16 %v2200_v8, %v2176_v57 }
 0x42a   : > { %v14826_v29 = vunpack.i.l.bf16 %v11069_v40  ;;  %v7443_v36 = vunpack.i.h.bf16 %v7441_v1  ;;  %v7442_v23 = vunpack.i.l.bf16 %v7441_v1  ;;  %v7448_v2 = vunpack.i.h.bf16 %v11069_v40 }
 0x42b   : > { %7735 = vrot.lane.b32.xlu1 %v10850_v58, %s14950_s2  ;;  %7730 = vrot.lane.b32.xlu0 %v10850_v58, %s14951_s3 }
 0x42c   : > { %v2226_v60 = vsel %vm786_vm4, %v14826_v29, %v7442_v23  ;;  %2412 = vmatprep.subr.bf16.mxu1 %v2311_v0  ;;  %v2225_v32 = vsel %vm786_vm4, %v7442_v23, %v7443_v36  ;;  %v2224_v45 = vsel %vm786_vm4, %v7443_v36, %v7448_v2 }
 0x42d   : > { %2413 = vmatpush1.bf16.msra.mxu1 %v2310_v49  ;;  %v7456_v13 = vpop.permute.xlu1 %7455  ;;  %v11083_v59 = vpop.permute.xlu0 %7450  ;;  %v2317_v19 = vpack.c.bf16 %v2225_v32, %v10793_v39  ;;  %v2316_v5 = vpack.c.bf16 %v2226_v60, %v10790_v14  ;;  %v2318_v8 = vpack.c.bf16 %v2224_v45, %v10796_v12 }
 0x42e   : > { %v7452_v34 = vunpack.i.l.bf16 %v11083_v59  ;;  %v7458_v31 = vunpack.i.h.bf16 %v7456_v13  ;;  %v7457_v18 = vunpack.i.l.bf16 %v7456_v13  ;;  %v14830_v29 = vunpack.i.h.bf16 %v11083_v59 }
 0x42f   : > { %7745 = vrot.lane.b32.xlu1 %v10864_v7, %s14950_s2  ;;  %7740 = vrot.lane.b32.xlu0 %v10864_v7, %s14951_s3 }
 0x430   : > { %2373 = vmatprep.subr.bf16.mxu0 %v2317_v19  ;;  %v2223_v39 = vsel %vm786_vm4, %v7448_v2, %v7452_v34  ;;  %v2249_v0 = vsel %vm14954_vm11, %v7457_v18, %v7458_v31  ;;  %vm14960_vm11 = vmmov %vm14958_vm5 }
 0x431   : > { %2374 = vmatpush1.bf16.msra.mxu0 %v2316_v5  ;;  %v11098_v14 = vpop.permute.xlu1 %7465  ;;  %v7461_v62 = vpop.permute.xlu0 %7460  ;;  %v2319_v30 = vpack.c.bf16 %v2223_v39, %v10810_v41 }
 0x432   : > { %v7463_v46 = vunpack.i.h.bf16 %v7461_v62  ;;  %v7462_v57 = vunpack.i.l.bf16 %v7461_v62  ;;  %v14821_v1 = vunpack.i.l.bf16 %v11098_v14  ;;  %v7468_v39 = vunpack.i.h.bf16 %v11098_v14 }
 0x433   : > { %7755 = vrot.lane.b32.xlu1 %v10854_v54, %s14952_s5  ;;  %7750 = vrot.lane.b32.xlu0 %v10854_v54, %s14953_s6 }
 0x434   : > { %2414 = vmatprep.subr.bf16.mxu1 %v2319_v30  ;;  %v2273_v36 = vsel %vm14955_vm12, %v7462_v57, %v7463_v46  ;;  %v2250_v12 = vsel %vm14956_vm13, %v14821_v1, %v7457_v18  ;;  %vm14961_vm12 = vcmp.lt.s32.totalorder %v9620_v21, 117  ;;  %v7438_v1 = vunpack.i.h.bf16 %v11047_v10  ;;  %vm14962_vm13 = vmmov %vm14959_vm6 }
 0x435   : > { %2415 = vmatpush1.bf16.msra.mxu1 %v2318_v8  ;;  %v11111_v41 = vpop.permute.xlu1 %7475  ;;  %v11113_v23 = vpop.permute.xlu0 %7470  ;;  %v2325_v49 = vpack.c.bf16 %v2273_v36, %v2249_v0  ;;  %v2248_v16 = vsel %vm14962_vm13, %v7458_v31, %v7468_v39 }
 0x436   : > { %v14824_v2 = vunpack.i.l.bf16 %v11113_v23  ;;  %v14829_v60 = vunpack.i.l.bf16 %v11111_v41  ;;  %v7473_v32 = vunpack.i.h.bf16 %v11113_v23 }
 0x437   : > { %7765 = vrot.lane.b32.xlu1 %v10850_v58, %s14952_s5  ;;  %7760 = vrot.lane.b32.xlu0 %v10850_v58, %s14953_s6 }
 0x438   : > { %v2274_v13 = vsel %vm14957_vm14, %v14824_v2, %v7462_v57  ;;  %2375 = vmatprep.subr.bf16.mxu0 %v2325_v49  ;;  %v2272_v57 = vsel %vm14958_vm5, %v7463_v46, %v7473_v32  ;;  %v2247_v8 = vsel %vm14959_vm6, %v7468_v39, %v14829_v60  ;;  %v7408_v49 = vunpack.i.h.bf16 %v10997_v61  ;;  %vm14965_vm14 = vmmov %vm14961_vm12 }
 0x439   : > { %v11130_v19 = vpop.permute.xlu1 %7485  ;;  %v11132_v5 = vpop.permute.xlu0 %7480  ;;  %v2324_v45 = vpack.c.bf16 %v2274_v13, %v2250_v12  ;;  %v7403_v46 = vunpack.i.h.bf16 %v10999_v42  ;;  %vm14966_vm5 = vmmov %vm14961_vm12  ;;  %v11190_v61 = vsel %vm761_vm3, %v7437_v35, %v7438_v1 }
 0x43a   : > { %v7488_v62 = vunpack.i.h.bf16 %v11130_v19  ;;  %v14828_v18 = vunpack.i.l.bf16 %v11130_v19  ;;  %v14825_v30 = vunpack.i.l.bf16 %v11132_v5  ;;  %v2151_v39 = vsel %vm711_vm0, %v7407_v22, %v7408_v49  ;;  %vm14967_vm6 = vmmov %vm14966_vm5 }
 0x43b   : > { %7775 = vrot.lane.b32.xlu1 %v10864_v7, %s14952_s5  ;;  %7770 = vrot.lane.b32.xlu0 %v10864_v7, %s14953_s6 }
 0x43c   : > { %2376 = vmatpush1.bf16.msra.mxu0 %v2324_v45  ;;  %v2271_v0 = vsel %vm14960_vm11, %v7473_v32, %v14825_v30  ;;  %v2298_v36 = vsel %vm14961_vm12, %v14828_v18, %v7488_v62  ;;  %v7433_v30 = vunpack.i.h.bf16 %v11049_v6  ;;  %v2326_v18 = vpack.c.bf16 %v2272_v57, %v2248_v16  ;;  %vm14974_vm11 = vmmov %vm14962_vm13 }
 0x43d   : > { %v11158_v12 = vpop.permute.xlu1 %7495  ;;  %v7491_v13 = vpop.permute.xlu0 %7490  ;;  %v2327_v45 = vpack.c.bf16 %v2271_v0, %v2247_v8  ;;  %v2332_v60 = vpack.c.bf16 %v2298_v36, %v2298_v36  ;;  %v2127_v0 = vsel %vm686_vm1, %v7402_v3, %v7403_v46  ;;  %vm14977_vm12 = vcmp.lt.s32.totalorder %v9620_v21, 118  ;;  %vm14979_vm13 = vmmov %vm14966_vm5 }
 0x43e   : > { %v7493_v2 = vunpack.i.h.bf16 %v7491_v13  ;;  %v7492_v32 = vunpack.i.l.bf16 %v7491_v13  ;;  %v7497_v8 = vunpack.i.l.bf16 %v11158_v12  ;;  %v7498_v35 = vunpack.i.h.bf16 %v11158_v12 }
 0x43f   : > { %7785 = vrot.lane.b32.xlu1 %v10854_v54, %s14963_s12  ;;  %7780 = vrot.lane.b32.xlu0 %v10854_v54, %s14964_s26  ;;  %v2346_v6 = vsel %vm916_vm8, %v2332_v60, 0  ;;  %v2304_v60 = vpack.c.bf16 %v2151_v39, %v2127_v0 }
 0x440   : > { %2416 = vmatprep.subr.bf16.mxu1 %v2327_v45  ;;  %v2297_v31 = vsel %vm14965_vm14, %v7488_v62, %v7492_v32  ;;  %v2296_v36 = vsel %vm14966_vm5, %v7492_v32, %v7493_v2  ;;  %v11197_v62 = vsel %vm736_vm2, %v7432_v53, %v7433_v30  ;;  %v2124_v20 = vsel %vm686_vm1, %v7498_v35, %v7392_v33  ;;  %vm14980_vm14 = vmmov %vm14974_vm11 }
 0x441   : > { %2417 = vmatpush1.bf16.msra.mxu1 %v2326_v18  ;;  %v11180_v13 = vpop.permute.xlu1 %7505  ;;  %v7501_v16 = vpop.permute.xlu0 %7500  ;;  %v2333_v57 = vpack.c.bf16 %v2297_v31, %v2297_v31  ;;  %v11205_v18 = vsel %vm786_vm4, %v7452_v34, %v14830_v29  ;;  %v2126_v34 = vsel %vm686_vm1, %v7403_v46, %v7497_v8  ;;  %v2334_v45 = vpack.c.bf16 %v2296_v36, %v2296_v36  ;;  %v11226_v46 = vld [vmem:[#allocation7 + $0x4] sm:$0xf]  ;;  %vm14981_vm5 = vmmov %vm14977_vm12 }
 0x442   : > { %v14832_v42 = vunpack.i.l.bf16 %v11180_v13  ;;  %v7503_v22 = vunpack.i.h.bf16 %v7501_v16  ;;  %v7502_v3 = vunpack.i.l.bf16 %v7501_v16  ;;  %v7478_v33 = vunpack.i.h.bf16 %v11111_v41 }
 0x443   : > { %7795 = vrot.lane.b32.xlu1 %v10850_v58, %s14963_s12  ;;  %7790 = vrot.lane.b32.xlu0 %v10850_v58, %s14964_s26  ;;  %v2352_v0 = vsel %vm916_vm8, %v2334_v45, 0 }
 0x444   : > { %6546 = vmatprep.subr.msk.bf16.mxu0 %vm916_vm8, %v2333_v57  ;;  %v2295_v53 = vsel %vm14967_vm6, %v7493_v2, %v14832_v42  ;;  %v2150_v12 = vsel %vm711_vm0, %v7408_v49, %v7502_v3  ;;  %v2148_v57 = vsel %vm711_vm0, %v7503_v22, %v7397_v24  ;;  %v2312_v24 = vpack.c.bf16 %v11190_v61, %v11197_v62 }
 0x445   : > { %2378 = vmatpush1.bf16.msra.mxu0 %v2346_v6  ;;  %v7516_v32 = vpop.permute.xlu1 %7515  ;;  %v7511_v31 = vpop.permute.xlu0 %7510  ;;  %v2335_v16 = vpack.c.bf16 %v2295_v53, %v2295_v53  ;;  %v2305_v29 = vpack.c.bf16 %v2150_v12, %v2126_v34  ;;  %v2320_v49 = vpack.c.bf16 %v11205_v18, %v10813_v48  ;;  %v2149_v39 = vsel %vm711_vm0, %v7502_v3, %v7503_v22 }
 0x446   : > { %v7518_v47 = vunpack.i.h.bf16 %v7516_v32  ;;  %v7517_v2 = vunpack.i.l.bf16 %v7516_v32  ;;  %v7513_v42 = vunpack.i.h.bf16 %v7511_v31  ;;  %v7512_v4 = vunpack.i.l.bf16 %v7511_v31 }
 0x447   : > { %2852 = vrot.lane.b32.xlu1 %v10813_v48, %s14963_s12  ;;  %7800 = vrot.lane.b32.xlu0 %v10864_v7, %s14964_s26  ;;  %v2307_v7 = vpack.c.bf16 %v2148_v57, %v2124_v20  ;;  %v14968_v22 = vunpack.i.l.bf16 %v11029_v63  ;;  %v7483_v6 = vunpack.i.h.bf16 %v11132_v5  ;;  %v2125_v53 = vsel %vm686_vm1, %v7497_v8, %v7498_v35 }
 0x448   : > { %6548 = vmatprep.subr.msk.bf16.mxu1 %vm916_vm8, %v2335_v16  ;;  %2451 = vmatprep.subr.bf16.mxu0 %v2305_v29  ;;  %v2174_v27 = vsel %vm736_vm2, %v7433_v30, %v7512_v4  ;;  %v2198_v29 = vsel %vm761_vm3, %v7438_v1, %v7517_v2  ;;  %v14969_v30 = vunpack.i.l.bf16 %v11027_v51  ;;  %v7508_v1 = vunpack.i.h.bf16 %v11180_v13 }
 0x449   : > { %6547 = vmatmul.mubr.msk.bf16.vlgmr.msra.gmra.mrb[8].mxu0 %vm912_vm9, %v11226_v46  ;;  %2419 = vmatpush1.bf16.msra.mxu1 %v2352_v0  ;;  %v11249_v36 = vpop.permute.xlu1 %7525  ;;  %v7521_v61 = vpop.permute.xlu0 %7520  ;;  %v2172_v3 = vsel %vm736_vm2, %v7513_v42, %v14968_v22  ;;  %v2197_v63 = vsel %vm761_vm3, %v7517_v2, %v7518_v47  ;;  %v2313_v51 = vpack.c.bf16 %v2198_v29, %v2174_v27  ;;  %v14972_v32 = vunpack.i.h.bf16 %v11083_v59 }
 0x44a   : > { %v2196_v62 = vsel %vm761_vm3, %v7518_v47, %v14969_v30  ;;  %2452 = vmatpush1.bf16.msra.mxu0 %v2304_v60  ;;  %v7523_v10 = vunpack.i.h.bf16 %v7521_v61  ;;  %v7522_v34 = vunpack.i.l.bf16 %v7521_v61  ;;  %2492 = vmatprep.subr.bf16.mxu1 %v2307_v7  ;;  %v2306_v12 = vpack.c.bf16 %v2149_v39, %v2125_v53 }
 0x44b   : > { %7810 = vrot.lane.b32.xlu1 %v10854_v54, %s14970_s25  ;;  %7805 = vrot.lane.b32.xlu0 %v10854_v54, %s14971_s19  ;;  %v2173_v8 = vsel %vm736_vm2, %v7512_v4, %v7513_v42  ;;  %v7527_v35 = vunpack.i.l.bf16 %v11249_v36  ;;  %v2315_v45 = vpack.c.bf16 %v2196_v62, %v2172_v3  ;;  %v14973_v31 = vunpack.i.l.bf16 %v11111_v41 }
 0x44c   : > { %6549 = vmatmul.mubr.msk.bf16.vlgmr.msra.gmra.mrb[8].mxu1 %vm912_vm9, %v11226_v46  ;;  %v2221_v47 = vsel %vm786_vm4, %v14972_v32, %v7522_v34  ;;  %2453 = vmatprep.subr.bf16.mxu0 %v2313_v51  ;;  %v14975_v60 = vunpack.i.l.bf16 %v11069_v40  ;;  %v14976_v59 = vunpack.i.l.bf16 %v11132_v5  ;;  %v7528_v0 = vunpack.i.h.bf16 %v11249_v36 }
 0x44d   : > { %v2246_v54 = vsel %vm14974_vm11, %v14973_v31, %v7478_v33  ;;  %2493 = vmatpush1.bf16.msra.mxu1 %v2306_v12  ;;  %v7536_v16 = vpop.permute.xlu1 %7535  ;;  %v7531_v4 = vpop.permute.xlu0 %7530  ;;  %v2321_v42 = vpack.c.bf16 %v2221_v47, %v10846_v55  ;;  %v2220_v55 = vsel %vm786_vm4, %v7522_v34, %v7523_v10  ;;  %v2314_v40 = vpack.c.bf16 %v2197_v63, %v2173_v8  ;;  %vm14983_vm11 = vmmov %vm14981_vm5 }
 0x44e   : > { %v2227_v57 = vsel %vm786_vm4, %v7523_v10, %v14975_v60  ;;  %v2270_v2 = vsel %vm14977_vm12, %v14976_v59, %v7483_v6  ;;  %2454 = vmatpush1.bf16.msra.mxu0 %v2312_v24  ;;  %v7537_v41 = vunpack.i.l.bf16 %v7536_v16  ;;  %v7533_v20 = vunpack.i.h.bf16 %v7531_v4  ;;  %2494 = vmatprep.subr.bf16.mxu1 %v2315_v45  ;;  %vm14986_vm12 = vmmov %vm14980_vm14 }
 0x44f   : > { %v7532_v39 = vunpack.i.l.bf16 %v7531_v4  ;;  %7820 = vrot.lane.b32.xlu1 %v10850_v58, %s14970_s25  ;;  %7815 = vrot.lane.b32.xlu0 %v10850_v58, %s14971_s19  ;;  %v14978_v5 = vunpack.i.l.bf16 %v11180_v13  ;;  %v7538_v7 = vunpack.i.h.bf16 %v7536_v16  ;;  %v2323_v27 = vpack.c.bf16 %v2227_v57, %v10799_v37 }
 0x450   : > { %2455 = vmatprep.subr.bf16.mxu0 %v2321_v42  ;;  %v2245_v36 = vsel %vm14980_vm14, %v7478_v33, %v7527_v35  ;;  %v2293_v13 = vsel %vm14967_vm6, %v7508_v1, %v7537_v41  ;;  %v14982_v3 = vunpack.i.l.bf16 %v11113_v23  ;;  %v14984_v62 = vmov 0   ;;  %vm14989_vm14 = vmmov %vm14967_vm6 }
 0x451   : > { %v2294_v24 = vsel %vm14979_vm13, %v14978_v5, %v7508_v1  ;;  %v2269_v61 = vsel %vm14981_vm5, %v7483_v6, %v7532_v39  ;;  %2495 = vmatpush1.bf16.msra.mxu1 %v2314_v40  ;;  %v7546_v29 = vpop.permute.xlu1 %7545  ;;  %v7541_v22 = vpop.permute.xlu0 %7540  ;;  %2483 = vmatprep.mubr.bf16.mxu0 %v14984_v62  ;;  %v2328_v23 = vpack.c.bf16 %v2270_v2, %v2246_v54  ;;  %v14985_v1 = vunpack.i.l.bf16 %v11098_v14  ;;  %vm14987_vm13 = vmmov %vm14981_vm5 }
 0x452   : > { %v2329_v58 = vpack.c.bf16 %v2269_v61, %v2245_v36  ;;  %v2275_v30 = vsel %vm14983_vm11, %v7533_v20, %v14982_v3  ;;  %2456 = vmatpush1.bf16.msra.mxu0 %v2320_v49  ;;  %v7548_v33 = vunpack.i.h.bf16 %v7546_v29  ;;  %v7547_v6 = vunpack.i.l.bf16 %v7546_v29  ;;  %2496 = vmatprep.subr.bf16.mxu1 %v2323_v27  ;;  %vm14990_vm5 = vmmov %vm14967_vm6 }
 0x453   : > { %v7543_v53 = vunpack.i.h.bf16 %v7541_v22  ;;  %v7542_v10 = vunpack.i.l.bf16 %v7541_v22  ;;  %2900 = vrot.lane.b32.xlu1 %v10813_v48, %s14970_s25  ;;  %2876 = vrot.lane.b32.xlu0 %v10813_v48, %s14971_s19  ;;  %v2322_v34 = vpack.c.bf16 %v2220_v55, %v10879_v11  ;;  %v2251_v18 = vsel %vm14986_vm12, %v7528_v0, %v14985_v1  ;;  %vm14991_vm6 = vmmov %vm14986_vm12 }
 0x454   : > { %v2268_v49 = vsel %vm14987_vm13, %v7532_v39, %v7533_v20  ;;  %2457 = vmatprep.subr.bf16.mxu0 %v2329_v58  ;;  %v2331_v63 = vpack.c.bf16 %v2275_v30, %v2251_v18  ;;  %v14988_v51 = vunpack.i.l.bf16 %v11130_v19  ;;  %v2292_v8 = vsel %vm14990_vm5, %v7537_v41, %v7538_v7  ;;  %2524 = vmatprep.mubr.bf16.mxu1 %v14984_v62 }
 0x455   : > { %v2244_v11 = vsel %vm14991_vm6, %v7527_v35, %v7528_v0  ;;  %2497 = vmatpush1.bf16.msra.mxu1 %v2322_v34  ;;  %v11340_v14 = vpop.permute.xlu1 %7555  ;;  %v11342_v45 = vpop.permute.xlu0 %7550  ;;  %v2337_v32 = vpack.c.bf16 %v2293_v13, %v2293_v13  ;;  %v2336_v47 = vpack.c.bf16 %v2294_v24, %v2294_v24  ;;  %vm14992_vm11 = vcmp.lt.s32.totalorder %v9620_v21, 111 }
 0x456   : > { %v2299_v12 = vsel %vm14989_vm14, %v7538_v7, %v14988_v51  ;;  %2458 = vmatpush1.bf16.msra.mxu0 %v2328_v23  ;;  %v7557_v19 = vunpack.i.l.bf16 %v11340_v14  ;;  %v7552_v31 = vunpack.i.l.bf16 %v11342_v45  ;;  %2498 = vmatprep.subr.bf16.mxu1 %v2331_v63  ;;  %v1873_v54 = vsel %vm14992_vm11, %v7542_v10, %v7543_v53  ;;  %vm14996_vm14 = vmmov %vm14992_vm11 }
 0x457   : > { %vm14993_vm12 = vcmp.lt.s32.totalorder %v9620_v21, 110  ;;  %6550 = vmatprep.subr.msk.bf16.mxu0 %vm916_vm8, %v2337_v32  ;;  %7830 = vrot.lane.b32.xlu1 %v10891_v43, %s14994_s27  ;;  %v2330_v16 = vpack.c.bf16 %v2268_v49, %v2244_v11  ;;  %v2339_v4 = vpack.c.bf16 %v2299_v12, %v2299_v12  ;;  %v2338_v42 = vpack.c.bf16 %v2292_v8, %v2292_v8  ;;  %vm14998_vm6 = vmmov %vm14992_vm11 }
 0x458   : > { %v1897_v35 = vsel %vm14993_vm12, %v7547_v6, %v7548_v33  ;;  %v7558_v60 = vunpack.i.h.bf16 %v11340_v14  ;;  %vm14995_vm13 = vmmov %vm14993_vm12  ;;  %v7553_v59 = vunpack.i.h.bf16 %v11342_v45  ;;  %v1874_v2 = vsel %vm14996_vm14, %v7552_v31, %v7542_v10  ;;  %7825 = vrot.lane.b32.xlu0 %v10803_v44, %s14994_s27 }
 0x459   : > { %v1898_v57 = vsel %vm14995_vm13, %v7557_v19, %v7547_v6  ;;  %v2358_v43 = vsel %vm916_vm8, %v2336_v47, 0  ;;  %2499 = vmatpush1.bf16.msra.mxu1 %v2330_v16  ;;  %v11367_v41 = vpop.permute.xlu1 %7565  ;;  %v11369_v20 = vpop.permute.xlu0 %7560  ;;  %v2068_v39 = vpack.c.bf16 %v1897_v35, %v1873_v54  ;;  %v2364_v44 = vsel %vm916_vm8, %v2338_v42, 0  ;;  %vm14997_vm5 = vmmov %vm14993_vm12 }
 0x45a   : > { %2460 = vmatpush1.bf16.msra.mxu0 %v2358_v43  ;;  %v7567_v0 = vunpack.i.l.bf16 %v11367_v41  ;;  %v7562_v55 = vunpack.i.l.bf16 %v11369_v20  ;;  %6552 = vmatprep.subr.msk.bf16.mxu1 %vm916_vm8, %v2339_v4  ;;  %v2067_v40 = vpack.c.bf16 %v1898_v57, %v1874_v2  ;;  %v1896_v5 = vsel %vm14997_vm5, %v7548_v33, %v7558_v60  ;;  %vm14999_vm11 = vmmov %vm14998_vm6 }
 0x45b   : > { %2560 = vmatprep.subr.bf16.mxu0 %v2068_v39  ;;  %7840 = vrot.lane.b32.xlu1 %v10907_v25, %s14950_s2  ;;  %v1872_v24 = vsel %vm14998_vm6, %v7543_v53, %v7553_v59  ;;  %vm15000_vm12 = vmmov %vm14997_vm5  ;;  %vm15001_vm13 = vcmp.lt.s32.totalorder %v9620_v21, 109  ;;  %vm15002_vm14 = vcmp.lt.s32.totalorder %v9620_v21, 101 }
 0x45c   : > { %7835 = vrot.lane.b32.xlu0 %v10907_v25, %s14951_s3  ;;  %v1871_v7 = vsel %vm14999_vm11, %v7553_v59, %v7562_v55  ;;  %v1895_v27 = vsel %vm15000_vm12, %v7558_v60, %v7567_v0  ;;  %v2069_v30 = vpack.c.bf16 %v1896_v5, %v1872_v24  ;;  %vm15003_vm5 = vmmov %vm15002_vm14 }
 0x45d   : > { %6551 = vmatmul.mubr.msk.bf16.vlgmr.msra.gmra.mrb[12].mxu0 %vm912_vm9, %v11226_v46  ;;  %2501 = vmatpush1.bf16.msra.mxu1 %v2364_v44  ;;  %v7576_v36 = vpop.permute.xlu1 %7575  ;;  %v7571_v61 = vpop.permute.xlu0 %7570  ;;  %v2070_v29 = vpack.c.bf16 %v1895_v27, %v1871_v7  ;;  %vm15004_vm6 = vmmov %vm15001_vm13 }
 0x45e   : > { %2561 = vmatpush1.bf16.msra.mxu0 %v2067_v40  ;;  %v7578_v22 = vunpack.i.h.bf16 %v7576_v36  ;;  %v7577_v58 = vunpack.i.l.bf16 %v7576_v36  ;;  %v7573_v13 = vunpack.i.h.bf16 %v7571_v61  ;;  %v7572_v3 = vunpack.i.l.bf16 %v7571_v61  ;;  %2592 = vmatprep.mubr.bf16.mxu0 %v14984_v62  ;;  %vm15005_vm11 = vmmov %vm15003_vm5 }
 0x45f   : > { %7845 = vrot.lane.b32.xlu1 %v10907_v25, %s14953_s6  ;;  %2601 = vmatprep.subr.bf16.mxu1 %v2070_v29  ;;  %vm15006_vm12 = vmmov %vm15004_vm6 }
 0x460   : > { %2924 = vrot.lane.b32.xlu0 %v10813_v48, %s14994_s27  ;;  %6553 = vmatmul.mubr.msk.bf16.vlgmr.msra.gmra.mrb[12].mxu1 %vm912_vm9, %v11226_v46  ;;  %v1921_v33 = vsel %vm15001_vm13, %v7572_v3, %v7573_v13  ;;  %v1945_v6 = vsel %vm15002_vm14, %v7577_v58, %v7578_v22  ;;  %vm15007_vm13 = vmmov %vm15004_vm6 }
 0x461   : > { %2602 = vmatpush1.bf16.msra.mxu1 %v2069_v30  ;;  %v11404_v53 = vpop.permute.xlu1 %7585  ;;  %v11406_v10 = vpop.permute.xlu0 %7580  ;;  %v2076_v23 = vpack.c.bf16 %v1945_v6, %v1921_v33  ;;  %2633 = vmatprep.mubr.bf16.mxu1 %v14984_v62  ;;  %vm15008_vm14 = vmmov %vm15003_vm5 }
 0x462   : > { %v7588_v34 = vunpack.i.h.bf16 %v11404_v53  ;;  %v7587_v48 = vunpack.i.l.bf16 %v11404_v53  ;;  %v7583_v46 = vunpack.i.h.bf16 %v11406_v10  ;;  %v7582_v1 = vunpack.i.l.bf16 %v11406_v10 }
 0x463   : > { %7855 = vrot.lane.b32.xlu1 %v10907_v25, %s14964_s26  ;;  %2562 = vmatprep.subr.bf16.mxu0 %v2076_v23 }
 0x464   : > { %v1946_v18 = vsel %vm15003_vm5, %v7587_v48, %v7577_v58  ;;  %v1922_v49 = vsel %vm15004_vm6, %v7582_v1, %v7572_v3  ;;  %7850 = vrot.lane.b32.xlu0 %v10907_v25, %s14952_s5  ;;  %v1944_v8 = vsel %vm15005_vm11, %v7578_v22, %v7588_v34  ;;  %v1920_v11 = vsel %vm15006_vm12, %v7573_v13, %v7583_v46 }
 0x465   : > { %v11425_v63 = vpop.permute.xlu1 %7595  ;;  %v11427_v51 = vpop.permute.xlu0 %7590  ;;  %v2075_v12 = vpack.c.bf16 %v1946_v18, %v1922_v49  ;;  %v2077_v42 = vpack.c.bf16 %v1944_v8, %v1920_v11  ;;  %vm15009_vm5 = vcmp.lt.s32.totalorder %v9620_v21, 100  ;;  %vm15010_vm6 = vcmp.lt.s32.totalorder %v9620_v21, 99 }
 0x466   : > { %v7597_v32 = vunpack.i.l.bf16 %v11425_v63  ;;  %v7592_v47 = vunpack.i.l.bf16 %v11427_v51  ;;  %vm15011_vm11 = vmmov %vm15010_vm6 }
 0x467   : > { %2858 = vrot.lane.b32.xlu1 %v10799_v37, %s14963_s12  ;;  %2563 = vmatpush1.bf16.msra.mxu0 %v2075_v12  ;;  %vm15012_vm12 = vmmov %vm15009_vm5 }
 0x468   : > { %7860 = vrot.lane.b32.xlu0 %v10887_v38, %s14963_s12  ;;  %v1919_v25 = vsel %vm15007_vm13, %v7583_v46, %v7592_v47  ;;  %v1943_v54 = vsel %vm15008_vm14, %v7588_v34, %v7597_v32  ;;  %vm15013_vm13 = vmmov %vm15010_vm6 }
 0x469   : > { %v7606_v35 = vpop.permute.xlu1 %7605  ;;  %v7601_v16 = vpop.permute.xlu0 %7600  ;;  %v2078_v4 = vpack.c.bf16 %v1943_v54, %v1919_v25  ;;  %vm15014_vm14 = vmmov %vm15009_vm5 }
 0x46a   : > { %v7608_v60 = vunpack.i.h.bf16 %v7606_v35  ;;  %v7607_v57 = vunpack.i.l.bf16 %v7606_v35  ;;  %v7603_v59 = vunpack.i.h.bf16 %v7601_v16  ;;  %v7602_v2 = vunpack.i.l.bf16 %v7601_v16 }
 0x46b   : > { %7870 = vrot.lane.b32.xlu1 %v10887_v38, %s14970_s25  ;;  %2603 = vmatprep.subr.bf16.mxu1 %v2078_v4 }
 0x46c   : > { %7865 = vrot.lane.b32.xlu0 %v10887_v38, %s14971_s19  ;;  %2604 = vmatpush1.bf16.msra.mxu1 %v2077_v42  ;;  %v1969_v43 = vsel %vm15009_vm5, %v7602_v2, %v7603_v59  ;;  %v1993_v39 = vsel %vm15010_vm6, %v7607_v57, %v7608_v60 }
 0x46d   : > { %v11455_v40 = vpop.permute.xlu1 %7615  ;;  %v11457_v44 = vpop.permute.xlu0 %7610  ;;  %v2084_v5 = vpack.c.bf16 %v1993_v39, %v1969_v43 }
 0x46e   : > { %v7618_v24 = vunpack.i.h.bf16 %v11455_v40  ;;  %v7617_v7 = vunpack.i.l.bf16 %v11455_v40  ;;  %v7613_v27 = vunpack.i.h.bf16 %v11457_v44  ;;  %v7612_v36 = vunpack.i.l.bf16 %v11457_v44 }
 0x46f   : > { %2906 = vrot.lane.b32.xlu1 %v10799_v37, %s14970_s25  ;;  %2564 = vmatprep.subr.bf16.mxu0 %v2084_v5 }
 0x470   : > { %v1994_v61 = vsel %vm15011_vm11, %v7617_v7, %v7607_v57  ;;  %v1970_v29 = vsel %vm15012_vm12, %v7612_v36, %v7602_v2  ;;  %2882 = vrot.lane.b32.xlu0 %v10799_v37, %s14971_s19  ;;  %v1992_v3 = vsel %vm15013_vm13, %v7608_v60, %v7618_v24  ;;  %v1968_v30 = vsel %vm15014_vm14, %v7603_v59, %v7613_v27 }
 0x471   : > { %v11475_v22 = vpop.permute.xlu1 %7625  ;;  %v11477_v58 = vpop.permute.xlu0 %7620  ;;  %v2083_v13 = vpack.c.bf16 %v1994_v61, %v1970_v29  ;;  %v2085_v12 = vpack.c.bf16 %v1992_v3, %v1968_v30  ;;  %vm15015_vm11 = vcmp.lt.s32.totalorder %v9620_v21, 91  ;;  %vm15016_vm12 = vcmp.lt.s32.totalorder %v9620_v21, 90 }
 0x472   : > { %v7627_v33 = vunpack.i.l.bf16 %v11475_v22  ;;  %v7622_v6 = vunpack.i.l.bf16 %v11477_v58  ;;  %vm15017_vm13 = vmmov %vm15016_vm12 }
 0x473   : > { %2930 = vrot.lane.b32.xlu1 %v10799_v37, %s14994_s27  ;;  %2565 = vmatpush1.bf16.msra.mxu0 %v2083_v13  ;;  %vm15018_vm14 = vmmov %vm15015_vm11 }
 0x474   : > { %7875 = vrot.lane.b32.xlu0 %v10887_v38, %s14994_s27  ;;  %v1967_v23 = vsel %vm15009_vm5, %v7613_v27, %v7622_v6  ;;  %v1991_v34 = vsel %vm15010_vm6, %v7618_v24, %v7627_v33  ;;  %vm15019_vm5 = vmmov %vm15016_vm12 }
 0x475   : > { %v7636_v46 = vpop.permute.xlu1 %7635  ;;  %v7631_v18 = vpop.permute.xlu0 %7630  ;;  %v2086_v49 = vpack.c.bf16 %v1991_v34, %v1967_v23  ;;  %vm15020_vm6 = vmmov %vm15015_vm11  ;;  %v7568_v23 = vunpack.i.h.bf16 %v11367_v41  ;;  %v7563_v34 = vunpack.i.h.bf16 %v11369_v20 }
 0x476   : > { %v7638_v8 = vunpack.i.h.bf16 %v7636_v46  ;;  %v7637_v37 = vunpack.i.l.bf16 %v7636_v46  ;;  %v7633_v11 = vunpack.i.h.bf16 %v7631_v18  ;;  %v7632_v25 = vunpack.i.l.bf16 %v7631_v18 }
 0x477   : > { %2605 = vmatprep.subr.bf16.mxu1 %v2086_v49 }
 0x478   : > { %2606 = vmatpush1.bf16.msra.mxu1 %v2085_v12  ;;  %v2017_v38 = vsel %vm15015_vm11, %v7632_v25, %v7633_v11  ;;  %v2041_v54 = vsel %vm15016_vm12, %v7637_v37, %v7638_v8  ;;  %vm15021_vm11 = vmmov %vm15020_vm6 }
 0x479   : > { %v11501_v35 = vpop.permute.xlu1 %7645  ;;  %v11503_v16 = vpop.permute.xlu0 %7640  ;;  %v2092_v4 = vpack.c.bf16 %v2041_v54, %v2017_v38  ;;  %vm15022_vm12 = vmmov %vm15019_vm5  ;;  %v7593_v38 = vunpack.i.h.bf16 %v11427_v51 }
 0x47a   : > { %v14839_v42 = vunpack.i.l.bf16 %v11501_v35  ;;  %v7642_v60 = vunpack.i.l.bf16 %v11503_v16  ;;  %v7648_v57 = vunpack.i.h.bf16 %v11501_v35  ;;  %v7643_v59 = vunpack.i.h.bf16 %v11503_v16 }
 0x47b   : > { %2566 = vmatprep.subr.bf16.mxu0 %v2092_v4 }
 0x47c   : > { %v2042_v2 = vsel %vm15017_vm13, %v14839_v42, %v7637_v37  ;;  %v2018_v43 = vsel %vm15018_vm14, %v7642_v60, %v7632_v25  ;;  %v2040_v29 = vsel %vm15019_vm5, %v7638_v8, %v7648_v57  ;;  %v2016_v13 = vsel %vm15020_vm6, %v7633_v11, %v7643_v59 }
 0x47d   : > { %v11517_v39 = vpop.permute.xlu1 %7655  ;;  %v11519_v5 = vpop.permute.xlu0 %7650  ;;  %v2091_v24 = vpack.c.bf16 %v2042_v2, %v2018_v43  ;;  %v2093_v11 = vpack.c.bf16 %v2040_v29, %v2016_v13  ;;  %v7598_v25 = vunpack.i.h.bf16 %v11425_v63  ;;  %vm15023_vm13 = vcmp.lt.s32.totalorder %v9620_v21, 89 }
 0x47e   : > { %v7657_v27 = vunpack.i.l.bf16 %v11517_v39  ;;  %v7652_v61 = vunpack.i.l.bf16 %v11519_v5  ;;  %vm15024_vm14 = vmmov %vm15023_vm13  ;;  %vm15025_vm5 = vcmp.lt.s32.totalorder %v9620_v21, 110  ;;  %vm15026_vm6 = vcmp.lt.s32.totalorder %v9620_v21, 111 }
 0x47f   : > { %2567 = vmatpush1.bf16.msra.mxu0 %v2091_v24  ;;  %v1870_v2 = vsel %vm15026_vm6, %v7562_v55, %v7563_v34 }
 0x480   : > { %v2015_v3 = vsel %vm15021_vm11, %v7643_v59, %v7652_v61  ;;  %v2039_v30 = vsel %vm15022_vm12, %v7648_v57, %v7657_v27  ;;  %v1894_v59 = vsel %vm15025_vm5, %v7567_v0, %v7568_v23  ;;  %vm15027_vm11 = vcmp.lt.s32.totalorder %v9620_v21, 101 }
 0x481   : > { %v11537_v46 = vpop.permute.xlu1 %7665  ;;  %v7661_v18 = vpop.permute.xlu0 %7660  ;;  %v2094_v49 = vpack.c.bf16 %v2039_v30, %v2015_v3  ;;  %v7628_v3 = vunpack.i.h.bf16 %v11475_v22  ;;  %v7623_v30 = vunpack.i.h.bf16 %v11477_v58  ;;  %v11565_v41 = vsel %vm15027_vm11, %v7597_v32, %v7598_v25 }
 0x482   : > { %v14838_v12 = vunpack.i.l.bf16 %v11537_v46  ;;  %v7663_v8 = vunpack.i.h.bf16 %v7661_v18  ;;  %v7662_v37 = vunpack.i.l.bf16 %v7661_v18  ;;  %v7668_v54 = vunpack.i.h.bf16 %v11537_v46 }
 0x483   : > { %2607 = vmatprep.subr.bf16.mxu1 %v2094_v49  ;;  %vm15028_vm12 = vcmp.lt.s32.totalorder %v9620_v21, 109  ;;  %vm15031_vm11 = vcmp.lt.s32.totalorder %v9620_v21, 100  ;;  %v15059_v16 = vunpack.i.l.bf16 %v11537_v46 }
 0x484   : > { %2608 = vmatpush1.bf16.msra.mxu1 %v2093_v11  ;;  %v2065_v4 = vsel %vm15023_vm13, %v7662_v37, %v7663_v8  ;;  %v2066_v57 = vsel %vm15024_vm14, %v14838_v12, %v7662_v37  ;;  %v11573_v20 = vsel %vm15028_vm12, %v7592_v47, %v7593_v38  ;;  %v2064_v55 = vsel %vm15023_vm13, %v7663_v8, %v7668_v54  ;;  %vm15029_vm14 = vmmov %vm15026_vm6 }
 0x485   : > { %v7676_v43 = vpop.permute.xlu1 %7675  ;;  %v7671_v24 = vpop.permute.xlu0 %7670  ;;  %v2100_v29 = vpack.c.bf16 %v2065_v4, %v2065_v4  ;;  %v2099_v13 = vpack.c.bf16 %v2066_v57, %v2066_v57  ;;  %v11583_v57 = vld [vmem:[#allocation7] sm:$0xf]  ;;  %v7658_v47 = vunpack.i.h.bf16 %v11517_v39  ;;  %v2071_v8 = vpack.c.bf16 %v1894_v59, %v1870_v2  ;;  %vm15032_vm12 = vmmov %vm15023_vm13 }
 0x486   : > { %v7677_v18 = vunpack.i.l.bf16 %v7676_v43  ;;  %v7672_v49 = vunpack.i.l.bf16 %v7671_v24  ;;  %v7678_v37 = vunpack.i.h.bf16 %v7676_v43  ;;  %v7673_v11 = vunpack.i.h.bf16 %v7671_v24  ;;  %vm15033_vm13 = vmmov %vm15029_vm14 }
 0x487   : > { %6554 = vmatprep.subr.msk.bf16.mxu0 %vm916_vm8, %v2100_v29  ;;  %v2537_v0 = vsel %vm916_vm8, %v2099_v13, 0  ;;  %v7653_v29 = vunpack.i.h.bf16 %v11519_v5  ;;  %vm15030_vm6 = vcmp.lt.s32.totalorder %v9620_v21, 99  ;;  %v2101_v24 = vpack.c.bf16 %v2064_v55, %v2064_v55 }
 0x488   : > { %2569 = vmatpush1.bf16.msra.mxu0 %v2537_v0  ;;  %v1869_v32 = vsel %vm15029_vm14, %v7563_v34, %v7672_v49  ;;  %v1893_v4 = vsel %vm15025_vm5, %v7568_v23, %v7677_v18  ;;  %v11595_v34 = vsel %vm15030_vm6, %v7627_v33, %v7628_v3  ;;  %v11603_v23 = vsel %vm15031_vm11, %v7622_v6, %v7623_v30  ;;  %vm15034_vm14 = vmmov %vm15025_vm5 }
 0x489   : > { %v7686_v12 = vpop.permute.xlu1 %7685  ;;  %v11587_v13 = vpop.permute.xlu0 %7680  ;;  %v2072_v42 = vpack.c.bf16 %v1893_v4, %v1869_v32  ;;  %v2079_v59 = vpack.c.bf16 %v11565_v41, %v11573_v20  ;;  %v1867_v6 = vsel %vm15033_vm13, %v7673_v11, %v7552_v31  ;;  %vm15035_vm5 = vcmp.lt.s32.totalorder %v9620_v21, 90  ;;  %vm15037_vm11 = vmmov %vm15034_vm14 }
 0x48a   : > { %v7682_v43 = vunpack.i.l.bf16 %v11587_v13  ;;  %v7687_v33 = vunpack.i.l.bf16 %v7686_v12  ;;  %v11626_v41 = vsel %vm15035_vm5, %v7657_v27, %v7658_v47  ;;  %vm15036_vm6 = vcmp.lt.s32.totalorder %v9620_v21, 91 }
 0x48b   : > { %2642 = vmatprep.subr.bf16.mxu0 %v2072_v42  ;;  %6555 = vmatmul.mubr.msk.bf16.vlgmr.msra.gmra.mrb[8].mxu0 %vm912_vm9, %v11583_v57  ;;  %v1891_v42 = vsel %vm15034_vm14, %v7678_v37, %v7557_v19  ;;  %v11634_v45 = vsel %vm15036_vm6, %v7652_v61, %v7653_v29  ;;  %v2087_v19 = vpack.c.bf16 %v11595_v34, %v11603_v23  ;;  %v7688_v20 = vunpack.i.h.bf16 %v7686_v12 }
 0x48c   : > { %2643 = vmatpush1.bf16.msra.mxu0 %v2071_v8  ;;  %v2063_v2 = vsel %vm15032_vm12, %v7668_v54, %v7682_v43  ;;  %2674 = vmatprep.mubr.bf16.mxu0 %v14984_v62  ;;  %v2543_v55 = vsel %vm916_vm8, %v2101_v24, 0  ;;  %v1892_v32 = vsel %vm15037_vm11, %v7677_v18, %v7678_v37  ;;  %vm15038_vm12 = vmmov %vm15033_vm13  ;;  %v7683_v4 = vunpack.i.h.bf16 %v11587_v13 }
 0x48d   : > { %v7696_v14 = vpop.permute.xlu1 %7695  ;;  %v7691_v31 = vpop.permute.xlu0 %7690  ;;  %v2102_v54 = vpack.c.bf16 %v2063_v2, %v2063_v2  ;;  %v1868_v61 = vsel %vm15038_vm12, %v7672_v49, %v7673_v11  ;;  %v2074_v8 = vpack.c.bf16 %v1891_v42, %v1867_v6  ;;  %vm15039_vm13 = vcmp.lt.s32.totalorder %v9620_v21, 109 }
 0x48e   : > { %v7693_v0 = vunpack.i.h.bf16 %v7691_v31  ;;  %v7692_v27 = vunpack.i.l.bf16 %v7691_v31  ;;  %v7697_v2 = vunpack.i.l.bf16 %v7696_v14  ;;  %v1917_v12 = vsel %vm15039_vm13, %v7593_v38, %v7687_v33  ;;  %vm15043_vm11 = vmmov %vm15039_vm13 }
 0x48f   : > { %6556 = vmatprep.subr.msk.bf16.mxu1 %vm916_vm8, %v2102_v54  ;;  %vm15040_vm14 = vcmp.lt.s32.totalorder %v9620_v21, 101  ;;  %v7698_v37 = vunpack.i.h.bf16 %v7696_v14  ;;  %v2095_v63 = vpack.c.bf16 %v11626_v41, %v11634_v45  ;;  %v1915_v53 = vsel %vm15043_vm11, %v7688_v20, %v7582_v1  ;;  %vm15044_vm12 = vmmov %vm15043_vm11 }
 0x490   : > { %2610 = vmatpush1.bf16.msra.mxu1 %v2543_v55  ;;  %v1941_v18 = vsel %vm15040_vm14, %v7598_v25, %v7692_v27  ;;  %vm15041_vm5 = vmmov %vm15040_vm14  ;;  %v2073_v25 = vpack.c.bf16 %v1892_v32, %v1868_v61  ;;  %vm15045_vm13 = vcmp.lt.s32.totalorder %v9620_v21, 89  ;;  %vm15046_vm14 = vcmp.lt.s32.totalorder %v9620_v21, 100 }
 0x491   : > { %v1939_v49 = vsel %vm15041_vm5, %v7693_v0, %v7587_v48  ;;  %vm15042_vm6 = vmmov %vm15041_vm5  ;;  %v11660_v13 = vpop.permute.xlu1 %7705  ;;  %v7701_v51 = vpop.permute.xlu0 %7700  ;;  %2683 = vmatprep.subr.bf16.mxu1 %v2074_v8  ;;  %v2080_v34 = vpack.c.bf16 %v1941_v18, %v1917_v12  ;;  %v1916_v48 = vsel %vm15044_vm12, %v7687_v33, %v7688_v20  ;;  %v2062_v6 = vsel %vm15045_vm13, %v7682_v43, %v7683_v4 }
 0x492   : > { %v1940_v11 = vsel %vm15042_vm6, %v7692_v27, %v7693_v0  ;;  %v7703_v38 = vunpack.i.h.bf16 %v7701_v51  ;;  %v7702_v23 = vunpack.i.l.bf16 %v7701_v51  ;;  %v2082_v24 = vpack.c.bf16 %v1939_v49, %v1915_v53  ;;  %vm15048_vm6 = vmmov %vm15046_vm14 }
 0x493   : > { %2644 = vmatprep.subr.bf16.mxu0 %v2080_v34  ;;  %6557 = vmatmul.mubr.msk.bf16.vlgmr.msra.gmra.mrb[8].mxu1 %vm912_vm9, %v11583_v57  ;;  %v7707_v42 = vunpack.i.l.bf16 %v11660_v13  ;;  %v1965_v10 = vsel %vm15046_vm14, %v7623_v30, %v7697_v2  ;;  %vm15047_vm5 = vcmp.lt.s32.totalorder %v9620_v21, 99  ;;  %v2081_v33 = vpack.c.bf16 %v1940_v11, %v1916_v48  ;;  %vm15051_vm13 = vmmov %vm15048_vm6 }
 0x494   : > { %2645 = vmatpush1.bf16.msra.mxu0 %v2079_v59  ;;  %2684 = vmatpush1.bf16.msra.mxu1 %v2073_v25  ;;  %v1989_v1 = vsel %vm15047_vm5, %v7628_v3, %v7702_v23  ;;  %v7708_v41 = vunpack.i.h.bf16 %v11660_v13  ;;  %v1963_v58 = vsel %vm15048_vm6, %v7698_v37, %v7612_v36  ;;  %vm15049_vm11 = vmmov %vm15047_vm5  ;;  %v1964_v54 = vsel %vm15051_vm13, %v7697_v2, %v7698_v37 }
 0x495   : > { %v7716_v45 = vpop.permute.xlu1 %7715  ;;  %v7711_v14 = vpop.permute.xlu0 %7710  ;;  %2685 = vmatprep.subr.bf16.mxu1 %v2082_v24  ;;  %v2088_v43 = vpack.c.bf16 %v1989_v1, %v1965_v10  ;;  %v1987_v22 = vsel %vm15049_vm11, %v7703_v38, %v7617_v7  ;;  %vm15050_vm12 = vmmov %vm15047_vm5  ;;  %2715 = vmatprep.mubr.bf16.mxu1 %v14984_v62  ;;  %v2103_v36 = vpack.c.bf16 %v2062_v6, %v2062_v6  ;;  %vm15052_vm14 = vcmp.lt.s32.totalorder %v9620_v21, 91 }
 0x496   : > { %v1988_v3 = vsel %vm15050_vm12, %v7702_v23, %v7703_v38  ;;  %v7717_v30 = vunpack.i.l.bf16 %v7716_v45  ;;  %v7713_v59 = vunpack.i.h.bf16 %v7711_v14  ;;  %v7712_v31 = vunpack.i.l.bf16 %v7711_v14  ;;  %vm15055_vm11 = vmmov %vm15052_vm14 }
 0x497   : > { %v7718_v44 = vunpack.i.h.bf16 %v7716_v45  ;;  %2646 = vmatprep.subr.bf16.mxu0 %v2088_v43  ;;  %v2090_v20 = vpack.c.bf16 %v1987_v22, %v1963_v58  ;;  %v2013_v40 = vsel %vm15052_vm14, %v7653_v29, %v7707_v42  ;;  %vm15053_vm5 = vcmp.lt.s32.totalorder %v9620_v21, 90 }
 0x498   : > { %2647 = vmatpush1.bf16.msra.mxu0 %v2087_v19  ;;  %2686 = vmatpush1.bf16.msra.mxu1 %v2081_v33  ;;  %v2037_v7 = vsel %vm15053_vm5, %v7658_v47, %v7712_v31  ;;  %vm15054_vm6 = vcmp.lt.s32.totalorder %v9620_v21, 89  ;;  %v2089_v61 = vpack.c.bf16 %v1988_v3, %v1964_v54  ;;  %v2011_v5 = vsel %vm15055_vm11, %v7708_v41, %v7642_v60  ;;  %vm15057_vm12 = vmmov %vm15053_vm5 }
 0x499   : > { %v2061_v0 = vsel %vm15054_vm6, %v7683_v4, %v7717_v30  ;;  %v7726_v27 = vpop.permute.xlu1 %7725  ;;  %v7721_v55 = vpop.permute.xlu0 %7720  ;;  %2687 = vmatprep.subr.bf16.mxu1 %v2090_v20  ;;  %v2096_v32 = vpack.c.bf16 %v2037_v7, %v2013_v40  ;;  %v15056_v29 = vunpack.i.l.bf16 %v11501_v35  ;;  %vm15058_vm13 = vmmov %vm15053_vm5 }
 0x49a   : > { %v7728_v19 = vunpack.i.h.bf16 %v7726_v27  ;;  %v7727_v47 = vunpack.i.l.bf16 %v7726_v27  ;;  %v7723_v8 = vunpack.i.h.bf16 %v7721_v55  ;;  %v7722_v2 = vunpack.i.l.bf16 %v7721_v55  ;;  %vm15060_vm14 = vmmov %vm15054_vm6 }
 0x49b   : > { %v2035_v39 = vsel %vm15057_vm12, %v7713_v59, %v15056_v29  ;;  %v2036_v4 = vsel %vm15058_vm13, %v7712_v31, %v7713_v59  ;;  %2648 = vmatprep.subr.bf16.mxu0 %v2096_v32  ;;  %v2104_v12 = vpack.c.bf16 %v2061_v0, %v2061_v0  ;;  %v2059_v60 = vsel %vm15060_vm14, %v7718_v44, %v15059_v16  ;;  %vm15061_vm5 = vmmov %vm15054_vm6 }
 0x49c   : > { %v2098_v18 = vpack.c.bf16 %v2035_v39, %v2011_v5  ;;  %2649 = vmatpush1.bf16.msra.mxu0 %v2095_v63  ;;  %2688 = vmatpush1.bf16.msra.mxu1 %v2089_v61  ;;  %v2745_v35 = vsel %vm1312_vm15, %v7722_v2, %v7723_v8  ;;  %v2769_v49 = vsel %vm1337_vm10, %v7727_v47, %v7728_v19  ;;  %vm15062_vm6 = vmmov %vm15055_vm11  ;;  %v2549_v63 = vsel %vm916_vm8, %v2103_v36, 0 }
 0x49d   : > { %v2060_v37 = vsel %vm15061_vm5, %v7717_v30, %v7718_v44  ;;  %v11727_v11 = vpop.permute.xlu1 %7735  ;;  %v11729_v13 = vpop.permute.xlu0 %7730  ;;  %6558 = vmatprep.subr.msk.bf16.mxu0 %vm916_vm8, %v2104_v12  ;;  %v2012_v46 = vsel %vm15062_vm6, %v7707_v42, %v7708_v41  ;;  %v2106_v23 = vpack.c.bf16 %v2059_v60, %v2059_v60  ;;  %v2941_v25 = vpack.c.bf16 %v2769_v49, %v2745_v35 }
 0x49e   : > { %2689 = vmatprep.subr.bf16.mxu1 %v2098_v18  ;;  %v7737_v51 = vunpack.i.l.bf16 %v11727_v11  ;;  %v7732_v34 = vunpack.i.l.bf16 %v11729_v13  ;;  %v2097_v38 = vpack.c.bf16 %v2036_v4, %v2012_v46  ;;  %v2105_v53 = vpack.c.bf16 %v2060_v37, %v2060_v37 }
 0x49f   : > { %v7738_v48 = vunpack.i.h.bf16 %v11727_v11  ;;  %v7733_v6 = vunpack.i.h.bf16 %v11729_v13  ;;  %vm15063_vm11 = vcmp.lt.s32.totalorder %v9620_v21, 29  ;;  %vm15067_vm5 = vcmp.lt.s32.totalorder %v9620_v21, 28 }
 0x4a0   : > { %v2770_v24 = vsel %vm1337_vm10, %v7737_v51, %v7727_v47  ;;  %v2746_v42 = vsel %vm1312_vm15, %v7732_v34, %v7722_v2  ;;  %2651 = vmatpush1.bf16.msra.mxu0 %v2549_v63  ;;  %2690 = vmatpush1.bf16.msra.mxu1 %v2097_v38  ;;  %v2555_v14 = vsel %vm916_vm8, %v2105_v53, 0  ;;  %vm15064_vm12 = vmmov %vm15063_vm11  ;;  %vm15068_vm6 = vcmp.lt.s32.totalorder %v9620_v21, 27 }
 0x4a1   : > { %v11747_v10 = vpop.permute.xlu1 %7745  ;;  %v11749_v1 = vpop.permute.xlu0 %7740  ;;  %3009 = vmatprep.subr.bf16.mxu0 %v2941_v25  ;;  %v2940_v33 = vpack.c.bf16 %v2770_v24, %v2746_v42  ;;  %6560 = vmatprep.subr.msk.bf16.mxu1 %vm916_vm8, %v2106_v23  ;;  %v2768_v43 = vsel %vm1337_vm10, %v7728_v19, %v7738_v48  ;;  %v2744_v58 = vsel %vm1312_vm15, %v7723_v8, %v7733_v6  ;;  %vm15065_vm13 = vmmov %vm15063_vm11 }
 0x4a2   : > { %v7747_v41 = vunpack.i.l.bf16 %v11747_v10  ;;  %v7742_v45 = vunpack.i.l.bf16 %v11749_v1  ;;  %v2942_v40 = vpack.c.bf16 %v2768_v43, %v2744_v58  ;;  %vm15066_vm14 = vmmov %vm15063_vm11 }
 0x4a3   : > { %6559 = vmatmul.mubr.msk.bf16.vlgmr.msra.gmra.mrb[12].mxu0 %vm912_vm9, %v11583_v57 }
 0x4a4   : > { %3010 = vmatpush1.bf16.msra.mxu0 %v2940_v33  ;;  %v2743_v22 = vsel %vm1312_vm15, %v7733_v6, %v7742_v45  ;;  %v2767_v3 = vsel %vm1337_vm10, %v7738_v48, %v7747_v41  ;;  %2692 = vmatpush1.bf16.msra.mxu1 %v2555_v14 }
 0x4a5   : > { %v7756_v30 = vpop.permute.xlu1 %7755  ;;  %v7751_v59 = vpop.permute.xlu0 %7750  ;;  %v2943_v31 = vpack.c.bf16 %v2767_v3, %v2743_v22  ;;  %3041 = vmatprep.mubr.bf16.mxu0 %v14984_v62 }
 0x4a6   : > { %v7758_v54 = vunpack.i.h.bf16 %v7756_v30  ;;  %v7757_v44 = vunpack.i.l.bf16 %v7756_v30  ;;  %v7753_v20 = vunpack.i.h.bf16 %v7751_v59  ;;  %v7752_v36 = vunpack.i.l.bf16 %v7751_v59 }
 0x4a7   : > { %3050 = vmatprep.subr.bf16.mxu1 %v2943_v31  ;;  %6561 = vmatmul.mubr.msk.bf16.vlgmr.msra.gmra.mrb[12].mxu1 %vm912_vm9, %v11583_v57 }
 0x4a8   : > { %v2793_v7 = vsel %vm1362_vm7, %v7752_v36, %v7753_v20  ;;  %v2817_v0 = vsel %vm15063_vm11, %v7757_v44, %v7758_v54  ;;  %3051 = vmatpush1.bf16.msra.mxu1 %v2942_v40  ;;  %3082 = vmatprep.mubr.bf16.mxu1 %v14984_v62  ;;  %vm15069_vm11 = vmmov %vm15068_vm6 }
 0x4a9   : > { %v11776_v27 = vpop.permute.xlu1 %7765  ;;  %v11778_v55 = vpop.permute.xlu0 %7760  ;;  %v2949_v32 = vpack.c.bf16 %v2817_v0, %v2793_v7 }
 0x4aa   : > { %v7768_v61 = vunpack.i.h.bf16 %v11776_v27  ;;  %v7767_v5 = vunpack.i.l.bf16 %v11776_v27  ;;  %v7763_v57 = vunpack.i.h.bf16 %v11778_v55  ;;  %v7762_v29 = vunpack.i.l.bf16 %v11778_v55 }
 0x4ab   : > { %3011 = vmatprep.subr.bf16.mxu0 %v2949_v32 }
 0x4ac   : > { %v2818_v39 = vsel %vm15064_vm12, %v7767_v5, %v7757_v44  ;;  %v2794_v19 = vsel %vm1362_vm7, %v7762_v29, %v7752_v36  ;;  %v2816_v4 = vsel %vm15065_vm13, %v7758_v54, %v7768_v61  ;;  %v2792_v12 = vsel %vm1362_vm7, %v7753_v20, %v7763_v57  ;;  %vm15070_vm12 = vmmov %vm15067_vm5 }
 0x4ad   : > { %v11793_v47 = vpop.permute.xlu1 %7775  ;;  %v11795_v8 = vpop.permute.xlu0 %7770  ;;  %v2948_v2 = vpack.c.bf16 %v2818_v39, %v2794_v19  ;;  %v2950_v63 = vpack.c.bf16 %v2816_v4, %v2792_v12  ;;  %vm15071_vm13 = vmmov %vm15068_vm6 }
 0x4ae   : > { %v7777_v18 = vunpack.i.l.bf16 %v11793_v47  ;;  %v7772_v16 = vunpack.i.l.bf16 %v11795_v8 }
 0x4af   : > { %3012 = vmatpush1.bf16.msra.mxu0 %v2948_v2 }
 0x4b0   : > { %v2791_v60 = vsel %vm1362_vm7, %v7763_v57, %v7772_v16  ;;  %v2815_v35 = vsel %vm15066_vm14, %v7768_v61, %v7777_v18  ;;  %vm15072_vm14 = vmmov %vm15067_vm5 }
 0x4b1   : > { %v7786_v49 = vpop.permute.xlu1 %7785  ;;  %v7781_v37 = vpop.permute.xlu0 %7780  ;;  %v2951_v46 = vpack.c.bf16 %v2815_v35, %v2791_v60 }
 0x4b2   : > { %v7788_v38 = vunpack.i.h.bf16 %v7786_v49  ;;  %v7787_v23 = vunpack.i.l.bf16 %v7786_v49  ;;  %v7783_v25 = vunpack.i.h.bf16 %v7781_v37  ;;  %v7782_v53 = vunpack.i.l.bf16 %v7781_v37 }
 0x4b3   : > { %3052 = vmatprep.subr.bf16.mxu1 %v2951_v46 }
 0x4b4   : > { %3053 = vmatpush1.bf16.msra.mxu1 %v2950_v63  ;;  %v2841_v48 = vsel %vm15067_vm5, %v7782_v53, %v7783_v25  ;;  %v2865_v24 = vsel %vm15068_vm6, %v7787_v23, %v7788_v38  ;;  %vm15073_vm5 = vmmov %vm15068_vm6 }
 0x4b5   : > { %v11815_v6 = vpop.permute.xlu1 %7795  ;;  %v11817_v42 = vpop.permute.xlu0 %7790  ;;  %v2957_v33 = vpack.c.bf16 %v2865_v24, %v2841_v48  ;;  %vm15074_vm6 = vmmov %vm15070_vm12 }
 0x4b6   : > { %v7798_v14 = vunpack.i.h.bf16 %v11815_v6  ;;  %v7797_v43 = vunpack.i.l.bf16 %v11815_v6  ;;  %v7793_v58 = vunpack.i.h.bf16 %v11817_v42  ;;  %v7792_v22 = vunpack.i.l.bf16 %v11817_v42 }
 0x4b7   : > { %3013 = vmatprep.subr.bf16.mxu0 %v2957_v33 }
 0x4b8   : > { %v2866_v3 = vsel %vm15069_vm11, %v7797_v43, %v7787_v23  ;;  %v2842_v30 = vsel %vm15070_vm12, %v7792_v22, %v7782_v53  ;;  %v2864_v44 = vsel %vm15071_vm13, %v7788_v38, %v7798_v14  ;;  %v2840_v20 = vsel %vm15072_vm14, %v7783_v25, %v7793_v58 }
 0x4b9   : > { %v11831_v59 = vpop.permute.xlu1 %2852  ;;  %v11833_v31 = vpop.permute.xlu0 %7800  ;;  %v2956_v54 = vpack.c.bf16 %v2866_v3, %v2842_v30  ;;  %v2958_v57 = vpack.c.bf16 %v2864_v44, %v2840_v20  ;;  %vm15075_vm11 = vcmp.lt.s32.totalorder %v9620_v21, 19  ;;  %vm15076_vm12 = vcmp.lt.s32.totalorder %v9620_v21, 18 }
 0x4ba   : > { %v7802_v36 = vunpack.i.l.bf16 %v11833_v31  ;;  %v2863_v40 = vsel %vm15073_vm5, %v7798_v14, %v11831_v59  ;;  %vm15077_vm13 = vmmov %vm15076_vm12  ;;  %v7748_v20 = vunpack.i.h.bf16 %v11747_v10 }
 0x4bb   : > { %3014 = vmatpush1.bf16.msra.mxu0 %v2956_v54  ;;  %vm15078_vm14 = vmmov %vm15075_vm11 }
 0x4bc   : > { %v2839_v7 = vsel %vm15074_vm6, %v7793_v58, %v7802_v36  ;;  %vm15079_vm5 = vmmov %vm15076_vm12 }
 0x4bd   : > { %v7811_v0 = vpop.permute.xlu1 %7810  ;;  %v7806_v32 = vpop.permute.xlu0 %7805  ;;  %v2959_v61 = vpack.c.bf16 %v2863_v40, %v2839_v7  ;;  %vm15080_vm6 = vmmov %vm15075_vm11  ;;  %v7743_v7 = vunpack.i.h.bf16 %v11749_v1 }
 0x4be   : > { %v7813_v39 = vunpack.i.h.bf16 %v7811_v0  ;;  %v7812_v19 = vunpack.i.l.bf16 %v7811_v0  ;;  %v7808_v2 = vunpack.i.h.bf16 %v7806_v32  ;;  %v7807_v4 = vunpack.i.l.bf16 %v7806_v32 }
 0x4bf   : > { %3054 = vmatprep.subr.bf16.mxu1 %v2959_v61 }
 0x4c0   : > { %3055 = vmatpush1.bf16.msra.mxu1 %v2958_v57  ;;  %v2889_v12 = vsel %vm15075_vm11, %v7807_v4, %v7808_v2  ;;  %v2913_v60 = vsel %vm15076_vm12, %v7812_v19, %v7813_v39  ;;  %vm15081_vm11 = vmmov %vm15079_vm5 }
 0x4c1   : > { %v11851_v35 = vpop.permute.xlu1 %7820  ;;  %v11853_v49 = vpop.permute.xlu0 %7815  ;;  %v2965_v37 = vpack.c.bf16 %v2913_v60, %v2889_v12  ;;  %vm15082_vm12 = vmmov %vm15080_vm6  ;;  %v2742_v60 = vsel %vm1312_vm15, %v7742_v45, %v7743_v7  ;;  %v11907_v45 = vld [vmem:[#allocation7 + $0x8] sm:$0xf] }
 0x4c2   : > { %v7823_v46 = vunpack.i.h.bf16 %v11851_v35  ;;  %v7822_v63 = vunpack.i.l.bf16 %v11851_v35  ;;  %v7818_v38 = vunpack.i.h.bf16 %v11853_v49  ;;  %v7817_v23 = vunpack.i.l.bf16 %v11853_v49 }
 0x4c3   : > { %3015 = vmatprep.subr.bf16.mxu0 %v2965_v37 }
 0x4c4   : > { %v2914_v25 = vsel %vm15077_vm13, %v7822_v63, %v7812_v19  ;;  %v2890_v53 = vsel %vm15078_vm14, %v7817_v23, %v7807_v4  ;;  %v2912_v48 = vsel %vm15079_vm5, %v7813_v39, %v7823_v46  ;;  %v2888_v24 = vsel %vm15080_vm6, %v7808_v2, %v7818_v38 }
 0x4c5   : > { %v11871_v33 = vpop.permute.xlu1 %2900  ;;  %v11873_v14 = vpop.permute.xlu0 %2876  ;;  %v2964_v58 = vpack.c.bf16 %v2914_v25, %v2890_v53  ;;  %v2966_v44 = vpack.c.bf16 %v2912_v48, %v2888_v24  ;;  %v2766_v19 = vsel %vm1337_vm10, %v7747_v41, %v7748_v20  ;;  %vm15083_vm13 = vcmp.lt.s32.totalorder %v9620_v21, 17 }
 0x4c6   : > { %v2911_v3 = vsel %vm15081_vm11, %v7823_v46, %v11871_v33  ;;  %v2887_v30 = vsel %vm15082_vm12, %v7818_v38, %v11873_v14  ;;  %vm15084_vm14 = vmmov %vm15083_vm13  ;;  %vm15087_vm11 = vcmp.lt.s32.totalorder %v9620_v21, 29 }
 0x4c7   : > { %3016 = vmatpush1.bf16.msra.mxu0 %v2964_v58  ;;  %v2967_v54 = vpack.c.bf16 %v2911_v3, %v2887_v30  ;;  %vm15085_vm5 = vmmov %vm15083_vm13  ;;  %v7778_v30 = vunpack.i.h.bf16 %v11793_v47 }
 0x4c8   : > { %vm15086_vm6 = vmmov %vm15085_vm5 }
 0x4c9   : > { %v7831_v40 = vpop.permute.xlu1 %7830  ;;  %3056 = vmatprep.subr.bf16.mxu1 %v2967_v54  ;;  %v2814_v11 = vsel %vm15087_vm11, %v7777_v18, %v7778_v30  ;;  %vm15088_vm12 = vmmov %vm15087_vm11 }
 0x4ca   : > { %v7832_v0 = vunpack.i.l.bf16 %v7831_v40  ;;  %v11883_v32 = vpop.permute.xlu0 %7825  ;;  %3057 = vmatpush1.bf16.msra.mxu1 %v2966_v44  ;;  %v7833_v61 = vunpack.i.h.bf16 %v7831_v40  ;;  %v2944_v40 = vpack.c.bf16 %v2766_v19, %v2742_v60 }
 0x4cb   : > { %v7828_v57 = vunpack.i.h.bf16 %v11883_v32  ;;  %v7827_v39 = vunpack.i.l.bf16 %v11883_v32 }
 0x4cc   : > { %v2936_v48 = vsel %vm15085_vm5, %v7832_v0, %v7833_v61  ;;  %vm15091_vm5 = vcmp.lt.s32.totalorder %v9620_v21, 27 }
 0x4cd   : > { %v7841_v2 = vpop.permute.xlu1 %7840  ;;  %v2937_v4 = vsel %vm15083_vm13, %v7828_v57, %v7832_v0  ;;  %v2938_v12 = vsel %vm15084_vm14, %v7827_v39, %v7828_v57  ;;  %v2974_v0 = vpack.c.bf16 %v2936_v48, %v2936_v48  ;;  %v7773_v57 = vunpack.i.h.bf16 %v11795_v8  ;;  %vm15089_vm13 = vmmov %vm15087_vm11 }
 0x4ce   : > { %v7842_v37 = vunpack.i.l.bf16 %v7841_v2  ;;  %v7836_v46 = vpop.permute.xlu0 %7835  ;;  %v2973_v10 = vpack.c.bf16 %v2937_v4, %v2937_v4  ;;  %v2972_v38 = vpack.c.bf16 %v2938_v12, %v2938_v12  ;;  %v7843_v25 = vunpack.i.h.bf16 %v7841_v2  ;;  %vm15090_vm14 = vmmov %vm15087_vm11 }
 0x4cf   : > { %v7838_v41 = vunpack.i.h.bf16 %v7836_v46  ;;  %v7837_v53 = vunpack.i.l.bf16 %v7836_v46  ;;  %v2992_v60 = vsel %vm916_vm8, %v2974_v0, 0 }
 0x4d0   : > { %6562 = vmatprep.subr.msk.bf16.mxu0 %vm916_vm8, %v2973_v10  ;;  %v2986_v24 = vsel %vm916_vm8, %v2972_v38, 0  ;;  %v2765_v1 = vsel %vm1337_vm10, %v7748_v20, %v7842_v37  ;;  %v2764_v19 = vsel %vm1337_vm10, %v7842_v37, %v7843_v25  ;;  %v2790_v37 = vsel %vm1362_vm7, %v7772_v16, %v7773_v57 }
 0x4d1   : > { %3018 = vmatpush1.bf16.msra.mxu0 %v2986_v24  ;;  %v7846_v58 = vpop.permute.xlu1 %7845  ;;  %v2741_v3 = vsel %vm1312_vm15, %v7743_v7, %v7837_v53  ;;  %v2747_v2 = vsel %vm1312_vm15, %v7838_v41, %v7732_v34  ;;  %v2771_v7 = vsel %vm1337_vm10, %v7843_v25, %v7737_v51  ;;  %v2740_v13 = vsel %vm1312_vm15, %v7837_v53, %v7838_v41 }
 0x4d2   : > { %v11912_v54 = vpop.permute.xlu0 %2924  ;;  %v2945_v44 = vpack.c.bf16 %v2765_v1, %v2741_v3  ;;  %v7847_v4 = vunpack.i.l.bf16 %v7846_v58  ;;  %v2947_v46 = vpack.c.bf16 %v2771_v7, %v2747_v2  ;;  %v7803_v10 = vunpack.i.h.bf16 %v11833_v31 }
 0x4d3   : > { %v2935_v20 = vsel %vm15086_vm6, %v7833_v61, %v11912_v54  ;;  %v7848_v61 = vunpack.i.h.bf16 %v7846_v58  ;;  %v2946_v18 = vpack.c.bf16 %v2764_v19, %v2740_v13  ;;  %v2952_v55 = vpack.c.bf16 %v2814_v11, %v2790_v37 }
 0x4d4   : > { %v2975_v12 = vpack.c.bf16 %v2935_v20, %v2935_v20  ;;  %6563 = vmatmul.mubr.msk.bf16.vlgmr.msra.gmra.mrb[8].mxu0 %vm912_vm9, %v11907_v45  ;;  %3091 = vmatprep.subr.bf16.mxu0 %v2945_v44  ;;  %v2789_v53 = vsel %vm1362_vm7, %v7773_v57, %v7847_v4  ;;  %vm15092_vm6 = vcmp.lt.s32.totalorder %v9620_v21, 28 }
 0x4d5   : > { %3092 = vmatpush1.bf16.msra.mxu0 %v2944_v40  ;;  %v7856_v34 = vpop.permute.xlu1 %7855  ;;  %3123 = vmatprep.mubr.bf16.mxu0 %v14984_v62  ;;  %v2795_v16 = vsel %vm1362_vm7, %v7848_v61, %v7762_v29  ;;  %v2838_v27 = vsel %vm15092_vm6, %v7802_v36, %v7803_v10  ;;  %vm15093_vm11 = vmmov %vm15092_vm6 }
 0x4d6   : > { %v7851_v51 = vpop.permute.xlu0 %7850  ;;  %6564 = vmatprep.subr.msk.bf16.mxu1 %vm916_vm8, %v2975_v12  ;;  %v7858_v47 = vunpack.i.h.bf16 %v7856_v34  ;;  %v7857_v41 = vunpack.i.l.bf16 %v7856_v34 }
 0x4d7   : > { %v7853_v38 = vunpack.i.h.bf16 %v7851_v51  ;;  %v7852_v25 = vunpack.i.l.bf16 %v7851_v51  ;;  %3059 = vmatpush1.bf16.msra.mxu1 %v2992_v60 }
 0x4d8   : > { %3132 = vmatprep.subr.bf16.mxu1 %v2947_v46  ;;  %v2837_v40 = vsel %vm15093_vm11, %v7803_v10, %v7857_v41  ;;  %vm15097_vm11 = vcmp.lt.s32.totalorder %v9620_v21, 18 }
 0x4d9   : > { %v2812_v48 = vsel %vm15088_vm12, %v7852_v25, %v7853_v38  ;;  %v2859_v24 = vpop.permute.xlu1 %2858  ;;  %v2813_v8 = vsel %vm15089_vm13, %v7778_v30, %v7852_v25  ;;  %v2819_v1 = vsel %vm15090_vm14, %v7853_v38, %v7767_v5  ;;  %v2788_v5 = vsel %vm1362_vm7, %v7847_v4, %v7848_v61  ;;  %vm15094_vm12 = vmmov %vm15092_vm6 }
 0x4da   : > { %v2867_v58 = vsel %vm15091_vm5, %v2859_v24, %v7797_v43  ;;  %v7861_v3 = vpop.permute.xlu0 %7860  ;;  %6565 = vmatmul.mubr.msk.bf16.vlgmr.msra.gmra.mrb[8].mxu1 %vm912_vm9, %v11907_v45  ;;  %v2953_v30 = vpack.c.bf16 %v2813_v8, %v2789_v53  ;;  %v2955_v44 = vpack.c.bf16 %v2819_v1, %v2795_v16  ;;  %v2954_v43 = vpack.c.bf16 %v2812_v48, %v2788_v5  ;;  %vm15095_vm13 = vmmov %vm15091_vm5  ;;  %v8894_v16 = vld [vmem:[%s9425_s20] sm:$0xff]  ;;  %v8896_v5 = vld [vmem:[%s9425_s20 + $0x10] sm:$0xff] }
 0x4db   : > { %v7863_v29 = vunpack.i.h.bf16 %v7861_v3  ;;  %v7862_v6 = vunpack.i.l.bf16 %v7861_v3  ;;  %3133 = vmatpush1.bf16.msra.mxu1 %v2946_v18  ;;  %3164 = vmatprep.mubr.bf16.mxu1 %v14984_v62  ;;  %v2843_v31 = vsel %vm15094_vm12, %v7858_v47, %v7792_v22  ;;  %vm15096_vm14 = vmmov %vm15091_vm5  ;;  %v2836_v61 = vsel %vm15092_vm6, %v7857_v41, %v7858_v47  ;;  %v8895_v3 = vld [vmem:[%s9425_s20 + $0x18] sm:$0xff] }
 0x4dc   : > { %3093 = vmatprep.subr.bf16.mxu0 %v2953_v30  ;;  %3134 = vmatprep.subr.bf16.mxu1 %v2955_v44  ;;  %v2963_v2 = vpack.c.bf16 %v2867_v58, %v2843_v31  ;;  %vm15098_vm12 = vmmov %vm15097_vm11  ;;  %v3239_v1 = vpack.c.bf16 %v8894_v16, %v8894_v16  ;;  %v3242_v30 = vpack.c.bf16 %v8895_v3, %v8895_v3  ;;  %v8897_v31 = vld [vmem:[%s9425_s20 + $0x28] sm:$0xff] }
 0x4dd   : > { %v2860_v36 = vsel %vm15095_vm13, %v7863_v29, %v2859_v24  ;;  %v2862_v0 = vsel %vm15096_vm14, %v11831_v59, %v7862_v6  ;;  %3094 = vmatpush1.bf16.msra.mxu0 %v2952_v55  ;;  %v7871_v57 = vpop.permute.xlu1 %7870  ;;  %v2861_v20 = vsel %vm15091_vm5, %v7862_v6, %v7863_v29  ;;  %vm15099_vm13 = vcmp.lt.s32.totalorder %v9620_v21, 19  ;;  %vm15101_vm5 = vmmov %vm15097_vm11 }
 0x4de   : > { %v7873_v7 = vunpack.i.h.bf16 %v7871_v57  ;;  %v7872_v4 = vunpack.i.l.bf16 %v7871_v57  ;;  %v7866_v12 = vpop.permute.xlu0 %7865  ;;  %v2961_v42 = vpack.c.bf16 %v2861_v20, %v2837_v40  ;;  %v2960_v19 = vpack.c.bf16 %v2862_v0, %v2838_v27  ;;  %vm15100_vm14 = vmmov %vm15099_vm13  ;;  %v8898_v0 = vld [vmem:[%s9425_s20 + $0x38] sm:$0xff]  ;;  %v8899_v20 = vld [vmem:[%s9425_s20 + $0x20] sm:$0xff] }
 0x4df   : > { %v7868_v13 = vunpack.i.h.bf16 %v7866_v12  ;;  %v7867_v22 = vunpack.i.l.bf16 %v7866_v12  ;;  %3135 = vmatpush1.bf16.msra.mxu1 %v2954_v43  ;;  %v2962_v60 = vpack.c.bf16 %v2860_v36, %v2836_v61  ;;  %vm15102_vm6 = vmmov %vm15101_vm5  ;;  %v3241_v29 = vpack.c.bf16 %v8896_v5, %v8896_v5  ;;  %v3238_v12 = vld [vmem:[#allocation8] sm:$0xf] }
 0x4e0   : > { %v2910_v59 = vsel %vm15097_vm11, %v11871_v33, %v7872_v4  ;;  %3095 = vmatprep.subr.bf16.mxu0 %v2961_v42  ;;  %3136 = vmatprep.subr.bf16.mxu1 %v2963_v2  ;;  %v2909_v34 = vsel %vm15098_vm12, %v7872_v4, %v7873_v7  ;;  %vm15103_vm11 = vmmov %vm15099_vm13  ;;  %v3244_v36 = vpack.c.bf16 %v8897_v31, %v8897_v31 }
 0x4e1   : > { %v2886_v11 = vsel %vm15099_vm13, %v11873_v14, %v7867_v22  ;;  %3096 = vmatpush1.bf16.msra.mxu0 %v2960_v19  ;;  %v2907_v51 = vpop.permute.xlu1 %2906  ;;  %v2885_v46 = vsel %vm15100_vm14, %v7867_v22, %v7868_v13  ;;  %vm15104_vm12 = vmmov %vm15103_vm11  ;;  %vm15105_vm13 = vcmp.lt.s32.totalorder %v9620_v21, 17  ;;  %v3258_v40 = vsel %vm916_vm8, %v3241_v29, 0 }
 0x4e2   : > { %v2908_v37 = vsel %vm15101_vm5, %v7873_v7, %v2907_v51  ;;  %v2915_v33 = vsel %vm15102_vm6, %v2907_v51, %v7822_v63  ;;  %v2883_v10 = vpop.permute.xlu0 %2882  ;;  %v2969_v38 = vpack.c.bf16 %v2909_v34, %v2885_v46  ;;  %v2968_v25 = vpack.c.bf16 %v2910_v59, %v2886_v11  ;;  %vm15106_vm14 = vmmov %vm15105_vm13  ;;  %v8900_v7 = vld [vmem:[%s9425_s20 + $0x30] sm:$0xff] }
 0x4e3   : > { %v2884_v14 = vsel %vm15103_vm11, %v7868_v13, %v2883_v10  ;;  %v2891_v47 = vsel %vm15104_vm12, %v2883_v10, %v7817_v23  ;;  %3137 = vmatpush1.bf16.msra.mxu1 %v2962_v60  ;;  %v8893_v23 = vld [vmem:[%s9425_s20 + $0x8] sm:$0xff]  ;;  %vm15107_vm5 = vmmov %vm15105_vm13  ;;  %v3246_v57 = vpack.c.bf16 %v8898_v0, %v8898_v0  ;;  %v3243_v2 = vpack.c.bf16 %v8899_v20, %v8899_v20  ;;  %s15113_s20 = smov 10  }
 0x4e4   : > { %v2970_v41 = vpack.c.bf16 %v2908_v37, %v2884_v14  ;;  %3097 = vmatprep.subr.bf16.mxu0 %v2969_v38  ;;  %v2971_v35 = vpack.c.bf16 %v2915_v33, %v2891_v47  ;;  %v3240_v8 = vpack.c.bf16 %v8893_v23, %v8893_v23  ;;  %vm15108_vm6 = vmmov %vm15107_vm5  ;;  %v3245_v4 = vpack.c.bf16 %v8900_v7, %v8900_v7 }
 0x4e5   : > { %3098 = vmatpush1.bf16.msra.mxu0 %v2968_v25  ;;  %v2931_v18 = vpop.permute.xlu1 %2930  ;;  %vm3247_vm11 = vcmask 64512   ;;  %v3264_v42 = vsel %vm916_vm8, %v3243_v2, 0 }
 0x4e6   : > { %v2939_v63 = vsel %vm15105_vm13, %v2931_v18, %v7827_v39  ;;  %v7876_v53 = vpop.permute.xlu0 %7875  ;;  %3138 = vmatprep.subr.bf16.mxu1 %v2971_v35 }
 0x4e7   : > { %v2979_v48 = vpack.c.bf16 %v2939_v63, %v2939_v63  ;;  %v7878_v49 = vunpack.i.h.bf16 %v7876_v53  ;;  %v7877_v24 = vunpack.i.l.bf16 %v7876_v53  ;;  %3139 = vmatpush1.bf16.msra.mxu1 %v2970_v41 }
 0x4e9   : > { %6568 = vmatprep.subr.msk.bf16.mxu1 %vm916_vm8, %v2979_v48  ;;  %v2933_v32 = vsel %vm15106_vm14, %v7877_v24, %v7878_v49  ;;  %v2934_v39 = vsel %vm15107_vm5, %v11912_v54, %v7877_v24  ;;  %v2932_v58 = vsel %vm15108_vm6, %v7878_v49, %v2931_v18  ;;  %v3252_v54 = vsel %vm916_vm8, %v3239_v1, 0 }
 0x4ea   : > { %v2977_v44 = vpack.c.bf16 %v2933_v32, %v2933_v32  ;;  %v2976_v55 = vpack.c.bf16 %v2934_v39, %v2934_v39  ;;  %v2978_v27 = vpack.c.bf16 %v2932_v58, %v2932_v58 }
 0x4ec   : > { %6566 = vmatprep.subr.msk.bf16.mxu0 %vm916_vm8, %v2977_v44  ;;  %v2998_v6 = vsel %vm916_vm8, %v2976_v55, 0  ;;  %v3004_v43 = vsel %vm916_vm8, %v2978_v27, 0 }
 0x4ed   : > { %3100 = vmatpush1.bf16.msra.mxu0 %v2998_v6  ;;  %3141 = vmatpush1.bf16.msra.mxu1 %v3004_v43 }
 0x4ee   : > { %6570 = vmatprep.subr.msk.bf16.mxu0 %vm916_vm8, %v3240_v8  ;;  %6572 = vmatprep.subr.msk.bf16.mxu1 %vm916_vm8, %v3242_v30 }
 0x4f0   : > { %6567 = vmatmul.mubr.msk.bf16.vlgmr.msra.gmra.mrb[12].mxu0 %vm912_vm9, %v11907_v45  ;;  %6569 = vmatmul.mubr.msk.bf16.vlgmr.msra.gmra.mrb[12].mxu1 %vm912_vm9, %v11907_v45  ;;  %v3270_v45 = vsel %vm916_vm8, %v3245_v4, 0 }
 0x4f1   : > { %3276 = vmatpush1.bf16.msra.mxu0 %v3252_v54  ;;  %3317 = vmatpush1.bf16.msra.mxu1 %v3258_v40 }
 0x4f2   : > { %3307 = vmatprep.mubr.bf16.mxu0 %v14984_v62  ;;  %6574 = vmatprep.subr.msk.bf16.mxu0 %vm916_vm8, %v3244_v36 }
 0x4f3   : > { %3348 = vmatprep.mubr.bf16.mxu1 %v14984_v62  ;;  %6576 = vmatprep.subr.msk.bf16.mxu1 %vm916_vm8, %v3246_v57 }
 0x4f8   : > { %6571 = vmatmul.mubr.msk.bf16.vlgmr.msra.gmra.mrb[16].mxu0 %vm3247_vm11, %v3238_v12  ;;  %6573 = vmatmul.mubr.msk.bf16.vlgmr.msra.gmra.mrb[16].mxu1 %vm3247_vm11, %v3238_v12 }
 0x4f9   : > { %3358 = vmatpush1.bf16.msra.mxu0 %v3264_v42  ;;  %3399 = vmatpush1.bf16.msra.mxu1 %v3270_v45 }
 0x4fa   : > { %3389 = vmatprep.mubr.bf16.mxu0 %v14984_v62  ;;  %3430 = vmatprep.mubr.bf16.mxu1 %v14984_v62 }
 0x500   : > { %6575 = vmatmul.mubr.msk.bf16.vlgmr.msra.gmra.mrb[20].mxu0 %vm3247_vm11, %v3238_v12  ;;  %6577 = vmatmul.mubr.msk.bf16.vlgmr.msra.gmra.mrb[20].mxu1 %vm3247_vm11, %v3238_v12 }
 0x501   : > { %4086 = vmatprep.mubr.bf16.mxu0 %v14984_v62  ;;  %4127 = vmatprep.mubr.bf16.mxu1 %v14984_v62 }
 0x5a7   : > { %v12049_v19 = vpop.f32.mrb[8].mxu0 }
 0x5a8   : > { %v3181_v13 = vmul.f32 %v12049_v19, %v10727_v17  ;;  %v12053_v22 = vpop.f32.mrb[9].mxu0 }
 0x5a9   : > { %v3182_v61 = vmul.f32 %v12053_v22, %v10729_v9  ;;  %v3047_v59 = vpop.f32.mrb[10].mxu0 }
 0x5aa   : > { %v3199_v34 = vmul.f32 %v3181_v13, %v12049_v19  ;;  %v3048_v11 = vpop.f32.mrb[11].mxu0 }
 0x5ab   : > { %v3189_v51 = vadd.f32 %v3182_v61, %v3181_v13  ;;  %v3200_v60 = vmul.f32 %v3182_v61, %v12053_v22 }
 0x5ad   : > { %v3207_v46 = vadd.f32 %v3200_v60, %v3199_v34  ;;  %v12059_v37 = vpop.f32.mrb[8].mxu1 }
 0x5ae   : > { %v3183_v33 = vmul.f32 %v12059_v37, %v10740_v15  ;;  %v12063_v10 = vpop.f32.mrb[9].mxu1 }
 0x5af   : > { %v3184_v38 = vmul.f32 %v12063_v10, %v10743_v50  ;;  %v3088_v25 = vpop.f32.mrb[10].mxu1 }
 0x5b0   : > { %v3190_v14 = vadd.f32 %v3189_v51, %v3183_v33  ;;  %v3201_v47 = vmul.f32 %v3183_v33, %v12059_v37  ;;  %v3089_v41 = vpop.f32.mrb[11].mxu1 }
 0x5b1   : > { %v3202_v35 = vmul.f32 %v3184_v38, %v12063_v10 }
 0x5b2   : > { %v3208_v18 = vadd.f32 %v3207_v46, %v3201_v47  ;;  %v3191_v63 = vadd.f32 %v3190_v14, %v3184_v38 }
 0x5b4   : > { %v3209_v53 = vadd.f32 %v3208_v18, %v3202_v35 }
 0x5c3   : > { %v12069_v48 = vpop.f32.mrb[12].mxu0  ;;  %v12071_v49 = vpop.f32.mrb[12].mxu1 }
 0x5c4   : > { %v3185_v24 = vmul.f32 %v12069_v48, %v10755_v56  ;;  %v12075_v23 = vpop.f32.mrb[13].mxu0  ;;  %v12077_v8 = vpop.f32.mrb[13].mxu1  ;;  %v3187_v3 = vmul.f32 %v12071_v49, %v10759_v52 }
 0x5c5   : > { %v3186_v16 = vmul.f32 %v12075_v23, %v10757_v26  ;;  %v3129_v1 = vpop.f32.mrb[14].mxu0  ;;  %v3170_v32 = vpop.f32.mrb[14].mxu1  ;;  %v3188_v27 = vmul.f32 %v12077_v8, %v10766_v28 }
 0x5c6   : > { %v3192_v39 = vadd.f32 %v3191_v63, %v3185_v24  ;;  %v3203_v58 = vmul.f32 %v3185_v24, %v12069_v48  ;;  %v3130_v30 = vpop.f32.mrb[15].mxu0  ;;  %v3171_v44 = vpop.f32.mrb[15].mxu1  ;;  %v3205_v6 = vmul.f32 %v3187_v3, %v12071_v49 }
 0x5c7   : > { %v3204_v55 = vmul.f32 %v3186_v16, %v12075_v23  ;;  %v3206_v40 = vmul.f32 %v3188_v27, %v12077_v8 }
 0x5c8   : > { %v3210_v5 = vadd.f32 %v3209_v53, %v3203_v58  ;;  %v3193_v29 = vadd.f32 %v3192_v39, %v3186_v16 }
 0x5ca   : > { %v3211_v43 = vadd.f32 %v3210_v5, %v3204_v55  ;;  %v3194_v54 = vadd.f32 %v3193_v29, %v3187_v3 }
 0x5cb   : > { %v12089_v31 = vpop.f32.mrb[16].mxu0  ;;  %v12091_v36 = vpop.f32.mrb[16].mxu1 }
 0x5cc   : > { %v3439_v0 = vmul.f32 %v12089_v31, %v10727_v17  ;;  %v12095_v57 = vpop.f32.mrb[17].mxu0  ;;  %v3441_v20 = vmul.f32 %v12091_v36, %v10740_v15  ;;  %v12099_v2 = vpop.f32.mrb[17].mxu1  ;;  %v3195_v7 = vadd.f32 %v3194_v54, %v3188_v27  ;;  %v3212_v4 = vadd.f32 %v3211_v43, %v3205_v6 }
 0x5cd   : > { %v3440_v12 = vmul.f32 %v12095_v57, %v10729_v9  ;;  %v3313_v42 = vpop.f32.mrb[18].mxu0  ;;  %v3354_v45 = vpop.f32.mrb[18].mxu1  ;;  %v3442_v46 = vmul.f32 %v12099_v2, %v10743_v50 }
 0x5ce   : > { %v3457_v13 = vmul.f32 %v3439_v0, %v12089_v31  ;;  %3196 = vadd.xlane.f32.xlu0 %v3195_v7  ;;  %v3314_v61 = vpop.f32.mrb[19].mxu0  ;;  %v3355_v59 = vpop.f32.mrb[19].mxu1  ;;  %v3213_v34 = vadd.f32 %v3212_v4, %v3206_v40  ;;  %v3459_v60 = vmul.f32 %v3441_v20, %v12091_v36 }
 0x5cf   : > { %v3447_v11 = vadd.f32 %v3440_v12, %v3439_v0  ;;  %v3458_v51 = vmul.f32 %v3440_v12, %v12095_v57  ;;  %v3460_v47 = vmul.f32 %v3442_v46, %v12099_v2 }
 0x5d1   : > { %v3465_v33 = vadd.f32 %v3458_v51, %v3457_v13  ;;  %v3448_v38 = vadd.f32 %v3447_v11, %v3441_v20 }
 0x5d2   : > { %3214 = vadd.xlane.f32.xlu0 %v3213_v34 }
 0x5d3   : > { %v3466_v25 = vadd.f32 %v3465_v33, %v3459_v60  ;;  %v3449_v14 = vadd.f32 %v3448_v38, %v3442_v46  ;;  %v12109_v41 = vpop.f32.mrb[20].mxu0  ;;  %v12111_v35 = vpop.f32.mrb[20].mxu1 }
 0x5d4   : > { %v3443_v18 = vmul.f32 %v12109_v41, %v10755_v56  ;;  %v12115_v63 = vpop.f32.mrb[21].mxu0  ;;  %v12117_v53 = vpop.f32.mrb[21].mxu1  ;;  %v3445_v3 = vmul.f32 %v12111_v35, %v10759_v52 }
 0x5d5   : > { %v3467_v24 = vadd.f32 %v3466_v25, %v3460_v47  ;;  %v3444_v16 = vmul.f32 %v12115_v63, %v10757_v26  ;;  %v3395_v1 = vpop.f32.mrb[22].mxu0  ;;  %v3436_v32 = vpop.f32.mrb[22].mxu1  ;;  %v3446_v29 = vmul.f32 %v12117_v53, %v10766_v28 }
 0x5d6   : > { %v3450_v39 = vadd.f32 %v3449_v14, %v3443_v18  ;;  %v3461_v58 = vmul.f32 %v3443_v18, %v12109_v41  ;;  %v3396_v30 = vpop.f32.mrb[23].mxu0  ;;  %v3437_v44 = vpop.f32.mrb[23].mxu1  ;;  %v3463_v54 = vmul.f32 %v3445_v3, %v12111_v35 }
 0x5d7   : > { %v3462_v55 = vmul.f32 %v3444_v16, %v12115_v63  ;;  %v3464_v0 = vmul.f32 %v3446_v29, %v12117_v53 }
 0x5d8   : > { %v3468_v27 = vadd.f32 %v3467_v24, %v3461_v58  ;;  %v3451_v5 = vadd.f32 %v3450_v39, %v3444_v16 }
 0x5da   : > { %v3469_v6 = vadd.f32 %v3468_v27, %v3462_v55  ;;  %v3452_v43 = vadd.f32 %v3451_v5, %v3445_v3 }
 0x5dc   : > { %v3470_v40 = vadd.f32 %v3469_v6, %v3463_v54  ;;  %v3453_v20 = vadd.f32 %v3452_v43, %v3446_v29 }
 0x5de   : > { %3454 = vadd.xlane.f32.xlu1 %v3453_v20  ;;  %v3471_v7 = vadd.f32 %v3470_v40, %v3464_v0 }
 0x5e0   : > { %3472 = vadd.xlane.f32.xlu0 %v3471_v7 }
 0x65b   : > { %v3197_v4 = vpop.xlane.xlu0 %3196 }
 0x65c   : > { %v3198_v42 = vmul.f32 0.001953125, %v3197_v4 }
 0x65e   : > { %v3217_v13 = vmul.f32 %v3198_v42, %v3198_v42  ;;  %v3220_v47 = vsub.f32 %v12049_v19, %v3198_v42  ;;  %v3221_v18 = vsub.f32 %v12053_v22, %v3198_v42  ;;  %v3222_v24 = vsub.f32 %v12059_v37, %v3198_v42 }
 0x65f   : > { %v3215_v12 = vpop.xlane.xlu0 %3214  ;;  %v3223_v16 = vsub.f32 %v12063_v10, %v3198_v42  ;;  %v3224_v32 = vsub.f32 %v12069_v48, %v3198_v42  ;;  %v3225_v39 = vsub.f32 %v12075_v23, %v3198_v42  ;;  %v3226_v58 = vsub.f32 %v12071_v49, %v3198_v42 }
 0x660   : > { %v3216_v45 = vmul.f32 0.001953125, %v3215_v12  ;;  %v3227_v3 = vsub.f32 %v12077_v8, %v3198_v42 }
 0x662   : > { %v3218_v61 = vsub.f32 %v3216_v45, %v3217_v13 }
 0x664   : > { %v3219_v11 = vmax.f32 %v3218_v61, 0.0 }
 0x666   : > { %v3228_v33 = vadd.f32 1e-05, %v3219_v11 }
 0x668   : > { %8881 = vrsqrt.f32 %v3228_v33 }
 0x66b   : > { %v3455_v59 = vpop.xlane.xlu1 %3454 }
 0x66c   : > { %v3456_v34 = vmul.f32 0.001953125, %v3455_v59 }
 0x66d   : > { %v3473_v51 = vpop.xlane.xlu0 %3472 }
 0x66e   : > { %v3474_v60 = vmul.f32 0.001953125, %v3473_v51  ;;  %v3475_v46 = vmul.f32 %v3456_v34, %v3456_v34  ;;  %v3478_v30 = vsub.f32 %v12089_v31, %v3456_v34  ;;  %v3479_v44 = vsub.f32 %v12095_v57, %v3456_v34 }
 0x66f   : > { %v3480_v19 = vsub.f32 %v12091_v36, %v3456_v34  ;;  %v3481_v22 = vsub.f32 %v12099_v2, %v3456_v34  ;;  %v3482_v37 = vsub.f32 %v12109_v41, %v3456_v34  ;;  %v3483_v10 = vsub.f32 %v12115_v63, %v3456_v34 }
 0x670   : > { %v3476_v38 = vsub.f32 %v3474_v60, %v3475_v46  ;;  %v3484_v48 = vsub.f32 %v12111_v35, %v3456_v34  ;;  %v3485_v23 = vsub.f32 %v12117_v53, %v3456_v34 }
 0x672   : > { %v3477_v25 = vmax.f32 %v3476_v38, 0.0  ;;  %v8882_v1 = vpop.eup %8881 }
 0x673   : > { %v3230_v55 = vmul.f32 %v8882_v1, %v3220_v47  ;;  %v3231_v49 = vmul.f32 %v8882_v1, %v3221_v18  ;;  %v3232_v27 = vmul.f32 %v8882_v1, %v3222_v24  ;;  %v3233_v8 = vmul.f32 %v8882_v1, %v3223_v16 }
 0x674   : > { %v3486_v14 = vadd.f32 1e-05, %v3477_v25  ;;  %v3234_v31 = vmul.f32 %v8882_v1, %v3224_v32  ;;  %v3235_v29 = vmul.f32 %v8882_v1, %v3225_v39  ;;  %v3236_v57 = vmul.f32 %v8882_v1, %v3226_v58 }
 0x675   : > { %v3237_v6 = vmul.f32 %v8882_v1, %v3227_v3 }
 0x676   : > { %8883 = vrsqrt.f32 %v3486_v14 }
 0x680   : > { %v8884_v5 = vpop.eup %8883 }
 0x681   : > { %v3488_v36 = vmul.f32 %v8884_v5, %v3478_v30  ;;  %v3489_v43 = vmul.f32 %v8884_v5, %v3479_v44  ;;  %v3490_v2 = vmul.f32 %v8884_v5, %v3480_v19  ;;  %v3491_v54 = vmul.f32 %v8884_v5, %v3481_v22 }
 0x682   : > { %v3492_v41 = vmul.f32 %v8884_v5, %v3482_v37  ;;  %v3493_v40 = vmul.f32 %v8884_v5, %v3483_v10  ;;  %v3494_v63 = vmul.f32 %v8884_v5, %v3484_v48  ;;  %v3495_v0 = vmul.f32 %v8884_v5, %v3485_v23 }
 0x683   : > { %v3496_v35 = vadd.f32 %v3488_v36, %v3230_v55  ;;  %v3497_v20 = vadd.f32 %v3489_v43, %v3231_v49  ;;  %v3498_v53 = vadd.f32 %v3490_v2, %v3232_v27  ;;  %v3499_v7 = vadd.f32 %v3491_v54, %v3233_v8 }
 0x684   : > { %v3500_v4 = vadd.f32 %v3492_v41, %v3234_v31  ;;  %v3501_v12 = vadd.f32 %v3493_v40, %v3235_v29  ;;  %v3502_v42 = vadd.f32 %v3494_v63, %v3236_v57  ;;  %v3503_v45 = vadd.f32 %v3495_v0, %v3237_v6 }
 0x685   : > { %vm3504_vm12 = vcmp.ge.f32.partialorder %v3496_v35, 0.0  ;;  %vm3505_vm13 = vcmp.ge.f32.partialorder %v3497_v20, 0.0  ;;  %vm3506_vm14 = vcmp.ge.f32.partialorder %v3498_v53, 0.0  ;;  %vm3507_vm5 = vcmp.ge.f32.partialorder %v3499_v7, 0.0 }
 0x686   : > { %vm3508_vm6 = vcmp.ge.f32.partialorder %v3500_v4, 0.0  ;;  %v3512_v13 = vmul.f32 0.01, %v3496_v35  ;;  %v3513_v61 = vmul.f32 0.01, %v3497_v20  ;;  %vm3511_vm11 = vcmp.ge.f32.partialorder %v3503_v45, 0.0 }
 0x687   : > { %v3514_v59 = vmul.f32 0.01, %v3498_v53  ;;  %v3515_v34 = vmul.f32 0.01, %v3499_v7  ;;  %v3516_v11 = vmul.f32 0.01, %v3500_v4 }
 0x688   : > { %v3519_v51 = vmul.f32 0.01, %v3503_v45  ;;  %v3520_v60 = vsel %vm3504_vm12, %v3496_v35, %v3512_v13  ;;  %v3521_v46 = vsel %vm3505_vm13, %v3497_v20, %v3513_v61  ;;  %v3517_v30 = vmul.f32 0.01, %v3501_v12 }
 0x689   : > { %v3522_v33 = vsel %vm3506_vm14, %v3498_v53, %v3514_v59  ;;  %v3523_v38 = vsel %vm3507_vm5, %v3499_v7, %v3515_v34  ;;  %v3524_v25 = vsel %vm3508_vm6, %v3500_v4, %v3516_v11  ;;  %v12146_v47 = vmul.f32 %v3520_v60, %v10727_v17 }
 0x68a   : > { %v3527_v14 = vsel %vm3511_vm11, %v3503_v45, %v3519_v51  ;;  %v12149_v18 = vmul.f32 %v3521_v46, %v10729_v9  ;;  %v12152_v24 = vmul.f32 %v3522_v33, %v10740_v15  ;;  %v12155_v16 = vmul.f32 %v3523_v38, %v10743_v50 }
 0x68b   : > { %v12158_v1 = vmul.f32 %v3524_v25, %v10755_v56  ;;  %v12161_v32 = vmul.f32 %v3527_v14, %v10766_v28  ;;  %vm3509_vm12 = vcmp.ge.f32.partialorder %v3501_v12, 0.0  ;;  %v3518_v48 = vmul.f32 0.01, %v3502_v42 }
 0x68c   : > { %15109 = vst [vmem:[#allocation24_spill] sm:$0xff] %v12152_v24  ;;  %15110 = vst [vmem:[#allocation25_spill] sm:$0xff] %v12155_v16  ;;  %v12165_v39 = vpack.i.bf16 %v12149_v18, %v12146_v47  ;;  %v3525_v44 = vsel %vm3509_vm12, %v3501_v12, %v3517_v30  ;;  %v12200_v22 = vpack.i.bf16 %v12152_v24, %v12149_v18  ;;  %vm3510_vm13 = vcmp.ge.f32.partialorder %v3502_v42, 0.0 }
 0x68d   : > { %15111 = vst [vmem:[#allocation26_spill] sm:$0xff] %v12158_v1  ;;  %15112 = vst [vmem:[#allocation27_spill] sm:$0xff] %v12161_v32  ;;  %v12173_v58 = vpack.i.bf16 %v12158_v1, %v12155_v16  ;;  %v12177_v3 = vpack.i.bf16 %v12152_v24, %v12161_v32  ;;  %v12196_v19 = vmul.f32 %v3525_v44, %v10757_v26  ;;  %vm15118_vm14 = vcmp.lt.s32.totalorder %v9620_v21, 119 }
 0x68e   : > { %7885 = vrot.lane.b32.xlu0 %v12165_v39, %s15113_s20  ;;  %7880 = vrot.lane.b32.xlu1 %v12165_v39, %s15114_s15  ;;  %v12216_v10 = vpack.i.bf16 %v12155_v16, %v12146_v47  ;;  %v3526_v23 = vsel %vm3510_vm13, %v3502_v42, %v3518_v48  ;;  %v12235_v49 = vpack.i.bf16 %v12155_v16, %v12152_v24  ;;  %vm15119_vm5 = vcmp.lt.s32.totalorder %v9620_v21, 118  ;;  %vm15121_vm11 = vmmov %vm15118_vm14 }
 0x68f   : > { %15116 = vst [vmem:[#allocation28_spill] sm:$0xff] %v12196_v19  ;;  %v12208_v37 = vpack.i.bf16 %v12196_v19, %v12158_v1  ;;  %v12231_v55 = vmul.f32 %v3526_v23, %v10759_v52  ;;  %vm15120_vm6 = vmmov %vm15119_vm5 }
 0x690   : > { %vm15122_vm12 = vmmov %vm15121_vm11 }
 0x691   : > { %15117 = vst [vmem:[#allocation29_spill] sm:$0xff] %v12231_v55  ;;  %v12243_v27 = vpack.i.bf16 %v12231_v55, %v12196_v19  ;;  %v12255_v8 = vpack.i.bf16 %v12161_v32, %v12231_v55  ;;  %vm15123_vm13 = vmmov %vm15121_vm11 }
 0x692   : > { %7900 = vrot.lane.b32.xlu0 %v12173_v58, %s15114_s15  ;;  %7890 = vrot.lane.b32.xlu1 %v12177_v3, %s15114_s15 }
 0x696   : > { %7910 = vrot.lane.b32.xlu0 %v12165_v39, %s14936_s16  ;;  %7895 = vrot.lane.b32.xlu1 %v12177_v3, %s15113_s20 }
 0x69a   : > { %7920 = vrot.lane.b32.xlu0 %v12177_v3, %s14936_s16  ;;  %7905 = vrot.lane.b32.xlu1 %v12173_v58, %s15113_s20 }
 0x69e   : > { %7930 = vrot.lane.b32.xlu0 %v12173_v58, %s14936_s16  ;;  %7915 = vrot.lane.b32.xlu1 %v12165_v39, %s15115_s24 }
 0x6a2   : > { %7940 = vrot.lane.b32.xlu0 %v12200_v22, %s14937_s17  ;;  %7925 = vrot.lane.b32.xlu1 %v12177_v3, %s15115_s24 }
 0x6a6   : > { %7950 = vrot.lane.b32.xlu0 %v12208_v37, %s14937_s17  ;;  %7935 = vrot.lane.b32.xlu1 %v12173_v58, %s15115_s24 }
 0x6aa   : > { %7960 = vrot.lane.b32.xlu0 %v12200_v22, %s14939_s18  ;;  %7945 = vrot.lane.b32.xlu1 %v12216_v10, %s14937_s17 }
 0x6ae   : > { %7970 = vrot.lane.b32.xlu0 %v12216_v10, %s14939_s18  ;;  %7955 = vrot.lane.b32.xlu1 %v12200_v22, %s14938_s14 }
 0x6b2   : > { %7980 = vrot.lane.b32.xlu0 %v12208_v37, %s14939_s18  ;;  %7965 = vrot.lane.b32.xlu1 %v12216_v10, %s14938_s14 }
 0x6b6   : > { %7990 = vrot.lane.b32.xlu0 %v12235_v49, %s14940_s10  ;;  %7975 = vrot.lane.b32.xlu1 %v12208_v37, %s14938_s14 }
 0x6ba   : > { %8000 = vrot.lane.b32.xlu0 %v12243_v27, %s15113_s20  ;;  %7985 = vrot.lane.b32.xlu1 %v12165_v39, %s14940_s10 }
 0x6be   : > { %8010 = vrot.lane.b32.xlu0 %v12243_v27, %s14936_s16  ;;  %7995 = vrot.lane.b32.xlu1 %v12243_v27, %s15114_s15 }
 0x6c2   : > { %8020 = vrot.lane.b32.xlu0 %v12255_v8, %s14937_s17  ;;  %8005 = vrot.lane.b32.xlu1 %v12208_v37, %s14940_s10 }
 0x6c6   : > { %8030 = vrot.lane.b32.xlu0 %v12255_v8, %s14939_s18  ;;  %8015 = vrot.lane.b32.xlu1 %v12243_v27, %s15115_s24 }
 0x6ca   : > { %8040 = vrot.lane.b32.xlu0 %v12165_v39, %s14942_s8  ;;  %8025 = vrot.lane.b32.xlu1 %v12255_v8, %s14938_s14 }
 0x6ce   : > { %8050 = vrot.lane.b32.xlu0 %v12177_v3, %s14942_s8  ;;  %8035 = vrot.lane.b32.xlu1 %v12255_v8, %s14940_s10 }
 0x6d2   : > { %8060 = vrot.lane.b32.xlu0 %v12173_v58, %s14942_s8  ;;  %8045 = vrot.lane.b32.xlu1 %v12165_v39, %s14941_s13 }
 0x6d6   : > { %8070 = vrot.lane.b32.xlu0 %v12165_v39, %s14944_s28  ;;  %8055 = vrot.lane.b32.xlu1 %v12177_v3, %s14941_s13 }
 0x6da   : > { %8080 = vrot.lane.b32.xlu0 %v12177_v3, %s14944_s28  ;;  %8065 = vrot.lane.b32.xlu1 %v12173_v58, %s14941_s13 }
 0x6de   : > { %8090 = vrot.lane.b32.xlu0 %v12173_v58, %s14944_s28  ;;  %8075 = vrot.lane.b32.xlu1 %v12165_v39, %s14943_s23 }
 0x6e2   : > { %8100 = vrot.lane.b32.xlu0 %v12165_v39, %s14946_s11  ;;  %8085 = vrot.lane.b32.xlu1 %v12177_v3, %s14943_s23 }
 0x6e6   : > { %8110 = vrot.lane.b32.xlu0 %v12177_v3, %s14946_s11  ;;  %8095 = vrot.lane.b32.xlu1 %v12173_v58, %s14943_s23 }
 0x6ea   : > { %8120 = vrot.lane.b32.xlu0 %v12173_v58, %s14946_s11  ;;  %8105 = vrot.lane.b32.xlu1 %v12165_v39, %s14945_s29 }
 0x6ee   : > { %8130 = vrot.lane.b32.xlu0 %v12165_v39, %s14948_s0  ;;  %8115 = vrot.lane.b32.xlu1 %v12177_v3, %s14945_s29 }
 0x6f2   : > { %8140 = vrot.lane.b32.xlu0 %v12177_v3, %s14948_s0  ;;  %8125 = vrot.lane.b32.xlu1 %v12173_v58, %s14945_s29 }
 0x6f6   : > { %8150 = vrot.lane.b32.xlu0 %v12173_v58, %s14948_s0  ;;  %8135 = vrot.lane.b32.xlu1 %v12165_v39, %s14947_s21 }
 0x6fa   : > { %8160 = vrot.lane.b32.xlu0 %v12165_v39, %s14949_s1  ;;  %8145 = vrot.lane.b32.xlu1 %v12177_v3, %s14947_s21 }
 0x6fe   : > { %8170 = vrot.lane.b32.xlu0 %v12243_v27, %s14942_s8  ;;  %8155 = vrot.lane.b32.xlu1 %v12173_v58, %s14947_s21 }
 0x700   : > { %v7886_v5 = vpop.permute.xlu0 %7885  ;;  %v7881_v31 = vpop.permute.xlu1 %7880 }
 0x701   : > { %v7888_v29 = vunpack.i.h.bf16 %v7886_v5  ;;  %v7887_v57 = vunpack.i.l.bf16 %v7886_v5  ;;  %v7883_v6 = vunpack.i.h.bf16 %v7881_v31  ;;  %v7882_v36 = vunpack.i.l.bf16 %v7881_v31 }
 0x702   : > { %8180 = vrot.lane.b32.xlu0 %v12173_v58, %s14949_s1  ;;  %8165 = vrot.lane.b32.xlu1 %v12177_v3, %s14949_s1 }
 0x703   : > { %v3815_v43 = vsel %vm686_vm1, %v7882_v36, %v7883_v6  ;;  %v3839_v2 = vsel %vm711_vm0, %v7887_v57, %v7888_v29 }
 0x704   : > { %v12329_v54 = vpop.permute.xlu0 %7900  ;;  %v12331_v41 = vpop.permute.xlu1 %7890  ;;  %v3986_v40 = vpack.c.bf16 %v3839_v2, %v3815_v43 }
 0x705   : > { %v7892_v63 = vunpack.i.l.bf16 %v12331_v41  ;;  %v7902_v53 = vunpack.i.l.bf16 %v12329_v54  ;;  %v7893_v7 = vunpack.i.h.bf16 %v12331_v41 }
 0x706   : > { %8190 = vrot.lane.b32.xlu0 %v12243_v27, %s14943_s23  ;;  %8175 = vrot.lane.b32.xlu1 %v12243_v27, %s14941_s13 }
 0x707   : > { %4054 = vmatprep.subr.bf16.mxu0 %v3986_v40  ;;  %v3816_v4 = vsel %vm686_vm1, %v7892_v63, %v7882_v36  ;;  %v3813_v34 = vsel %vm686_vm1, %v7893_v7, %v7902_v53  ;;  %v3814_v14 = vsel %vm686_vm1, %v7883_v6, %v7893_v7 }
 0x708   : > { %v12338_v0 = vpop.permute.xlu0 %7910  ;;  %v12340_v35 = vpop.permute.xlu1 %7895 }
 0x709   : > { %v14849_v20 = vunpack.i.l.bf16 %v12340_v35  ;;  %v7898_v12 = vunpack.i.h.bf16 %v12340_v35  ;;  %v7913_v11 = vunpack.i.h.bf16 %v12338_v0  ;;  %v7912_v51 = vunpack.i.l.bf16 %v12338_v0 }
 0x70a   : > { %8200 = vrot.lane.b32.xlu0 %v12243_v27, %s14945_s29  ;;  %8185 = vrot.lane.b32.xlu1 %v12243_v27, %s14944_s28 }
 0x70b   : > { %v3840_v42 = vsel %vm711_vm0, %v14849_v20, %v7887_v57  ;;  %v3838_v60 = vsel %vm711_vm0, %v7888_v29, %v7898_v12  ;;  %v3863_v48 = vsel %vm736_vm2, %v7912_v51, %v7913_v11 }
 0x70c   : > { %v12358_v45 = vpop.permute.xlu0 %7920  ;;  %v12360_v13 = vpop.permute.xlu1 %7905  ;;  %v3985_v61 = vpack.c.bf16 %v3840_v42, %v3816_v4  ;;  %v3987_v44 = vpack.c.bf16 %v3838_v60, %v3814_v14 }
 0x70d   : > { %v7907_v59 = vunpack.i.l.bf16 %v12360_v13  ;;  %v14847_v30 = vunpack.i.l.bf16 %v12358_v45 }
 0x70e   : > { %8210 = vrot.lane.b32.xlu0 %v12243_v27, %s14947_s21  ;;  %8195 = vrot.lane.b32.xlu1 %v12243_v27, %s14946_s11 }
 0x70f   : > { %4055 = vmatpush1.bf16.msra.mxu0 %v3985_v61  ;;  %v3837_v46 = vsel %vm711_vm0, %v7898_v12, %v7907_v59  ;;  %v3864_v43 = vsel %vm736_vm2, %v14847_v30, %v7912_v51 }
 0x710   : > { %v12379_v33 = vpop.permute.xlu0 %7930  ;;  %v7916_v38 = vpop.permute.xlu1 %7915  ;;  %v3988_v25 = vpack.c.bf16 %v3837_v46, %v3813_v34  ;;  %v7923_v34 = vunpack.i.h.bf16 %v12358_v45 }
 0x711   : > { %v7918_v58 = vunpack.i.h.bf16 %v7916_v38  ;;  %v7917_v3 = vunpack.i.l.bf16 %v7916_v38  ;;  %v7932_v2 = vunpack.i.l.bf16 %v12379_v33 }
 0x712   : > { %8220 = vrot.lane.b32.xlu0 %v12200_v22, %s14951_s3  ;;  %8205 = vrot.lane.b32.xlu1 %v12243_v27, %s14948_s0 }
 0x713   : > { %4095 = vmatprep.subr.bf16.mxu1 %v3988_v25  ;;  %v3887_v23 = vsel %vm761_vm3, %v7917_v3, %v7918_v58  ;;  %v3861_v46 = vsel %vm736_vm2, %v7923_v34, %v7932_v2 }
 0x714   : > { %4096 = vmatpush1.bf16.msra.mxu1 %v3987_v44  ;;  %v7941_v5 = vpop.permute.xlu0 %7940  ;;  %v12392_v31 = vpop.permute.xlu1 %7925  ;;  %v3994_v29 = vpack.c.bf16 %v3887_v23, %v3863_v48  ;;  %v3862_v44 = vsel %vm736_vm2, %v7913_v11, %v7923_v34 }
 0x715   : > { %v7943_v57 = vunpack.i.h.bf16 %v7941_v5  ;;  %v7942_v6 = vunpack.i.l.bf16 %v7941_v5  ;;  %v14848_v36 = vunpack.i.l.bf16 %v12392_v31  ;;  %v7928_v40 = vunpack.i.h.bf16 %v12392_v31 }
 0x716   : > { %8230 = vrot.lane.b32.xlu0 %v12216_v10, %s14951_s3  ;;  %8215 = vrot.lane.b32.xlu1 %v12243_v27, %s14949_s1 }
 0x717   : > { %v3888_v0 = vsel %vm761_vm3, %v14848_v36, %v7917_v3  ;;  %4056 = vmatprep.subr.bf16.mxu0 %v3994_v29  ;;  %v3910_v7 = vsel %vm786_vm4, %v7942_v6, %v7943_v57  ;;  %v3886_v60 = vsel %vm761_vm3, %v7918_v58, %v7928_v40 }
 0x718   : > { %v12411_v4 = vpop.permute.xlu0 %7950  ;;  %v12413_v12 = vpop.permute.xlu1 %7935  ;;  %v3993_v42 = vpack.c.bf16 %v3888_v0, %v3864_v43  ;;  %v4002_v61 = vpack.c.bf16 %v3910_v7, %v12149_v18  ;;  %v3995_v29 = vpack.c.bf16 %v3886_v60, %v3862_v44 }
 0x719   : > { %v7937_v51 = vunpack.i.l.bf16 %v12413_v12  ;;  %v7952_v58 = vunpack.i.l.bf16 %v12411_v4 }
 0x71a   : > { %8240 = vrot.lane.b32.xlu0 %v12208_v37, %s14951_s3  ;;  %8225 = vrot.lane.b32.xlu1 %v12200_v22, %s14950_s2 }
 0x71b   : > { %4057 = vmatpush1.bf16.msra.mxu0 %v3993_v42  ;;  %v3885_v38 = vsel %vm761_vm3, %v7928_v40, %v7937_v51 }
 0x71c   : > { %4058 = vmatprep.subr.bf16.mxu0 %v4002_v61  ;;  %v7961_v25 = vpop.permute.xlu0 %7960  ;;  %v12432_v14 = vpop.permute.xlu1 %7945  ;;  %v3996_v3 = vpack.c.bf16 %v3885_v38, %v3861_v46 }
 0x71d   : > { %v7948_v48 = vunpack.i.h.bf16 %v12432_v14  ;;  %v14844_v23 = vunpack.i.l.bf16 %v12432_v14  ;;  %v7963_v5 = vunpack.i.h.bf16 %v7961_v25  ;;  %v7962_v43 = vunpack.i.l.bf16 %v7961_v25 }
 0x71e   : > { %8250 = vrot.lane.b32.xlu0 %v12200_v22, %s14953_s6  ;;  %8235 = vrot.lane.b32.xlu1 %v12216_v10, %s14950_s2 }
 0x71f   : > { %v3909_v40 = vsel %vm786_vm4, %v7943_v57, %v7948_v48  ;;  %v3911_v11 = vsel %vm786_vm4, %v14844_v23, %v7942_v6  ;;  %4097 = vmatprep.subr.bf16.mxu1 %v3996_v3  ;;  %v3908_v0 = vsel %vm786_vm4, %v7948_v48, %v7952_v58  ;;  %v3958_v25 = vsel %vm15119_vm5, %v7962_v43, %v7963_v5 }
 0x720   : > { %4098 = vmatpush1.bf16.msra.mxu1 %v3995_v29  ;;  %v12453_v7 = vpop.permute.xlu0 %7970  ;;  %v7956_v42 = vpop.permute.xlu1 %7955  ;;  %v4001_v61 = vpack.c.bf16 %v3911_v11, %v12146_v47  ;;  %v4004_v34 = vpack.c.bf16 %v3908_v0, %v12155_v16  ;;  %v4003_v57 = vpack.c.bf16 %v3909_v40, %v12152_v24  ;;  %v13876_v16 = vld [vmem:[#allocation10 + $0x4] sm:$0xf] }
 0x721   : > { %v7958_v60 = vunpack.i.h.bf16 %v7956_v42  ;;  %v7957_v46 = vunpack.i.l.bf16 %v7956_v42  ;;  %v14842_v6 = vunpack.i.l.bf16 %v12453_v7 }
 0x722   : > { %8260 = vrot.lane.b32.xlu0 %v12216_v10, %s14953_s6  ;;  %8245 = vrot.lane.b32.xlu1 %v12208_v37, %s14950_s2 }
 0x723   : > { %4059 = vmatpush1.bf16.msra.mxu0 %v4001_v61  ;;  %4099 = vmatprep.subr.bf16.mxu1 %v4004_v34  ;;  %v3934_v38 = vsel %vm15118_vm14, %v7957_v46, %v7958_v60  ;;  %v3959_v40 = vsel %vm15120_vm6, %v14842_v6, %v7962_v43  ;;  %vm15124_vm14 = vmmov %vm15119_vm5  ;;  %vm15125_vm6 = vcmp.lt.s32.totalorder %v9620_v21, 117 }
 0x724   : > { %4100 = vmatpush1.bf16.msra.mxu1 %v4003_v57  ;;  %v12467_v3 = vpop.permute.xlu0 %7980  ;;  %v12469_v44 = vpop.permute.xlu1 %7965  ;;  %v4010_v48 = vpack.c.bf16 %v3958_v25, %v3934_v38  ;;  %v7973_v38 = vunpack.i.h.bf16 %v12453_v7 }
 0x725   : > { %v14843_v29 = vunpack.i.l.bf16 %v12469_v44  ;;  %v14845_v11 = vunpack.i.l.bf16 %v12467_v3  ;;  %v7968_v0 = vunpack.i.h.bf16 %v12469_v44 }
 0x726   : > { %8270 = vrot.lane.b32.xlu0 %v12208_v37, %s14953_s6  ;;  %8255 = vrot.lane.b32.xlu1 %v12200_v22, %s14952_s5 }
 0x727   : > { %v3935_v42 = vsel %vm15121_vm11, %v14843_v29, %v7957_v46  ;;  %4060 = vmatprep.subr.bf16.mxu0 %v4010_v48  ;;  %v3933_v43 = vsel %vm15122_vm12, %v7958_v60, %v7968_v0  ;;  %v3956_v48 = vsel %vm15124_vm14, %v7973_v38, %v14845_v11  ;;  %v3957_v29 = vsel %vm15119_vm5, %v7963_v5, %v7973_v38  ;;  %vm15126_vm11 = vmmov %vm15125_vm6 }
 0x728   : > { %v12486_v61 = vpop.permute.xlu0 %7990  ;;  %v12488_v34 = vpop.permute.xlu1 %7975  ;;  %v4009_v57 = vpack.c.bf16 %v3959_v40, %v3935_v42  ;;  %v4011_v11 = vpack.c.bf16 %v3957_v29, %v3933_v43  ;;  %v7903_v29 = vunpack.i.h.bf16 %v12329_v54  ;;  %v7938_v43 = vunpack.i.h.bf16 %v12413_v12  ;;  %vm15127_vm12 = vmmov %vm15125_vm6 }
 0x729   : > { %v14846_v25 = vunpack.i.l.bf16 %v12488_v34  ;;  %v7992_v60 = vunpack.i.l.bf16 %v12486_v61  ;;  %vm15134_vm14 = vcmp.lt.s32.totalorder %v9620_v21, 119 }
 0x72a   : > { %8280 = vrot.lane.b32.xlu0 %v12200_v22, %s14964_s26  ;;  %8265 = vrot.lane.b32.xlu1 %v12216_v10, %s14952_s5  ;;  %vm15135_vm5 = vmmov %vm15134_vm14 }
 0x72b   : > { %4061 = vmatpush1.bf16.msra.mxu0 %v4009_v57  ;;  %v3932_v46 = vsel %vm15123_vm13, %v7968_v0, %v14846_v25  ;;  %v7908_v0 = vunpack.i.h.bf16 %v12360_v13  ;;  %vm15128_vm13 = vmmov %vm15125_vm6 }
 0x72c   : > { %v12506_v40 = vpop.permute.xlu0 %8000  ;;  %v12508_v42 = vpop.permute.xlu1 %7985  ;;  %v4012_v6 = vpack.c.bf16 %v3956_v48, %v3932_v46  ;;  %v7993_v46 = vunpack.i.h.bf16 %v12486_v61 }
 0x72d   : > { %v7988_v57 = vunpack.i.h.bf16 %v12508_v42  ;;  %v14853_v23 = vunpack.i.l.bf16 %v12508_v42  ;;  %v14855_v48 = vunpack.i.l.bf16 %v12506_v40 }
 0x72e   : > { %8290 = vrot.lane.b32.xlu0 %v12216_v10, %s14964_s26  ;;  %8275 = vrot.lane.b32.xlu1 %v12208_v37, %s14952_s5 }
 0x72f   : > { %4101 = vmatprep.subr.bf16.mxu1 %v4012_v6  ;;  %v3982_v5 = vsel %vm15125_vm6, %v7988_v57, %v7992_v60  ;;  %v3983_v38 = vsel %vm15126_vm11, %v14853_v23, %v7988_v57  ;;  %v12558_v23 = vld [vmem:[%s14742_s4 + $0x4] sm:$0xf]  ;;  %vm15138_vm6 = vcmp.lt.s32.totalorder %v9620_v21, 118 }
 0x730   : > { %4102 = vmatpush1.bf16.msra.mxu1 %v4011_v11  ;;  %v12528_v25 = vpop.permute.xlu0 %8010  ;;  %v7996_v30 = vpop.permute.xlu1 %7995  ;;  %v4018_v36 = vpack.c.bf16 %v3982_v5, %v3982_v5  ;;  %v4017_v20 = vpack.c.bf16 %v3983_v38, %v3983_v38  ;;  %v3836_v11 = vsel %vm711_vm0, %v7907_v59, %v7908_v0  ;;  %v3981_v5 = vsel %vm15127_vm12, %v7992_v60, %v7993_v46  ;;  %vm15139_vm11 = vmmov %vm15138_vm6 }
 0x731   : > { %v7997_v61 = vunpack.i.l.bf16 %v7996_v30  ;;  %v7998_v38 = vunpack.i.h.bf16 %v7996_v30  ;;  %v7953_v60 = vunpack.i.h.bf16 %v12411_v4 }
 0x732   : > { %8300 = vrot.lane.b32.xlu0 %v12208_v37, %s14964_s26  ;;  %8285 = vrot.lane.b32.xlu1 %v12200_v22, %s14963_s12  ;;  %v4031_v6 = vsel %vm916_vm8, %v4017_v20, 0  ;;  %v3835_v37 = vsel %vm711_vm0, %v7908_v0, %v14855_v48  ;;  %v7933_v20 = vunpack.i.h.bf16 %v12379_v33  ;;  %v3812_v0 = vsel %vm686_vm1, %v7902_v53, %v7903_v29 }
 0x733   : > { %6579 = vmatprep.subr.msk.bf16.mxu0 %vm916_vm8, %v4018_v36  ;;  %v3811_v57 = vsel %vm686_vm1, %v7903_v29, %v7997_v61  ;;  %v3989_v54 = vpack.c.bf16 %v3836_v11, %v3812_v0  ;;  %v8012_v53 = vunpack.i.l.bf16 %v12528_v25  ;;  %v3809_v0 = vsel %vm686_vm1, %v7998_v38, %v7892_v63 }
 0x734   : > { %4063 = vmatpush1.bf16.msra.mxu0 %v4031_v6  ;;  %v12551_v13 = vpop.permute.xlu0 %8020  ;;  %v12553_v59 = vpop.permute.xlu1 %8005  ;;  %v3990_v36 = vpack.c.bf16 %v3835_v37, %v3811_v57  ;;  %v3884_v6 = vsel %vm761_vm3, %v7937_v51, %v7938_v43  ;;  %v8003_v57 = vunpack.i.h.bf16 %v12506_v40  ;;  %v4019_v37 = vpack.c.bf16 %v3981_v5, %v3981_v5 }
 0x735   : > { %v14854_v30 = vunpack.i.l.bf16 %v12553_v59  ;;  %v3860_v51 = vsel %vm736_vm2, %v7932_v2, %v7933_v20  ;;  %v8022_v29 = vunpack.i.l.bf16 %v12551_v13  ;;  %v12597_v33 = vsel %vm786_vm4, %v7952_v58, %v7953_v60 }
 0x736   : > { %8305 = vrot.lane.b32.xlu0 %v12200_v22, %s14971_s19  ;;  %8295 = vrot.lane.b32.xlu1 %v12216_v10, %s14963_s12  ;;  %v4037_v41 = vsel %vm916_vm8, %v4019_v37, 0  ;;  %v15129_v63 = vunpack.i.l.bf16 %v12340_v35  ;;  %v3810_v58 = vsel %vm686_vm1, %v7997_v61, %v7998_v38  ;;  %v15130_v61 = vunpack.i.l.bf16 %v12392_v31 }
 0x737   : > { %4136 = vmatprep.subr.bf16.mxu0 %v3990_v36  ;;  %6580 = vmatmul.mubr.msk.bf16.vlgmr.msra.gmra.mrb[24].mxu0 %vm912_vm9, %v12558_v23  ;;  %v3980_v12 = vsel %vm15128_vm13, %v7993_v46, %v14854_v30  ;;  %v3997_v30 = vpack.c.bf16 %v3884_v6, %v3860_v51  ;;  %vm15141_vm13 = vmmov %vm15127_vm12 }
 0x738   : > { %4137 = vmatpush1.bf16.msra.mxu0 %v3989_v54  ;;  %v12587_v11 = vpop.permute.xlu0 %8030  ;;  %v8016_v5 = vpop.permute.xlu1 %8015  ;;  %v4020_v36 = vpack.c.bf16 %v3980_v12, %v3980_v12  ;;  %4168 = vmatprep.mubr.bf16.mxu0 %v14984_v62  ;;  %v7978_v54 = vunpack.i.h.bf16 %v12488_v34  ;;  %v8013_v12 = vunpack.i.h.bf16 %v12528_v25  ;;  %v3833_v4 = vsel %vm711_vm0, %v8003_v57, %v15129_v63 }
 0x739   : > { %v8018_v46 = vunpack.i.h.bf16 %v8016_v5  ;;  %v8017_v2 = vunpack.i.l.bf16 %v8016_v5  ;;  %v3992_v6 = vpack.c.bf16 %v3833_v4, %v3809_v0  ;;  %v3859_v25 = vsel %vm736_vm2, %v7933_v20, %v8012_v53 }
 0x73a   : > { %8315 = vrot.lane.b32.xlu0 %v12216_v10, %s14971_s19  ;;  %4537 = vrot.lane.b32.xlu1 %v12158_v1, %s14963_s12  ;;  %v8023_v5 = vunpack.i.h.bf16 %v12551_v13  ;;  %v3906_v63 = vsel %vm786_vm4, %v7953_v60, %v8022_v29  ;;  %v7983_v20 = vunpack.i.h.bf16 %v12467_v3  ;;  %v4005_v0 = vpack.c.bf16 %v12597_v33, %v12158_v1 }
 0x73b   : > { %6581 = vmatprep.subr.msk.bf16.mxu1 %vm916_vm8, %v4020_v36  ;;  %v3883_v51 = vsel %vm761_vm3, %v7938_v43, %v8017_v2  ;;  %v3881_v38 = vsel %vm761_vm3, %v8018_v46, %v15130_v61  ;;  %v15131_v36 = vunpack.i.l.bf16 %v12506_v40  ;;  %v8032_v60 = vunpack.i.l.bf16 %v12587_v11 }
 0x73c   : > { %4104 = vmatpush1.bf16.msra.mxu1 %v4037_v41  ;;  %v12619_v37 = vpop.permute.xlu0 %8040  ;;  %v8026_v35 = vpop.permute.xlu1 %8025  ;;  %v3998_v48 = vpack.c.bf16 %v3883_v51, %v3859_v25  ;;  %v8008_v41 = vunpack.i.h.bf16 %v12553_v59  ;;  %v15132_v40 = vunpack.i.l.bf16 %v12358_v45  ;;  %v3882_v4 = vsel %vm761_vm3, %v8017_v2, %v8018_v46 }
 0x73d   : > { %v3834_v43 = vsel %vm711_vm0, %v15131_v36, %v8003_v57  ;;  %v8027_v13 = vunpack.i.l.bf16 %v8026_v35  ;;  %4177 = vmatprep.subr.bf16.mxu1 %v3992_v6  ;;  %v4006_v33 = vpack.c.bf16 %v3906_v63, %v12196_v19  ;;  %v15133_v25 = vunpack.i.l.bf16 %v12488_v34 }
 0x73e   : > { %4561 = vrot.lane.b32.xlu0 %v12158_v1, %s14971_s19  ;;  %8310 = vrot.lane.b32.xlu1 %v12200_v22, %s14970_s25  ;;  %v3991_v31 = vpack.c.bf16 %v3834_v43, %v3810_v58  ;;  %v3857_v57 = vsel %vm736_vm2, %v8013_v12, %v15132_v40  ;;  %v8028_v58 = vunpack.i.h.bf16 %v8026_v35  ;;  %v15136_v46 = vunpack.i.l.bf16 %v12432_v14 }
 0x73f   : > { %4138 = vmatprep.subr.bf16.mxu0 %v3998_v48  ;;  %6582 = vmatmul.mubr.msk.bf16.vlgmr.msra.gmra.mrb[24].mxu1 %vm912_vm9, %v12558_v23  ;;  %v4000_v6 = vpack.c.bf16 %v3881_v38, %v3857_v57  ;;  %v3931_v22 = vsel %vm15134_vm14, %v15133_v25, %v7978_v54  ;;  %v3930_v48 = vsel %vm15135_vm5, %v7978_v54, %v8027_v13  ;;  %v15137_v63 = vunpack.i.l.bf16 %v12467_v3  ;;  %vm15143_vm14 = vmmov %vm15135_vm5 }
 0x740   : > { %4139 = vmatpush1.bf16.msra.mxu0 %v3997_v30  ;;  %4178 = vmatpush1.bf16.msra.mxu1 %v3991_v31  ;;  %v12653_v45 = vpop.permute.xlu0 %8050  ;;  %v8036_v51 = vpop.permute.xlu1 %8035  ;;  %v3912_v2 = vsel %vm786_vm4, %v8023_v5, %v15136_v46  ;;  %v3858_v30 = vsel %vm736_vm2, %v8012_v53, %v8013_v12  ;;  %v3905_v35 = vsel %vm786_vm4, %v8022_v29, %v8023_v5  ;;  %v8033_v54 = vunpack.i.h.bf16 %v12587_v11 }
 0x741   : > { %v3955_v34 = vsel %vm15138_vm6, %v15137_v63, %v7983_v20  ;;  %v8037_v61 = vunpack.i.l.bf16 %v8036_v51  ;;  %4140 = vmatprep.subr.bf16.mxu0 %v4006_v33  ;;  %4179 = vmatprep.subr.bf16.mxu1 %v4000_v6  ;;  %v3999_v14 = vpack.c.bf16 %v3882_v4, %v3858_v30  ;;  %v3954_v3 = vsel %vm15139_vm11, %v7983_v20, %v8032_v60  ;;  %vm15145_vm11 = vmmov %vm15127_vm12 }
 0x742   : > { %8325 = vrot.lane.b32.xlu0 %v12165_v39, %s14994_s27  ;;  %8320 = vrot.lane.b32.xlu1 %v12216_v10, %s14970_s25  ;;  %v15140_v53 = vunpack.i.l.bf16 %v12553_v59  ;;  %v8038_v12 = vunpack.i.h.bf16 %v8036_v51  ;;  %v4014_v5 = vpack.c.bf16 %v3954_v3, %v3930_v48  ;;  %v4008_v38 = vpack.c.bf16 %v3912_v2, %v12161_v32 }
 0x743   : > { %v4013_v11 = vpack.c.bf16 %v3955_v34, %v3931_v22  ;;  %4209 = vmatprep.mubr.bf16.mxu1 %v14984_v62  ;;  %v4007_v36 = vpack.c.bf16 %v3905_v35, %v12231_v55  ;;  %v3978_v59 = vsel %vm15141_vm13, %v8008_v41, %v8037_v61  ;;  %v15142_v20 = vunpack.i.l.bf16 %v12469_v44  ;;  %vm15148_vm13 = vmmov %vm15145_vm11 }
 0x744   : > { %v3979_v29 = vsel %vm15127_vm12, %v15140_v53, %v8008_v41  ;;  %4141 = vmatpush1.bf16.msra.mxu0 %v4005_v0  ;;  %4180 = vmatpush1.bf16.msra.mxu1 %v3999_v14  ;;  %v12682_v39 = vpop.permute.xlu0 %8060  ;;  %v8046_v10 = vpop.permute.xlu1 %8045  ;;  %v8043_v31 = vunpack.i.h.bf16 %v12619_v37  ;;  %v8042_v4 = vunpack.i.l.bf16 %v12619_v37  ;;  %v3929_v33 = vsel %vm15135_vm5, %v8027_v13, %v8028_v58  ;;  %vm15146_vm12 = vmmov %vm15138_vm6 }
 0x745   : > { %v3936_v43 = vsel %vm15143_vm14, %v8028_v58, %v15142_v20  ;;  %v8048_v40 = vunpack.i.h.bf16 %v8046_v10  ;;  %v8047_v57 = vunpack.i.l.bf16 %v8046_v10  ;;  %4142 = vmatprep.subr.bf16.mxu0 %v4014_v5  ;;  %4181 = vmatprep.subr.bf16.mxu1 %v4008_v38  ;;  %v4021_v0 = vpack.c.bf16 %v3979_v29, %v3979_v29 }
 0x746   : > { %v8052_v6 = vunpack.i.l.bf16 %v12653_v45  ;;  %8335 = vrot.lane.b32.xlu0 %v12255_v8, %s14951_s3  ;;  %4585 = vrot.lane.b32.xlu1 %v12158_v1, %s14970_s25  ;;  %v15144_v44 = vunpack.i.l.bf16 %v12453_v7  ;;  %v4022_v25 = vpack.c.bf16 %v3978_v59, %v3978_v59  ;;  %v3977_v37 = vsel %vm15145_vm11, %v8037_v61, %v8038_v12 }
 0x747   : > { %v3953_v13 = vsel %vm15146_vm12, %v8032_v60, %v8033_v54  ;;  %v15147_v48 = vunpack.i.l.bf16 %v12508_v42  ;;  %vm15149_vm14 = vcmp.lt.s32.totalorder %v9620_v21, 110  ;;  %v4043_v60 = vsel %vm916_vm8, %v4021_v0, 0 }
 0x748   : > { %v3960_v41 = vsel %vm15138_vm6, %v8033_v54, %v15144_v44  ;;  %4143 = vmatpush1.bf16.msra.mxu0 %v4013_v11  ;;  %4182 = vmatpush1.bf16.msra.mxu1 %v4007_v36  ;;  %v12708_v58 = vpop.permute.xlu0 %8070  ;;  %v12710_v51 = vpop.permute.xlu1 %8055  ;;  %v3582_v46 = vsel %vm15149_vm14, %v8047_v57, %v8048_v40  ;;  %v4015_v63 = vpack.c.bf16 %v3953_v13, %v3929_v33  ;;  %vm15150_vm5 = vcmp.lt.s32.totalorder %v9620_v21, 111  ;;  %vm15152_vm11 = vmmov %vm15149_vm14 }
 0x749   : > { %v4016_v22 = vpack.c.bf16 %v3960_v41, %v3936_v43  ;;  %v3984_v7 = vsel %vm15148_vm13, %v8038_v12, %v15147_v48  ;;  %v8057_v2 = vunpack.i.l.bf16 %v12710_v51  ;;  %6583 = vmatprep.subr.msk.bf16.mxu0 %vm916_vm8, %v4022_v25  ;;  %v3559_v34 = vsel %vm15150_vm5, %v8052_v6, %v8042_v4  ;;  %vm15151_vm6 = vmmov %vm15150_vm5 }
 0x74a   : > { %v8062_v42 = vunpack.i.l.bf16 %v12682_v39  ;;  %4609 = vrot.lane.b32.xlu0 %v12158_v1, %s14994_s27  ;;  %8330 = vrot.lane.b32.xlu1 %v12235_v49, %s14994_s27  ;;  %v3558_v30 = vsel %vm15151_vm6, %v8042_v4, %v8043_v31  ;;  %v4023_v35 = vpack.c.bf16 %v3977_v37, %v3977_v37  ;;  %v8058_v61 = vunpack.i.h.bf16 %v12710_v51  ;;  %vm15153_vm12 = vmmov %vm15150_vm5 }
 0x74b   : > { %4183 = vmatprep.subr.bf16.mxu1 %v4016_v22  ;;  %v3583_v54 = vsel %vm15152_vm11, %v8057_v2, %v8047_v57  ;;  %v4024_v14 = vpack.c.bf16 %v3984_v7, %v3984_v7  ;;  %v3753_v3 = vpack.c.bf16 %v3582_v46, %v3558_v30  ;;  %v8053_v53 = vunpack.i.h.bf16 %v12653_v45  ;;  %vm15154_vm13 = vmmov %vm15152_vm11 }
 0x74c   : > { %4145 = vmatpush1.bf16.msra.mxu0 %v4043_v60  ;;  %4184 = vmatpush1.bf16.msra.mxu1 %v4015_v63  ;;  %v12738_v29 = vpop.permute.xlu0 %8080  ;;  %v12740_v49 = vpop.permute.xlu1 %8065  ;;  %v3752_v12 = vpack.c.bf16 %v3583_v54, %v3559_v34  ;;  %v4049_v38 = vsel %vm916_vm8, %v4023_v35, 0  ;;  %v8073_v10 = vunpack.i.h.bf16 %v12708_v58  ;;  %v8072_v36 = vunpack.i.l.bf16 %v12708_v58  ;;  %vm15155_vm14 = vmmov %vm15152_vm11 }
 0x74d   : > { %v8067_v5 = vunpack.i.l.bf16 %v12740_v49  ;;  %6585 = vmatprep.subr.msk.bf16.mxu1 %vm916_vm8, %v4024_v14  ;;  %4245 = vmatprep.subr.bf16.mxu0 %v3753_v3  ;;  %v3556_v11 = vsel %vm15153_vm12, %v8053_v53, %v8062_v42  ;;  %v3581_v59 = vsel %vm15154_vm13, %v8048_v40, %v8058_v61  ;;  %v3557_v4 = vsel %vm15150_vm5, %v8043_v31, %v8053_v53 }
 0x74e   : > { %8350 = vrot.lane.b32.xlu0 %v12255_v8, %s14952_s5  ;;  %8340 = vrot.lane.b32.xlu1 %v12255_v8, %s14950_s2  ;;  %v3754_v40 = vpack.c.bf16 %v3581_v59, %v3557_v4  ;;  %v14862_v41 = vunpack.i.l.bf16 %v12738_v29  ;;  %vm15156_vm6 = vcmp.lt.s32.totalorder %v9620_v21, 109  ;;  %vm15157_vm11 = vcmp.lt.s32.totalorder %v9620_v21, 101 }
 0x74f   : > { %6584 = vmatmul.mubr.msk.bf16.vlgmr.msra.gmra.mrb[28].mxu0 %vm912_vm9, %v12558_v23  ;;  %v3580_v20 = vsel %vm15155_vm14, %v8058_v61, %v8067_v5  ;;  %v3606_v31 = vsel %vm15156_vm6, %v8072_v36, %v8073_v10  ;;  %vm15158_vm12 = vmmov %vm15156_vm6  ;;  %v8083_v60 = vunpack.i.h.bf16 %v12738_v29 }
 0x750   : > { %4186 = vmatpush1.bf16.msra.mxu1 %v4049_v38  ;;  %4246 = vmatpush1.bf16.msra.mxu0 %v3752_v12  ;;  %v12763_v43 = vpop.permute.xlu0 %8090  ;;  %v8076_v57 = vpop.permute.xlu1 %8075  ;;  %v3755_v0 = vpack.c.bf16 %v3580_v20, %v3556_v11  ;;  %vm15159_vm13 = vmmov %vm15157_vm11 }
 0x751   : > { %v8078_v33 = vunpack.i.h.bf16 %v8076_v57  ;;  %v8077_v44 = vunpack.i.l.bf16 %v8076_v57  ;;  %4277 = vmatprep.mubr.bf16.mxu0 %v14984_v62  ;;  %v8092_v48 = vunpack.i.l.bf16 %v12763_v43  ;;  %vm15160_vm14 = vmmov %vm15156_vm6 }
 0x752   : > { %8360 = vrot.lane.b32.xlu0 %v12243_v27, %s14963_s12  ;;  %8345 = vrot.lane.b32.xlu1 %v12255_v8, %s14953_s6  ;;  %vm15161_vm5 = vmmov %vm15157_vm11 }
 0x753   : > { %4286 = vmatprep.subr.bf16.mxu1 %v3755_v0  ;;  %6586 = vmatmul.mubr.msk.bf16.vlgmr.msra.gmra.mrb[28].mxu1 %vm912_vm9, %v12558_v23  ;;  %v3630_v25 = vsel %vm15157_vm11, %v8077_v44, %v8078_v33  ;;  %v3607_v23 = vsel %vm15158_vm12, %v14862_v41, %v8072_v36  ;;  %v3604_v35 = vsel %vm15160_vm14, %v8083_v60, %v8092_v48  ;;  %vm15162_vm6 = vmmov %vm15161_vm5 }
 0x754   : > { %4287 = vmatpush1.bf16.msra.mxu1 %v3754_v40  ;;  %v12779_v22 = vpop.permute.xlu0 %8100  ;;  %v12781_v37 = vpop.permute.xlu1 %8085  ;;  %v3761_v13 = vpack.c.bf16 %v3630_v25, %v3606_v31  ;;  %4318 = vmatprep.mubr.bf16.mxu1 %v14984_v62  ;;  %vm15163_vm11 = vmmov %vm15158_vm12  ;;  %vm15164_vm12 = vcmp.lt.s32.totalorder %v9620_v21, 100 }
 0x755   : > { %v14861_v58 = vunpack.i.l.bf16 %v12781_v37  ;;  %v8088_v7 = vunpack.i.h.bf16 %v12781_v37  ;;  %v8103_v61 = vunpack.i.h.bf16 %v12779_v22  ;;  %v8102_v54 = vunpack.i.l.bf16 %v12779_v22  ;;  %vm15166_vm14 = vmmov %vm15164_vm12 }
 0x756   : > { %8365 = vrot.lane.b32.xlu0 %v12243_v27, %s14971_s19  ;;  %8355 = vrot.lane.b32.xlu1 %v12255_v8, %s14964_s26  ;;  %v3605_v11 = vsel %vm15163_vm11, %v8073_v10, %v8083_v60  ;;  %vm15169_vm11 = vmmov %vm15164_vm12 }
 0x757   : > { %v3631_v46 = vsel %vm15159_vm13, %v14861_v58, %v8077_v44  ;;  %4247 = vmatprep.subr.bf16.mxu0 %v3761_v13  ;;  %v3629_v14 = vsel %vm15161_vm5, %v8078_v33, %v8088_v7  ;;  %v3654_v0 = vsel %vm15164_vm12, %v8102_v54, %v8103_v61  ;;  %vm15165_vm13 = vcmp.lt.s32.totalorder %v9620_v21, 99 }
 0x758   : > { %v12800_v63 = vpop.permute.xlu0 %8110  ;;  %v12802_v34 = vpop.permute.xlu1 %8095  ;;  %v3760_v8 = vpack.c.bf16 %v3631_v46, %v3607_v23  ;;  %v3762_v20 = vpack.c.bf16 %v3629_v14, %v3605_v11  ;;  %vm15167_vm5 = vmmov %vm15165_vm13 }
 0x759   : > { %v8097_v30 = vunpack.i.l.bf16 %v12802_v34  ;;  %v14859_v57 = vunpack.i.l.bf16 %v12800_v63  ;;  %v8113_v13 = vunpack.i.h.bf16 %v12800_v63  ;;  %vm15170_vm12 = vmmov %vm15167_vm5 }
 0x75a   : > { %4567 = vrot.lane.b32.xlu0 %v12161_v32, %s14971_s19  ;;  %4543 = vrot.lane.b32.xlu1 %v12161_v32, %s14963_s12 }
 0x75b   : > { %4248 = vmatpush1.bf16.msra.mxu0 %v3760_v8  ;;  %v3628_v3 = vsel %vm15162_vm6, %v8088_v7, %v8097_v30  ;;  %v3655_v31 = vsel %vm15166_vm14, %v14859_v57, %v8102_v54  ;;  %vm15168_vm6 = vmmov %vm15167_vm5  ;;  %vm15172_vm14 = vcmp.lt.s32.totalorder %v9620_v21, 91 }
 0x75c   : > { %v12821_v53 = vpop.permute.xlu0 %8120  ;;  %v8106_v12 = vpop.permute.xlu1 %8105  ;;  %v3763_v38 = vpack.c.bf16 %v3628_v3, %v3604_v35 }
 0x75d   : > { %v8108_v36 = vunpack.i.h.bf16 %v8106_v12  ;;  %v8107_v59 = vunpack.i.l.bf16 %v8106_v12  ;;  %v8122_v25 = vunpack.i.l.bf16 %v12821_v53 }
 0x75e   : > { %8375 = vrot.lane.b32.xlu0 %v12243_v27, %s14994_s27  ;;  %8370 = vrot.lane.b32.xlu1 %v12243_v27, %s14970_s25 }
 0x75f   : > { %4288 = vmatprep.subr.bf16.mxu1 %v3763_v38  ;;  %v3678_v4 = vsel %vm15165_vm13, %v8107_v59, %v8108_v36  ;;  %v3652_v14 = vsel %vm15169_vm11, %v8113_v13, %v8122_v25  ;;  %vm15171_vm13 = vmmov %vm15169_vm11 }
 0x760   : > { %4289 = vmatpush1.bf16.msra.mxu1 %v3762_v20  ;;  %v12834_v10 = vpop.permute.xlu0 %8130  ;;  %v12836_v33 = vpop.permute.xlu1 %8115  ;;  %v3769_v44 = vpack.c.bf16 %v3678_v4, %v3654_v0  ;;  %v3653_v12 = vsel %vm15171_vm13, %v8103_v61, %v8113_v13 }
 0x761   : > { %v14857_v40 = vunpack.i.l.bf16 %v12836_v33  ;;  %v8118_v27 = vunpack.i.h.bf16 %v12836_v33  ;;  %v8133_v35 = vunpack.i.h.bf16 %v12834_v10  ;;  %v8132_v54 = vunpack.i.l.bf16 %v12834_v10 }
 0x762   : > { %4591 = vrot.lane.b32.xlu1 %v12161_v32, %s14970_s25  ;;  %4249 = vmatprep.subr.bf16.mxu0 %v3769_v44 }
 0x763   : > { %v3679_v22 = vsel %vm15167_vm5, %v14857_v40, %v8107_v59  ;;  %v3677_v8 = vsel %vm15168_vm6, %v8108_v36, %v8118_v27  ;;  %v3702_v10 = vsel %vm15172_vm14, %v8132_v54, %v8133_v35  ;;  %vm15173_vm5 = vcmp.lt.s32.totalorder %v9620_v21, 90  ;;  %vm15174_vm6 = vmmov %vm15172_vm14 }
 0x764   : > { %v12852_v23 = vpop.permute.xlu0 %8140  ;;  %v12854_v7 = vpop.permute.xlu1 %8125  ;;  %v3768_v46 = vpack.c.bf16 %v3679_v22, %v3655_v31  ;;  %v3770_v0 = vpack.c.bf16 %v3677_v8, %v3653_v12  ;;  %vm15175_vm11 = vmmov %vm15173_vm5  ;;  %v14865_v40 = vunpack.i.h.bf16 %v12763_v43 }
 0x765   : > { %v8127_v60 = vunpack.i.l.bf16 %v12854_v7  ;;  %v14856_v4 = vunpack.i.l.bf16 %v12852_v23  ;;  %vm15177_vm13 = vmmov %vm15173_vm5 }
 0x766   : > { %4615 = vrot.lane.b32.xlu1 %v12161_v32, %s14994_s27  ;;  %4250 = vmatpush1.bf16.msra.mxu0 %v3768_v46  ;;  %vm15178_vm14 = vmmov %vm15174_vm6 }
 0x767   : > { %v3676_v3 = vsel %vm15170_vm12, %v8118_v27, %v8127_v60  ;;  %vm15176_vm12 = vcmp.lt.s32.totalorder %v9620_v21, 89 }
 0x768   : > { %v12873_v38 = vpop.permute.xlu0 %8150  ;;  %v8136_v11 = vpop.permute.xlu1 %8135  ;;  %v3771_v36 = vpack.c.bf16 %v3676_v3, %v3652_v14  ;;  %v3703_v14 = vsel %vm15174_vm6, %v14856_v4, %v8132_v54  ;;  %v8068_v4 = vunpack.i.h.bf16 %v12740_v49  ;;  %vm15179_vm6 = vcmp.lt.s32.totalorder %v9620_v21, 111 }
 0x769   : > { %v8138_v59 = vunpack.i.h.bf16 %v8136_v11  ;;  %v8137_v20 = vunpack.i.l.bf16 %v8136_v11  ;;  %v14860_v3 = vunpack.i.l.bf16 %v12873_v38  ;;  %v8123_v49 = vunpack.i.h.bf16 %v12821_v53 }
 0x76a   : > { %4290 = vmatprep.subr.bf16.mxu1 %v3771_v36  ;;  %v8063_v36 = vunpack.i.h.bf16 %v12682_v39 }
 0x76b   : > { %4291 = vmatpush1.bf16.msra.mxu1 %v3770_v0  ;;  %v3726_v44 = vsel %vm15173_vm5, %v8137_v20, %v8138_v59  ;;  %v8143_v0 = vunpack.i.h.bf16 %v12852_v23 }
 0x76c   : > { %v8161_v27 = vpop.permute.xlu0 %8160  ;;  %v12880_v31 = vpop.permute.xlu1 %8145  ;;  %v3777_v61 = vpack.c.bf16 %v3726_v44, %v3702_v10 }
 0x76d   : > { %v8163_v22 = vunpack.i.h.bf16 %v8161_v27  ;;  %v8162_v13 = vunpack.i.l.bf16 %v8161_v27  ;;  %v14858_v46 = vunpack.i.l.bf16 %v12880_v31  ;;  %v8148_v8 = vunpack.i.h.bf16 %v12880_v31 }
 0x76e   : > { %4251 = vmatprep.subr.bf16.mxu0 %v3777_v61 }
 0x76f   : > { %v3727_v12 = vsel %vm15175_vm11, %v14858_v46, %v8137_v20  ;;  %v3750_v11 = vsel %vm15176_vm12, %v8162_v13, %v8163_v22  ;;  %v14864_v20 = vunpack.i.h.bf16 %v12802_v34  ;;  %v3725_v46 = vsel %vm15177_vm13, %v8138_v59, %v8148_v8  ;;  %vm15180_vm11 = vmmov %vm15178_vm14 }
 0x770   : > { %v12897_v10 = vpop.permute.xlu0 %8170  ;;  %v12899_v44 = vpop.permute.xlu1 %8155  ;;  %v3776_v27 = vpack.c.bf16 %v3727_v12, %v3703_v14  ;;  %v3785_v54 = vpack.c.bf16 %v3750_v11, %v3750_v11  ;;  %v3700_v14 = vsel %vm15178_vm14, %v8143_v0, %v14860_v3  ;;  %v3555_v11 = vsel %vm15179_vm6, %v8062_v42, %v8063_v36 }
 0x771   : > { %v14863_v61 = vunpack.i.l.bf16 %v12899_v44  ;;  %v3701_v59 = vsel %vm15180_vm11, %v8133_v35, %v8143_v0  ;;  %vm15181_vm12 = vcmp.lt.s32.totalorder %v9620_v21, 110  ;;  %vm15182_vm13 = vcmp.lt.s32.totalorder %v9620_v21, 109 }
 0x772   : > { %4252 = vmatpush1.bf16.msra.mxu0 %v3776_v27  ;;  %v3579_v39 = vsel %vm15181_vm12, %v8067_v5, %v8068_v4  ;;  %v12939_v42 = vsel %vm15182_vm13, %v8092_v48, %v14865_v40  ;;  %vm15183_vm14 = vcmp.lt.s32.totalorder %v9620_v21, 101  ;;  %v8172_v5 = vunpack.i.l.bf16 %v12897_v10 }
 0x773   : > { %6587 = vmatprep.subr.msk.bf16.mxu0 %vm916_vm8, %v3785_v54  ;;  %v3724_v12 = vsel %vm15173_vm5, %v8148_v8, %v14863_v61  ;;  %v3778_v8 = vpack.c.bf16 %v3725_v46, %v3701_v59  ;;  %v12947_v35 = vsel %vm15183_vm14, %v8097_v30, %v14864_v20  ;;  %vm15184_vm5 = vcmp.lt.s32.totalorder %v9620_v21, 89 }
 0x774   : > { %v12922_v27 = vpop.permute.xlu0 %8180  ;;  %v12924_v54 = vpop.permute.xlu1 %8165  ;;  %v3779_v57 = vpack.c.bf16 %v3724_v12, %v3700_v14  ;;  %vm15185_vm6 = vmmov %vm15184_vm5  ;;  %v8173_v0 = vunpack.i.h.bf16 %v12897_v10  ;;  %v3756_v40 = vpack.c.bf16 %v3579_v39, %v3555_v11  ;;  %vm15187_vm12 = vcmp.lt.s32.totalorder %v9620_v21, 100 }
 0x775   : > { %v14866_v3 = vunpack.i.l.bf16 %v12922_v27  ;;  %v8168_v58 = vunpack.i.h.bf16 %v12924_v54  ;;  %v8167_v41 = vunpack.i.l.bf16 %v12924_v54  ;;  %vm15186_vm11 = vmmov %vm15184_vm5  ;;  %vm15188_vm13 = vcmp.lt.s32.totalorder %v9620_v21, 110 }
 0x776   : > { %4292 = vmatprep.subr.bf16.mxu1 %v3779_v57  ;;  %vm15189_vm14 = vcmp.lt.s32.totalorder %v9620_v21, 111 }
 0x777   : > { %4293 = vmatpush1.bf16.msra.mxu1 %v3778_v8  ;;  %v3748_v48 = vsel %vm15184_vm5, %v8168_v58, %v14866_v3  ;;  %v3751_v46 = vsel %vm15185_vm6, %v8167_v41, %v8162_v13  ;;  %v3749_v30 = vsel %vm15186_vm11, %v8163_v22, %v8168_v58  ;;  %v3764_v3 = vpack.c.bf16 %v12947_v35, %v12939_v42  ;;  %vm15190_vm5 = vmmov %vm15188_vm13  ;;  %v12985_v35 = vld [vmem:[%s14742_s4] sm:$0xf] }
 0x778   : > { %v8191_v14 = vpop.permute.xlu0 %8190  ;;  %v8176_v57 = vpop.permute.xlu1 %8175  ;;  %v3787_v12 = vpack.c.bf16 %v3748_v48, %v3748_v48  ;;  %v3784_v59 = vpack.c.bf16 %v3751_v46, %v3751_v46  ;;  %v3786_v8 = vpack.c.bf16 %v3749_v30, %v3749_v30  ;;  %v12970_v58 = vsel %vm15187_vm12, %v8122_v25, %v8123_v49  ;;  %vm15191_vm6 = vmmov %vm15189_vm14 }
 0x779   : > { %v8178_v61 = vunpack.i.h.bf16 %v8176_v57  ;;  %v8177_v20 = vunpack.i.l.bf16 %v8176_v57  ;;  %v8128_v22 = vunpack.i.h.bf16 %v12854_v7  ;;  %v8192_v11 = vunpack.i.l.bf16 %v8191_v14  ;;  %vm15192_vm11 = vmmov %vm15190_vm5 }
 0x77a   : > { %6589 = vmatprep.subr.msk.bf16.mxu1 %vm916_vm8, %v3787_v12  ;;  %v4222_v13 = vsel %vm916_vm8, %v3784_v59, 0  ;;  %v4228_v10 = vsel %vm916_vm8, %v3786_v8, 0  ;;  %v3554_v42 = vsel %vm15189_vm14, %v8063_v36, %v8172_v5  ;;  %v3553_v48 = vsel %vm15191_vm6, %v8172_v5, %v8173_v0  ;;  %vm15193_vm12 = vmmov %vm15191_vm6 }
 0x77b   : > { %v3577_v39 = vsel %vm15188_vm13, %v8177_v20, %v8178_v61  ;;  %4254 = vmatpush1.bf16.msra.mxu0 %v4222_v13  ;;  %4295 = vmatpush1.bf16.msra.mxu1 %v4228_v10  ;;  %v3578_v25 = vsel %vm15190_vm5, %v8068_v4, %v8177_v20  ;;  %v8193_v46 = vunpack.i.h.bf16 %v8191_v14  ;;  %v3576_v36 = vsel %vm15192_vm11, %v8178_v61, %v8057_v2 }
 0x77c   : > { %v8201_v30 = vpop.permute.xlu0 %8200  ;;  %v8186_v57 = vpop.permute.xlu1 %8185  ;;  %v3757_v12 = vpack.c.bf16 %v3578_v25, %v3554_v42  ;;  %v3552_v4 = vsel %vm15193_vm12, %v8173_v0, %v8052_v6  ;;  %v3758_v20 = vpack.c.bf16 %v3577_v39, %v3553_v48  ;;  %vm15194_vm13 = vcmp.lt.s32.totalorder %v9620_v21, 99 }
 0x77d   : > { %v8188_v59 = vunpack.i.h.bf16 %v8186_v57  ;;  %v8187_v8 = vunpack.i.l.bf16 %v8186_v57  ;;  %v3675_v5 = vsel %vm15194_vm13, %v8127_v60, %v8128_v22  ;;  %v8158_v14 = vunpack.i.h.bf16 %v12899_v44 }
 0x77e   : > { %v8202_v13 = vunpack.i.l.bf16 %v8201_v30  ;;  %4327 = vmatprep.subr.bf16.mxu0 %v3757_v12  ;;  %v3759_v51 = vpack.c.bf16 %v3576_v36, %v3552_v4  ;;  %6588 = vmatmul.mubr.msk.bf16.vlgmr.msra.gmra.mrb[24].mxu0 %vm912_vm9, %v12985_v35  ;;  %v8203_v2 = vunpack.i.h.bf16 %v8201_v30  ;;  %vm15195_vm14 = vcmp.lt.s32.totalorder %v9620_v21, 109 }
 0x77f   : > { %v3601_v45 = vsel %vm15195_vm14, %v8187_v8, %v8188_v59  ;;  %6590 = vmatmul.mubr.msk.bf16.vlgmr.msra.gmra.mrb[24].mxu1 %vm912_vm9, %v12985_v35  ;;  %4328 = vmatpush1.bf16.msra.mxu0 %v3756_v40  ;;  %v15196_v6 = vunpack.i.h.bf16 %v12763_v43  ;;  %vm15197_vm5 = vmmov %vm15195_vm14  ;;  %v15198_v60 = vunpack.i.h.bf16 %v12802_v34  ;;  %vm15199_vm6 = vcmp.lt.s32.totalorder %v9620_v21, 101 }
 0x780   : > { %v8183_v0 = vunpack.i.h.bf16 %v12922_v27  ;;  %vm15200_vm11 = vmmov %vm15199_vm6  ;;  %4368 = vmatprep.subr.bf16.mxu1 %v3759_v51  ;;  %v8211_v39 = vpop.permute.xlu0 %8210  ;;  %v8196_v42 = vpop.permute.xlu1 %8195  ;;  %v15201_v40 = vunpack.i.l.bf16 %v12738_v29  ;;  %v15203_v30 = vunpack.i.l.bf16 %v12781_v37  ;;  %4359 = vmatprep.mubr.bf16.mxu0 %v14984_v62  ;;  %vm15205_vm14 = vcmp.lt.s32.totalorder %v9620_v21, 99 }
 0x781   : > { %v3602_v7 = vsel %vm15197_vm5, %v15196_v6, %v8187_v8  ;;  %v3626_v61 = vsel %vm15199_vm6, %v15198_v60, %v8192_v11  ;;  %v3625_v10 = vsel %vm15200_vm11, %v8192_v11, %v8193_v46  ;;  %vm15202_vm12 = vmmov %vm15197_vm5  ;;  %4369 = vmatpush1.bf16.msra.mxu1 %v3758_v20  ;;  %v8198_v48 = vunpack.i.h.bf16 %v8196_v42  ;;  %4400 = vmatprep.mubr.bf16.mxu1 %v14984_v62 }
 0x782   : > { %v3765_v25 = vpack.c.bf16 %v3626_v61, %v3602_v7  ;;  %v3600_v43 = vsel %vm15202_vm12, %v8188_v59, %v15201_v40  ;;  %v8197_v34 = vunpack.i.l.bf16 %v8196_v42  ;;  %vm15204_vm13 = vmmov %vm15199_vm6  ;;  %v3766_v12 = vpack.c.bf16 %v3625_v10, %v3601_v45 }
 0x783   : > { %v3624_v57 = vsel %vm15204_vm13, %v8193_v46, %v15203_v30  ;;  %v8213_v11 = vunpack.i.h.bf16 %v8211_v39  ;;  %v8212_v36 = vunpack.i.l.bf16 %v8211_v39  ;;  %v3674_v29 = vsel %vm15205_vm14, %v8128_v22, %v8202_v13  ;;  %vm15211_vm12 = vmmov %vm15205_vm14 }
 0x784   : > { %4329 = vmatprep.subr.bf16.mxu0 %v3765_v25  ;;  %v3767_v8 = vpack.c.bf16 %v3624_v57, %v3600_v43  ;;  %vm15206_vm5 = vcmp.lt.s32.totalorder %v9620_v21, 100  ;;  %v15208_v46 = vunpack.i.l.bf16 %v12800_v63  ;;  %v15210_v20 = vunpack.i.l.bf16 %v12836_v33  ;;  %vm15212_vm13 = vmmov %vm15211_vm12  ;;  %v13048_v53 = vpop.permute.xlu0 %8220  ;;  %v8206_v45 = vpop.permute.xlu1 %8205 }
 0x785   : > { %v3649_v59 = vsel %vm15206_vm5, %v8197_v34, %v8198_v48  ;;  %4330 = vmatpush1.bf16.msra.mxu0 %v3764_v3  ;;  %vm15207_vm6 = vmmov %vm15206_vm5  ;;  %v8153_v51 = vunpack.i.h.bf16 %v12873_v38  ;;  %v3673_v3 = vsel %vm15212_vm13, %v8202_v13, %v8203_v2  ;;  %v8208_v63 = vunpack.i.h.bf16 %v8206_v45 }
 0x786   : > { %v3650_v37 = vsel %vm15207_vm6, %v8123_v49, %v8197_v34  ;;  %vm15209_vm11 = vmmov %vm15206_vm5  ;;  %v3672_v22 = vsel %vm15211_vm12, %v8203_v2, %v15210_v20  ;;  %4370 = vmatprep.subr.bf16.mxu1 %v3767_v8  ;;  %v8207_v7 = vunpack.i.l.bf16 %v8206_v45  ;;  %v3772_v60 = vpack.c.bf16 %v3675_v5, %v12970_v58 }
 0x787   : > { %v3648_v4 = vsel %vm15209_vm11, %v8198_v48, %v15208_v46  ;;  %v3773_v49 = vpack.c.bf16 %v3674_v29, %v3650_v37  ;;  %4371 = vmatpush1.bf16.msra.mxu1 %v3766_v12  ;;  %v3774_v33 = vpack.c.bf16 %v3673_v3, %v3649_v59  ;;  %v15213_v61 = vunpack.i.l.bf16 %v12899_v44 }
 0x788   : > { %v3775_v6 = vpack.c.bf16 %v3672_v22, %v3648_v4  ;;  %vm15214_vm14 = vcmp.lt.s32.totalorder %v9620_v21, 90  ;;  %v15216_v2 = vunpack.i.l.bf16 %v12922_v27  ;;  %vm15217_vm6 = vcmp.lt.s32.totalorder %v9620_v21, 89  ;;  %v13081_v34 = vpop.permute.xlu0 %8230  ;;  %v8216_v30 = vpop.permute.xlu1 %8215 }
 0x789   : > { %v3723_v10 = vsel %vm15214_vm14, %v15213_v61, %v8158_v14  ;;  %4331 = vmatprep.subr.bf16.mxu0 %v3773_v49  ;;  %vm15215_vm5 = vmmov %vm15214_vm14  ;;  %vm15218_vm11 = vcmp.lt.s32.totalorder %v9620_v21, 91  ;;  %v15220_v5 = vunpack.i.l.bf16 %v12852_v23  ;;  %v15224_v40 = vunpack.i.l.bf16 %v12873_v38 }
 0x78a   : > { %4372 = vmatprep.subr.bf16.mxu1 %v3775_v6  ;;  %v3722_v13 = vsel %vm15215_vm5, %v8158_v14, %v8212_v36  ;;  %v3747_v39 = vsel %vm15217_vm6, %v15216_v2, %v8183_v0  ;;  %v3697_v58 = vsel %vm15218_vm11, %v8207_v7, %v8208_v63  ;;  %4332 = vmatpush1.bf16.msra.mxu0 %v3772_v60  ;;  %vm15219_vm12 = vmmov %vm15218_vm11  ;;  %v15222_v14 = vunpack.i.l.bf16 %v12880_v31 }
 0x78b   : > { %v3698_v44 = vsel %vm15219_vm12, %v8153_v51, %v8207_v7  ;;  %vm15221_vm13 = vmmov %vm15218_vm11  ;;  %4373 = vmatpush1.bf16.msra.mxu1 %v3774_v33  ;;  %v8218_v12 = vunpack.i.h.bf16 %v8216_v30  ;;  %v8217_v8 = vunpack.i.l.bf16 %v8216_v30  ;;  %v3788_v59 = vpack.c.bf16 %v3747_v39, %v3747_v39 }
 0x78c   : > { %v3696_v42 = vsel %vm15221_vm13, %v8208_v63, %v15220_v5  ;;  %vm15223_vm14 = vmmov %vm15215_vm5  ;;  %v3781_v23 = vpack.c.bf16 %v3722_v13, %v3698_v44  ;;  %v8223_v38 = vunpack.i.h.bf16 %v13048_v53  ;;  %v8222_v37 = vunpack.i.l.bf16 %v13048_v53  ;;  %v13093_v46 = vpop.permute.xlu0 %8240  ;;  %v8226_v4 = vpop.permute.xlu1 %8225 }
 0x78d   : > { %v3720_v25 = vsel %vm15223_vm14, %v8213_v11, %v15222_v14  ;;  %vm15225_vm5 = vmmov %vm15218_vm11  ;;  %vm15227_vm11 = vcmp.lt.s32.totalorder %v9620_v21, 89  ;;  %v8228_v3 = vunpack.i.h.bf16 %v8226_v4  ;;  %v8227_v53 = vunpack.i.l.bf16 %v8226_v4 }
 0x78e   : > { %v3699_v43 = vsel %vm15225_vm5, %v15224_v40, %v8153_v51  ;;  %vm15226_vm6 = vmmov %vm15223_vm14  ;;  %v3783_v57 = vpack.c.bf16 %v3720_v25, %v3696_v42  ;;  %4333 = vmatprep.subr.bf16.mxu0 %v3781_v23  ;;  %v4234_v27 = vsel %vm916_vm8, %v3788_v59, 0  ;;  %v8233_v2 = vunpack.i.h.bf16 %v13081_v34 }
 0x78f   : > { %v3721_v48 = vsel %vm15226_vm6, %v8212_v36, %v8213_v11  ;;  %v3780_v31 = vpack.c.bf16 %v3723_v10, %v3699_v43  ;;  %v3746_v11 = vsel %vm15227_vm11, %v8183_v0, %v8217_v8  ;;  %vm15228_vm12 = vmmov %vm15227_vm11  ;;  %v4430_v0 = vsel %vm1312_vm15, %v8222_v37, %v8223_v38 }
 0x790   : > { %v3782_v29 = vpack.c.bf16 %v3721_v48, %v3697_v58  ;;  %4374 = vmatprep.subr.bf16.mxu1 %v3783_v57  ;;  %v3744_v36 = vsel %vm15228_vm12, %v8218_v12, %v8167_v41  ;;  %v3789_v20 = vpack.c.bf16 %v3746_v11, %v3746_v11  ;;  %vm15229_vm13 = vmmov %vm15227_vm11  ;;  %v8232_v41 = vunpack.i.l.bf16 %v13081_v34  ;;  %v8251_v6 = vpop.permute.xlu0 %8250  ;;  %v13106_v63 = vpop.permute.xlu1 %8235 }
 0x791   : > { %4334 = vmatpush1.bf16.msra.mxu0 %v3780_v31  ;;  %v3791_v22 = vpack.c.bf16 %v3744_v36, %v3744_v36  ;;  %v3745_v51 = vsel %vm15229_vm13, %v8217_v8, %v8218_v12  ;;  %v4454_v45 = vsel %vm1337_vm10, %v8227_v53, %v8228_v3  ;;  %v8237_v60 = vunpack.i.l.bf16 %v13106_v63 }
 0x792   : > { %4375 = vmatpush1.bf16.msra.mxu1 %v3782_v29  ;;  %6591 = vmatprep.subr.msk.bf16.mxu0 %vm916_vm8, %v3789_v20  ;;  %v3790_v54 = vpack.c.bf16 %v3745_v51, %v3745_v51  ;;  %v4626_v7 = vpack.c.bf16 %v4454_v45, %v4430_v0  ;;  %v8238_v33 = vunpack.i.h.bf16 %v13106_v63  ;;  %v4431_v61 = vsel %vm1312_vm15, %v8232_v41, %v8222_v37 }
 0x793   : > { %6593 = vmatprep.subr.msk.bf16.mxu1 %vm916_vm8, %v3791_v22  ;;  %v8242_v10 = vunpack.i.l.bf16 %v13093_v46  ;;  %v4455_v13 = vsel %vm1337_vm10, %v8237_v60, %v8227_v53  ;;  %v8253_v14 = vunpack.i.h.bf16 %v8251_v6  ;;  %v8252_v25 = vunpack.i.l.bf16 %v8251_v6 }
 0x794   : > { %v4240_v49 = vsel %vm916_vm8, %v3790_v54, 0  ;;  %v13123_v39 = vpop.permute.xlu0 %8260  ;;  %v13125_v58 = vpop.permute.xlu1 %8245  ;;  %v4625_v44 = vpack.c.bf16 %v4455_v13, %v4431_v61  ;;  %v4453_v42 = vsel %vm1337_vm10, %v8228_v3, %v8238_v33  ;;  %v4429_v43 = vsel %vm1312_vm15, %v8223_v38, %v8233_v2 }
 0x795   : > { %4336 = vmatpush1.bf16.msra.mxu0 %v4234_v27  ;;  %v8247_v5 = vunpack.i.l.bf16 %v13125_v58  ;;  %v4428_v40 = vsel %vm1312_vm15, %v8233_v2, %v8242_v10  ;;  %v4627_v8 = vpack.c.bf16 %v4453_v42, %v4429_v43  ;;  %v8262_v31 = vunpack.i.l.bf16 %v13123_v39 }
 0x796   : > { %4377 = vmatpush1.bf16.msra.mxu1 %v4240_v49  ;;  %4694 = vmatprep.subr.bf16.mxu0 %v4626_v7  ;;  %v4478_v29 = vsel %vm1362_vm7, %v8252_v25, %v8253_v14  ;;  %vm15230_vm14 = vcmp.lt.s32.totalorder %v9620_v21, 29  ;;  %v8263_v3 = vunpack.i.h.bf16 %v13123_v39  ;;  %vm15234_vm12 = vcmp.lt.s32.totalorder %v9620_v21, 28 }
 0x797   : > { %v4479_v20 = vsel %vm1362_vm7, %v8262_v31, %v8252_v25  ;;  %vm15231_vm5 = vmmov %vm15230_vm14  ;;  %vm15235_vm13 = vcmp.lt.s32.totalorder %v9620_v21, 27 }
 0x798   : > { %6592 = vmatmul.mubr.msk.bf16.vlgmr.msra.gmra.mrb[28].mxu0 %vm912_vm9, %v12985_v35  ;;  %v13143_v48 = vpop.permute.xlu0 %8270  ;;  %v8256_v30 = vpop.permute.xlu1 %8255  ;;  %vm15232_vm6 = vmmov %vm15231_vm5  ;;  %v4477_v61 = vsel %vm1362_vm7, %v8253_v14, %v8263_v3 }
 0x799   : > { %4726 = vmatprep.mubr.bf16.mxu0 %v14984_v62  ;;  %6594 = vmatmul.mubr.msk.bf16.vlgmr.msra.gmra.mrb[28].mxu1 %vm912_vm9, %v12985_v35  ;;  %v4452_v35 = vsel %vm1337_vm10, %v8238_v33, %v8247_v5  ;;  %v8258_v57 = vunpack.i.h.bf16 %v8256_v30  ;;  %v8257_v12 = vunpack.i.l.bf16 %v8256_v30  ;;  %v14873_v22 = vunpack.i.l.bf16 %v13143_v48  ;;  %vm15233_vm11 = vmmov %vm15231_vm5 }
 0x79a   : > { %4767 = vmatprep.mubr.bf16.mxu1 %v14984_v62  ;;  %4695 = vmatpush1.bf16.msra.mxu0 %v4625_v44  ;;  %v4628_v23 = vpack.c.bf16 %v4452_v35, %v4428_v40  ;;  %v15257_v39 = vunpack.i.l.bf16 %v13143_v48 }
 0x79b   : > { %v4502_v59 = vsel %vm15230_vm14, %v8257_v12, %v8258_v57  ;;  %v4476_v7 = vsel %vm1362_vm7, %v8263_v3, %v14873_v22  ;;  %vm15236_vm14 = vmmov %vm15234_vm12 }
 0x79c   : > { %4735 = vmatprep.subr.bf16.mxu1 %v4628_v23  ;;  %v8281_v37 = vpop.permute.xlu0 %8280  ;;  %v13150_v11 = vpop.permute.xlu1 %8265  ;;  %v4634_v38 = vpack.c.bf16 %v4502_v59, %v4478_v29 }
 0x79d   : > { %4736 = vmatpush1.bf16.msra.mxu1 %v4627_v8  ;;  %v8267_v36 = vunpack.i.l.bf16 %v13150_v11  ;;  %v8268_v4 = vunpack.i.h.bf16 %v13150_v11  ;;  %v8283_v49 = vunpack.i.h.bf16 %v8281_v37  ;;  %v8282_v6 = vunpack.i.l.bf16 %v8281_v37 }
 0x79e   : > { %4696 = vmatprep.subr.bf16.mxu0 %v4634_v38 }
 0x79f   : > { %v4503_v51 = vsel %vm15231_vm5, %v8267_v36, %v8257_v12  ;;  %v4501_v45 = vsel %vm15232_vm6, %v8258_v57, %v8268_v4  ;;  %v4526_v43 = vsel %vm15234_vm12, %v8282_v6, %v8283_v49  ;;  %vm15237_vm5 = vmmov %vm15235_vm13 }
 0x7a0   : > { %v13164_v53 = vpop.permute.xlu0 %8290  ;;  %v13166_v27 = vpop.permute.xlu1 %8275  ;;  %v4633_v54 = vpack.c.bf16 %v4503_v51, %v4479_v20  ;;  %v4635_v40 = vpack.c.bf16 %v4501_v45, %v4477_v61  ;;  %vm15238_vm6 = vmmov %vm15237_vm5 }
 0x7a1   : > { %v8277_v0 = vunpack.i.l.bf16 %v13166_v27  ;;  %v14869_v35 = vunpack.i.l.bf16 %v13164_v53  ;;  %v8293_v59 = vunpack.i.h.bf16 %v13164_v53 }
 0x7a2   : > { %4697 = vmatpush1.bf16.msra.mxu0 %v4633_v54 }
 0x7a3   : > { %v4500_v33 = vsel %vm15233_vm11, %v8268_v4, %v8277_v0  ;;  %v4527_v37 = vsel %vm15236_vm14, %v14869_v35, %v8282_v6  ;;  %vm15239_vm11 = vmmov %vm15237_vm5  ;;  %vm15241_vm14 = vcmp.lt.s32.totalorder %v9620_v21, 19 }
 0x7a4   : > { %v13181_v13 = vpop.permute.xlu0 %8300  ;;  %v8286_v2 = vpop.permute.xlu1 %8285  ;;  %v4636_v44 = vpack.c.bf16 %v4500_v33, %v4476_v7 }
 0x7a5   : > { %v8288_v42 = vunpack.i.h.bf16 %v8286_v2  ;;  %v8287_v25 = vunpack.i.l.bf16 %v8286_v2  ;;  %v14872_v12 = vunpack.i.l.bf16 %v13181_v13 }
 0x7a6   : > { %4737 = vmatprep.subr.bf16.mxu1 %v4636_v44 }
 0x7a7   : > { %4738 = vmatpush1.bf16.msra.mxu1 %v4635_v40  ;;  %v4550_v30 = vsel %vm15235_vm13, %v8287_v25, %v8288_v42  ;;  %v4524_v45 = vsel %vm15234_vm12, %v8293_v59, %v14872_v12  ;;  %vm15240_vm13 = vmmov %vm15234_vm12  ;;  %v8273_v12 = vunpack.i.h.bf16 %v13143_v48 }
 0x7a8   : > { %v8306_v23 = vpop.permute.xlu0 %8305  ;;  %v13188_v57 = vpop.permute.xlu1 %8295  ;;  %v4642_v14 = vpack.c.bf16 %v4550_v30, %v4526_v43  ;;  %v4525_v6 = vsel %vm15240_vm13, %v8283_v49, %v8293_v59 }
 0x7a9   : > { %v8298_v8 = vunpack.i.h.bf16 %v13188_v57  ;;  %v14871_v29 = vunpack.i.l.bf16 %v13188_v57  ;;  %v8308_v33 = vunpack.i.h.bf16 %v8306_v23  ;;  %v8307_v61 = vunpack.i.l.bf16 %v8306_v23 }
 0x7aa   : > { %4698 = vmatprep.subr.bf16.mxu0 %v4642_v14 }
 0x7ab   : > { %v4551_v38 = vsel %vm15237_vm5, %v14871_v29, %v8287_v25  ;;  %v4549_v4 = vsel %vm15238_vm6, %v8288_v42, %v8298_v8  ;;  %v4574_v30 = vsel %vm15241_vm14, %v8307_v61, %v8308_v33  ;;  %vm15242_vm5 = vcmp.lt.s32.totalorder %v9620_v21, 18  ;;  %vm15243_vm6 = vmmov %vm15241_vm14 }
 0x7ac   : > { %v13204_v20 = vpop.permute.xlu0 %8315  ;;  %v13206_v51 = vpop.permute.xlu1 %4537  ;;  %v4641_v3 = vpack.c.bf16 %v4551_v38, %v4527_v37  ;;  %v4643_v2 = vpack.c.bf16 %v4549_v4, %v4525_v6  ;;  %vm15245_vm12 = vmmov %vm15242_vm5 }
 0x7ad   : > { %v4548_v54 = vsel %vm15239_vm11, %v8298_v8, %v13206_v51  ;;  %v14868_v43 = vunpack.i.l.bf16 %v13204_v20  ;;  %v8318_v38 = vunpack.i.h.bf16 %v13204_v20  ;;  %vm15244_vm11 = vmmov %vm15242_vm5 }
 0x7ae   : > { %4699 = vmatpush1.bf16.msra.mxu0 %v4641_v3  ;;  %v4644_v7 = vpack.c.bf16 %v4548_v54, %v4524_v45  ;;  %vm15246_vm13 = vmmov %vm15243_vm6 }
 0x7af   : > { %v4575_v4 = vsel %vm15243_vm6, %v14868_v43, %v8307_v61  ;;  %vm15247_vm14 = vmmov %vm15242_vm5 }
 0x7b0   : > { %v13217_v44 = vpop.permute.xlu0 %4561  ;;  %v8311_v42 = vpop.permute.xlu1 %8310  ;;  %4739 = vmatprep.subr.bf16.mxu1 %v4644_v7 }
 0x7b1   : > { %v8313_v25 = vunpack.i.h.bf16 %v8311_v42  ;;  %v8312_v40 = vunpack.i.l.bf16 %v8311_v42  ;;  %4740 = vmatpush1.bf16.msra.mxu1 %v4643_v2  ;;  %v4572_v61 = vsel %vm15246_vm13, %v8318_v38, %v13217_v44 }
 0x7b3   : > { %v4598_v49 = vsel %vm15242_vm5, %v8312_v40, %v8313_v25  ;;  %vm15248_vm5 = vmmov %vm15243_vm6  ;;  %vm15249_vm6 = vcmp.lt.s32.totalorder %v9620_v21, 17 }
 0x7b4   : > { %v13224_v14 = vpop.permute.xlu0 %8325  ;;  %v13226_v8 = vpop.permute.xlu1 %8320  ;;  %v4650_v23 = vpack.c.bf16 %v4598_v49, %v4574_v30  ;;  %v8243_v49 = vunpack.i.h.bf16 %v13093_v46  ;;  %vm15252_vm13 = vmmov %vm15249_vm6 }
 0x7b5   : > { %v8323_v59 = vunpack.i.h.bf16 %v13226_v8  ;;  %v14867_v37 = vunpack.i.l.bf16 %v13226_v8  ;;  %v8328_v3 = vunpack.i.h.bf16 %v13224_v14  ;;  %v14870_v54 = vunpack.i.l.bf16 %v13224_v14 }
 0x7b6   : > { %4700 = vmatprep.subr.bf16.mxu0 %v4650_v23  ;;  %v8248_v23 = vunpack.i.h.bf16 %v13125_v58 }
 0x7b7   : > { %v4599_v45 = vsel %vm15244_vm11, %v14867_v37, %v8312_v40  ;;  %v4597_v6 = vsel %vm15245_vm12, %v8313_v25, %v8323_v59  ;;  %v4573_v40 = vsel %vm15248_vm5, %v8308_v33, %v8318_v38  ;;  %v4427_v33 = vsel %vm1312_vm15, %v8242_v10, %v8243_v49  ;;  %vm15250_vm11 = vmmov %vm15249_vm6 }
 0x7b8   : > { %v8336_v7 = vpop.permute.xlu0 %8335  ;;  %v13243_v2 = vpop.permute.xlu1 %4585  ;;  %v4649_v42 = vpack.c.bf16 %v4599_v45, %v4575_v4  ;;  %v4651_v37 = vpack.c.bf16 %v4597_v6, %v4573_v40  ;;  %v4623_v4 = vsel %vm15249_vm6, %v14870_v54, %v8328_v3  ;;  %v4451_v38 = vsel %vm1337_vm10, %v8247_v5, %v8248_v23  ;;  %vm15251_vm12 = vmmov %vm15249_vm6 }
 0x7b9   : > { %v4596_v30 = vsel %vm15247_vm14, %v8323_v59, %v13243_v2  ;;  %v8278_v6 = vunpack.i.h.bf16 %v13166_v27  ;;  %v8338_v10 = vunpack.i.h.bf16 %v8336_v7  ;;  %vm15253_vm14 = vcmp.lt.s32.totalorder %v9620_v21, 29 }
 0x7ba   : > { %4701 = vmatpush1.bf16.msra.mxu0 %v4649_v42  ;;  %v4652_v25 = vpack.c.bf16 %v4596_v30, %v4572_v61  ;;  %v4657_v42 = vpack.c.bf16 %v4623_v4, %v4623_v4  ;;  %v8337_v61 = vunpack.i.l.bf16 %v8336_v7  ;;  %v4629_v4 = vpack.c.bf16 %v4451_v38, %v4427_v33  ;;  %v13287_v33 = vld [vmem:[%s14742_s4 + $0x8] sm:$0xf]  ;;  %vm15254_vm5 = vmmov %vm15253_vm14 }
 0x7bb   : > { %v4432_v27 = vsel %vm1312_vm15, %v8338_v10, %v8232_v41  ;;  %vm15255_vm6 = vmmov %vm15254_vm5 }
 0x7bc   : > { %v13259_v45 = vpop.permute.xlu0 %4609  ;;  %v8331_v43 = vpop.permute.xlu1 %8330  ;;  %4741 = vmatprep.subr.bf16.mxu1 %v4652_v25  ;;  %v4426_v38 = vsel %vm1312_vm15, %v8243_v49, %v8337_v61 }
 0x7bd   : > { %v8333_v59 = vunpack.i.h.bf16 %v8331_v43  ;;  %v8332_v35 = vunpack.i.l.bf16 %v8331_v43  ;;  %4742 = vmatpush1.bf16.msra.mxu1 %v4651_v37 }
 0x7bf   : > { %v4622_v30 = vsel %vm15250_vm11, %v8328_v3, %v8332_v35  ;;  %v4620_v43 = vsel %vm15251_vm12, %v8333_v59, %v13259_v45  ;;  %v4621_v46 = vsel %vm15252_vm13, %v8332_v35, %v8333_v59  ;;  %v4671_v3 = vsel %vm916_vm8, %v4657_v42, 0  ;;  %vm15256_vm11 = vmmov %vm15254_vm5 }
 0x7c0   : > { %v8351_v37 = vpop.permute.xlu0 %8350  ;;  %v8341_v58 = vpop.permute.xlu1 %8340  ;;  %v4658_v40 = vpack.c.bf16 %v4622_v30, %v4622_v30  ;;  %v4660_v25 = vpack.c.bf16 %v4620_v43, %v4620_v43  ;;  %v4659_v5 = vpack.c.bf16 %v4621_v46, %v4621_v46  ;;  %v4499_v42 = vsel %vm15253_vm14, %v8277_v0, %v8278_v6 }
 0x7c1   : > { %v8343_v54 = vunpack.i.h.bf16 %v8341_v58  ;;  %v8342_v29 = vunpack.i.l.bf16 %v8341_v58  ;;  %v8352_v22 = vunpack.i.l.bf16 %v8351_v37  ;;  %v8353_v7 = vunpack.i.h.bf16 %v8351_v37 }
 0x7c2   : > { %6596 = vmatprep.subr.msk.bf16.mxu0 %vm916_vm8, %v4658_v40  ;;  %6598 = vmatprep.subr.msk.bf16.mxu1 %vm916_vm8, %v4660_v25  ;;  %v4677_v35 = vsel %vm916_vm8, %v4659_v5, 0  ;;  %v4425_v43 = vsel %vm1312_vm15, %v8337_v61, %v8338_v10  ;;  %v8303_v10 = vunpack.i.h.bf16 %v13181_v13  ;;  %vm15258_vm12 = vcmp.lt.s32.totalorder %v9620_v21, 27 }
 0x7c3   : > { %v4449_v59 = vsel %vm1337_vm10, %v8342_v29, %v8343_v54  ;;  %4703 = vmatpush1.bf16.msra.mxu0 %v4671_v3  ;;  %4744 = vmatpush1.bf16.msra.mxu1 %v4677_v35  ;;  %v4450_v30 = vsel %vm1337_vm10, %v8248_v23, %v8342_v29  ;;  %v4456_v40 = vsel %vm1337_vm10, %v8343_v54, %v8237_v60  ;;  %vm15259_vm13 = vcmp.lt.s32.totalorder %v9620_v21, 28  ;;  %vm15260_vm14 = vmmov %vm15258_vm12 }
 0x7c4   : > { %v8361_v46 = vpop.permute.xlu0 %8360  ;;  %v8346_v37 = vpop.permute.xlu1 %8345  ;;  %v4630_v58 = vpack.c.bf16 %v4450_v30, %v4426_v38  ;;  %v4631_v29 = vpack.c.bf16 %v4449_v59, %v4425_v43  ;;  %v4632_v63 = vpack.c.bf16 %v4456_v40, %v4432_v27  ;;  %v4498_v60 = vsel %vm15254_vm5, %v8278_v6, %v8352_v22  ;;  %vm15262_vm5 = vmmov %vm15259_vm13 }
 0x7c5   : > { %v8348_v49 = vunpack.i.h.bf16 %v8346_v37  ;;  %v8347_v25 = vunpack.i.l.bf16 %v8346_v37  ;;  %v8363_v0 = vunpack.i.h.bf16 %v8361_v46  ;;  %v8362_v23 = vunpack.i.l.bf16 %v8361_v46 }
 0x7c6   : > { %6597 = vmatmul.mubr.msk.bf16.vlgmr.msra.gmra.mrb[24].mxu0 %vm912_vm9, %v13287_v33  ;;  %6599 = vmatmul.mubr.msk.bf16.vlgmr.msra.gmra.mrb[24].mxu1 %vm912_vm9, %v13287_v33  ;;  %v4504_v61 = vsel %vm15255_vm6, %v8353_v7, %v8267_v36  ;;  %v4497_v6 = vsel %vm15256_vm11, %v8352_v22, %v8353_v7  ;;  %vm15263_vm6 = vmmov %vm15262_vm5  ;;  %v15265_v40 = vunpack.i.l.bf16 %v13188_v57 }
 0x7c7   : > { %v4473_v54 = vsel %vm1362_vm7, %v8347_v25, %v8348_v49  ;;  %4776 = vmatprep.subr.bf16.mxu0 %v4630_v58  ;;  %v4474_v34 = vsel %vm1362_vm7, %v8273_v12, %v8347_v25  ;;  %v4480_v41 = vsel %vm1362_vm7, %v8348_v49, %v8262_v31  ;;  %4817 = vmatprep.subr.bf16.mxu1 %v4632_v63  ;;  %vm15264_vm11 = vmmov %vm15258_vm12  ;;  %v15267_v49 = vunpack.i.l.bf16 %v13164_v53 }
 0x7c8   : > { %4777 = vmatpush1.bf16.msra.mxu0 %v4629_v4  ;;  %v8366_v5 = vpop.permute.xlu0 %8365  ;;  %v8356_v3 = vpop.permute.xlu1 %8355  ;;  %v4638_v35 = vpack.c.bf16 %v4498_v60, %v4474_v34  ;;  %v4640_v59 = vpack.c.bf16 %v4504_v61, %v4480_v41  ;;  %v4475_v31 = vsel %vm1362_vm7, %v15257_v39, %v8273_v12  ;;  %4818 = vmatpush1.bf16.msra.mxu1 %v4631_v29  ;;  %v15261_v12 = vunpack.i.l.bf16 %v13181_v13 }
 0x7c9   : > { %v8358_v11 = vunpack.i.h.bf16 %v8356_v3  ;;  %v8357_v38 = vunpack.i.l.bf16 %v8356_v3  ;;  %v4639_v36 = vpack.c.bf16 %v4497_v6, %v4473_v54  ;;  %4808 = vmatprep.mubr.bf16.mxu0 %v14984_v62  ;;  %v4637_v22 = vpack.c.bf16 %v4499_v42, %v4475_v31  ;;  %4849 = vmatprep.mubr.bf16.mxu1 %v14984_v62 }
 0x7ca   : > { %4778 = vmatprep.subr.bf16.mxu0 %v4638_v35  ;;  %4819 = vmatprep.subr.bf16.mxu1 %v4640_v59  ;;  %v4547_v4 = vsel %vm15258_vm12, %v13206_v51, %v8362_v23  ;;  %v4546_v48 = vsel %vm15260_vm14, %v8362_v23, %v8363_v0  ;;  %v4523_v30 = vsel %vm15262_vm5, %v15261_v12, %v8303_v10  ;;  %v8368_v43 = vunpack.i.h.bf16 %v8366_v5  ;;  %vm15266_vm12 = vmmov %vm15264_vm11 }
 0x7cb   : > { %v4522_v7 = vsel %vm15259_vm13, %v8303_v10, %v8357_v38  ;;  %v4521_v51 = vsel %vm15263_vm6, %v8357_v38, %v8358_v11  ;;  %vm15268_vm13 = vmmov %vm15262_vm5  ;;  %v8367_v27 = vunpack.i.l.bf16 %v8366_v5  ;;  %v4645_v23 = vpack.c.bf16 %v4547_v4, %v4523_v30 }
 0x7cc   : > { %4779 = vmatpush1.bf16.msra.mxu0 %v4637_v22  ;;  %v4568_v42 = vpop.permute.xlu0 %4567  ;;  %v4544_v46 = vpop.permute.xlu1 %4543  ;;  %v4646_v37 = vpack.c.bf16 %v4546_v48, %v4522_v7  ;;  %4820 = vmatpush1.bf16.msra.mxu1 %v4639_v36  ;;  %v4528_v25 = vsel %vm15268_vm13, %v8358_v11, %v15267_v49  ;;  %vm15269_vm14 = vcmp.lt.s32.totalorder %v9620_v21, 19  ;;  %vm15271_vm6 = vcmp.lt.s32.totalorder %v9620_v21, 18 }
 0x7cd   : > { %v4545_v58 = vsel %vm15264_vm11, %v8363_v0, %v4544_v46  ;;  %v4552_v13 = vsel %vm15266_vm12, %v4544_v46, %v15265_v40  ;;  %v4571_v53 = vsel %vm15269_vm14, %v13217_v44, %v8367_v27  ;;  %vm15270_vm5 = vmmov %vm15269_vm14  ;;  %vm15273_vm12 = vcmp.lt.s32.totalorder %v9620_v21, 17 }
 0x7ce   : > { %v4647_v29 = vpack.c.bf16 %v4545_v58, %v4521_v51  ;;  %4780 = vmatprep.subr.bf16.mxu0 %v4646_v37  ;;  %v4648_v63 = vpack.c.bf16 %v4552_v13, %v4528_v25  ;;  %v4570_v61 = vsel %vm15270_vm5, %v8367_v27, %v8368_v43  ;;  %vm15272_vm11 = vmmov %vm15271_vm6  ;;  %v15276_v31 = vunpack.i.l.bf16 %v13204_v20 }
 0x7cf   : > { %vm15274_vm13 = vmmov %vm15273_vm12  ;;  %v15277_v38 = vunpack.i.l.bf16 %v13226_v8  ;;  %v15279_v12 = vunpack.i.l.bf16 %v13224_v14 }
 0x7d0   : > { %4781 = vmatpush1.bf16.msra.mxu0 %v4645_v23  ;;  %v8376_v60 = vpop.permute.xlu0 %8375  ;;  %v8371_v54 = vpop.permute.xlu1 %8370  ;;  %4821 = vmatprep.subr.bf16.mxu1 %v4648_v63  ;;  %vm15275_vm14 = vmmov %vm15270_vm5 }
 0x7d1   : > { %v8378_v0 = vunpack.i.h.bf16 %v8376_v60  ;;  %v8377_v34 = vunpack.i.l.bf16 %v8376_v60  ;;  %v8373_v57 = vunpack.i.h.bf16 %v8371_v54  ;;  %v8372_v41 = vunpack.i.l.bf16 %v8371_v54  ;;  %4822 = vmatpush1.bf16.msra.mxu1 %v4647_v29 }
 0x7d2   : > { %v4569_v39 = vsel %vm15275_vm14, %v8368_v43, %v4568_v42 }
 0x7d3   : > { %v4595_v10 = vsel %vm15271_vm6, %v13243_v2, %v8372_v41  ;;  %v4594_v6 = vsel %vm15272_vm11, %v8372_v41, %v8373_v57  ;;  %v4618_v5 = vsel %vm15273_vm12, %v8377_v34, %v8378_v0  ;;  %v4619_v3 = vsel %vm15274_vm13, %v13259_v45, %v8377_v34  ;;  %vm15278_vm11 = vmmov %vm15271_vm6 }
 0x7d4   : > { %v4592_v35 = vpop.permute.xlu1 %4591  ;;  %v4654_v59 = vpack.c.bf16 %v4594_v6, %v4570_v61  ;;  %v4653_v44 = vpack.c.bf16 %v4595_v10, %v4571_v53  ;;  %v4576_v2 = vsel %vm15270_vm5, %v4568_v42, %v15276_v31  ;;  %v4662_v22 = vpack.c.bf16 %v4618_v5, %v4618_v5  ;;  %vm15280_vm13 = vmmov %vm15273_vm12 }
 0x7d5   : > { %v4593_v11 = vsel %vm15271_vm6, %v8373_v57, %v4592_v35  ;;  %v4600_v36 = vsel %vm15278_vm11, %v4592_v35, %v15277_v38  ;;  %v4661_v7 = vpack.c.bf16 %v4619_v3, %v4619_v3 }
 0x7d6   : > { %v4655_v45 = vpack.c.bf16 %v4593_v11, %v4569_v39  ;;  %4782 = vmatprep.subr.bf16.mxu0 %v4654_v59  ;;  %v4656_v4 = vpack.c.bf16 %v4600_v36, %v4576_v2 }
 0x7d7   : > { %4783 = vmatpush1.bf16.msra.mxu0 %v4653_v44  ;;  %v4683_v42 = vsel %vm916_vm8, %v4661_v7, 0 }
 0x7d8   : > { %v4616_v48 = vpop.permute.xlu1 %4615  ;;  %6600 = vmatprep.subr.msk.bf16.mxu0 %vm916_vm8, %v4662_v22  ;;  %4823 = vmatprep.subr.bf16.mxu1 %v4656_v4 }
 0x7d9   : > { %v4617_v20 = vsel %vm15273_vm12, %v8378_v0, %v4616_v48  ;;  %v4624_v8 = vsel %vm15280_vm13, %v4616_v48, %v15279_v12  ;;  %4824 = vmatpush1.bf16.msra.mxu1 %v4655_v45 }
 0x7da   : > { %v4663_v30 = vpack.c.bf16 %v4617_v20, %v4617_v20  ;;  %v4664_v43 = vpack.c.bf16 %v4624_v8, %v4624_v8 }
 0x7db   : > { %4785 = vmatpush1.bf16.msra.mxu0 %v4683_v42 }
 0x7dc   : > { %6602 = vmatprep.subr.msk.bf16.mxu1 %vm916_vm8, %v4664_v43  ;;  %v4689_v46 = vsel %vm916_vm8, %v4663_v30, 0 }
 0x7dd   : > { %4826 = vmatpush1.bf16.msra.mxu1 %v4689_v46 }
 0x7de   : > { %6601 = vmatmul.mubr.msk.bf16.vlgmr.msra.gmra.mrb[28].mxu0 %vm912_vm9, %v13287_v33 }
 0x7df   : > { %5505 = vmatprep.mubr.bf16.mxu0 %v14984_v62 }
 0x7e0   : > { %6603 = vmatmul.mubr.msk.bf16.vlgmr.msra.gmra.mrb[28].mxu1 %vm912_vm9, %v13287_v33 }
 0x7e1   : > { %5546 = vmatprep.mubr.bf16.mxu1 %v14984_v62 }
 0x899   : > { %v13400_v14 = vpop.f32.mrb[24].mxu0  ;;  %v13402_v37 = vpop.f32.mrb[24].mxu1 }
 0x89a   : > { %v4866_v51 = vmul.f32 %v13400_v14, %v10727_v17  ;;  %v4730_v58 = vpop.f32.mrb[25].mxu0  ;;  %v13406_v40 = vpop.f32.mrb[25].mxu1  ;;  %v4868_v13 = vmul.f32 %v13402_v37, %v10740_v15 }
 0x89b   : > { %v4867_v49 = vmul.f32 %v4730_v58, %v10729_v9  ;;  %v4732_v25 = vpop.f32.mrb[26].mxu0  ;;  %v4773_v27 = vpop.f32.mrb[26].mxu1  ;;  %v4869_v54 = vmul.f32 %v13406_v40, %v10743_v50 }
 0x89c   : > { %v4884_v33 = vmul.f32 %v4866_v51, %v13400_v14  ;;  %v4733_v29 = vpop.f32.mrb[27].mxu0  ;;  %v4774_v23 = vpop.f32.mrb[27].mxu1  ;;  %v4886_v0 = vmul.f32 %v4868_v13, %v13402_v37 }
 0x89d   : > { %v4874_v63 = vadd.f32 %v4867_v49, %v4866_v51  ;;  %v4885_v60 = vmul.f32 %v4867_v49, %v4730_v58  ;;  %v4887_v53 = vmul.f32 %v4869_v54, %v13406_v40 }
 0x89f   : > { %v4892_v34 = vadd.f32 %v4885_v60, %v4884_v33  ;;  %v4875_v57 = vadd.f32 %v4874_v63, %v4868_v13 }
 0x8a1   : > { %v4876_v41 = vadd.f32 %v4875_v57, %v4869_v54  ;;  %v4893_v61 = vadd.f32 %v4892_v34, %v4886_v0 }
 0x8a3   : > { %v4894_v10 = vadd.f32 %v4893_v61, %v4887_v53 }
 0x8b1   : > { %v4810_v6 = vpop.f32.mrb[28].mxu0 }
 0x8b2   : > { %v4870_v5 = vmul.f32 %v4810_v6, %v10755_v56  ;;  %v13417_v3 = vpop.f32.mrb[29].mxu0 }
 0x8b3   : > { %v4871_v35 = vmul.f32 %v13417_v3, %v10757_v26  ;;  %v4814_v59 = vpop.f32.mrb[30].mxu0  ;;  %v13421_v44 = vpop.f32.mrb[28].mxu1 }
 0x8b4   : > { %v4877_v39 = vadd.f32 %v4876_v41, %v4870_v5  ;;  %v4888_v31 = vmul.f32 %v4870_v5, %v4810_v6  ;;  %v4872_v2 = vmul.f32 %v13421_v44, %v10759_v52  ;;  %v4815_v11 = vpop.f32.mrb[31].mxu0  ;;  %v4853_v38 = vpop.f32.mrb[29].mxu1 }
 0x8b5   : > { %v4889_v36 = vmul.f32 %v4871_v35, %v13417_v3  ;;  %v4855_v45 = vpop.f32.mrb[30].mxu1  ;;  %v4873_v7 = vmul.f32 %v4853_v38, %v10766_v28 }
 0x8b6   : > { %v4895_v22 = vadd.f32 %v4894_v10, %v4888_v31  ;;  %v4878_v4 = vadd.f32 %v4877_v39, %v4871_v35  ;;  %v4856_v48 = vpop.f32.mrb[31].mxu1  ;;  %v4890_v8 = vmul.f32 %v4872_v2, %v13421_v44 }
 0x8b7   : > { %v4891_v43 = vmul.f32 %v4873_v7, %v4853_v38 }
 0x8b8   : > { %v4896_v20 = vadd.f32 %v4895_v22, %v4889_v36  ;;  %v4879_v12 = vadd.f32 %v4878_v4, %v4872_v2 }
 0x8ba   : > { %v4897_v30 = vadd.f32 %v4896_v20, %v4890_v8  ;;  %v4880_v42 = vadd.f32 %v4879_v12, %v4873_v7 }
 0x8bc   : > { %4881 = vadd.xlane.f32.xlu0 %v4880_v42  ;;  %v4898_v46 = vadd.f32 %v4897_v30, %v4891_v43 }
 0x8be   : > { %4899 = vadd.xlane.f32.xlu1 %v4898_v46 }
 0x949   : > { %v4882_v51 = vpop.xlane.xlu0 %4881 }
 0x94a   : > { %v13428_v13 = vmul.f32 0.001953125, %v4882_v51 }
 0x94b   : > { %v4900_v49 = vpop.xlane.xlu1 %4899 }
 0x94c   : > { %v4901_v25 = vmul.f32 0.001953125, %v4900_v49  ;;  %v4902_v27 = vmul.f32 %v13428_v13, %v13428_v13  ;;  %v4905_v63 = vsub.f32 %v13400_v14, %v13428_v13  ;;  %v4906_v60 = vsub.f32 %v4730_v58, %v13428_v13 }
 0x94d   : > { %v4907_v54 = vsub.f32 %v13402_v37, %v13428_v13  ;;  %v4912_v34 = vsub.f32 %v4853_v38, %v13428_v13  ;;  %v4908_v57 = vsub.f32 %v13406_v40, %v13428_v13  ;;  %v4909_v10 = vsub.f32 %v4810_v6, %v13428_v13 }
 0x94e   : > { %v4903_v33 = vsub.f32 %v4901_v25, %v4902_v27  ;;  %v4910_v42 = vsub.f32 %v13417_v3, %v13428_v13 }
 0x950   : > { %v4904_v29 = vmax.f32 %v4903_v33, 0.0  ;;  %v4911_v33 = vsub.f32 %v13421_v44, %v13428_v13 }
 0x952   : > { %v4913_v23 = vadd.f32 1e-05, %v4904_v29 }
 0x954   : > { %8885 = vrsqrt.f32 %v4913_v23 }
 0x95e   : > { %v8886_v0 = vpop.eup %8885 }
 0x95f   : > { %v4915_v41 = vmul.f32 %v8886_v0, %v4905_v63  ;;  %v4916_v53 = vmul.f32 %v8886_v0, %v4906_v60  ;;  %v4917_v61 = vmul.f32 %v8886_v0, %v4907_v54  ;;  %v4922_v5 = vmul.f32 %v8886_v0, %v4912_v34 }
 0x960   : > { %v4918_v35 = vmul.f32 %v8886_v0, %v4908_v57  ;;  %v4919_v59 = vmul.f32 %v8886_v0, %v4909_v10  ;;  %v4920_v46 = vmul.f32 %v8886_v0, %v4910_v42  ;;  %v4921_v23 = vmul.f32 %v8886_v0, %v4911_v33 }
 0x961   : > { %vm4923_vm14 = vcmp.ge.f32.partialorder %v4915_v41, 0.0  ;;  %vm4924_vm5 = vcmp.ge.f32.partialorder %v4916_v53, 0.0  ;;  %vm4925_vm6 = vcmp.ge.f32.partialorder %v4917_v61, 0.0  ;;  %v4931_v14 = vmul.f32 0.01, %v4915_v41 }
 0x962   : > { %v4932_v58 = vmul.f32 0.01, %v4916_v53  ;;  %v4933_v37 = vmul.f32 0.01, %v4917_v61  ;;  %vm4930_vm11 = vcmp.ge.f32.partialorder %v4922_v5, 0.0  ;;  %vm4926_vm12 = vcmp.ge.f32.partialorder %v4918_v35, 0.0 }
 0x963   : > { %v4938_v39 = vmul.f32 0.01, %v4922_v5  ;;  %v4939_v31 = vsel %vm4923_vm14, %v4915_v41, %v4931_v14  ;;  %v4934_v40 = vmul.f32 0.01, %v4918_v35  ;;  %v4935_v11 = vmul.f32 0.01, %v4919_v59 }
 0x964   : > { %v4940_v2 = vsel %vm4924_vm5, %v4916_v53, %v4932_v58  ;;  %v4941_v38 = vsel %vm4925_vm6, %v4917_v61, %v4933_v37  ;;  %vm4927_vm13 = vcmp.ge.f32.partialorder %v4919_v59, 0.0  ;;  %v13442_v6 = vmul.f32 %v4939_v31, %v10727_v17 }
 0x965   : > { %v4946_v36 = vsel %vm4930_vm11, %v4922_v5, %v4938_v39  ;;  %v13445_v45 = vmul.f32 %v4940_v2, %v10729_v9  ;;  %v13448_v22 = vmul.f32 %v4941_v38, %v10740_v15  ;;  %v4942_v48 = vsel %vm4926_vm12, %v4918_v35, %v4934_v40 }
 0x966   : > { %v13451_v4 = vmul.f32 %v4946_v36, %v10766_v28  ;;  %v4943_v20 = vsel %vm4927_vm13, %v4919_v59, %v4935_v11  ;;  %v13462_v12 = vmul.f32 %v4942_v48, %v10743_v50  ;;  %v4936_v51 = vmul.f32 0.01, %v4920_v46 }
 0x967   : > { %v13455_v7 = vpack.i.bf16 %v13445_v45, %v13442_v6  ;;  %v13465_v8 = vmul.f32 %v4943_v20, %v10755_v56  ;;  %vm4928_vm14 = vcmp.ge.f32.partialorder %v4920_v46, 0.0  ;;  %v13506_v27 = vpack.i.bf16 %v13448_v22, %v13445_v45 }
 0x968   : > { %v13469_v30 = vpack.i.bf16 %v13448_v22, %v13451_v4  ;;  %v4944_v49 = vsel %vm4928_vm14, %v4920_v46, %v4936_v51  ;;  %v13502_v25 = vpack.i.bf16 %v13462_v12, %v13442_v6  ;;  %v4937_v63 = vmul.f32 0.01, %v4921_v23 }
 0x969   : > { %8385 = vrot.lane.b32.xlu1 %v13455_v7, %s15113_s20  ;;  %8380 = vrot.lane.b32.xlu0 %v13455_v7, %s15114_s15  ;;  %v13477_v43 = vpack.i.bf16 %v13465_v8, %v13462_v12  ;;  %v13498_v3 = vmul.f32 %v4944_v49, %v10757_v26  ;;  %vm4929_vm5 = vcmp.ge.f32.partialorder %v4921_v23, 0.0  ;;  %v13543_v54 = vpack.i.bf16 %v13462_v12, %v13448_v22 }
 0x96a   : > { %v4945_v44 = vsel %vm4929_vm5, %v4921_v23, %v4937_v63  ;;  %vm15281_vm6 = vcmp.lt.s32.totalorder %v9620_v21, 119  ;;  %vm15282_vm11 = vcmp.lt.s32.totalorder %v9620_v21, 118 }
 0x96b   : > { %v13516_v29 = vpack.i.bf16 %v13498_v3, %v13465_v8  ;;  %v13531_v13 = vmul.f32 %v4945_v44, %v10759_v52  ;;  %vm15283_vm12 = vmmov %vm15281_vm6 }
 0x96c   : > { %vm15284_vm13 = vmmov %vm15282_vm11 }
 0x96d   : > { %8395 = vrot.lane.b32.xlu1 %v13469_v30, %s15113_s20  ;;  %8390 = vrot.lane.b32.xlu0 %v13469_v30, %s15114_s15  ;;  %v13539_v60 = vpack.i.bf16 %v13531_v13, %v13498_v3  ;;  %v13559_v0 = vpack.i.bf16 %v13451_v4, %v13531_v13  ;;  %vm15285_vm14 = vmmov %vm15282_vm11 }
 0x96e   : > { %vm15286_vm5 = vmmov %vm15281_vm6 }
 0x971   : > { %8405 = vrot.lane.b32.xlu1 %v13477_v43, %s15113_s20  ;;  %8400 = vrot.lane.b32.xlu0 %v13477_v43, %s15114_s15 }
 0x975   : > { %8415 = vrot.lane.b32.xlu1 %v13455_v7, %s15115_s24  ;;  %8410 = vrot.lane.b32.xlu0 %v13455_v7, %s14936_s16 }
 0x979   : > { %8425 = vrot.lane.b32.xlu1 %v13469_v30, %s15115_s24  ;;  %8420 = vrot.lane.b32.xlu0 %v13469_v30, %s14936_s16 }
 0x97d   : > { %8435 = vrot.lane.b32.xlu1 %v13477_v43, %s15115_s24  ;;  %8430 = vrot.lane.b32.xlu0 %v13477_v43, %s14936_s16 }
 0x981   : > { %8445 = vrot.lane.b32.xlu1 %v13502_v25, %s14937_s17  ;;  %8440 = vrot.lane.b32.xlu0 %v13506_v27, %s14937_s17 }
 0x985   : > { %8455 = vrot.lane.b32.xlu1 %v13506_v27, %s14938_s14  ;;  %8450 = vrot.lane.b32.xlu0 %v13516_v29, %s14937_s17 }
 0x989   : > { %8465 = vrot.lane.b32.xlu1 %v13502_v25, %s14938_s14  ;;  %8460 = vrot.lane.b32.xlu0 %v13506_v27, %s14939_s18 }
 0x98d   : > { %8475 = vrot.lane.b32.xlu1 %v13516_v29, %s14938_s14  ;;  %8470 = vrot.lane.b32.xlu0 %v13502_v25, %s14939_s18 }
 0x991   : > { %8485 = vrot.lane.b32.xlu1 %v13455_v7, %s14940_s10  ;;  %8480 = vrot.lane.b32.xlu0 %v13516_v29, %s14939_s18 }
 0x995   : > { %8495 = vrot.lane.b32.xlu1 %v13539_v60, %s15114_s15  ;;  %8490 = vrot.lane.b32.xlu0 %v13543_v54, %s14940_s10 }
 0x999   : > { %8505 = vrot.lane.b32.xlu1 %v13516_v29, %s14940_s10  ;;  %8500 = vrot.lane.b32.xlu0 %v13539_v60, %s15113_s20 }
 0x99d   : > { %8515 = vrot.lane.b32.xlu1 %v13539_v60, %s15115_s24  ;;  %8510 = vrot.lane.b32.xlu0 %v13539_v60, %s14936_s16 }
 0x9a1   : > { %8525 = vrot.lane.b32.xlu1 %v13559_v0, %s14938_s14  ;;  %8520 = vrot.lane.b32.xlu0 %v13559_v0, %s14937_s17 }
 0x9a5   : > { %8535 = vrot.lane.b32.xlu1 %v13559_v0, %s14940_s10  ;;  %8530 = vrot.lane.b32.xlu0 %v13559_v0, %s14939_s18 }
 0x9a9   : > { %8545 = vrot.lane.b32.xlu1 %v13455_v7, %s14941_s13  ;;  %8540 = vrot.lane.b32.xlu0 %v13455_v7, %s14942_s8 }
 0x9ad   : > { %8555 = vrot.lane.b32.xlu1 %v13469_v30, %s14941_s13  ;;  %8550 = vrot.lane.b32.xlu0 %v13469_v30, %s14942_s8 }
 0x9b1   : > { %8565 = vrot.lane.b32.xlu1 %v13477_v43, %s14941_s13  ;;  %8560 = vrot.lane.b32.xlu0 %v13477_v43, %s14942_s8 }
 0x9b5   : > { %8575 = vrot.lane.b32.xlu1 %v13455_v7, %s14943_s23  ;;  %8570 = vrot.lane.b32.xlu0 %v13455_v7, %s14944_s28 }
 0x9b9   : > { %8585 = vrot.lane.b32.xlu1 %v13469_v30, %s14943_s23  ;;  %8580 = vrot.lane.b32.xlu0 %v13469_v30, %s14944_s28 }
 0x9bd   : > { %8595 = vrot.lane.b32.xlu1 %v13477_v43, %s14943_s23  ;;  %8590 = vrot.lane.b32.xlu0 %v13477_v43, %s14944_s28 }
 0x9c1   : > { %8605 = vrot.lane.b32.xlu1 %v13455_v7, %s14945_s29  ;;  %8600 = vrot.lane.b32.xlu0 %v13455_v7, %s14946_s11 }
 0x9c5   : > { %8615 = vrot.lane.b32.xlu1 %v13469_v30, %s14945_s29  ;;  %8610 = vrot.lane.b32.xlu0 %v13469_v30, %s14946_s11 }
 0x9c9   : > { %8625 = vrot.lane.b32.xlu1 %v13477_v43, %s14945_s29  ;;  %8620 = vrot.lane.b32.xlu0 %v13477_v43, %s14946_s11 }
 0x9cd   : > { %8635 = vrot.lane.b32.xlu1 %v13455_v7, %s14947_s21  ;;  %8630 = vrot.lane.b32.xlu0 %v13455_v7, %s14948_s0 }
 0x9d1   : > { %8645 = vrot.lane.b32.xlu1 %v13469_v30, %s14947_s21  ;;  %8640 = vrot.lane.b32.xlu0 %v13469_v30, %s14948_s0 }
 0x9d5   : > { %8655 = vrot.lane.b32.xlu1 %v13477_v43, %s14947_s21  ;;  %8650 = vrot.lane.b32.xlu0 %v13477_v43, %s14948_s0 }
 0x9d9   : > { %8665 = vrot.lane.b32.xlu1 %v13469_v30, %s14949_s1  ;;  %8660 = vrot.lane.b32.xlu0 %v13455_v7, %s14949_s1 }
 0x9db   : > { %v8386_v34 = vpop.permute.xlu1 %8385  ;;  %v8381_v57 = vpop.permute.xlu0 %8380 }
 0x9dc   : > { %v8388_v41 = vunpack.i.h.bf16 %v8386_v34  ;;  %v8387_v53 = vunpack.i.l.bf16 %v8386_v34  ;;  %v8383_v61 = vunpack.i.h.bf16 %v8381_v57  ;;  %v8382_v10 = vunpack.i.l.bf16 %v8381_v57 }
 0x9dd   : > { %8675 = vrot.lane.b32.xlu1 %v13539_v60, %s14941_s13  ;;  %8670 = vrot.lane.b32.xlu0 %v13539_v60, %s14942_s8 }
 0x9de   : > { %v5234_v5 = vsel %vm686_vm1, %v8382_v10, %v8383_v61  ;;  %v5258_v35 = vsel %vm711_vm0, %v8387_v53, %v8388_v41 }
 0x9df   : > { %v13629_v59 = vpop.permute.xlu1 %8395  ;;  %v13631_v14 = vpop.permute.xlu0 %8390  ;;  %v5405_v58 = vpack.c.bf16 %v5258_v35, %v5234_v5 }
 0x9e0   : > { %v14880_v37 = vunpack.i.l.bf16 %v13629_v59  ;;  %v14877_v39 = vunpack.i.l.bf16 %v13631_v14  ;;  %v8398_v31 = vunpack.i.h.bf16 %v13629_v59  ;;  %v8393_v40 = vunpack.i.h.bf16 %v13631_v14 }
 0x9e1   : > { %8685 = vrot.lane.b32.xlu1 %v13539_v60, %s14944_s28  ;;  %8680 = vrot.lane.b32.xlu0 %v13477_v43, %s14949_s1  ;;  %v15297_v19 = vunpack.i.l.bf16 %v13629_v59  ;;  %v15298_v59 = vunpack.i.l.bf16 %v13631_v14 }
 0x9e2   : > { %v5259_v2 = vsel %vm711_vm0, %v14880_v37, %v8387_v53  ;;  %v5235_v11 = vsel %vm686_vm1, %v14877_v39, %v8382_v10  ;;  %5473 = vmatprep.subr.bf16.mxu0 %v5405_v58  ;;  %v5257_v43 = vsel %vm711_vm0, %v8388_v41, %v8398_v31  ;;  %v5233_v42 = vsel %vm686_vm1, %v8383_v61, %v8393_v40 }
 0x9e3   : > { %v13649_v38 = vpop.permute.xlu1 %8405  ;;  %v13651_v36 = vpop.permute.xlu0 %8400  ;;  %v5404_v48 = vpack.c.bf16 %v5259_v2, %v5235_v11  ;;  %v5406_v41 = vpack.c.bf16 %v5257_v43, %v5233_v42 }
 0x9e4   : > { %v8407_v20 = vunpack.i.l.bf16 %v13649_v38  ;;  %v14886_v30 = vunpack.i.l.bf16 %v13651_v36  ;;  %v15292_v32 = vunpack.i.l.bf16 %v13651_v36 }
 0x9e5   : > { %8695 = vrot.lane.b32.xlu1 %v13539_v60, %s14946_s11  ;;  %8690 = vrot.lane.b32.xlu0 %v13539_v60, %s14943_s23 }
 0x9e6   : > { %5474 = vmatpush1.bf16.msra.mxu0 %v5404_v48  ;;  %v5232_v46 = vsel %vm686_vm1, %v8393_v40, %v14886_v30  ;;  %v5256_v51 = vsel %vm711_vm0, %v8398_v31, %v8407_v20 }
 0x9e7   : > { %v8416_v49 = vpop.permute.xlu1 %8415  ;;  %v8411_v33 = vpop.permute.xlu0 %8410  ;;  %v5407_v23 = vpack.c.bf16 %v5256_v51, %v5232_v46 }
 0x9e8   : > { %v8418_v63 = vunpack.i.h.bf16 %v8416_v49  ;;  %v8417_v44 = vunpack.i.l.bf16 %v8416_v49  ;;  %v8413_v34 = vunpack.i.h.bf16 %v8411_v33  ;;  %v8412_v57 = vunpack.i.l.bf16 %v8411_v33 }
 0x9e9   : > { %8705 = vrot.lane.b32.xlu1 %v13539_v60, %s14948_s0  ;;  %8700 = vrot.lane.b32.xlu0 %v13539_v60, %s14945_s29  ;;  %s6634_s0 = sshll.u32 %s9215_s30, 10 }
 0x9ea   : > { %5514 = vmatprep.subr.bf16.mxu1 %v5407_v23  ;;  %v5282_v53 = vsel %vm736_vm2, %v8412_v57, %v8413_v34  ;;  %v5306_v61 = vsel %vm761_vm3, %v8417_v44, %v8418_v63 }
 0x9eb   : > { %5515 = vmatpush1.bf16.msra.mxu1 %v5406_v41  ;;  %v13679_v10 = vpop.permute.xlu1 %8425  ;;  %v13681_v5 = vpop.permute.xlu0 %8420  ;;  %v5413_v35 = vpack.c.bf16 %v5306_v61, %v5282_v53 }
 0x9ec   : > { %v14875_v58 = vunpack.i.l.bf16 %v13679_v10  ;;  %v14876_v31 = vunpack.i.l.bf16 %v13681_v5  ;;  %v8428_v2 = vunpack.i.h.bf16 %v13679_v10  ;;  %v8423_v11 = vunpack.i.h.bf16 %v13681_v5 }
 0x9ed   : > { %8715 = vrot.lane.b32.xlu1 %v13539_v60, %s14949_s1  ;;  %8710 = vrot.lane.b32.xlu0 %v13539_v60, %s14947_s21  ;;  %s15448_s1 = sshll.u32 %s9419_s22, 6 }
 0x9ee   : > { %v5307_v40 = vsel %vm761_vm3, %v14875_v58, %v8417_v44  ;;  %v5283_v48 = vsel %vm736_vm2, %v14876_v31, %v8412_v57  ;;  %5475 = vmatprep.subr.bf16.mxu0 %v5413_v35  ;;  %v5305_v33 = vsel %vm761_vm3, %v8418_v63, %v8428_v2  ;;  %v5281_v23 = vsel %vm736_vm2, %v8413_v34, %v8423_v11 }
 0x9ef   : > { %v13699_v43 = vpop.permute.xlu1 %8435  ;;  %v13701_v42 = vpop.permute.xlu0 %8430  ;;  %v5412_v46 = vpack.c.bf16 %v5307_v40, %v5283_v48  ;;  %v5414_v34 = vpack.c.bf16 %v5305_v33, %v5281_v23 }
 0x9f0   : > { %v14884_v51 = vunpack.i.l.bf16 %v13699_v43  ;;  %v14883_v49 = vunpack.i.l.bf16 %v13701_v42 }
 0x9f1   : > { %8725 = vrot.lane.b32.xlu1 %v13506_v27, %s14950_s2  ;;  %8720 = vrot.lane.b32.xlu0 %v13506_v27, %s14951_s3 }
 0x9f2   : > { %5476 = vmatpush1.bf16.msra.mxu0 %v5412_v46  ;;  %v5280_v44 = vsel %vm736_vm2, %v8423_v11, %v14883_v49  ;;  %v5304_v57 = vsel %vm761_vm3, %v8428_v2, %v14884_v51 }
 0x9f3   : > { %v13721_v41 = vpop.permute.xlu1 %8445  ;;  %v8441_v53 = vpop.permute.xlu0 %8440  ;;  %v5415_v61 = vpack.c.bf16 %v5304_v57, %v5280_v44 }
 0x9f4   : > { %v14874_v63 = vunpack.i.l.bf16 %v13721_v41  ;;  %v8443_v35 = vunpack.i.h.bf16 %v8441_v53  ;;  %v8442_v40 = vunpack.i.l.bf16 %v8441_v53  ;;  %v8448_v11 = vunpack.i.h.bf16 %v13721_v41 }
 0x9f5   : > { %8735 = vrot.lane.b32.xlu1 %v13502_v25, %s14950_s2  ;;  %8730 = vrot.lane.b32.xlu0 %v13502_v25, %s14951_s3 }
 0x9f6   : > { %v5330_v2 = vsel %vm786_vm4, %v14874_v63, %v8442_v40  ;;  %5516 = vmatprep.subr.bf16.mxu1 %v5415_v61  ;;  %v5329_v48 = vsel %vm786_vm4, %v8442_v40, %v8443_v35  ;;  %v5328_v23 = vsel %vm786_vm4, %v8443_v35, %v8448_v11 }
 0x9f7   : > { %v5420_v46 = vpack.c.bf16 %v5330_v2, %v13442_v6  ;;  %5517 = vmatpush1.bf16.msra.mxu1 %v5414_v34  ;;  %v8456_v44 = vpop.permute.xlu1 %8455  ;;  %v13736_v57 = vpop.permute.xlu0 %8450  ;;  %v5421_v53 = vpack.c.bf16 %v5329_v48, %v13445_v45  ;;  %v5422_v58 = vpack.c.bf16 %v5328_v23, %v13448_v22 }
 0x9f8   : > { %v14881_v33 = vunpack.i.l.bf16 %v13736_v57  ;;  %v8458_v61 = vunpack.i.h.bf16 %v8456_v44  ;;  %v8457_v40 = vunpack.i.l.bf16 %v8456_v44 }
 0x9f9   : > { %8745 = vrot.lane.b32.xlu1 %v13516_v29, %s14950_s2  ;;  %8740 = vrot.lane.b32.xlu0 %v13516_v29, %s14951_s3 }
 0x9fa   : > { %5477 = vmatprep.subr.bf16.mxu0 %v5421_v53  ;;  %v5327_v6 = vsel %vm786_vm4, %v8448_v11, %v14881_v33  ;;  %v5353_v11 = vsel %vm15281_vm6, %v8457_v40, %v8458_v61  ;;  %vm15287_vm6 = vmmov %vm15282_vm11  ;;  %v8403_v33 = vunpack.i.h.bf16 %v13651_v36 }
 0x9fb   : > { %5478 = vmatpush1.bf16.msra.mxu0 %v5420_v46  ;;  %v13750_v45 = vpop.permute.xlu1 %8465  ;;  %v8461_v34 = vpop.permute.xlu0 %8460  ;;  %v5423_v2 = vpack.c.bf16 %v5327_v6, %v13462_v12 }
 0x9fc   : > { %v8463_v48 = vunpack.i.h.bf16 %v8461_v34  ;;  %v8462_v63 = vunpack.i.l.bf16 %v8461_v34  ;;  %v14878_v35 = vunpack.i.l.bf16 %v13750_v45  ;;  %v8468_v31 = vunpack.i.h.bf16 %v13750_v45 }
 0x9fd   : > { %8755 = vrot.lane.b32.xlu1 %v13506_v27, %s14952_s5  ;;  %8750 = vrot.lane.b32.xlu0 %v13506_v27, %s14953_s6 }
 0x9fe   : > { %5518 = vmatprep.subr.bf16.mxu1 %v5423_v2  ;;  %v5377_v46 = vsel %vm15282_vm11, %v8462_v63, %v8463_v48  ;;  %v5354_v23 = vsel %vm15283_vm12, %v14878_v35, %v8457_v40  ;;  %vm15288_vm11 = vcmp.lt.s32.totalorder %v9620_v21, 117  ;;  %vm15289_vm12 = vmmov %vm15286_vm5 }
 0x9ff   : > { %5519 = vmatpush1.bf16.msra.mxu1 %v5422_v58  ;;  %v13763_v12 = vpop.permute.xlu1 %8475  ;;  %v13765_v44 = vpop.permute.xlu0 %8470  ;;  %v5429_v22 = vpack.c.bf16 %v5377_v46, %v5353_v11 }
 0xa00   : > { %v14879_v53 = vunpack.i.l.bf16 %v13765_v44  ;;  %v14882_v58 = vunpack.i.l.bf16 %v13763_v12  ;;  %v8473_v6 = vunpack.i.h.bf16 %v13765_v44 }
 0xa01   : > { %8765 = vrot.lane.b32.xlu1 %v13502_v25, %s14952_s5  ;;  %8760 = vrot.lane.b32.xlu0 %v13502_v25, %s14953_s6 }
 0xa02   : > { %v5378_v34 = vsel %vm15284_vm13, %v14879_v53, %v8462_v63  ;;  %5479 = vmatprep.subr.bf16.mxu0 %v5429_v22  ;;  %v5376_v63 = vsel %vm15285_vm14, %v8463_v48, %v8473_v6  ;;  %v5351_v22 = vsel %vm15286_vm5, %v8468_v31, %v14882_v58  ;;  %v8408_v53 = vunpack.i.h.bf16 %v13649_v38  ;;  %vm15290_vm13 = vmmov %vm15288_vm11 }
 0xa03   : > { %v5428_v2 = vpack.c.bf16 %v5378_v34, %v5354_v23  ;;  %v13782_v11 = vpop.permute.xlu1 %8485  ;;  %v13784_v46 = vpop.permute.xlu0 %8480  ;;  %v5352_v58 = vsel %vm15289_vm12, %v8458_v61, %v8468_v31  ;;  %v14895_v61 = vunpack.i.h.bf16 %v13736_v57  ;;  %vm15291_vm14 = vmmov %vm15288_vm11 }
 0xa04   : > { %v8488_v39 = vunpack.i.h.bf16 %v13782_v11  ;;  %v14887_v40 = vunpack.i.l.bf16 %v13782_v11  ;;  %v14885_v35 = vunpack.i.l.bf16 %v13784_v46  ;;  %v5430_v30 = vpack.c.bf16 %v5376_v63, %v5352_v58  ;;  %vm15295_vm5 = vmmov %vm15288_vm11 }
 0xa05   : > { %8775 = vrot.lane.b32.xlu1 %v13516_v29, %s14952_s5  ;;  %8770 = vrot.lane.b32.xlu0 %v13516_v29, %s14953_s6  ;;  %v5255_v31 = vsel %vm711_vm0, %v8407_v20, %v8408_v53  ;;  %v15293_v20 = vunpack.i.l.bf16 %v13699_v43  ;;  %v8483_v14 = vunpack.i.h.bf16 %v13784_v46 }
 0xa06   : > { %5480 = vmatpush1.bf16.msra.mxu0 %v5428_v2  ;;  %v5375_v23 = vsel %vm15287_vm6, %v8473_v6, %v14885_v35  ;;  %v5402_v34 = vsel %vm15288_vm11, %v14887_v40, %v8488_v39  ;;  %v8438_v6 = vunpack.i.h.bf16 %v13699_v43  ;;  %v8433_v35 = vunpack.i.h.bf16 %v13701_v42 }
 0xa07   : > { %v13809_v37 = vpop.permute.xlu1 %8495  ;;  %v8491_v48 = vpop.permute.xlu0 %8490  ;;  %v5431_v2 = vpack.c.bf16 %v5375_v23, %v5351_v22  ;;  %v5436_v40 = vpack.c.bf16 %v5402_v34, %v5402_v34 }
 0xa08   : > { %v8493_v49 = vunpack.i.h.bf16 %v8491_v48  ;;  %v8492_v51 = vunpack.i.l.bf16 %v8491_v48  ;;  %v8497_v22 = vunpack.i.l.bf16 %v13809_v37  ;;  %v8498_v36 = vunpack.i.h.bf16 %v13809_v37 }
 0xa09   : > { %8785 = vrot.lane.b32.xlu1 %v13506_v27, %s14963_s12  ;;  %8780 = vrot.lane.b32.xlu0 %v13506_v27, %s14964_s26 }
 0xa0a   : > { %v5401_v23 = vsel %vm15290_vm13, %v8488_v39, %v8492_v51  ;;  %5520 = vmatprep.subr.bf16.mxu1 %v5431_v2  ;;  %v5400_v34 = vsel %vm15291_vm14, %v8492_v51, %v8493_v49  ;;  %v5231_v39 = vsel %vm686_vm1, %v15292_v32, %v8403_v33  ;;  %v5450_v32 = vsel %vm916_vm8, %v5436_v40, 0 }
 0xa0b   : > { %v5437_v58 = vpack.c.bf16 %v5401_v23, %v5401_v23  ;;  %5521 = vmatpush1.bf16.msra.mxu1 %v5430_v30  ;;  %v13828_v63 = vpop.permute.xlu1 %8505  ;;  %v8501_v48 = vpop.permute.xlu0 %8500  ;;  %v13841_v30 = vsel %vm761_vm3, %v15293_v20, %v8438_v6  ;;  %v15294_v23 = vunpack.i.l.bf16 %v13701_v42  ;;  %v5230_v42 = vsel %vm686_vm1, %v8403_v33, %v8497_v22 }
 0xa0c   : > { %v14890_v38 = vunpack.i.l.bf16 %v13828_v63  ;;  %v8503_v2 = vunpack.i.h.bf16 %v8501_v48  ;;  %v8502_v55 = vunpack.i.l.bf16 %v8501_v48  ;;  %v5438_v48 = vpack.c.bf16 %v5400_v34, %v5400_v34 }
 0xa0d   : > { %v13847_v51 = vsel %vm736_vm2, %v15294_v23, %v8433_v35  ;;  %8795 = vrot.lane.b32.xlu1 %v13502_v25, %s14963_s12  ;;  %8790 = vrot.lane.b32.xlu0 %v13502_v25, %s14964_s26  ;;  %v15296_v20 = vunpack.i.l.bf16 %v13736_v57  ;;  %v5408_v24 = vpack.c.bf16 %v5255_v31, %v5231_v39 }
 0xa0e   : > { %v5399_v43 = vsel %vm15295_vm5, %v8493_v49, %v14890_v38  ;;  %6604 = vmatprep.subr.msk.bf16.mxu0 %vm916_vm8, %v5437_v58  ;;  %v5254_v37 = vsel %vm711_vm0, %v8408_v53, %v8502_v55  ;;  %v5252_v33 = vsel %vm711_vm0, %v8503_v2, %v15297_v19  ;;  %v5228_v19 = vsel %vm686_vm1, %v8498_v36, %v15298_v59 }
 0xa0f   : > { %v13870_v40 = vsel %vm786_vm4, %v15296_v20, %v14895_v61  ;;  %v5439_v23 = vpack.c.bf16 %v5399_v43, %v5399_v43  ;;  %5482 = vmatpush1.bf16.msra.mxu0 %v5450_v32  ;;  %v8516_v49 = vpop.permute.xlu1 %8515  ;;  %v8511_v38 = vpop.permute.xlu0 %8510  ;;  %v5409_v58 = vpack.c.bf16 %v5254_v37, %v5230_v42  ;;  %v5253_v20 = vsel %vm711_vm0, %v8502_v55, %v8503_v2  ;;  %vm15303_vm0 = vmmov %vm15287_vm6 }
 0xa10   : > { %v8517_v53 = vunpack.i.l.bf16 %v8516_v49  ;;  %v8513_v34 = vunpack.i.h.bf16 %v8511_v38  ;;  %v8512_v1 = vunpack.i.l.bf16 %v8511_v38  ;;  %v8518_v61 = vunpack.i.h.bf16 %v8516_v49  ;;  %vm15317_vm13 = vmmov %vm15303_vm0 }
 0xa11   : > { %5956 = vrot.lane.b32.xlu1 %v13465_v8, %s14963_s12  ;;  %8800 = vrot.lane.b32.xlu0 %v13516_v29, %s14964_s26  ;;  %v5416_v38 = vpack.c.bf16 %v13841_v30, %v13847_v51  ;;  %v5424_v31 = vpack.c.bf16 %v13870_v40, %v13465_v8  ;;  %v5456_v55 = vsel %vm916_vm8, %v5438_v48, 0  ;;  %v5411_v39 = vpack.c.bf16 %v5252_v33, %v5228_v19  ;;  %vm15318_vm14 = vmmov %vm15303_vm0 }
 0xa12   : > { %6606 = vmatprep.subr.msk.bf16.mxu1 %vm916_vm8, %v5439_v23  ;;  %5555 = vmatprep.subr.bf16.mxu0 %v5409_v58  ;;  %v5278_v29 = vsel %vm736_vm2, %v8433_v35, %v8512_v1  ;;  %v5229_v2 = vsel %vm686_vm1, %v8497_v22, %v8498_v36  ;;  %v5302_v32 = vsel %vm761_vm3, %v8438_v6, %v8517_v53  ;;  %v15299_v43 = vunpack.i.l.bf16 %v13681_v5  ;;  %vm15306_vm1 = vmmov %vm15289_vm12 }
 0xa13   : > { %6605 = vmatmul.mubr.msk.bf16.vlgmr.msra.gmra.mrb[32].mxu0 %vm912_vm9, %v13876_v16  ;;  %5523 = vmatpush1.bf16.msra.mxu1 %v5456_v55  ;;  %v13901_v30 = vpop.permute.xlu1 %8525  ;;  %v8521_v51 = vpop.permute.xlu0 %8520  ;;  %v8478_v42 = vunpack.i.h.bf16 %v13763_v12  ;;  %v5410_v37 = vpack.c.bf16 %v5253_v20, %v5229_v2  ;;  %v5301_v48 = vsel %vm761_vm3, %v8517_v53, %v8518_v61  ;;  %v5417_v5 = vpack.c.bf16 %v5302_v32, %v5278_v29  ;;  %vm15315_vm12 = vmmov %vm15306_vm1 }
 0xa14   : > { %v5276_v35 = vsel %vm736_vm2, %v8513_v34, %v15299_v43  ;;  %5556 = vmatpush1.bf16.msra.mxu0 %v5408_v24  ;;  %v8523_v22 = vunpack.i.h.bf16 %v8521_v51  ;;  %v8522_v36 = vunpack.i.l.bf16 %v8521_v51  ;;  %5596 = vmatprep.subr.bf16.mxu1 %v5411_v39  ;;  %v15300_v6 = vunpack.i.l.bf16 %v13679_v10 }
 0xa15   : > { %8810 = vrot.lane.b32.xlu1 %v13506_v27, %s14970_s25  ;;  %8805 = vrot.lane.b32.xlu0 %v13506_v27, %s14971_s19  ;;  %v5277_v24 = vsel %vm736_vm2, %v8512_v1, %v8513_v34  ;;  %v8527_v49 = vunpack.i.l.bf16 %v13901_v30  ;;  %v15301_v33 = vunpack.i.h.bf16 %v13736_v57  ;;  %v15302_v53 = vunpack.i.l.bf16 %v13784_v46  ;;  %vm15307_vm2 = vmmov %vm15306_vm1 }
 0xa16   : > { %v5300_v23 = vsel %vm761_vm3, %v8518_v61, %v15300_v6  ;;  %6607 = vmatmul.mubr.msk.bf16.vlgmr.msra.gmra.mrb[32].mxu1 %vm912_vm9, %v13876_v16  ;;  %v8508_v61 = vunpack.i.h.bf16 %v13828_v63  ;;  %5557 = vmatprep.subr.bf16.mxu0 %v5417_v5  ;;  %v15304_v59 = vunpack.i.l.bf16 %v13721_v41  ;;  %v15305_v19 = vunpack.i.l.bf16 %v13763_v12  ;;  %vm15308_vm3 = vmmov %vm15303_vm0 }
 0xa17   : > { %v5419_v58 = vpack.c.bf16 %v5300_v23, %v5276_v35  ;;  %v5325_v27 = vsel %vm786_vm4, %v15301_v33, %v8522_v36  ;;  %v5374_v10 = vsel %vm15303_vm0, %v15302_v53, %v8483_v14  ;;  %5597 = vmatpush1.bf16.msra.mxu1 %v5410_v37  ;;  %v8536_v1 = vpop.permute.xlu1 %8535  ;;  %v8531_v34 = vpop.permute.xlu0 %8530  ;;  %v5324_v55 = vsel %vm786_vm4, %v8522_v36, %v8523_v22  ;;  %vm15320_vm0 = vmmov %vm15306_vm1 }
 0xa18   : > { %v5425_v20 = vpack.c.bf16 %v5325_v27, %v13498_v3  ;;  %v5331_v57 = vsel %vm786_vm4, %v8523_v22, %v15304_v59  ;;  %v5350_v46 = vsel %vm15306_vm1, %v15305_v19, %v8478_v42  ;;  %5558 = vmatpush1.bf16.msra.mxu0 %v5416_v38  ;;  %v8537_v39 = vunpack.i.l.bf16 %v8536_v1  ;;  %vm15309_vm4 = vmmov %vm15295_vm5  ;;  %5587 = vmatprep.mubr.bf16.mxu0 %v14984_v62 }
 0xa19   : > { %v8532_v29 = vunpack.i.l.bf16 %v8531_v34  ;;  %5598 = vmatprep.subr.bf16.mxu1 %v5419_v58  ;;  %v5418_v2 = vpack.c.bf16 %v5301_v48, %v5277_v24  ;;  %v8528_v3 = vunpack.i.h.bf16 %v13901_v30  ;;  %v8538_v51 = vunpack.i.h.bf16 %v8536_v1  ;;  %8820 = vrot.lane.b32.xlu1 %v13502_v25, %s14970_s25  ;;  %vm15311_vm6 = vmmov %vm15309_vm4 }
 0xa1a   : > { %v8533_v41 = vunpack.i.h.bf16 %v8531_v34  ;;  %8815 = vrot.lane.b32.xlu0 %v13502_v25, %s14971_s19  ;;  %v5432_v12 = vpack.c.bf16 %v5374_v10, %v5350_v46  ;;  %5559 = vmatprep.subr.bf16.mxu0 %v5425_v20  ;;  %v5427_v32 = vpack.c.bf16 %v5331_v57, %v13451_v4  ;;  %v5349_v38 = vsel %vm15307_vm2, %v8478_v42, %v8527_v49  ;;  %vm15313_vm11 = vmmov %vm15309_vm4 }
 0xa1b   : > { %v5373_v43 = vsel %vm15308_vm3, %v8483_v14, %v8532_v29  ;;  %v5426_v30 = vpack.c.bf16 %v5324_v55, %v13531_v13  ;;  %v5397_v35 = vsel %vm15309_vm4, %v8508_v61, %v8537_v39  ;;  %5599 = vmatpush1.bf16.msra.mxu1 %v5418_v2  ;;  %v8546_v37 = vpop.permute.xlu1 %8545  ;;  %v8541_v22 = vpop.permute.xlu0 %8540  ;;  %v15310_v25 = vunpack.i.l.bf16 %v13828_v63  ;;  %vm15319_vm5 = vmmov %vm15309_vm4  ;;  %5628 = vmatprep.mubr.bf16.mxu1 %v14984_v62 }
 0xa1c   : > { %v5433_v36 = vpack.c.bf16 %v5373_v43, %v5349_v38  ;;  %5560 = vmatpush1.bf16.msra.mxu0 %v5424_v31  ;;  %v8548_v42 = vunpack.i.h.bf16 %v8546_v37  ;;  %v8547_v14 = vunpack.i.l.bf16 %v8546_v37  ;;  %v8543_v5 = vunpack.i.h.bf16 %v8541_v22  ;;  %5600 = vmatprep.subr.bf16.mxu1 %v5427_v32 }
 0xa1d   : > { %v5398_v48 = vsel %vm15311_vm6, %v15310_v25, %v8508_v61  ;;  %v8542_v13 = vunpack.i.l.bf16 %v8541_v22  ;;  %v15312_v6 = vunpack.i.l.bf16 %v13782_v11  ;;  %6004 = vrot.lane.b32.xlu1 %v13465_v8, %s14970_s25  ;;  %v15314_v63 = vunpack.i.l.bf16 %v13750_v45 }
 0xa1e   : > { %5980 = vrot.lane.b32.xlu0 %v13465_v8, %s14971_s19  ;;  %v15316_v31 = vunpack.i.l.bf16 %v13765_v44  ;;  %v5372_v11 = vsel %vm15318_vm14, %v8532_v29, %v8533_v41  ;;  %5561 = vmatprep.subr.bf16.mxu0 %v5433_v36  ;;  %v5396_v33 = vsel %vm15319_vm5, %v8537_v39, %v8538_v51  ;;  %v5348_v45 = vsel %vm15320_vm0, %v8527_v49, %v8528_v3 }
 0xa1f   : > { %v5403_v23 = vsel %vm15313_vm11, %v8538_v51, %v15312_v6  ;;  %v5355_v40 = vsel %vm15315_vm12, %v8528_v3, %v15314_v63  ;;  %v5441_v27 = vpack.c.bf16 %v5397_v35, %v5397_v35  ;;  %5601 = vmatpush1.bf16.msra.mxu1 %v5426_v30  ;;  %v13988_v53 = vpop.permute.xlu1 %8555  ;;  %v13990_v44 = vpop.permute.xlu0 %8550  ;;  %v5440_v10 = vpack.c.bf16 %v5398_v48, %v5398_v48 }
 0xa20   : > { %v5379_v24 = vsel %vm15317_vm13, %v8533_v41, %v15316_v31  ;;  %5562 = vmatpush1.bf16.msra.mxu0 %v5432_v12  ;;  %v8557_v61 = vunpack.i.l.bf16 %v13988_v53  ;;  %v8552_v1 = vunpack.i.l.bf16 %v13990_v44  ;;  %vm15321_vm1 = vcmp.lt.s32.totalorder %v9620_v21, 111 }
 0xa21   : > { %v5435_v58 = vpack.c.bf16 %v5379_v24, %v5355_v40  ;;  %v4977_v34 = vsel %vm15321_vm1, %v8542_v13, %v8543_v5  ;;  %vm15322_vm2 = vcmp.lt.s32.totalorder %v9620_v21, 110  ;;  %v5443_v20 = vpack.c.bf16 %v5403_v23, %v5403_v23  ;;  %6608 = vmatprep.subr.msk.bf16.mxu0 %vm916_vm8, %v5441_v27  ;;  %8830 = vrot.lane.b32.xlu1 %v13543_v54, %s14994_s27  ;;  %vm15324_vm4 = vmmov %vm15321_vm1 }
 0xa22   : > { %v5001_v49 = vsel %vm15322_vm2, %v8547_v14, %v8548_v42  ;;  %v5434_v59 = vpack.c.bf16 %v5372_v11, %v5348_v45  ;;  %v5442_v57 = vpack.c.bf16 %v5396_v33, %v5396_v33  ;;  %v8558_v19 = vunpack.i.h.bf16 %v13988_v53  ;;  %vm15323_vm3 = vmmov %vm15322_vm2  ;;  %8825 = vrot.lane.b32.xlu0 %v13455_v7, %s14994_s27 }
 0xa23   : > { %5602 = vmatprep.subr.bf16.mxu1 %v5435_v58  ;;  %v5002_v46 = vsel %vm15323_vm3, %v8557_v61, %v8547_v14  ;;  %v8553_v55 = vunpack.i.h.bf16 %v13990_v44  ;;  %v4978_v39 = vsel %vm15324_vm4, %v8552_v1, %v8542_v13  ;;  %v5462_v54 = vsel %vm916_vm8, %v5440_v10, 0  ;;  %v14015_v29 = vpop.permute.xlu1 %8565  ;;  %v14017_v2 = vpop.permute.xlu0 %8560  ;;  %vm15325_vm6 = vmmov %vm15322_vm2 }
 0xa24   : > { %5603 = vmatpush1.bf16.msra.mxu1 %v5434_v59  ;;  %v5172_v3 = vpack.c.bf16 %v5001_v49, %v4977_v34  ;;  %v5171_v51 = vpack.c.bf16 %v5002_v46, %v4978_v39  ;;  %5564 = vmatpush1.bf16.msra.mxu0 %v5462_v54  ;;  %v8567_v41 = vunpack.i.l.bf16 %v14015_v29  ;;  %v8562_v12 = vunpack.i.l.bf16 %v14017_v2  ;;  %vm15326_vm11 = vmmov %vm15321_vm1 }
 0xa25   : > { %6610 = vmatprep.subr.msk.bf16.mxu1 %vm916_vm8, %v5443_v20  ;;  %8840 = vrot.lane.b32.xlu1 %v13559_v0, %s14950_s2  ;;  %v5468_v7 = vsel %vm916_vm8, %v5442_v57, 0  ;;  %v5000_v32 = vsel %vm15325_vm6, %v8548_v42, %v8558_v19  ;;  %v4976_v38 = vsel %vm15326_vm11, %v8543_v5, %v8553_v55  ;;  %vm15327_vm12 = vmmov %vm15321_vm1  ;;  %vm15329_vm14 = vcmp.lt.s32.totalorder %v9620_v21, 109  ;;  %s350_s2 = scalar_lea.vmem [#allocation11], %s15448_s1 }
 0xa26   : > { %5664 = vmatprep.subr.bf16.mxu0 %v5172_v3  ;;  %8835 = vrot.lane.b32.xlu0 %v13559_v0, %s14951_s3  ;;  %v4975_v43 = vsel %vm15327_vm12, %v8553_v55, %v8562_v12  ;;  %vm15328_vm13 = vmmov %vm15322_vm2  ;;  %v5173_v14 = vpack.c.bf16 %v5000_v32, %v4976_v38  ;;  %vm15330_vm5 = vcmp.lt.s32.totalorder %v9620_v21, 101  ;;  %vm15337_vm11 = vcmp.lt.s32.totalorder %v9620_v21, 100  ;;  %s6397_s3 = sshll.u32 %s350_s2, 4  ;;  %s14694_s3 = int_to_ptr.vmem [resolvable:$true] %s6397_s3 }
 0xa27   : > { %v4999_v30 = vsel %vm15328_vm13, %v8558_v19, %v8567_v41  ;;  %6609 = vmatmul.mubr.msk.bf16.vlgmr.msra.gmra.mrb[36].mxu0 %vm912_vm9, %v13876_v16  ;;  %v8576_v35 = vpop.permute.xlu1 %8575  ;;  %v8571_v37 = vpop.permute.xlu0 %8570  ;;  %vm15331_vm0 = vmmov %vm15330_vm5  ;;  %vm15338_vm12 = vcmp.lt.s32.totalorder %v9620_v21, 99 }
 0xa28   : > { %5605 = vmatpush1.bf16.msra.mxu1 %v5468_v7  ;;  %v5174_v22 = vpack.c.bf16 %v4999_v30, %v4975_v43  ;;  %5665 = vmatpush1.bf16.msra.mxu0 %v5171_v51  ;;  %v8578_v36 = vunpack.i.h.bf16 %v8576_v35  ;;  %v8577_v25 = vunpack.i.l.bf16 %v8576_v35  ;;  %v8573_v48 = vunpack.i.h.bf16 %v8571_v37  ;;  %vm15332_vm1 = vmmov %vm15329_vm14 }
 0xa29   : > { %v8572_v42 = vunpack.i.l.bf16 %v8571_v37  ;;  %5696 = vmatprep.mubr.bf16.mxu0 %v14984_v62  ;;  %8845 = vrot.lane.b32.xlu1 %v13559_v0, %s14953_s6  ;;  %vm15333_vm2 = vmmov %vm15331_vm0 }
 0xa2a   : > { %5705 = vmatprep.subr.bf16.mxu1 %v5174_v22  ;;  %6028 = vrot.lane.b32.xlu0 %v13465_v8, %s14994_s27  ;;  %v5049_v13 = vsel %vm15330_vm5, %v8577_v25, %v8578_v36  ;;  %vm15334_vm3 = vmmov %vm15332_vm1 }
 0xa2b   : > { %6611 = vmatmul.mubr.msk.bf16.vlgmr.msra.gmra.mrb[36].mxu1 %vm912_vm9, %v13876_v16  ;;  %v5025_v5 = vsel %vm15329_vm14, %v8572_v42, %v8573_v48  ;;  %v14052_v6 = vpop.permute.xlu1 %8585  ;;  %v14054_v23 = vpop.permute.xlu0 %8580  ;;  %vm15335_vm4 = vmmov %vm15332_vm1 }
 0xa2c   : > { %5706 = vmatpush1.bf16.msra.mxu1 %v5173_v14  ;;  %v5180_v63 = vpack.c.bf16 %v5049_v13, %v5025_v5  ;;  %5737 = vmatprep.mubr.bf16.mxu1 %v14984_v62  ;;  %v8588_v40 = vunpack.i.h.bf16 %v14052_v6  ;;  %v8587_v8 = vunpack.i.l.bf16 %v14052_v6  ;;  %v8583_v16 = vunpack.i.h.bf16 %v14054_v23  ;;  %vm15336_vm6 = vmmov %vm15331_vm0 }
 0xa2d   : > { %v8582_v31 = vunpack.i.l.bf16 %v14054_v23  ;;  %8855 = vrot.lane.b32.xlu1 %v13559_v0, %s14964_s26  ;;  %vm15339_vm13 = vmmov %vm15338_vm12 }
 0xa2e   : > { %5666 = vmatprep.subr.bf16.mxu0 %v5180_v63  ;;  %v5050_v24 = vsel %vm15331_vm0, %v8587_v8, %v8577_v25  ;;  %8850 = vrot.lane.b32.xlu0 %v13559_v0, %s14952_s5  ;;  %v5048_v27 = vsel %vm15333_vm2, %v8578_v36, %v8588_v40  ;;  %v5024_v10 = vsel %vm15334_vm3, %v8573_v48, %v8583_v16  ;;  %vm15340_vm14 = vmmov %vm15337_vm11  ;;  %vm15345_vm3 = vcmp.lt.s32.totalorder %v9620_v21, 91  ;;  %s15449_s5 = sld [smem:[#allocation22_spill]] }
 0xa2f   : > { %v5026_v11 = vsel %vm15332_vm1, %v8582_v31, %v8572_v42  ;;  %v14073_v33 = vpop.permute.xlu1 %8595  ;;  %v14075_v45 = vpop.permute.xlu0 %8590  ;;  %v5181_v59 = vpack.c.bf16 %v5048_v27, %v5024_v10  ;;  %vm15341_vm5 = vmmov %vm15338_vm12 }
 0xa30   : > { %v5179_v58 = vpack.c.bf16 %v5050_v24, %v5026_v11  ;;  %v8597_v34 = vunpack.i.l.bf16 %v14073_v33  ;;  %v8592_v49 = vunpack.i.l.bf16 %v14075_v45  ;;  %vm15342_vm0 = vmmov %vm15337_vm11 }
 0xa31   : > { %5962 = vrot.lane.b32.xlu1 %v13451_v4, %s14963_s12  ;;  %vm15343_vm1 = vmmov %vm15342_vm0 }
 0xa32   : > { %5667 = vmatpush1.bf16.msra.mxu0 %v5179_v58  ;;  %8860 = vrot.lane.b32.xlu0 %v13539_v60, %s14963_s12  ;;  %v5023_v0 = vsel %vm15335_vm4, %v8583_v16, %v8592_v49  ;;  %v5047_v20 = vsel %vm15336_vm6, %v8588_v40, %v8597_v34  ;;  %vm15344_vm2 = vmmov %vm15341_vm5  ;;  %vm15346_vm4 = vcmp.lt.s32.totalorder %v9620_v21, 90  ;;  %s9153_s12 = smov [#allocation11]  }
 0xa33   : > { %v8606_v57 = vpop.permute.xlu1 %8605  ;;  %v8601_v19 = vpop.permute.xlu0 %8600  ;;  %v5182_v46 = vpack.c.bf16 %v5047_v20, %v5023_v0  ;;  %vm15347_vm6 = vmmov %vm15346_vm4  ;;  %s9047_s15 = sshll.u32 %s9153_s12, 4  ;;  %s9048_s15 = int_to_ptr.vmem [resolvable:$false] %s9047_s15 }
 0xa34   : > { %v8608_v55 = vunpack.i.h.bf16 %v8606_v57  ;;  %v8607_v39 = vunpack.i.l.bf16 %v8606_v57  ;;  %v8603_v54 = vunpack.i.h.bf16 %v8601_v19  ;;  %v8602_v3 = vunpack.i.l.bf16 %v8601_v19  ;;  %p15452_p5 = scmp.ne.s32.totalorder %s15449_s5, 0  ;;  %s9049_s18 = scalar_lea.vmem %s9048_s15, 2048 }
 0xa35   : > { %8870 = vrot.lane.b32.xlu1 %v13539_v60, %s14970_s25  ;;  %5707 = vmatprep.subr.bf16.mxu1 %v5182_v46  ;;  %p9050_p12 = scmp.lt.s32.totalorder %s14694_s3, %s9048_s15 }
 0xa36   : > { %8865 = vrot.lane.b32.xlu0 %v13539_v60, %s14971_s19  ;;  %5708 = vmatpush1.bf16.msra.mxu1 %v5181_v59  ;;  %v5073_v51 = vsel %vm15337_vm11, %v8602_v3, %v8603_v54  ;;  %v5097_v7 = vsel %vm15338_vm12, %v8607_v39, %v8608_v55  ;;  %vm15348_vm11 = vmmov %vm15345_vm3 }
 0xa37   : > { %v14103_v32 = vpop.permute.xlu1 %8615  ;;  %v14105_v38 = vpop.permute.xlu0 %8610  ;;  %v5188_v43 = vpack.c.bf16 %v5097_v7, %v5073_v51  ;;  %vm15349_vm12 = vmmov %vm15346_vm4 }
 0xa38   : > { %v8618_v30 = vunpack.i.h.bf16 %v14103_v32  ;;  %v8617_v35 = vunpack.i.l.bf16 %v14103_v32  ;;  %v8613_v37 = vunpack.i.h.bf16 %v14105_v38  ;;  %v14899_v22 = vunpack.i.l.bf16 %v14105_v38 }
 0xa39   : > { %6010 = vrot.lane.b32.xlu1 %v13451_v4, %s14970_s25  ;;  %5668 = vmatprep.subr.bf16.mxu0 %v5188_v43  ;;  %s15450_s25 = sld [smem:[#allocation36_spill]] }
 0xa3a   : > { %v5098_v36 = vsel %vm15339_vm13, %v8617_v35, %v8607_v39  ;;  %v5074_v25 = vsel %vm15340_vm14, %v14899_v22, %v8602_v3  ;;  %5986 = vrot.lane.b32.xlu0 %v13451_v4, %s14971_s19  ;;  %v5096_v5 = vsel %vm15341_vm5, %v8608_v55, %v8618_v30  ;;  %v5072_v13 = vsel %vm15342_vm0, %v8603_v54, %v8613_v37  ;;  %vm15350_vm13 = vmmov %vm15345_vm3  ;;  %s9043_s19 = scalar_lea.vmem %s14694_s3, 1024 }
 0xa3b   : > { %v5187_v48 = vpack.c.bf16 %v5098_v36, %v5074_v25  ;;  %v14123_v42 = vpop.permute.xlu1 %8625  ;;  %v14125_v14 = vpop.permute.xlu0 %8620  ;;  %v5189_v11 = vpack.c.bf16 %v5096_v5, %v5072_v13  ;;  %vm15351_vm14 = vmmov %vm15345_vm3  ;;  %vm15353_vm0 = vcmp.lt.s32.totalorder %v9620_v21, 89  ;;  %p9044_p6 = scmp.ne.s32.totalorder %s14694_s3, %s9043_s19  ;;  %p9051_p3 = scmp.lt.s32.totalorder %s9049_s18, %s9043_s19 }
 0xa3c   : > { %v8627_v63 = vunpack.i.l.bf16 %v14123_v42  ;;  %v8622_v40 = vunpack.i.l.bf16 %v14125_v14  ;;  %vm15352_vm5 = vmmov %vm15346_vm4 }
 0xa3d   : > { %6034 = vrot.lane.b32.xlu1 %v13451_v4, %s14994_s27  ;;  %5669 = vmatpush1.bf16.msra.mxu0 %v5187_v48  ;;  %p9045_p7 = pnand %p9044_p6, %p15452_p5  ;;  %p9052_p13 = por %p9051_p3, %p9050_p12 }
 0xa3e   : > { %8875 = vrot.lane.b32.xlu0 %v13539_v60, %s14994_s27  ;;  %v5071_v16 = vsel %vm15343_vm1, %v8613_v37, %v8622_v40  ;;  %v5095_v24 = vsel %vm15344_vm2, %v8618_v30, %v8627_v63  ;;  %vm15354_vm1 = vmmov %vm15353_vm0  ;;  %vm15355_vm2 = vcmp.lt.s32.totalorder %v9620_v21, 110  ;;  %s6383_s27 = scalar_lea.sflag [#allocation4], %s9419_s22 }
 0xa3f   : > { %v8636_v58 = vpop.permute.xlu1 %8635  ;;  %v8631_v27 = vpop.permute.xlu0 %8630  ;;  %v5190_v10 = vpack.c.bf16 %v5095_v24, %v5071_v16  ;;  %s15451_s30 = smov %s15450_s25  ;;  %s14692_s26 = scalar_lea.hbm %s15450_s25, %s6634_s0 }
 0xa40   : > { %v8638_v0 = vunpack.i.h.bf16 %v8636_v58  ;;  %v8637_v4 = vunpack.i.l.bf16 %v8636_v58  ;;  %v8633_v20 = vunpack.i.h.bf16 %v8631_v27  ;;  %v8632_v59 = vunpack.i.l.bf16 %v8631_v27  ;;  %p9046_p9 = pneg %p9045_p7 }
 0xa41   : > { %5709 = vmatprep.subr.bf16.mxu1 %v5190_v10  ;;  %v8563_v58 = vunpack.i.h.bf16 %v14017_v2 }
 0xa42   : > { %5710 = vmatpush1.bf16.msra.mxu1 %v5189_v11  ;;  %v5121_v60 = vsel %vm15345_vm3, %v8632_v59, %v8633_v20  ;;  %v5145_v57 = vsel %vm15346_vm4, %v8637_v4, %v8638_v0  ;;  %v8568_v11 = vunpack.i.h.bf16 %v14015_v29  ;;  %vm15356_vm3 = vcmp.lt.s32.totalorder %v9620_v21, 111  ;;  %vm15357_vm4 = vmmov %vm15353_vm0  ;;  %p9053_p0 = pnand %p9052_p13, %p9046_p9 }
 0xa43   : > { %v14149_v19 = vpop.permute.xlu1 %8645  ;;  %v14151_v46 = vpop.permute.xlu0 %8640  ;;  %v5196_v55 = vpack.c.bf16 %v5145_v57, %v5121_v60  ;;  %v8628_v29 = vunpack.i.h.bf16 %v14123_v42  ;;  %v15379_v42 = vunpack.i.l.bf16 %v14105_v38 }
 0xa44   : > { %v14897_v39 = vunpack.i.l.bf16 %v14149_v19  ;;  %v14898_v54 = vunpack.i.l.bf16 %v14151_v46  ;;  %v8648_v3 = vunpack.i.h.bf16 %v14149_v19  ;;  %v8643_v51 = vunpack.i.h.bf16 %v14151_v46 }
 0xa45   : > { %5670 = vmatprep.subr.bf16.mxu0 %v5196_v55 }
 0xa46   : > { %v5146_v7 = vsel %vm15347_vm6, %v14897_v39, %v8637_v4  ;;  %v5122_v43 = vsel %vm15348_vm11, %v14898_v54, %v8632_v59  ;;  %v5144_v5 = vsel %vm15349_vm12, %v8638_v0, %v8648_v3  ;;  %v5120_v13 = vsel %vm15350_vm13, %v8633_v20, %v8643_v51  ;;  %vm15358_vm6 = vmmov %vm15356_vm3 }
 0xa47   : > { %v5195_v30 = vpack.c.bf16 %v5146_v7, %v5122_v43  ;;  %v14165_v37 = vpop.permute.xlu1 %8655  ;;  %v14167_v36 = vpop.permute.xlu0 %8650  ;;  %v5197_v4 = vpack.c.bf16 %v5144_v5, %v5120_v13  ;;  %v4974_v7 = vsel %vm15356_vm3, %v8562_v12, %v8563_v58  ;;  %vm15359_vm11 = vmmov %vm15355_vm2  ;;  %vm15360_vm12 = vcmp.lt.s32.totalorder %v9620_v21, 101 }
 0xa48   : > { %v8657_v25 = vunpack.i.l.bf16 %v14165_v37  ;;  %v8652_v48 = vunpack.i.l.bf16 %v14167_v36  ;;  %vm15361_vm13 = vcmp.lt.s32.totalorder %v9620_v21, 109 }
 0xa49   : > { %5671 = vmatpush1.bf16.msra.mxu0 %v5195_v30 }
 0xa4a   : > { %v5119_v16 = vsel %vm15351_vm14, %v8643_v51, %v8652_v48  ;;  %v5143_v24 = vsel %vm15352_vm5, %v8648_v3, %v8657_v25  ;;  %v4998_v51 = vsel %vm15355_vm2, %v8567_v41, %v8568_v11  ;;  %vm15362_vm14 = vcmp.lt.s32.totalorder %v9620_v21, 99 }
 0xa4b   : > { %v14185_v27 = vpop.permute.xlu1 %8665  ;;  %v8661_v10 = vpop.permute.xlu0 %8660  ;;  %v5198_v0 = vpack.c.bf16 %v5143_v24, %v5119_v16  ;;  %v8598_v16 = vunpack.i.h.bf16 %v14073_v33  ;;  %v8593_v24 = vunpack.i.h.bf16 %v14075_v45  ;;  %v5175_v22 = vpack.c.bf16 %v4998_v51, %v4974_v7 }
 0xa4c   : > { %v14896_v20 = vunpack.i.l.bf16 %v14185_v27  ;;  %v8663_v59 = vunpack.i.h.bf16 %v8661_v10  ;;  %v8662_v60 = vunpack.i.l.bf16 %v8661_v10  ;;  %v8668_v57 = vunpack.i.h.bf16 %v14185_v27 }
 0xa4d   : > { %5711 = vmatprep.subr.bf16.mxu1 %v5198_v0  ;;  %vm15363_vm5 = vcmp.lt.s32.totalorder %v9620_v21, 100  ;;  %v8658_v7 = vunpack.i.h.bf16 %v14165_v37 }
 0xa4e   : > { %v5169_v55 = vsel %vm15353_vm0, %v8662_v60, %v8663_v59  ;;  %5712 = vmatpush1.bf16.msra.mxu1 %v5197_v4  ;;  %v5170_v3 = vsel %vm15354_vm1, %v14896_v20, %v8662_v60  ;;  %v8623_v4 = vunpack.i.h.bf16 %v14125_v14  ;;  %v5168_v41 = vsel %vm15357_vm4, %v8663_v59, %v8668_v57  ;;  %v14215_v20 = vld [vmem:[#allocation10] sm:$0xf]  ;;  %vm15364_vm1 = vmmov %vm15356_vm3 }
 0xa4f   : > { %v5204_v43 = vpack.c.bf16 %v5169_v55, %v5169_v55  ;;  %v8676_v30 = vpop.permute.xlu1 %8675  ;;  %v8671_v5 = vpop.permute.xlu0 %8670  ;;  %v5203_v13 = vpack.c.bf16 %v5170_v3, %v5170_v3  ;;  %v5046_v59 = vsel %vm15360_vm12, %v8597_v34, %v8598_v16  ;;  %v5205_v45 = vpack.c.bf16 %v5168_v41, %v5168_v41  ;;  %vm15365_vm3 = vmmov %vm15355_vm2 }
 0xa50   : > { %v8677_v10 = vunpack.i.l.bf16 %v8676_v30  ;;  %v8672_v0 = vunpack.i.l.bf16 %v8671_v5  ;;  %v8678_v12 = vunpack.i.h.bf16 %v8676_v30  ;;  %v8673_v60 = vunpack.i.h.bf16 %v8671_v5  ;;  %vm15366_vm4 = vmmov %vm15364_vm1 }
 0xa51   : > { %6612 = vmatprep.subr.msk.bf16.mxu0 %vm916_vm8, %v5204_v43  ;;  %v5641_v2 = vsel %vm916_vm8, %v5203_v13, 0  ;;  %v14242_v33 = vsel %vm15363_vm5, %v8622_v40, %v8623_v4  ;;  %v8653_v41 = vunpack.i.h.bf16 %v14167_v36 }
 0xa52   : > { %5673 = vmatpush1.bf16.msra.mxu0 %v5641_v2  ;;  %v4973_v55 = vsel %vm15358_vm6, %v8563_v58, %v8672_v0  ;;  %v4997_v3 = vsel %vm15359_vm11, %v8568_v11, %v8677_v10  ;;  %v5022_v58 = vsel %vm15361_vm13, %v8592_v49, %v8593_v24  ;;  %v14234_v11 = vsel %vm15362_vm14, %v8627_v63, %v8628_v29  ;;  %vm15367_vm6 = vmmov %vm15361_vm13 }
 0xa53   : > { %v8686_v39 = vpop.permute.xlu1 %8685  ;;  %v14217_v54 = vpop.permute.xlu0 %8680  ;;  %v5176_v43 = vpack.c.bf16 %v4997_v3, %v4973_v55  ;;  %v4971_v63 = vsel %vm15364_vm1, %v8673_v60, %v8552_v1  ;;  %v4995_v40 = vsel %vm15355_vm2, %v8678_v12, %v8557_v61  ;;  %v5183_v51 = vpack.c.bf16 %v5046_v59, %v5022_v58  ;;  %vm15368_vm11 = vmmov %vm15360_vm12 }
 0xa54   : > { %v8682_v30 = vunpack.i.l.bf16 %v14217_v54  ;;  %v8687_v34 = vunpack.i.l.bf16 %v8686_v39  ;;  %v4996_v5 = vsel %vm15365_vm3, %v8677_v10, %v8678_v12  ;;  %v4972_v44 = vsel %vm15366_vm4, %v8672_v0, %v8673_v60  ;;  %vm15369_vm12 = vmmov %vm15368_vm11 }
 0xa55   : > { %5746 = vmatprep.subr.bf16.mxu0 %v5176_v43  ;;  %6613 = vmatmul.mubr.msk.bf16.vlgmr.msra.gmra.mrb[32].mxu0 %vm912_vm9, %v14215_v20  ;;  %v8688_v1 = vunpack.i.h.bf16 %v8686_v39  ;;  %v5191_v61 = vpack.c.bf16 %v14234_v11, %v14242_v33  ;;  %v5647_v10 = vsel %vm916_vm8, %v5205_v45, 0  ;;  %v5178_v12 = vpack.c.bf16 %v4995_v40, %v4971_v63  ;;  %vm15371_vm14 = vmmov %vm15368_vm11 }
 0xa56   : > { %v5167_v49 = vsel %vm15353_vm0, %v8668_v57, %v8682_v30  ;;  %5747 = vmatpush1.bf16.msra.mxu0 %v5175_v22  ;;  %5778 = vmatprep.mubr.bf16.mxu0 %v14984_v62  ;;  %v5021_v3 = vsel %vm15367_vm6, %v8593_v24, %v8687_v34  ;;  %vm15370_vm13 = vcmp.lt.s32.totalorder %v9620_v21, 90  ;;  %v5177_v43 = vpack.c.bf16 %v4996_v5, %v4972_v44  ;;  %vm15372_vm5 = vmmov %vm15367_vm6 }
 0xa57   : > { %v5206_v13 = vpack.c.bf16 %v5167_v49, %v5167_v49  ;;  %v8696_v2 = vpop.permute.xlu1 %8695  ;;  %v8691_v57 = vpop.permute.xlu0 %8690  ;;  %v14283_v60 = vsel %vm15370_vm13, %v8657_v25, %v8658_v7  ;;  %vm15373_vm0 = vcmp.lt.s32.totalorder %v9620_v21, 91  ;;  %vm15374_vm1 = vmmov %vm15372_vm5  ;;  %v8683_v63 = vunpack.i.h.bf16 %v14217_v54 }
 0xa58   : > { %v8693_v22 = vunpack.i.h.bf16 %v8691_v57  ;;  %v8692_v53 = vunpack.i.l.bf16 %v8691_v57  ;;  %v8697_v55 = vunpack.i.l.bf16 %v8696_v2  ;;  %v8698_v6 = vunpack.i.h.bf16 %v8696_v2 }
 0xa59   : > { %6614 = vmatprep.subr.msk.bf16.mxu1 %vm916_vm8, %v5206_v13  ;;  %v5118_v25 = vsel %vm15373_vm0, %v8652_v48, %v8653_v41  ;;  %v5020_v45 = vsel %vm15374_vm1, %v8687_v34, %v8688_v1  ;;  %vm15375_vm2 = vcmp.lt.s32.totalorder %v9620_v21, 100  ;;  %vm15376_vm3 = vcmp.lt.s32.totalorder %v9620_v21, 99 }
 0xa5a   : > { %5714 = vmatpush1.bf16.msra.mxu1 %v5647_v10  ;;  %v5045_v39 = vsel %vm15368_vm11, %v8598_v16, %v8692_v53  ;;  %v5043_v0 = vsel %vm15369_vm12, %v8693_v22, %v8587_v8  ;;  %v5044_v24 = vsel %vm15371_vm14, %v8692_v53, %v8693_v22  ;;  %v5019_v8 = vsel %vm15372_vm5, %v8688_v1, %v8582_v31  ;;  %vm15377_vm4 = vmmov %vm15376_vm3 }
 0xa5b   : > { %v8706_v59 = vpop.permute.xlu1 %8705  ;;  %v8701_v58 = vpop.permute.xlu0 %8700  ;;  %5787 = vmatprep.subr.bf16.mxu1 %v5178_v12  ;;  %v5184_v16 = vpack.c.bf16 %v5045_v39, %v5021_v3  ;;  %v5186_v49 = vpack.c.bf16 %v5043_v0, %v5019_v8  ;;  %v5185_v40 = vpack.c.bf16 %v5044_v24, %v5020_v45  ;;  %v5069_v23 = vsel %vm15375_vm2, %v8623_v4, %v8697_v55  ;;  %vm15378_vm6 = vmmov %vm15376_vm3 }
 0xa5c   : > { %v8703_v11 = vunpack.i.h.bf16 %v8701_v58  ;;  %v8702_v33 = vunpack.i.l.bf16 %v8701_v58  ;;  %v8707_v36 = vunpack.i.l.bf16 %v8706_v59  ;;  %vm15380_vm11 = vmmov %vm15375_vm2  ;;  %v8708_v44 = vunpack.i.h.bf16 %v8706_v59 }
 0xa5d   : > { %5748 = vmatprep.subr.bf16.mxu0 %v5184_v16  ;;  %6615 = vmatmul.mubr.msk.bf16.vlgmr.msra.gmra.mrb[32].mxu1 %vm912_vm9, %v14215_v20  ;;  %vm15381_vm12 = vmmov %vm15375_vm2  ;;  %v5199_v32 = vpack.c.bf16 %v14283_v60, %v5118_v25  ;;  %vm15382_vm13 = vcmp.lt.s32.totalorder %v9620_v21, 89  ;;  %vm15384_vm5 = vcmp.lt.s32.totalorder %v9620_v21, 90  ;;  %v15388_v59 = vunpack.i.l.bf16 %v14149_v19 }
 0xa5e   : > { %5749 = vmatpush1.bf16.msra.mxu0 %v5183_v51  ;;  %5788 = vmatpush1.bf16.msra.mxu1 %v5177_v43  ;;  %v5093_v31 = vsel %vm15376_vm3, %v8628_v29, %v8702_v33  ;;  %v5092_v48 = vsel %vm15377_vm4, %v8702_v33, %v8703_v11  ;;  %v5091_v14 = vsel %vm15378_vm6, %v8703_v11, %v8617_v35  ;;  %vm15383_vm14 = vmmov %vm15382_vm13  ;;  %v15386_v43 = vunpack.i.l.bf16 %v14151_v46 }
 0xa5f   : > { %v8716_v34 = vpop.permute.xlu1 %8715  ;;  %v8711_v5 = vpop.permute.xlu0 %8710  ;;  %5789 = vmatprep.subr.bf16.mxu1 %v5186_v49  ;;  %v5192_v13 = vpack.c.bf16 %v5093_v31, %v5069_v23  ;;  %v5067_v29 = vsel %vm15380_vm11, %v8698_v6, %v15379_v42  ;;  %5819 = vmatprep.mubr.bf16.mxu1 %v14984_v62  ;;  %v5068_v57 = vsel %vm15381_vm12, %v8697_v55, %v8698_v6  ;;  %vm15385_vm1 = vmmov %vm15384_vm5  ;;  %vm15394_vm12 = vcmp.lt.s32.totalorder %v9620_v21, 29 }
 0xa60   : > { %v8717_v51 = vunpack.i.l.bf16 %v8716_v34  ;;  %v8713_v4 = vunpack.i.h.bf16 %v8711_v5  ;;  %v8712_v2 = vunpack.i.l.bf16 %v8711_v5  ;;  %v5194_v1 = vpack.c.bf16 %v5091_v14, %v5067_v29  ;;  %vm15387_vm2 = vmmov %vm15373_vm0 }
 0xa61   : > { %5750 = vmatprep.subr.bf16.mxu0 %v5192_v13  ;;  %v5193_v22 = vpack.c.bf16 %v5092_v48, %v5068_v57  ;;  %v8718_v35 = vunpack.i.h.bf16 %v8716_v34  ;;  %v5166_v38 = vsel %vm15382_vm13, %v8682_v30, %v8683_v63  ;;  %v5117_v3 = vsel %vm15373_vm0, %v8653_v41, %v8707_v36  ;;  %vm15389_vm3 = vmmov %vm15385_vm1 }
 0xa62   : > { %5751 = vmatpush1.bf16.msra.mxu0 %v5191_v61  ;;  %5790 = vmatpush1.bf16.msra.mxu1 %v5185_v40  ;;  %v5165_v53 = vsel %vm15383_vm14, %v8683_v63, %v8717_v51  ;;  %v5140_v10 = vsel %vm15384_vm5, %v8712_v2, %v8713_v4  ;;  %v5141_v54 = vsel %vm15385_vm1, %v8658_v7, %v8712_v2  ;;  %vm15390_vm4 = vmmov %vm15373_vm0  ;;  %v15391_v7 = vunpack.i.l.bf16 %v14185_v27 }
 0xa63   : > { %v8726_v12 = vpop.permute.xlu1 %8725  ;;  %v8721_v55 = vpop.permute.xlu0 %8720  ;;  %5791 = vmatprep.subr.bf16.mxu1 %v5194_v1  ;;  %v5200_v60 = vpack.c.bf16 %v5141_v54, %v5117_v3  ;;  %v5115_v24 = vsel %vm15387_vm2, %v8708_v44, %v15386_v43  ;;  %v5139_v41 = vsel %vm15389_vm3, %v8713_v4, %v15388_v59  ;;  %v5207_v58 = vpack.c.bf16 %v5166_v38, %v5166_v38  ;;  %vm15392_vm6 = vmmov %vm15382_vm13 }
 0xa64   : > { %v8728_v61 = vunpack.i.h.bf16 %v8726_v12  ;;  %v8727_v39 = vunpack.i.l.bf16 %v8726_v12  ;;  %v8723_v30 = vunpack.i.h.bf16 %v8721_v55  ;;  %v8722_v0 = vunpack.i.l.bf16 %v8721_v55  ;;  %vm15393_vm11 = vmmov %vm15392_vm6 }
 0xa65   : > { %v5116_v37 = vsel %vm15390_vm4, %v8707_v36, %v8708_v44  ;;  %v5163_v16 = vsel %vm15392_vm6, %v8718_v35, %v15391_v7  ;;  %v5202_v6 = vpack.c.bf16 %v5139_v41, %v5115_v24  ;;  %v5164_v46 = vsel %vm15393_vm11, %v8717_v51, %v8718_v35  ;;  %5752 = vmatprep.subr.bf16.mxu0 %v5200_v60  ;;  %vm15395_vm13 = vmmov %vm15394_vm12 }
 0xa66   : > { %5792 = vmatpush1.bf16.msra.mxu1 %v5193_v22  ;;  %v5208_v11 = vpack.c.bf16 %v5165_v53, %v5165_v53  ;;  %v5201_v33 = vpack.c.bf16 %v5140_v10, %v5116_v37  ;;  %v5849_v25 = vsel %vm1312_vm15, %v8722_v0, %v8723_v30  ;;  %v5873_v27 = vsel %vm1337_vm10, %v8727_v39, %v8728_v61  ;;  %vm15396_vm14 = vmmov %vm15394_vm12 }
 0xa67   : > { %v14352_v19 = vpop.permute.xlu1 %8735  ;;  %v14354_v8 = vpop.permute.xlu0 %8730  ;;  %5753 = vmatpush1.bf16.msra.mxu0 %v5199_v32  ;;  %5793 = vmatprep.subr.bf16.mxu1 %v5202_v6  ;;  %v5210_v23 = vpack.c.bf16 %v5163_v16, %v5163_v16  ;;  %v5209_v31 = vpack.c.bf16 %v5164_v46, %v5164_v46  ;;  %v5653_v5 = vsel %vm916_vm8, %v5207_v58, 0  ;;  %v6045_v51 = vpack.c.bf16 %v5873_v27, %v5849_v25  ;;  %vm15397_vm5 = vmmov %vm15394_vm12 }
 0xa68   : > { %v8738_v45 = vunpack.i.h.bf16 %v14352_v19  ;;  %v8737_v49 = vunpack.i.l.bf16 %v14352_v19  ;;  %v8733_v63 = vunpack.i.h.bf16 %v14354_v8  ;;  %v8732_v40 = vunpack.i.l.bf16 %v14354_v8  ;;  %6616 = vmatprep.subr.msk.bf16.mxu0 %vm916_vm8, %v5208_v11 }
 0xa69   : > { %v5659_v57 = vsel %vm916_vm8, %v5209_v31, 0  ;;  %vm15398_vm0 = vcmp.lt.s32.totalorder %v9620_v21, 28  ;;  %vm15399_vm1 = vcmp.lt.s32.totalorder %v9620_v21, 27 }
 0xa6a   : > { %v5874_v36 = vsel %vm1337_vm10, %v8737_v49, %v8727_v39  ;;  %v5850_v48 = vsel %vm1312_vm15, %v8732_v40, %v8722_v0  ;;  %5794 = vmatpush1.bf16.msra.mxu1 %v5201_v33  ;;  %v5872_v34 = vsel %vm1337_vm10, %v8728_v61, %v8738_v45  ;;  %v5848_v4 = vsel %vm1312_vm15, %v8723_v30, %v8733_v63  ;;  %vm15400_vm2 = vmmov %vm15399_vm1 }
 0xa6b   : > { %v14376_v13 = vpop.permute.xlu1 %8745  ;;  %v14378_v14 = vpop.permute.xlu0 %8740  ;;  %6618 = vmatprep.subr.msk.bf16.mxu1 %vm916_vm8, %v5210_v23  ;;  %v6044_v2 = vpack.c.bf16 %v5874_v36, %v5850_v48  ;;  %5755 = vmatpush1.bf16.msra.mxu0 %v5653_v5  ;;  %v6046_v32 = vpack.c.bf16 %v5872_v34, %v5848_v4  ;;  %vm15401_vm3 = vmmov %vm15398_vm0 }
 0xa6c   : > { %v8747_v42 = vunpack.i.l.bf16 %v14376_v13  ;;  %v8742_v29 = vunpack.i.l.bf16 %v14378_v14  ;;  %6113 = vmatprep.subr.bf16.mxu0 %v6045_v51  ;;  %vm15402_vm4 = vmmov %vm15399_vm1 }
 0xa6d   : > { %vm15403_vm6 = vmmov %vm15398_vm0 }
 0xa6e   : > { %5796 = vmatpush1.bf16.msra.mxu1 %v5659_v57  ;;  %v5847_v44 = vsel %vm1312_vm15, %v8733_v63, %v8742_v29  ;;  %v5871_v1 = vsel %vm1337_vm10, %v8738_v45, %v8747_v42  ;;  %6617 = vmatmul.mubr.msk.bf16.vlgmr.msra.gmra.mrb[36].mxu0 %vm912_vm9, %v14215_v20  ;;  %vm15404_vm11 = vmmov %vm15399_vm1 }
 0xa6f   : > { %v8756_v22 = vpop.permute.xlu1 %8755  ;;  %v8751_v35 = vpop.permute.xlu0 %8750  ;;  %v6047_v38 = vpack.c.bf16 %v5871_v1, %v5847_v44  ;;  %6114 = vmatpush1.bf16.msra.mxu0 %v6044_v2  ;;  %6145 = vmatprep.mubr.bf16.mxu0 %v14984_v62 }
 0xa70   : > { %v8758_v53 = vunpack.i.h.bf16 %v8756_v22  ;;  %v8757_v10 = vunpack.i.l.bf16 %v8756_v22  ;;  %v8753_v12 = vunpack.i.h.bf16 %v8751_v35  ;;  %v8752_v55 = vunpack.i.l.bf16 %v8751_v35 }
 0xa71   : > { %6154 = vmatprep.subr.bf16.mxu1 %v6047_v38  ;;  %6619 = vmatmul.mubr.msk.bf16.vlgmr.msra.gmra.mrb[36].mxu1 %vm912_vm9, %v14215_v20 }
 0xa72   : > { %6155 = vmatpush1.bf16.msra.mxu1 %v6046_v32  ;;  %v5897_v3 = vsel %vm1362_vm7, %v8752_v55, %v8753_v12  ;;  %v5921_v54 = vsel %vm15394_vm12, %v8757_v10, %v8758_v53  ;;  %6186 = vmatprep.mubr.bf16.mxu1 %v14984_v62  ;;  %vm15405_vm12 = vmmov %vm15398_vm0 }
 0xa73   : > { %v14404_v61 = vpop.permute.xlu1 %8765  ;;  %v14406_v39 = vpop.permute.xlu0 %8760  ;;  %v6053_v30 = vpack.c.bf16 %v5921_v54, %v5897_v3 }
 0xa74   : > { %v8768_v0 = vunpack.i.h.bf16 %v14404_v61  ;;  %v8767_v60 = vunpack.i.l.bf16 %v14404_v61  ;;  %v8763_v20 = vunpack.i.h.bf16 %v14406_v39  ;;  %v8762_v43 = vunpack.i.l.bf16 %v14406_v39 }
 0xa75   : > { %6115 = vmatprep.subr.bf16.mxu0 %v6053_v30 }
 0xa76   : > { %v5922_v24 = vsel %vm15395_vm13, %v8767_v60, %v8757_v10  ;;  %v5898_v59 = vsel %vm1362_vm7, %v8762_v43, %v8752_v55  ;;  %v5920_v7 = vsel %vm15396_vm14, %v8758_v53, %v8768_v0  ;;  %v5896_v16 = vsel %vm1362_vm7, %v8753_v12, %v8763_v20 }
 0xa77   : > { %v6052_v41 = vpack.c.bf16 %v5922_v24, %v5898_v59  ;;  %v14420_v58 = vpop.permute.xlu1 %8775  ;;  %v14422_v37 = vpop.permute.xlu0 %8770  ;;  %v6054_v25 = vpack.c.bf16 %v5920_v7, %v5896_v16  ;;  %vm15406_vm13 = vcmp.lt.s32.totalorder %v9620_v21, 19  ;;  %vm15407_vm14 = vcmp.lt.s32.totalorder %v9620_v21, 18 }
 0xa78   : > { %v8777_v6 = vunpack.i.l.bf16 %v14420_v58  ;;  %v8772_v46 = vunpack.i.l.bf16 %v14422_v37 }
 0xa79   : > { %6116 = vmatpush1.bf16.msra.mxu0 %v6052_v41 }
 0xa7a   : > { %v5895_v11 = vsel %vm1362_vm7, %v8763_v20, %v8772_v46  ;;  %v5919_v33 = vsel %vm15397_vm5, %v8768_v0, %v8777_v6  ;;  %vm15408_vm5 = vmmov %vm15407_vm14 }
 0xa7b   : > { %v8786_v27 = vpop.permute.xlu1 %8785  ;;  %v8781_v45 = vpop.permute.xlu0 %8780  ;;  %v6055_v63 = vpack.c.bf16 %v5919_v33, %v5895_v11 }
 0xa7c   : > { %v8788_v23 = vunpack.i.h.bf16 %v8786_v27  ;;  %v8787_v31 = vunpack.i.l.bf16 %v8786_v27  ;;  %v8783_v36 = vunpack.i.h.bf16 %v8781_v45  ;;  %v8782_v48 = vunpack.i.l.bf16 %v8781_v45 }
 0xa7d   : > { %6156 = vmatprep.subr.bf16.mxu1 %v6055_v63 }
 0xa7e   : > { %6157 = vmatpush1.bf16.msra.mxu1 %v6054_v25  ;;  %v5945_v34 = vsel %vm15398_vm0, %v8782_v48, %v8783_v36  ;;  %v5969_v5 = vsel %vm15399_vm1, %v8787_v31, %v8788_v23  ;;  %vm15409_vm0 = vmmov %vm15406_vm13 }
 0xa7f   : > { %v14442_v51 = vpop.permute.xlu1 %8795  ;;  %v14444_v4 = vpop.permute.xlu0 %8790  ;;  %v6061_v2 = vpack.c.bf16 %v5969_v5, %v5945_v34  ;;  %vm15410_vm1 = vmmov %vm15408_vm5 }
 0xa80   : > { %v8798_v57 = vunpack.i.h.bf16 %v14442_v51  ;;  %v8797_v44 = vunpack.i.l.bf16 %v14442_v51  ;;  %v8793_v1 = vunpack.i.h.bf16 %v14444_v4  ;;  %v8792_v32 = vunpack.i.l.bf16 %v14444_v4 }
 0xa81   : > { %6117 = vmatprep.subr.bf16.mxu0 %v6061_v2 }
 0xa82   : > { %v5970_v22 = vsel %vm15400_vm2, %v8797_v44, %v8787_v31  ;;  %v5946_v35 = vsel %vm15401_vm3, %v8792_v32, %v8782_v48  ;;  %v5968_v12 = vsel %vm15402_vm4, %v8788_v23, %v8798_v57  ;;  %v5944_v55 = vsel %vm15403_vm6, %v8783_v36, %v8793_v1  ;;  %vm15411_vm2 = vmmov %vm15409_vm0 }
 0xa83   : > { %v6060_v38 = vpack.c.bf16 %v5970_v22, %v5946_v35  ;;  %v14458_v53 = vpop.permute.xlu1 %5956  ;;  %v14460_v10 = vpop.permute.xlu0 %8800  ;;  %v6062_v0 = vpack.c.bf16 %v5968_v12, %v5944_v55  ;;  %vm15412_vm3 = vmmov %vm15410_vm1  ;;  %vm15414_vm6 = vcmp.lt.s32.totalorder %v9620_v21, 17 }
 0xa84   : > { %v8802_v3 = vunpack.i.l.bf16 %v14460_v10  ;;  %v5967_v54 = vsel %vm15404_vm11, %v8798_v57, %v14458_v53  ;;  %vm15413_vm4 = vmmov %vm15409_vm0 }
 0xa85   : > { %6118 = vmatpush1.bf16.msra.mxu0 %v6060_v38  ;;  %vm15415_vm11 = vmmov %vm15414_vm6 }
 0xa86   : > { %v5943_v30 = vsel %vm15405_vm12, %v8793_v1, %v8802_v3  ;;  %vm15416_vm12 = vmmov %vm15414_vm6 }
 0xa87   : > { %v8811_v20 = vpop.permute.xlu1 %8810  ;;  %v8806_v24 = vpop.permute.xlu0 %8805  ;;  %v6063_v59 = vpack.c.bf16 %v5967_v54, %v5943_v30  ;;  %v8748_v30 = vunpack.i.h.bf16 %v14376_v13 }
 0xa88   : > { %v8813_v41 = vunpack.i.h.bf16 %v8811_v20  ;;  %v8812_v7 = vunpack.i.l.bf16 %v8811_v20  ;;  %v8808_v16 = vunpack.i.h.bf16 %v8806_v24  ;;  %v8807_v11 = vunpack.i.l.bf16 %v8806_v24 }
 0xa89   : > { %6158 = vmatprep.subr.bf16.mxu1 %v6063_v59  ;;  %v8743_v20 = vunpack.i.h.bf16 %v14378_v14 }
 0xa8a   : > { %6159 = vmatpush1.bf16.msra.mxu1 %v6062_v0  ;;  %v5993_v33 = vsel %vm15406_vm13, %v8807_v11, %v8808_v16  ;;  %v6017_v25 = vsel %vm15407_vm14, %v8812_v7, %v8813_v41  ;;  %vm15417_vm13 = vmmov %vm15414_vm6  ;;  %vm15418_vm14 = vcmp.lt.s32.totalorder %v9620_v21, 29 }
 0xa8b   : > { %v14478_v27 = vpop.permute.xlu1 %8820  ;;  %v6069_v63 = vpack.c.bf16 %v6017_v25, %v5993_v33 }
 0xa8c   : > { %v14480_v45 = vpop.permute.xlu0 %8815  ;;  %v8823_v23 = vunpack.i.h.bf16 %v14478_v27  ;;  %v8822_v31 = vunpack.i.l.bf16 %v14478_v27 }
 0xa8d   : > { %v8818_v36 = vunpack.i.h.bf16 %v14480_v45  ;;  %v8817_v48 = vunpack.i.l.bf16 %v14480_v45  ;;  %6119 = vmatprep.subr.bf16.mxu0 %v6069_v63 }
 0xa8e   : > { %v6018_v34 = vsel %vm15408_vm5, %v8822_v31, %v8812_v7  ;;  %v6016_v2 = vsel %vm15410_vm1, %v8813_v41, %v8823_v23  ;;  %vm15423_vm1 = vcmp.lt.s32.totalorder %v9620_v21, 28 }
 0xa8f   : > { %v5994_v5 = vsel %vm15409_vm0, %v8817_v48, %v8807_v11  ;;  %v5992_v57 = vsel %vm15411_vm2, %v8808_v16, %v8818_v36  ;;  %v14498_v22 = vpop.permute.xlu1 %6004  ;;  %v5870_v11 = vsel %vm1337_vm10, %v8747_v42, %v8748_v30  ;;  %vm15422_vm0 = vcmp.lt.s32.totalorder %v9620_v21, 27  ;;  %vm15424_vm2 = vmmov %vm15423_vm1 }
 0xa90   : > { %v6068_v1 = vpack.c.bf16 %v6018_v34, %v5994_v5  ;;  %v14500_v35 = vpop.permute.xlu0 %5980  ;;  %v6015_v38 = vsel %vm15412_vm3, %v8823_v23, %v14498_v22  ;;  %v6070_v54 = vpack.c.bf16 %v6016_v2, %v5992_v57  ;;  %v5846_v23 = vsel %vm1312_vm15, %v8742_v29, %v8743_v20  ;;  %v14534_v29 = vld [vmem:[#allocation10 + $0x8] sm:$0xf]  ;;  %vm15425_vm3 = vmmov %vm15423_vm1 }
 0xa91   : > { %v5991_v12 = vsel %vm15413_vm4, %v8818_v36, %v14500_v35  ;;  %vm15426_vm4 = vmmov %vm15422_vm0 }
 0xa92   : > { %v6071_v55 = vpack.c.bf16 %v6015_v38, %v5991_v12  ;;  %6120 = vmatpush1.bf16.msra.mxu0 %v6068_v1 }
 0xa93   : > { %v8831_v0 = vpop.permute.xlu1 %8830 }
 0xa94   : > { %6160 = vmatprep.subr.bf16.mxu1 %v6071_v55  ;;  %v8832_v24 = vunpack.i.l.bf16 %v8831_v0  ;;  %v14510_v59 = vpop.permute.xlu0 %8825  ;;  %v8833_v41 = vunpack.i.h.bf16 %v8831_v0 }
 0xa95   : > { %6161 = vmatpush1.bf16.msra.mxu1 %v6070_v54  ;;  %v8828_v7 = vunpack.i.h.bf16 %v14510_v59  ;;  %v8827_v16 = vunpack.i.l.bf16 %v14510_v59  ;;  %v6048_v54 = vpack.c.bf16 %v5870_v11, %v5846_v23  ;;  %v8773_v11 = vunpack.i.h.bf16 %v14422_v37 }
 0xa96   : > { %v6040_v1 = vsel %vm15416_vm12, %v8832_v24, %v8833_v41  ;;  %vm15430_vm12 = vcmp.lt.s32.totalorder %v9620_v21, 18 }
 0xa97   : > { %v6041_v33 = vsel %vm15414_vm6, %v8828_v7, %v8832_v24  ;;  %v8841_v25 = vpop.permute.xlu1 %8840  ;;  %v6042_v63 = vsel %vm15415_vm11, %v8827_v16, %v8828_v7  ;;  %v8778_v24 = vunpack.i.h.bf16 %v14420_v58  ;;  %vm15428_vm6 = vmmov %vm15422_vm0 }
 0xa98   : > { %v6077_v36 = vpack.c.bf16 %v6041_v33, %v6041_v33  ;;  %v8842_v34 = vunpack.i.l.bf16 %v8841_v25  ;;  %v8836_v13 = vpop.permute.xlu0 %8835  ;;  %v6076_v5 = vpack.c.bf16 %v6042_v63, %v6042_v63  ;;  %v8843_v2 = vunpack.i.h.bf16 %v8841_v25  ;;  %vm15429_vm11 = vmmov %vm15423_vm1 }
 0xa99   : > { %v8838_v42 = vunpack.i.h.bf16 %v8836_v13  ;;  %v8837_v57 = vunpack.i.l.bf16 %v8836_v13  ;;  %v6078_v33 = vpack.c.bf16 %v6040_v1, %v6040_v1 }
 0xa9a   : > { %6620 = vmatprep.subr.msk.bf16.mxu0 %vm916_vm8, %v6077_v36  ;;  %v6090_v38 = vsel %vm916_vm8, %v6076_v5, 0  ;;  %v5869_v14 = vsel %vm1337_vm10, %v8748_v30, %v8842_v34  ;;  %v8803_v5 = vunpack.i.h.bf16 %v14460_v10 }
 0xa9b   : > { %6122 = vmatpush1.bf16.msra.mxu0 %v6090_v38  ;;  %v8846_v12 = vpop.permute.xlu1 %8845  ;;  %v5845_v55 = vsel %vm1312_vm15, %v8743_v20, %v8837_v57  ;;  %v5851_v30 = vsel %vm1312_vm15, %v8838_v42, %v8732_v40  ;;  %v5875_v20 = vsel %vm1337_vm10, %v8843_v2, %v8737_v49  ;;  %v5844_v8 = vsel %vm1312_vm15, %v8837_v57, %v8838_v42 }
 0xa9c   : > { %v14538_v0 = vpop.permute.xlu0 %6028  ;;  %v6049_v7 = vpack.c.bf16 %v5869_v14, %v5845_v55  ;;  %v8848_v23 = vunpack.i.h.bf16 %v8846_v12  ;;  %v8847_v40 = vunpack.i.l.bf16 %v8846_v12  ;;  %v6096_v36 = vsel %vm916_vm8, %v6078_v33, 0 }
 0xa9d   : > { %v6039_v25 = vsel %vm15417_vm13, %v8833_v41, %v14538_v0  ;;  %v5868_v41 = vsel %vm1337_vm10, %v8842_v34, %v8843_v2  ;;  %v6051_v13 = vpack.c.bf16 %v5875_v20, %v5851_v30  ;;  %v5918_v34 = vsel %vm15418_vm14, %v8777_v6, %v8778_v24  ;;  %vm15419_vm10 = vmmov %vm15418_vm14 }
 0xa9e   : > { %v6079_v63 = vpack.c.bf16 %v6039_v25, %v6039_v25  ;;  %6621 = vmatmul.mubr.msk.bf16.vlgmr.msra.gmra.mrb[32].mxu0 %vm912_vm9, %v14534_v29  ;;  %6195 = vmatprep.subr.bf16.mxu0 %v6049_v7  ;;  %v5894_v57 = vsel %vm1362_vm7, %v8772_v46, %v8773_v11  ;;  %v6050_v1 = vpack.c.bf16 %v5868_v41, %v5844_v8  ;;  %vm15420_vm15 = vmmov %vm15419_vm10  ;;  %vm15432_vm14 = vcmp.lt.s32.totalorder %v9620_v21, 19 }
 0xa9f   : > { %6196 = vmatpush1.bf16.msra.mxu0 %v6048_v54  ;;  %v8856_v19 = vpop.permute.xlu1 %8855  ;;  %6227 = vmatprep.mubr.bf16.mxu0 %v14984_v62  ;;  %v5893_v58 = vsel %vm1362_vm7, %v8773_v11, %v8847_v40  ;;  %v5899_v55 = vsel %vm1362_vm7, %v8848_v23, %v8762_v43  ;;  %vm15421_vm5 = vmmov %vm15419_vm10  ;;  %v6056_v43 = vpack.c.bf16 %v5918_v34, %v5894_v57 }
 0xaa0   : > { %v8851_v49 = vpop.permute.xlu0 %8850  ;;  %6622 = vmatprep.subr.msk.bf16.mxu1 %vm916_vm8, %v6079_v63  ;;  %v8858_v38 = vunpack.i.h.bf16 %v8856_v19  ;;  %v8857_v14 = vunpack.i.l.bf16 %v8856_v19  ;;  %v5942_v61 = vsel %vm15423_vm1, %v8802_v3, %v8803_v5  ;;  %v5892_v51 = vsel %vm1362_vm7, %v8847_v40, %v8848_v23  ;;  %vm15427_vm7 = vmmov %vm15422_vm0 }
 0xaa1   : > { %v8853_v2 = vunpack.i.h.bf16 %v8851_v49  ;;  %v8852_v42 = vunpack.i.l.bf16 %v8851_v49  ;;  %6163 = vmatpush1.bf16.msra.mxu1 %v6096_v36  ;;  %vm15431_vm13 = vmmov %vm15430_vm12 }
 0xaa2   : > { %6236 = vmatprep.subr.bf16.mxu1 %v6051_v13  ;;  %v5941_v10 = vsel %vm15425_vm3, %v8803_v5, %v8857_v14  ;;  %v5940_v19 = vsel %vm15429_vm11, %v8857_v14, %v8858_v38 }
 0xaa3   : > { %v5963_v12 = vpop.permute.xlu1 %5962  ;;  %v5917_v6 = vsel %vm15419_vm10, %v8778_v24, %v8852_v42  ;;  %v5923_v37 = vsel %vm15420_vm15, %v8853_v2, %v8767_v60  ;;  %v5916_v46 = vsel %vm15421_vm5, %v8852_v42, %v8853_v2  ;;  %vm15433_vm10 = vmmov %vm15432_vm14 }
 0xaa4   : > { %v5971_v54 = vsel %vm15422_vm0, %v5963_v12, %v8797_v44  ;;  %v8861_v7 = vpop.permute.xlu0 %8860  ;;  %6623 = vmatmul.mubr.msk.bf16.vlgmr.msra.gmra.mrb[32].mxu1 %vm912_vm9, %v14534_v29  ;;  %v6057_v39 = vpack.c.bf16 %v5917_v6, %v5893_v58  ;;  %v6059_v33 = vpack.c.bf16 %v5923_v37, %v5899_v55  ;;  %v5947_v44 = vsel %vm15424_vm2, %v8858_v38, %v8792_v32  ;;  %vm15434_vm15 = vmmov %vm15430_vm12 }
 0xaa5   : > { %v8863_v60 = vunpack.i.h.bf16 %v8861_v7  ;;  %v8862_v24 = vunpack.i.l.bf16 %v8861_v7  ;;  %6237 = vmatpush1.bf16.msra.mxu1 %v6050_v1  ;;  %6268 = vmatprep.mubr.bf16.mxu1 %v14984_v62  ;;  %v6058_v25 = vpack.c.bf16 %v5916_v46, %v5892_v51  ;;  %v6067_v3 = vpack.c.bf16 %v5971_v54, %v5947_v44  ;;  %vm15435_vm5 = vmmov %vm15430_vm12 }
 0xaa6   : > { %6197 = vmatprep.subr.bf16.mxu0 %v6057_v39  ;;  %6238 = vmatprep.subr.bf16.mxu1 %v6059_v33  ;;  %vm15436_vm0 = vmmov %vm15433_vm10  ;;  %vm15438_vm2 = vcmp.lt.s32.totalorder %v9620_v21, 17 }
 0xaa7   : > { %v5966_v30 = vsel %vm15426_vm4, %v14458_v53, %v8862_v24  ;;  %6198 = vmatpush1.bf16.msra.mxu0 %v6056_v43  ;;  %v8871_v62 = vpop.permute.xlu1 %8870  ;;  %v5965_v20 = vsel %vm15427_vm7, %v8862_v24, %v8863_v60  ;;  %v5964_v4 = vsel %vm15428_vm6, %v8863_v60, %v5963_v12  ;;  %vm15437_vm1 = vmmov %vm15436_vm0 }
 0xaa8   : > { %v6064_v32 = vpack.c.bf16 %v5966_v30, %v5942_v61  ;;  %v8873_v11 = vunpack.i.h.bf16 %v8871_v62  ;;  %v8872_v63 = vunpack.i.l.bf16 %v8871_v62  ;;  %v8866_v41 = vpop.permute.xlu0 %8865  ;;  %v6065_v40 = vpack.c.bf16 %v5965_v20, %v5941_v10  ;;  %vm15439_vm3 = vmmov %vm15438_vm2 }
 0xaa9   : > { %v8868_v8 = vunpack.i.h.bf16 %v8866_v41  ;;  %v8867_v23 = vunpack.i.l.bf16 %v8866_v41  ;;  %6239 = vmatpush1.bf16.msra.mxu1 %v6058_v25  ;;  %v6066_v36 = vpack.c.bf16 %v5964_v4, %v5940_v19  ;;  %vm15440_vm4 = vmmov %vm15438_vm2 }
 0xaaa   : > { %v6014_v53 = vsel %vm15430_vm12, %v14498_v22, %v8872_v63  ;;  %6240 = vmatprep.subr.bf16.mxu1 %v6067_v3  ;;  %v6013_v49 = vsel %vm15431_vm13, %v8872_v63, %v8873_v11  ;;  %6199 = vmatprep.subr.bf16.mxu0 %v6065_v40  ;;  %vm15441_vm7 = vmmov %vm15438_vm2 }
 0xaab   : > { %v5990_v13 = vsel %vm15432_vm14, %v14500_v35, %v8867_v23  ;;  %v6011_v34 = vpop.permute.xlu1 %6010  ;;  %v5989_v5 = vsel %vm15433_vm10, %v8867_v23, %v8868_v8  ;;  %6200 = vmatpush1.bf16.msra.mxu0 %v6064_v32 }
 0xaac   : > { %v6072_v2 = vpack.c.bf16 %v6014_v53, %v5990_v13  ;;  %v6012_v42 = vsel %vm15434_vm15, %v8873_v11, %v6011_v34  ;;  %v6019_v22 = vsel %vm15435_vm5, %v6011_v34, %v8822_v31  ;;  %v5987_v57 = vpop.permute.xlu0 %5986  ;;  %v6073_v1 = vpack.c.bf16 %v6013_v49, %v5989_v5 }
 0xaad   : > { %v5988_v35 = vsel %vm15436_vm0, %v8868_v8, %v5987_v57  ;;  %v5995_v38 = vsel %vm15437_vm1, %v5987_v57, %v8817_v48  ;;  %6241 = vmatpush1.bf16.msra.mxu1 %v6066_v36 }
 0xaae   : > { %v6074_v14 = vpack.c.bf16 %v6012_v42, %v5988_v35  ;;  %v6075_v12 = vpack.c.bf16 %v6019_v22, %v5995_v38  ;;  %6201 = vmatprep.subr.bf16.mxu0 %v6073_v1 }
 0xaaf   : > { %v6035_v58 = vpop.permute.xlu1 %6034  ;;  %6202 = vmatpush1.bf16.msra.mxu0 %v6072_v2 }
 0xab0   : > { %v6043_v27 = vsel %vm15438_vm2, %v6035_v58, %v8827_v16  ;;  %v8876_v31 = vpop.permute.xlu0 %8875  ;;  %6242 = vmatprep.subr.bf16.mxu1 %v6075_v12 }
 0xab1   : > { %v6083_v6 = vpack.c.bf16 %v6043_v27, %v6043_v27  ;;  %v8878_v55 = vunpack.i.h.bf16 %v8876_v31  ;;  %v8877_v37 = vunpack.i.l.bf16 %v8876_v31  ;;  %6243 = vmatpush1.bf16.msra.mxu1 %v6074_v14 }
 0xab3   : > { %v6037_v45 = vsel %vm15439_vm3, %v8877_v37, %v8878_v55  ;;  %6626 = vmatprep.subr.msk.bf16.mxu1 %vm916_vm8, %v6083_v6  ;;  %v6038_v48 = vsel %vm15440_vm4, %v14538_v0, %v8877_v37  ;;  %v6036_v59 = vsel %vm15441_vm7, %v8878_v55, %v6035_v58 }
 0xab4   : > { %v6081_v46 = vpack.c.bf16 %v6037_v45, %v6037_v45  ;;  %v6080_v16 = vpack.c.bf16 %v6038_v48, %v6038_v48  ;;  %v6082_v54 = vpack.c.bf16 %v6036_v59, %v6036_v59 }
 0xab6   : > { %6624 = vmatprep.subr.msk.bf16.mxu0 %vm916_vm8, %v6081_v46  ;;  %v6102_v7 = vsel %vm916_vm8, %v6080_v16, 0  ;;  %v6108_v39 = vsel %vm916_vm8, %v6082_v54, 0 }
 0xab7   : > { %6204 = vmatpush1.bf16.msra.mxu0 %v6102_v7  ;;  %6245 = vmatpush1.bf16.msra.mxu1 %v6108_v39 }
 0xaba   : > { %6625 = vmatmul.mubr.msk.bf16.vlgmr.msra.gmra.mrb[36].mxu0 %vm912_vm9, %v14534_v29  ;;  %6627 = vmatmul.mubr.msk.bf16.vlgmr.msra.gmra.mrb[36].mxu1 %vm912_vm9, %v14534_v29 }
 0xb71   : > { %v14654_v0 = vpop.f32.mrb[32].mxu0 }
 0xb72   : > { %v6285_v21 = vmul.f32 %v14654_v0, %v10727_v17  ;;  %v14658_v33 = vpop.f32.mrb[33].mxu0 }
 0xb73   : > { %v6286_v43 = vmul.f32 %v14658_v33, %v10729_v9  ;;  %v6151_v61 = vpop.f32.mrb[34].mxu0 }
 0xb74   : > { %v6303_v60 = vmul.f32 %v6285_v21, %v14654_v0  ;;  %v6152_v24 = vpop.f32.mrb[35].mxu0 }
 0xb75   : > { %v6293_v51 = vadd.f32 %v6286_v43, %v6285_v21  ;;  %v6304_v44 = vmul.f32 %v6286_v43, %v14658_v33 }
 0xb77   : > { %v6311_v10 = vadd.f32 %v6304_v44, %v6303_v60  ;;  %v6188_v25 = vpop.f32.mrb[32].mxu1 }
 0xb78   : > { %v6287_v29 = vmul.f32 %v6188_v25, %v10740_v15  ;;  %v6190_v3 = vpop.f32.mrb[33].mxu1 }
 0xb79   : > { %v6288_v30 = vmul.f32 %v6190_v3, %v10743_v50  ;;  %v6192_v17 = vpop.f32.mrb[34].mxu1 }
 0xb7a   : > { %v6294_v62 = vadd.f32 %v6293_v51, %v6287_v29  ;;  %v6305_v20 = vmul.f32 %v6287_v29, %v6188_v25  ;;  %v6193_v4 = vpop.f32.mrb[35].mxu1 }
 0xb7b   : > { %v6306_v32 = vmul.f32 %v6288_v30, %v6190_v3  ;;  %v15445_v4 = vld [vmem:[#allocation28_spill] sm:$0xff] }
 0xb7c   : > { %v6312_v9 = vadd.f32 %v6311_v10, %v6305_v20  ;;  %v6295_v11 = vadd.f32 %v6294_v62, %v6288_v30  ;;  %v15444_v62 = vld [vmem:[#allocation26_spill] sm:$0xff] }
 0xb7e   : > { %v6313_v63 = vadd.f32 %v6312_v9, %v6306_v32  ;;  %v15446_v9 = vld [vmem:[#allocation29_spill] sm:$0xff] }
 0xb8d   : > { %v6229_v41 = vpop.f32.mrb[36].mxu0  ;;  %v6270_v8 = vpop.f32.mrb[36].mxu1 }
 0xb8e   : > { %v6289_v23 = vmul.f32 %v6229_v41, %v10755_v56  ;;  %v6231_v40 = vpop.f32.mrb[37].mxu0  ;;  %v6272_v19 = vpop.f32.mrb[37].mxu1  ;;  %v6291_v13 = vmul.f32 %v6270_v8, %v10759_v52 }
 0xb8f   : > { %v6290_v53 = vmul.f32 %v6231_v40, %v10757_v26  ;;  %v6233_v15 = vpop.f32.mrb[38].mxu0  ;;  %v6274_v49 = vpop.f32.mrb[38].mxu1  ;;  %v6292_v57 = vmul.f32 %v6272_v19, %v10766_v28 }
 0xb90   : > { %v6296_v36 = vadd.f32 %v6295_v11, %v6289_v23  ;;  %v6307_v50 = vmul.f32 %v6289_v23, %v6229_v41  ;;  %v6234_v34 = vpop.f32.mrb[39].mxu0  ;;  %v6275_v5 = vpop.f32.mrb[39].mxu1  ;;  %v6309_v1 = vmul.f32 %v6291_v13, %v6270_v8 }
 0xb91   : > { %v6308_v2 = vmul.f32 %v6290_v53, %v6231_v40  ;;  %v6310_v38 = vmul.f32 %v6292_v57, %v6272_v19 }
 0xb92   : > { %v6314_v42 = vadd.f32 %v6313_v63, %v6307_v50  ;;  %v6297_v22 = vadd.f32 %v6296_v36, %v6290_v53  ;;  %v15447_v63 = vld [vmem:[#allocation27_spill] sm:$0xff] }
 0xb94   : > { %v6315_v35 = vadd.f32 %v6314_v42, %v6308_v2  ;;  %v6298_v56 = vadd.f32 %v6297_v22, %v6291_v13 }
 0xb96   : > { %v6299_v14 = vadd.f32 %v6298_v56, %v6292_v57  ;;  %v6316_v12 = vadd.f32 %v6315_v35, %v6309_v1 }
 0xb98   : > { %6300 = vadd.xlane.f32.xlu0 %v6299_v14  ;;  %v6317_v26 = vadd.f32 %v6316_v12, %v6310_v38 }
 0xb9a   : > { %6318 = vadd.xlane.f32.xlu1 %v6317_v26 }
 0xc25   : > { %v6301_v58 = vpop.xlane.xlu0 %6300 }
 0xc26   : > { %v6302_v27 = vmul.f32 0.001953125, %v6301_v58 }
 0xc27   : > { %v6319_v31 = vpop.xlane.xlu1 %6318 }
 0xc28   : > { %v6320_v52 = vmul.f32 0.001953125, %v6319_v31  ;;  %v6321_v6 = vmul.f32 %v6302_v27, %v6302_v27  ;;  %v6324_v28 = vsub.f32 %v14654_v0, %v6302_v27  ;;  %v6325_v48 = vsub.f32 %v14658_v33, %v6302_v27  ;;  %v15442_v33 = vld [vmem:[#allocation24_spill] sm:$0xff] }
 0xc29   : > { %v6326_v59 = vsub.f32 %v6188_v25, %v6302_v27  ;;  %v6327_v46 = vsub.f32 %v6190_v3, %v6302_v27  ;;  %v6328_v54 = vsub.f32 %v6229_v41, %v6302_v27  ;;  %v6329_v7 = vsub.f32 %v6231_v40, %v6302_v27  ;;  %v15443_v3 = vld [vmem:[#allocation25_spill] sm:$0xff] }
 0xc2a   : > { %v6322_v55 = vsub.f32 %v6320_v52, %v6321_v6  ;;  %v6330_v39 = vsub.f32 %v6270_v8, %v6302_v27  ;;  %v6331_v21 = vsub.f32 %v6272_v19, %v6302_v27 }
 0xc2c   : > { %v6323_v37 = vmax.f32 %v6322_v55, 0.0 }
 0xc2e   : > { %v6332_v45 = vadd.f32 1e-05, %v6323_v37 }
 0xc30   : > { %8887 = vrsqrt.f32 %v6332_v45 }
 0xc3a   : > { %v8888_v16 = vpop.eup %8887 }
 0xc3b   : > { %v6334_v43 = vmul.f32 %v8888_v16, %v6324_v28  ;;  %v6335_v61 = vmul.f32 %v8888_v16, %v6325_v48  ;;  %v6336_v60 = vmul.f32 %v8888_v16, %v6326_v59  ;;  %v6337_v24 = vmul.f32 %v8888_v16, %v6327_v46 }
 0xc3c   : > { %v6338_v51 = vmul.f32 %v8888_v16, %v6328_v54  ;;  %v6339_v44 = vmul.f32 %v8888_v16, %v6329_v7  ;;  %v6340_v10 = vmul.f32 %v8888_v16, %v6330_v39  ;;  %v6341_v29 = vmul.f32 %v8888_v16, %v6331_v21 }
 0xc3d   : > { %v6342_v30 = vadd.f32 %v6334_v43, %v12146_v47  ;;  %v6343_v0 = vadd.f32 %v6335_v61, %v12149_v18  ;;  %v6344_v25 = vadd.f32 %v6336_v60, %v15442_v33  ;;  %v6345_v17 = vadd.f32 %v6337_v24, %v15443_v3 }
 0xc3e   : > { %v6346_v20 = vadd.f32 %v6338_v51, %v15444_v62  ;;  %v6347_v32 = vadd.f32 %v6339_v44, %v15445_v4  ;;  %v6348_v11 = vadd.f32 %v6340_v10, %v15446_v9  ;;  %v6349_v41 = vadd.f32 %v6341_v29, %v15447_v63 }
 0xc3f   : > { %vm6350_vm8 = vcmp.ge.f32.partialorder %v6342_v30, 0.0  ;;  %vm6351_vm9 = vcmp.ge.f32.partialorder %v6343_v0, 0.0  ;;  %vm6352_vm6 = vcmp.ge.f32.partialorder %v6344_v25, 0.0  ;;  %vm6353_vm11 = vcmp.ge.f32.partialorder %v6345_v17, 0.0 }
 0xc40   : > { %vm6354_vm12 = vcmp.ge.f32.partialorder %v6346_v20, 0.0  ;;  %vm6355_vm13 = vcmp.ge.f32.partialorder %v6347_v32, 0.0  ;;  %vm6356_vm14 = vcmp.ge.f32.partialorder %v6348_v11, 0.0  ;;  %vm6357_vm10 = vcmp.ge.f32.partialorder %v6349_v41, 0.0 }
 0xc41   : > { %v6358_v47 = vmul.f32 0.01, %v6342_v30  ;;  %v6359_v18 = vmul.f32 0.01, %v6343_v0  ;;  %v6360_v8 = vmul.f32 0.01, %v6344_v25 }
 0xc42   : > { %v6361_v23 = vmul.f32 0.01, %v6345_v17  ;;  %v6362_v40 = vmul.f32 0.01, %v6346_v20  ;;  %v6363_v19 = vmul.f32 0.01, %v6347_v32 }
 0xc43   : > { %v6364_v53 = vmul.f32 0.01, %v6348_v11  ;;  %v6365_v15 = vmul.f32 0.01, %v6349_v41  ;;  %v6366_v49 = vsel %vm6350_vm8, %v6342_v30, %v6358_v47  ;;  %v6367_v36 = vsel %vm6351_vm9, %v6343_v0, %v6359_v18 }
 0xc44   : > { %v6368_v50 = vsel %vm6352_vm6, %v6344_v25, %v6360_v8  ;;  %v6369_v13 = vsel %vm6353_vm11, %v6345_v17, %v6361_v23  ;;  %v6370_v34 = vsel %vm6354_vm12, %v6346_v20, %v6362_v40  ;;  %v6371_v5 = vsel %vm6355_vm13, %v6347_v32, %v6363_v19  ;;  %6374 = vst [vmem:[%s350_s2] sm:$0xff] %v6366_v49 }
 0xc45   : > { %6375 = vst [vmem:[%s350_s2 + $0x8] sm:$0xff] %v6367_v36  ;;  %v6372_v2 = vsel %vm6356_vm14, %v6348_v11, %v6364_v53  ;;  %v6373_v42 = vsel %vm6357_vm10, %v6349_v41, %v6365_v15  ;;  %6376 = vst [vmem:[%s350_s2 + $0x10] sm:$0xff] %v6368_v50 }
 0xc46   : > { %6377 = vst [vmem:[%s350_s2 + $0x18] sm:$0xff] %v6369_v13  ;;  %6378 = vst [vmem:[%s350_s2 + $0x20] sm:$0xff] %v6370_v34 }
 0xc47   : > { %6379 = vst [vmem:[%s350_s2 + $0x28] sm:$0xff] %v6371_v5  ;;  %6380 = vst [vmem:[%s350_s2 + $0x30] sm:$0xff] %v6372_v2 }
 0xc48   : > { %6381 = vst [vmem:[%s350_s2 + $0x38] sm:$0xff] %v6373_v42 }
 0xc49   : > { %9056 = shalt.err (!%p9053_p0)
}
 0xc4a   : > { %s9057_s22 = scalar_lea.hbm %s14692_s26, 1024  ;;  %s9061_s13 = scalar_lea.hbm %s15451_s30, 2048 }
 0xc4b   : > { %p9058_p2 = scmp.ne.s32.totalorder %s14692_s26, %s9057_s22  ;;  %p9062_p10 = scmp.lt.u32.totalorder %s14692_s26, %s15451_s30 }
 0xc4c   : > { %p9063_p11 = scmp.lt.u32.totalorder %s9061_s13, %s9057_s22  ;;  %p9065_p6 = scmp.lt.u32.totalorder %s9057_s22, %s14692_s26 }
 0xc4d   : > { %p9059_p8 = pnand %p9058_p2, %p15452_p5 }
 0xc4e   : > { %p9064_p1 = por %p9063_p11, %p9062_p10 }
 0xc4f   : > { %p9060_p4 = pneg %p9059_p8 }
 0xc50   : > { %p9066_p7 = por %p9065_p6, %p9064_p1 }
 0xc52   : > { %p9067_p9 = pnand %p9066_p7, %p9060_p4 }
 0xc54   : > { %9070 = shalt.err (!%p9067_p9)
}
 0xc55   : > { %6781 = dma.vmem_to_hbm [thread:$0]  (%p15452_p5), %s14694_s3, 1024, %s14692_s26, %s6383_s27  }
 0xc56 PF: > { %s15453_s29 = sld [smem:[#allocation16_spill]]  ;;  %s15454_s28 = sld [smem:[#allocation23_spill]] }
 0xc57   : > { %s15455_s10 = sld [smem:[#allocation19_spill]] }
 0xc5c   : > { %s6409_s14 = sand.u32 1, %s15453_s29   ;;  %p15456_p12 = scmp.ne.s32.totalorder %s15454_s28, 0 }
 0xc5d   : > { %p15457_p3 = scmp.ge.s32.totalorder %s15455_s10, 2  ;;  %s6410_s16 = scalar_lea.sflag [#allocation4], %s6409_s14 }
 0xc5f   : > { %p6801_p13 = pnand %p15457_p3, %p15456_p12 }
 0xc61   : > { %9100 = dma.done.wait (!%p6801_p13), %s6410_s16, 1024  }
 0xc62   : > { %9102 = vsyncadd (!%p6801_p13), %s6410_s16, 4294966272  ;;  %s15458_s27 = sld [smem:[#allocation20_spill]]  ;;  %s15459_s24 = sld [smem:[#allocation17_spill]] }
 0xc63   : > { %s15460_s25 = sld [smem:[#allocation18_spill]]  ;;  %s15461_s26 = sld [smem:[#allocation21_spill]] }
 0xc68   : > { %p22_p0 = scmp.ge.s32.totalorder %s15458_s27, 4  }
 0xc6a   :  { %24 = sbr.rel (!%p22_p0) target bundleno = 15 (0xf), region = 117 }
 0xc71   :  { %6415 = vsyncpa [#allocation3], 1 }
 0xc72   :  { %6417 = vsyncpa [#allocation3 + $0x1], 1 }
 0xc73   :  { %6418 = vsyncpa [#allocation6], 1 }
 0xc74   :  { %6419 = vsyncpa [#allocation9], 1 }
 0xc75   :  { %6420 = vsyncpa [#allocation4], 1 }
 0xc76   :  { %6422 = vsyncpa [#allocation4 + $0x1], 1 }

</bundles_post_ra>
